<compile_context>
chip_gen: v7x
topology: tpu7x:2x2x1
jax: 0.10.0
libtpu: 0.0.40
codegen_flags: <defaults>
</compile_context>

<pallas_src>
import functools

import jax
import jax.numpy as jnp
from jax.experimental import pallas as pl
from jax.experimental.pallas import tpu as pltpu

# ---- model constants (from the PyTorch spec) --------------------------------
H = 256                  # num_hiddens
N_HEADS = 4              # transpose_qkv hardcodes 4 heads
HEAD_DIM = H // N_HEADS  # 64
FFN = 1024
VOCAB = 29
MAX_POS = 12
DROPOUT_P = 0.1
LN_EPS = 1e-5            # nn.LayerNorm default
N_BLOCKS = 4

# one-time padding of the tiny embedding tables (never pads activations)
VOCAB_PAD = 32
POS_PAD = 16


# ---- small helpers -----------------------------------------------------------
def _round_up(x, m):
    return (x + m - 1) // m * m


def _row_tile(n_rows, bytes_per_row, target_bytes=8 << 20, max_rows=2048):
    """Row-tile size: as large as a ~8 MiB/step VMEM budget allows (amortizes the
    ~0.35 us per-grid-step overhead), multiple of 8, clamped to the problem size."""
    rows = max(8, min(max_rows, target_bytes // max(int(bytes_per_row), 1)))
    return min(_round_up(rows, 8), _round_up(n_rows, 8))


def _vmem_limit(footprint_bytes):
    """Scoped-VMEM limit: 2x headroom over the double-buffered footprint, floored at
    the 16 MiB default and capped well under v7x's 64 MiB physical VMEM."""
    return int(min(max(2 * int(footprint_bytes), 16 << 20), 48 << 20))


def _compiler_params(grid_len, footprint_bytes):
    return pltpu.CompilerParams(
        dimension_semantics=("parallel",) * grid_len,
        vmem_limit_bytes=_vmem_limit(footprint_bytes),
    )


# ---- embedding: word + positional, as one-hot MXU matmuls -------------------
def _embed_kernel(idpos_ref, wtab_ref, ptab_ref, o_ref):
    tm = idpos_ref.shape[0]
    idpos = idpos_ref[...]                                   # (tm, 2) int32
    word_id = idpos[:, 0:1]
    pos_id = idpos[:, 1:2]

    lane_v = jax.lax.broadcasted_iota(jnp.int32, (tm, VOCAB_PAD), 1)
    one_hot_w = (lane_v == word_id).astype(jnp.float32)
    emb = jnp.dot(one_hot_w, wtab_ref[...].astype(jnp.float32),
                  preferred_element_type=jnp.float32)

    lane_p = jax.lax.broadcasted_iota(jnp.int32, (tm, POS_PAD), 1)
    one_hot_p = (lane_p == pos_id).astype(jnp.float32)
    emb = emb + jnp.dot(one_hot_p, ptab_ref[...].astype(jnp.float32),
                        preferred_element_type=jnp.float32)
    o_ref[...] = emb.astype(o_ref.dtype)


def embed(ids, word_tab, pos_tab):
    """ids: (B, S) int32 -> (B*S, H) word + positional embedding."""
    batch, seq = ids.shape
    m = batch * seq
    pos = jnp.tile(jnp.arange(seq, dtype=jnp.int32), batch)
    idpos = jnp.stack([ids.reshape(-1).astype(jnp.int32), pos], axis=1)   # (M, 2)

    tm = _row_tile(m, (2 + H) * 4)
    grid = (pl.cdiv(m, tm),)
    footprint = (2 * tm * (8 + H * word_tab.dtype.itemsize)
                 + (VOCAB_PAD + POS_PAD) * H * word_tab.dtype.itemsize)
    return pl.pallas_call(
        _embed_kernel,
        out_shape=jax.ShapeDtypeStruct((m, H), word_tab.dtype),
        grid=grid,
        in_specs=[
            pl.BlockSpec((tm, 2), lambda i: (i, 0)),             # [word_id | pos_id]
            pl.BlockSpec((VOCAB_PAD, H), lambda i: (0, 0)),      # resident table
            pl.BlockSpec((POS_PAD, H), lambda i: (0, 0)),        # resident table
        ],
        out_specs=pl.BlockSpec((tm, H), lambda i: (i, 0)),
        compiler_params=_compiler_params(1, footprint),
    )(idpos, word_tab, pos_tab)


# ---- plain linear (optionally fused ReLU) ------------------------------------
def _linear_kernel(x_ref, w_ref, o_ref, *, relu):
    y = jnp.dot(x_ref[...], w_ref[...], preferred_element_type=jnp.float32)
    if relu:
        y = jnp.maximum(y, 0.0)
    o_ref[...] = y.astype(o_ref.dtype)


def linear(x, w, *, relu=False):
    """Y = [relu](X @ W). x: (M, K), w: (K, N) -> (M, N) in x.dtype."""
    m, k = x.shape
    k2, n = w.shape
    assert k == k2
    itm = x.dtype.itemsize
    tm = _row_tile(m, (k + n) * itm)
    grid = (pl.cdiv(m, tm),)
    footprint = 2 * tm * (k + n) * itm + k * n * w.dtype.itemsize
    return pl.pallas_call(
        functools.partial(_linear_kernel, relu=relu),
        out_shape=jax.ShapeDtypeStruct((m, n), x.dtype),
        grid=grid,
        in_specs=[pl.BlockSpec((tm, k), lambda i: (i, 0)),
                  pl.BlockSpec((k, n), lambda i: (0, 0))],     # weight resident
        out_specs=pl.BlockSpec((tm, n), lambda i: (i, 0)),
        compiler_params=_compiler_params(1, footprint),
    )(x, w)


# ---- fused producer-GEMM + AddNorm epilogue ----------------------------------
def _linear_addnorm_kernel(seed_ref, x_ref, w_ref, res_ref, ln_ref, o_ref, *,
                           relu, p, training, hw_prng):
    # producer GEMM (AddNorm costs no standalone HBM pass)
    x1 = jnp.dot(x_ref[...], w_ref[...], preferred_element_type=jnp.float32)
    if relu:
        x1 = jnp.maximum(x1, 0.0)

    # LayerNorm(X1) over hidden, f32 in-register.
    mean = jnp.mean(x1, axis=-1, keepdims=True)
    centered = x1 - mean
    var = jnp.mean(centered * centered, axis=-1, keepdims=True)
    ln_w = ln_ref[0:1, :].astype(jnp.float32)
    ln_b = ln_ref[1:2, :].astype(jnp.float32)
    y = centered * jax.lax.rsqrt(var + LN_EPS) * ln_w + ln_b

    # residual add (spec order: X + LayerNorm(X1))
    z = res_ref[...].astype(jnp.float32) + y

    if training and p > 0.0:
        threshold = jnp.uint32(min(int(round(p * 2.0 ** 32)), 2 ** 32 - 1))
        if hw_prng:
            # hardware PRNG: ~1 op per vreg (perf-review recommendation)
            pltpu.prng_seed(seed_ref[0] + pl.program_id(0))
            bits = pltpu.bitcast(pltpu.prng_random_bits(z.shape), jnp.uint32)
        else:
            # counter-hash fallback (non-TPU / interpret); seed mixed multiplicatively
            tm = z.shape[0]
            row = (jax.lax.broadcasted_iota(jnp.int32, z.shape, 0)
                   + pl.program_id(0) * tm)
            col = jax.lax.broadcasted_iota(jnp.int32, z.shape, 1)
            s = jax.lax.convert_element_type(seed_ref[0], jnp.uint32)
            h = (jax.lax.bitcast_convert_type(row, jnp.uint32) * jnp.uint32(0x9E3779B1)
                 ^ jax.lax.bitcast_convert_type(col, jnp.uint32) * jnp.uint32(0x85EBCA77))
            h = h + s * jnp.uint32(0x27D4EB2F)
            h = h ^ (h >> 16)
            h = h * jnp.uint32(0x7FEB352D)
            h = h ^ (h >> 15)
            h = h * jnp.uint32(0x846CA68B)
            h = h ^ (h >> 16)
            bits = h
        keep = bits >= threshold
        z = jnp.where(keep, z * jnp.float32(1.0 / (1.0 - p)), jnp.float32(0.0))

    o_ref[...] = z.astype(o_ref.dtype)


def linear_addnorm(x, w, resid, ln_wb, seed, *, relu=False, p=DROPOUT_P,
                   training=False):
    """AddNorm fused into its producing GEMM:
         Y = Dropout(resid + LayerNorm([relu](x @ w)))
       x: (M, K), w: (K, H), resid: (M, H), ln_wb: (2, H) = [gamma; beta]."""
    m, k = x.shape
    k2, n = w.shape
    assert k == k2 and n == H and resid.shape == (m, H)
    itm = x.dtype.itemsize
    rtm = resid.dtype.itemsize
    tm = _row_tile(m, k * itm + 2 * H * rtm)
    grid = (pl.cdiv(m, tm),)
    footprint = (2 * tm * (k * itm + 2 * H * rtm)
                 + k * H * w.dtype.itemsize + 2 * H * 4)
    hw_prng = jax.default_backend() == "tpu"
    kernel = functools.partial(_linear_addnorm_kernel, relu=relu, p=float(p),
                               training=bool(training), hw_prng=hw_prng)
    seed_arr = jnp.asarray([seed], dtype=jnp.int32)
    return pl.pallas_call(
        kernel,
        out_shape=jax.ShapeDtypeStruct((m, H), resid.dtype),
        grid_spec=pltpu.PrefetchScalarGridSpec(
            num_scalar_prefetch=1,
            grid=grid,
            in_specs=[
                pl.BlockSpec((tm, k), lambda i, s: (i, 0)),   # producer activations
                pl.BlockSpec((k, H), lambda i, s: (0, 0)),    # producer weight (resident)
                pl.BlockSpec((tm, H), lambda i, s: (i, 0)),   # residual stream X
                pl.BlockSpec((2, H), lambda i, s: (0, 0)),    # LN gamma|beta (resident)
            ],
            out_specs=pl.BlockSpec((tm, H), lambda i, s: (i, 0)),
        ),
        compiler_params=_compiler_params(1, footprint),
    )(seed_arr, x, w, resid, ln_wb)


# ---- attention ---------------------------------------------------------------
def _mha(q, k, v):
    """Multi-head attention for one batch element; q: (Sq, H), k/v: (Sk, H), f32.
    The spec's out-of-place masked_fill has no effect, so no mask is applied."""
    scale = 1.0 / (HEAD_DIM ** 0.5)
    outs = []
    for h in range(N_HEADS):
        sl = slice(h * HEAD_DIM, (h + 1) * HEAD_DIM)
        qh, kh, vh = q[:, sl], k[:, sl], v[:, sl]
        s = jax.lax.dot_general(qh, kh, (((1,), (1,)), ((), ())),
                                preferred_element_type=jnp.float32) * scale
        s = s - jnp.max(s, axis=-1, keepdims=True)
        e = jnp.exp(s)
        a = e / jnp.sum(e, axis=-1, keepdims=True)
        outs.append(jnp.dot(a, vh, preferred_element_type=jnp.float32))
    return jnp.concatenate(outs, axis=-1)


def _self_attn_kernel(qkv_ref, o_ref):
    x = qkv_ref[0].astype(jnp.float32)                       # (S, 3H) packed [Q|K|V]
    o_ref[0] = _mha(x[:, :H], x[:, H:2 * H], x[:, 2 * H:]).astype(o_ref.dtype)


def _cross_attn_kernel(q_ref, kv_ref, o_ref):
    q = q_ref[0].astype(jnp.float32)                         # (Sq, H)
    kv = kv_ref[0].astype(jnp.float32)                       # (Sk, 2H) packed [K|V]
    o_ref[0] = _mha(q, kv[:, :H], kv[:, H:]).astype(o_ref.dtype)


# TODO(synk): for long sequences replace these whole-sequence-per-step attention
# kernels with a flash-style KV-tiled kernel; this spec caps S at 12.
def self_attention(qkv, batch, seq):
    """qkv: (batch*seq, 3H) packed projections -> (batch*seq, H)."""
    x = qkv.reshape(batch, seq, 3 * H)
    footprint = 2 * seq * 4 * H * qkv.dtype.itemsize
    out = pl.pallas_call(
        _self_attn_kernel,
        out_shape=jax.ShapeDtypeStruct((batch, seq, H), qkv.dtype),
        grid=(batch,),
        in_specs=[pl.BlockSpec((1, seq, 3 * H), lambda b: (b, 0, 0))],
        out_specs=pl.BlockSpec((1, seq, H), lambda b: (b, 0, 0)),
        compiler_params=_compiler_params(1, footprint),
    )(x)
    return out.reshape(batch * seq, H)


def cross_attention(q, kv, batch, seq_q, seq_k):
    """q: (batch*seq_q, H), kv: (batch*seq_k, 2H) -> (batch*seq_q, H)."""
    q3 = q.reshape(batch, seq_q, H)
    kv3 = kv.reshape(batch, seq_k, 2 * H)
    footprint = 2 * (seq_q * 2 * H + seq_k * 2 * H) * q.dtype.itemsize
    out = pl.pallas_call(
        _cross_attn_kernel,
        out_shape=jax.ShapeDtypeStruct((batch, seq_q, H), q.dtype),
        grid=(batch,),
        in_specs=[pl.BlockSpec((1, seq_q, H), lambda b: (b, 0, 0)),
                  pl.BlockSpec((1, seq_k, 2 * H), lambda b: (b, 0, 0))],
        out_specs=pl.BlockSpec((1, seq_q, H), lambda b: (b, 0, 0)),
        compiler_params=_compiler_params(1, footprint),
    )(q3, kv3)
    return out.reshape(batch * seq_q, H)


# ---- parameters --------------------------------------------------------------
def init_params(key):
    keys = iter(jax.random.split(key, 128))

    def _w(shape, scale):
        return scale * jax.random.normal(next(keys), shape, dtype=jnp.float32)

    def _ln():
        gamma = 1.0 + 0.05 * jax.random.normal(next(keys), (H,), dtype=jnp.float32)
        beta = 0.02 * jax.random.normal(next(keys), (H,), dtype=jnp.float32)
        return jnp.stack([gamma, beta], axis=0)               # (2, H)

    def _attn():
        return {"wqkv": _w((H, 3 * H), H ** -0.5), "wo": _w((H, H), H ** -0.5)}

    def _cross():
        return {"wq": _w((H, H), H ** -0.5), "wkv": _w((H, 2 * H), H ** -0.5),
                "wo": _w((H, H), H ** -0.5)}

    def _ffn():
        return {"w1": _w((H, FFN), H ** -0.5), "w2": _w((FFN, H), FFN ** -0.5)}

    def _ebd():
        word = _w((VOCAB, H), 1.0)
        pos = _w((MAX_POS, H), 1.0)
        word_pad = jnp.zeros((VOCAB_PAD, H), jnp.float32).at[:VOCAB].set(word)
        pos_pad = jnp.zeros((POS_PAD, H), jnp.float32).at[:MAX_POS].set(pos)
        return {"word": word_pad, "pos": pos_pad}

    enc = [{"attn": _attn(), "ln1": _ln(), "ffn": _ffn(), "ln2": _ln()}
           for _ in range(N_BLOCKS)]
    dec = [{"attn": _attn(), "ln1": _ln(), "cross": _cross(), "ln2": _ln(),
            "ffn": _ffn(), "ln3": _ln()}
           for _ in range(N_BLOCKS)]
    return {"enc_ebd": _ebd(), "dec_ebd": _ebd(), "enc": enc, "dec": dec,
            "dense": _w((H, VOCAB), H ** -0.5)}


# ---- full Transformer forward (Pallas kernels) --------------------------------
def transformer_forward(params, x_s, i_m, x_t, o_m, *, training=False, seed=0):
    del i_m, o_m  # masks have no effect in the spec forward (out-of-place masked_fill)
    batch, s_en = x_s.shape
    _, s_de = x_t.shape
    counter = [int(seed)]

    def next_seed():
        counter[0] += 1
        return counter[0]

    def addnorm(x1_act, w, resid, ln, relu=False):
        return linear_addnorm(x1_act, w, resid, ln, next_seed(), relu=relu,
                              p=DROPOUT_P, training=training)

    def encoder_block(p, x):
        qkv = linear(x, p["attn"]["wqkv"])
        attn_out = self_attention(qkv, batch, s_en)
        x = addnorm(attn_out, p["attn"]["wo"], x, p["ln1"])          # Wo + AddNorm1
        hid = linear(x, p["ffn"]["w1"], relu=True)
        x = addnorm(hid, p["ffn"]["w2"], x, p["ln2"], relu=True)     # lin2+relu + AddNorm2
        return x

    def decoder_block(p, x, x_en):
        qkv = linear(x, p["attn"]["wqkv"])
        attn_out = self_attention(qkv, batch, s_de)
        x = addnorm(attn_out, p["attn"]["wo"], x, p["ln1"])
        q = linear(x, p["cross"]["wq"])
        kv = linear(x_en, p["cross"]["wkv"])
        attn_out = cross_attention(q, kv, batch, s_de, s_en)
        x = addnorm(attn_out, p["cross"]["wo"], x, p["ln2"])
        hid = linear(x, p["ffn"]["w1"], relu=True)
        x = addnorm(hid, p["ffn"]["w2"], x, p["ln3"], relu=True)
        return x

    x_en = embed(x_s, params["enc_ebd"]["word"], params["enc_ebd"]["pos"])
    for p in params["enc"]:
        x_en = encoder_block(p, x_en)

    x = embed(x_t, params["dec_ebd"]["word"], params["dec_ebd"]["pos"])
    for p in params["dec"]:
        x = decoder_block(p, x, x_en)

    logits = linear(x, params["dense"])
    return logits.reshape(batch, s_de, VOCAB)


# ---- pure-JAX reference (eval mode) for validation -----------------------------
def reference_forward(params, x_s, i_m, x_t, o_m):
    del i_m, o_m
    hi = jax.lax.Precision.HIGHEST

    def mm(a, b):
        return jnp.matmul(a, b, precision=hi)

    def layer_norm(x, ln):
        m = jnp.mean(x, axis=-1, keepdims=True)
        v = jnp.mean((x - m) ** 2, axis=-1, keepdims=True)
        return (x - m) * jax.lax.rsqrt(v + LN_EPS) * ln[0] + ln[1]

    def add_norm(x, x1, ln):
        return x + layer_norm(x1, ln)                       # eval: dropout = identity

    def mha(q, k, v):
        b, sq, _ = q.shape
        sk = k.shape[1]
        qh = q.reshape(b, sq, N_HEADS, HEAD_DIM).transpose(0, 2, 1, 3)
        kh = k.reshape(b, sk, N_HEADS, HEAD_DIM).transpose(0, 2, 1, 3)
        vh = v.reshape(b, sk, N_HEADS, HEAD_DIM).transpose(0, 2, 1, 3)
        a = jnp.einsum("bhqd,bhkd->bhqk", qh, kh, precision=hi) / (HEAD_DIM ** 0.5)
        a = jax.nn.softmax(a, axis=-1)
        o = jnp.einsum("bhqk,bhkd->bhqd", a, vh, precision=hi)
        return o.transpose(0, 2, 1, 3).reshape(b, sq, H)

    def ebd(ids, p, s):
        return p["word"][:VOCAB][ids] + p["pos"][:s][None, :, :]

    _, s_en = x_s.shape
    _, s_de = x_t.shape

    x = ebd(x_s, params["enc_ebd"], s_en)
    for p in params["enc"]:
        qkv = mm(x, p["attn"]["wqkv"])
        q, k, v = qkv[..., :H], qkv[..., H:2 * H], qkv[..., 2 * H:]
        o = mm(mha(q, k, v), p["attn"]["wo"])
        x = add_norm(x, o, p["ln1"])
        hid = jax.nn.relu(mm(x, p["ffn"]["w1"]))
        hid = jax.nn.relu(mm(hid, p["ffn"]["w2"]))
        x = add_norm(x, hid, p["ln2"])
    x_en = x

    y = ebd(x_t, params["dec_ebd"], s_de)
    for p in params["dec"]:
        qkv = mm(y, p["attn"]["wqkv"])
        q, k, v = qkv[..., :H], qkv[..., H:2 * H], qkv[..., 2 * H:]
        o = mm(mha(q, k, v), p["attn"]["wo"])
        y = add_norm(y, o, p["ln1"])
        q = mm(y, p["cross"]["wq"])
        kv = mm(x_en, p["cross"]["wkv"])
        o = mm(mha(q, kv[..., :H], kv[..., H:]), p["cross"]["wo"])
        y = add_norm(y, o, p["ln2"])
        hid = jax.nn.relu(mm(y, p["ffn"]["w1"]))
        hid = jax.nn.relu(mm(hid, p["ffn"]["w2"]))
        y = add_norm(y, hid, p["ln3"])

    return mm(y, params["dense"])


# ---- demo / self-test -----------------------------------------------------------
if __name__ == "__main__":
    root = jax.random.PRNGKey(0)
    k_params, k_src, k_tgt, k_a, k_b, k_c = jax.random.split(root, 6)
    params = init_params(k_params)

    batch, seq = 2, 12
    x_s = jax.random.randint(k_src, (batch, seq), 0, VOCAB, dtype=jnp.int32)
    x_t = jax.random.randint(k_tgt, (batch, seq), 0, VOCAB, dtype=jnp.int32)
    i_m = jnp.ones((batch, seq), dtype=jnp.float32)
    o_m = jnp.ones((batch, seq), dtype=jnp.float32)

    # full forward (eval mode) through the Pallas kernels
    fwd = jax.jit(functools.partial(transformer_forward, training=False, seed=0))
    logits = fwd(params, x_s, i_m, x_t, o_m)
    jax.block_until_ready(logits)
    assert logits.shape == (batch, seq, VOCAB)

    # validate against a pure-JAX reference of the same forward
    ref = reference_forward(params, x_s, i_m, x_t, o_m)
    err = float(jnp.max(jnp.abs(logits - ref)))
    assert err < 2e-2, f"kernel/reference mismatch: max abs err = {err}"

    # exercise the training-mode (hardware-PRNG) dropout path of the fused
    # GEMM+AddNorm kernel once and sanity-check the drop rate (p = 0.1)
    x_a = jax.random.normal(k_a, (batch * seq, H), dtype=jnp.float32)
    res = jax.random.normal(k_b, (batch * seq, H), dtype=jnp.float32)
    w_a = jax.random.normal(k_c, (H, H), dtype=jnp.float32) * H ** -0.5
    out_tr = linear_addnorm(x_a, w_a, res, params["enc"][0]["ln1"], seed=1234,
                            training=True)
    jax.block_until_ready(out_tr)
    drop_frac = float(jnp.mean((out_tr == 0.0).astype(jnp.float32)))
    assert 0.02 < drop_frac < 0.30, f"unexpected dropout rate {drop_frac}"

    print("KERNEL_OK")
</pallas_src>

<mosaic_0001>
module attributes {stable_mosaic.version = 11 : i64} {
  func.func @_linear_kernel(%arg0: i32, %arg1: memref<24x256xf32, #tpu.memory_space<vmem>>, %arg2: memref<256x768xf32, #tpu.memory_space<vmem>>, %arg3: memref<24x768xf32, #tpu.memory_space<vmem>>) attributes {dimension_semantics = [#tpu.dimension_semantics<parallel>], iteration_bounds = array<i64: 1>, scalar_prefetch = 0 : i64, scratch_operands = 0 : i64, tpu.core_type = #tpu.core_type<tc>, window_params = [{transform_indices = @transform_0, window_bounds = array<i64: 24, 256>}, {pipeline_mode = #tpu.pipeline_mode<synchronous>, transform_indices = @transform_1, window_bounds = array<i64: 256, 768>}, {transform_indices = @transform_2, window_bounds = array<i64: 24, 768>}]} {
    %c0 = arith.constant 0 : index
    %c0_0 = arith.constant 0 : index
    %0 = vector.load %arg1[%c0, %c0_0] : memref<24x256xf32, #tpu.memory_space<vmem>>, vector<24x256xf32>
    %c0_1 = arith.constant 0 : index
    %c0_2 = arith.constant 0 : index
    %1 = vector.load %arg2[%c0_1, %c0_2] : memref<256x768xf32, #tpu.memory_space<vmem>>, vector<256x768xf32>
    %cst = arith.constant dense<0.000000e+00> : vector<24x768xf32>
    %2 = tpu.matmul %0, %1, %cst {dimension_numbers = #tpu.dot_dimension_numbers<[1], [0], [0], [1], [0, 0, 1, 1], [], []>} : vector<24x256xf32>, vector<256x768xf32>, vector<24x768xf32> -> vector<24x768xf32>
    %c0_3 = arith.constant 0 : index
    %c0_4 = arith.constant 0 : index
    %3 = vector.load %arg3[%c0_3, %c0_4] : memref<24x768xf32, #tpu.memory_space<vmem>>, vector<24x768xf32>
    tpu.vector_store %arg3[%c0_3, %c0_4], %2 {strides = array<i32>} : memref<24x768xf32, #tpu.memory_space<vmem>>, vector<24x768xf32>,
    return
  }
  func.func @transform_0(%arg0: i32) -> (i32, i32) {
    %c0_i32 = arith.constant 0 : i32
    %c0_i32_0 = arith.constant 0 : i32
    return %arg0, %c0_i32 : i32, i32
  }
  func.func @transform_1(%arg0: i32) -> (i32, i32) {
    %c0_i32 = arith.constant 0 : i32
    %c0_i32_0 = arith.constant 0 : i32
    %c0_i32_1 = arith.constant 0 : i32
    return %c0_i32, %c0_i32_0 : i32, i32
  }
  func.func @transform_2(%arg0: i32) -> (i32, i32) {
    %c0_i32 = arith.constant 0 : i32
    %c0_i32_0 = arith.constant 0 : i32
    return %arg0, %c0_i32 : i32, i32
  }
}

module attributes {stable_mosaic.version = 11 : i64} {
  func.func @_linear_addnorm_kernel(%arg0: i32, %arg1: memref<1xi32, #tpu.memory_space<smem>>, %arg2: memref<24x256xf32, #tpu.memory_space<vmem>>, %arg3: memref<256x256xf32, #tpu.memory_space<vmem>>, %arg4: memref<24x256xf32, #tpu.memory_space<vmem>>, %arg5: memref<2x256xf32, #tpu.memory_space<vmem>>, %arg6: memref<24x256xf32, #tpu.memory_space<vmem>>) attributes {dimension_semantics = [#tpu.dimension_semantics<parallel>], iteration_bounds = array<i64: 1>, scalar_prefetch = 1 : i64, scratch_operands = 0 : i64, tpu.core_type = #tpu.core_type<tc>, window_params = [{transform_indices = @transform_0, window_bounds = array<i64: 24, 256>}, {pipeline_mode = #tpu.pipeline_mode<synchronous>, transform_indices = @transform_1, window_bounds = array<i64: 256, 256>}, {transform_indices = @transform_2, window_bounds = array<i64: 24, 256>}, {pipeline_mode = #tpu.pipeline_mode<synchronous>, transform_indices = @transform_3, window_bounds = array<i64: 2, 256>}, {transform_indices = @transform_4, window_bounds = array<i64: 24, 256>}]} {
    %c0 = arith.constant 0 : index
    %c0_0 = arith.constant 0 : index
    %0 = vector.load %arg2[%c0, %c0_0] : memref<24x256xf32, #tpu.memory_space<vmem>>, vector<24x256xf32>
    %c0_1 = arith.constant 0 : index
    %c0_2 = arith.constant 0 : index
    %1 = vector.load %arg3[%c0_1, %c0_2] : memref<256x256xf32, #tpu.memory_space<vmem>>, vector<256x256xf32>
    %cst = arith.constant dense<0.000000e+00> : vector<24x256xf32>
    %2 = tpu.matmul %0, %1, %cst {dimension_numbers = #tpu.dot_dimension_numbers<[1], [0], [0], [1], [0, 0, 1, 1], [], []>} : vector<24x256xf32>, vector<256x256xf32>, vector<24x256xf32> -> vector<24x256xf32>
    %cst_3 = arith.constant dense<0.000000e+00> : vector<24xf32>
    %3 = vector.multi_reduction <add>, %2, %cst_3 [1] : vector<24x256xf32> to vector<24xf32>
    %4 = vector.shape_cast %3 : vector<24xf32> to vector<24x1xf32>
    %cst_4 = arith.constant 2.560000e+02 : f32
    %5 = vector.broadcast %cst_4 : f32 to vector<24x1xf32>
    %6 = arith.divf %4, %5 : vector<24x1xf32>
    %7 = vector.broadcast %6 : vector<24x1xf32> to vector<24x256xf32>
    %8 = arith.subf %2, %7 : vector<24x256xf32>
    %9 = arith.mulf %8, %8 : vector<24x256xf32>
    %cst_5 = arith.constant dense<0.000000e+00> : vector<24xf32>
    %10 = vector.multi_reduction <add>, %9, %cst_5 [1] : vector<24x256xf32> to vector<24xf32>
    %11 = vector.shape_cast %10 : vector<24xf32> to vector<24x1xf32>
    %cst_6 = arith.constant 2.560000e+02 : f32
    %12 = vector.broadcast %cst_6 : f32 to vector<24x1xf32>
    %13 = arith.divf %11, %12 : vector<24x1xf32>
    %c0_7 = arith.constant 0 : index
    %c0_8 = arith.constant 0 : index
    %14 = vector.load %arg5[%c0_7, %c0_8] : memref<2x256xf32, #tpu.memory_space<vmem>>, vector<1x256xf32>
    %c1 = arith.constant 1 : index
    %c0_9 = arith.constant 0 : index
    %15 = vector.load %arg5[%c1, %c0_9] : memref<2x256xf32, #tpu.memory_space<vmem>>, vector<1x256xf32>
    %cst_10 = arith.constant 9.99999974E-6 : f32
    %16 = vector.broadcast %cst_10 : f32 to vector<24x1xf32>
    %17 = arith.addf %13, %16 : vector<24x1xf32>
    %18 = math.rsqrt %17 : vector<24x1xf32>
    %19 = vector.broadcast %18 : vector<24x1xf32> to vector<24x256xf32>
    %20 = arith.mulf %8, %19 : vector<24x256xf32>
    %21 = vector.broadcast %14 : vector<1x256xf32> to vector<24x256xf32>
    %22 = arith.mulf %20, %21 : vector<24x256xf32>
    %23 = vector.broadcast %15 : vector<1x256xf32> to vector<24x256xf32>
    %24 = arith.addf %22, %23 : vector<24x256xf32>
    %c0_11 = arith.constant 0 : index
    %c0_12 = arith.constant 0 : index
    %25 = vector.load %arg4[%c0_11, %c0_12] : memref<24x256xf32, #tpu.memory_space<vmem>>, vector<24x256xf32>
    %26 = arith.addf %25, %24 : vector<24x256xf32>
    %c0_13 = arith.constant 0 : index
    %c0_14 = arith.constant 0 : index
    %27 = vector.load %arg6[%c0_13, %c0_14] : memref<24x256xf32, #tpu.memory_space<vmem>>, vector<24x256xf32>
    tpu.vector_store %arg6[%c0_13, %c0_14], %26 {strides = array<i32>} : memref<24x256xf32, #tpu.memory_space<vmem>>, vector<24x256xf32>,
    return
  }
  func.func @transform_0(%arg0: i32, %arg1: memref<1xi32, #tpu.memory_space<smem>>) -> (i32, i32) {
    %c0_i32 = arith.constant 0 : i32
    %c0_i32_0 = arith.constant 0 : i32
    return %arg0, %c0_i32 : i32, i32
  }
  func.func @transform_1(%arg0: i32, %arg1: memref<1xi32, #tpu.memory_space<smem>>) -> (i32, i32) {
    %c0_i32 = arith.constant 0 : i32
    %c0_i32_0 = arith.constant 0 : i32
    %c0_i32_1 = arith.constant 0 : i32
    return %c0_i32, %c0_i32_0 : i32, i32
  }
  func.func @transform_2(%arg0: i32, %arg1: memref<1xi32, #tpu.memory_space<smem>>) -> (i32, i32) {
    %c0_i32 = arith.constant 0 : i32
    %c0_i32_0 = arith.constant 0 : i32
    return %arg0, %c0_i32 : i32, i32
  }
  func.func @transform_3(%arg0: i32, %arg1: memref<1xi32, #tpu.memory_space<smem>>) -> (i32, i32) {
    %c0_i32 = arith.constant 0 : i32
    %c0_i32_0 = arith.constant 0 : i32
    %c0_i32_1 = arith.constant 0 : i32
    return %c0_i32, %c0_i32_0 : i32, i32
  }
  func.func @transform_4(%arg0: i32, %arg1: memref<1xi32, #tpu.memory_space<smem>>) -> (i32, i32) {
    %c0_i32 = arith.constant 0 : i32
    %c0_i32_0 = arith.constant 0 : i32
    return %arg0, %c0_i32 : i32, i32
  }
}

module attributes {stable_mosaic.version = 11 : i64} {
  func.func @_embed_kernel(%arg0: i32, %arg1: memref<24x2xi32, #tpu.memory_space<vmem>>, %arg2: memref<32x256xf32, #tpu.memory_space<vmem>>, %arg3: memref<16x256xf32, #tpu.memory_space<vmem>>, %arg4: memref<24x256xf32, #tpu.memory_space<vmem>>) attributes {dimension_semantics = [#tpu.dimension_semantics<parallel>], iteration_bounds = array<i64: 1>, scalar_prefetch = 0 : i64, scratch_operands = 0 : i64, tpu.core_type = #tpu.core_type<tc>, window_params = [{transform_indices = @transform_0, window_bounds = array<i64: 24, 2>}, {pipeline_mode = #tpu.pipeline_mode<synchronous>, transform_indices = @transform_1, window_bounds = array<i64: 32, 256>}, {pipeline_mode = #tpu.pipeline_mode<synchronous>, transform_indices = @transform_2, window_bounds = array<i64: 16, 256>}, {transform_indices = @transform_3, window_bounds = array<i64: 24, 256>}]} {
    %c0 = arith.constant 0 : index
    %c0_0 = arith.constant 0 : index
    %0 = vector.load %arg1[%c0, %c0_0] : memref<24x2xi32, #tpu.memory_space<vmem>>, vector<24x2xi32>
    %1 = vector.extract_strided_slice %0 {offsets = [0, 0], sizes = [24, 1], strides = [1, 1]} : vector<24x2xi32> to vector<24x1xi32>
    %2 = vector.extract_strided_slice %0 {offsets = [0, 1], sizes = [24, 1], strides = [1, 1]} : vector<24x2xi32> to vector<24x1xi32>
    %3 = tpu.iota {dimensions = array<i32: 1>} : vector<24x32xi32>
    %4 = vector.broadcast %1 : vector<24x1xi32> to vector<24x32xi32>
    %5 = arith.cmpi eq, %3, %4 : vector<24x32xi32>
    %6 = arith.extui %5 : vector<24x32xi1> to vector<24x32xi32>
    %7 = arith.sitofp %6 : vector<24x32xi32> to vector<24x32xf32>
    %c0_1 = arith.constant 0 : index
    %c0_2 = arith.constant 0 : index
    %8 = vector.load %arg2[%c0_1, %c0_2] : memref<32x256xf32, #tpu.memory_space<vmem>>, vector<32x256xf32>
    %cst = arith.constant dense<0.000000e+00> : vector<24x256xf32>
    %9 = tpu.matmul %7, %8, %cst {dimension_numbers = #tpu.dot_dimension_numbers<[1], [0], [0], [1], [0, 0, 1, 1], [], []>} : vector<24x32xf32>, vector<32x256xf32>, vector<24x256xf32> -> vector<24x256xf32>
    %10 = tpu.iota {dimensions = array<i32: 1>} : vector<24x16xi32>
    %11 = vector.broadcast %2 : vector<24x1xi32> to vector<24x16xi32>
    %12 = arith.cmpi eq, %10, %11 : vector<24x16xi32>
    %13 = arith.extui %12 : vector<24x16xi1> to vector<24x16xi32>
    %14 = arith.sitofp %13 : vector<24x16xi32> to vector<24x16xf32>
    %c0_3 = arith.constant 0 : index
    %c0_4 = arith.constant 0 : index
    %15 = vector.load %arg3[%c0_3, %c0_4] : memref<16x256xf32, #tpu.memory_space<vmem>>, vector<16x256xf32>
    %cst_5 = arith.constant dense<0.000000e+00> : vector<24x256xf32>
    %16 = tpu.matmul %14, %15, %cst_5 {dimension_numbers = #tpu.dot_dimension_numbers<[1], [0], [0], [1], [0, 0, 1, 1], [], []>} : vector<24x16xf32>, vector<16x256xf32>, vector<24x256xf32> -> vector<24x256xf32>
    %17 = arith.addf %9, %16 : vector<24x256xf32>
    %c0_6 = arith.constant 0 : index
    %c0_7 = arith.constant 0 : index
    %18 = vector.load %arg4[%c0_6, %c0_7] : memref<24x256xf32, #tpu.memory_space<vmem>>, vector<24x256xf32>
    tpu.vector_store %arg4[%c0_6, %c0_7], %17 {strides = array<i32>} : memref<24x256xf32, #tpu.memory_space<vmem>>, vector<24x256xf32>,
    return
  }
  func.func @transform_0(%arg0: i32) -> (i32, i32) {
    %c0_i32 = arith.constant 0 : i32
    %c0_i32_0 = arith.constant 0 : i32
    return %arg0, %c0_i32 : i32, i32
  }
  func.func @transform_1(%arg0: i32) -> (i32, i32) {
    %c0_i32 = arith.constant 0 : i32
    %c0_i32_0 = arith.constant 0 : i32
    %c0_i32_1 = arith.constant 0 : i32
    return %c0_i32, %c0_i32_0 : i32, i32
  }
  func.func @transform_2(%arg0: i32) -> (i32, i32) {
    %c0_i32 = arith.constant 0 : i32
    %c0_i32_0 = arith.constant 0 : i32
    %c0_i32_1 = arith.constant 0 : i32
    return %c0_i32, %c0_i32_0 : i32, i32
  }
  func.func @transform_3(%arg0: i32) -> (i32, i32) {
    %c0_i32 = arith.constant 0 : i32
    %c0_i32_0 = arith.constant 0 : i32
    return %arg0, %c0_i32 : i32, i32
  }
}

module attributes {stable_mosaic.version = 11 : i64} {
  func.func @_self_attn_kernel(%arg0: i32, %arg1: memref<1x12x768xf32, #tpu.memory_space<vmem>>, %arg2: memref<1x12x256xf32, #tpu.memory_space<vmem>>) attributes {dimension_semantics = [#tpu.dimension_semantics<parallel>], iteration_bounds = array<i64: 2>, scalar_prefetch = 0 : i64, scratch_operands = 0 : i64, tpu.core_type = #tpu.core_type<tc>, window_params = [{transform_indices = @transform_0, window_bounds = array<i64: 1, 12, 768>}, {transform_indices = @transform_1, window_bounds = array<i64: 1, 12, 256>}]} {
    %c0 = arith.constant 0 : index
    %c0_0 = arith.constant 0 : index
    %c0_1 = arith.constant 0 : index
    %0 = vector.load %arg1[%c0, %c0_0, %c0_1] : memref<1x12x768xf32, #tpu.memory_space<vmem>>, vector<1x12x768xf32>
    %1 = vector.shape_cast %0 : vector<1x12x768xf32> to vector<12x768xf32>
    %2 = vector.extract_strided_slice %1 {offsets = [0, 0], sizes = [12, 256], strides = [1, 1]} : vector<12x768xf32> to vector<12x256xf32>
    %3 = vector.extract_strided_slice %1 {offsets = [0, 256], sizes = [12, 256], strides = [1, 1]} : vector<12x768xf32> to vector<12x256xf32>
    %4 = vector.extract_strided_slice %1 {offsets = [0, 512], sizes = [12, 256], strides = [1, 1]} : vector<12x768xf32> to vector<12x256xf32>
    %5 = vector.extract_strided_slice %2 {offsets = [0, 0], sizes = [12, 64], strides = [1, 1]} : vector<12x256xf32> to vector<12x64xf32>
    %6 = vector.extract_strided_slice %3 {offsets = [0, 0], sizes = [12, 64], strides = [1, 1]} : vector<12x256xf32> to vector<12x64xf32>
    %7 = vector.extract_strided_slice %4 {offsets = [0, 0], sizes = [12, 64], strides = [1, 1]} : vector<12x256xf32> to vector<12x64xf32>
    %cst = arith.constant dense<0.000000e+00> : vector<12x12xf32>
    %8 = tpu.matmul %5, %6, %cst {dimension_numbers = #tpu.dot_dimension_numbers<[1], [1], [0], [0], [0, 0, 1, 0], [], []>} : vector<12x64xf32>, vector<12x64xf32>, vector<12x12xf32> -> vector<12x12xf32>
    %cst_2 = arith.constant 1.250000e-01 : f32
    %9 = vector.broadcast %cst_2 : f32 to vector<12x12xf32>
    %10 = arith.mulf %8, %9 : vector<12x12xf32>
    %cst_3 = arith.constant dense<0xFF800000> : vector<12xf32>
    %11 = vector.multi_reduction <maximumf>, %10, %cst_3 [1] : vector<12x12xf32> to vector<12xf32>
    %12 = vector.shape_cast %11 : vector<12xf32> to vector<12x1xf32>
    %13 = vector.broadcast %12 : vector<12x1xf32> to vector<12x12xf32>
    %14 = arith.subf %10, %13 : vector<12x12xf32>
    %15 = math.exp %14 : vector<12x12xf32>
    %cst_4 = arith.constant dense<0.000000e+00> : vector<12xf32>
    %16 = vector.multi_reduction <add>, %15, %cst_4 [1] : vector<12x12xf32> to vector<12xf32>
    %17 = vector.shape_cast %16 : vector<12xf32> to vector<12x1xf32>
    %18 = vector.broadcast %17 : vector<12x1xf32> to vector<12x12xf32>
    %19 = arith.divf %15, %18 : vector<12x12xf32>
    %cst_5 = arith.constant dense<0.000000e+00> : vector<12x64xf32>
    %20 = tpu.matmul %19, %7, %cst_5 {dimension_numbers = #tpu.dot_dimension_numbers<[1], [0], [0], [1], [0, 0, 1, 1], [], []>} : vector<12x12xf32>, vector<12x64xf32>, vector<12x64xf32> -> vector<12x64xf32>
    %21 = vector.extract_strided_slice %2 {offsets = [0, 64], sizes = [12, 64], strides = [1, 1]} : vector<12x256xf32> to vector<12x64xf32>
    %22 = vector.extract_strided_slice %3 {offsets = [0, 64], sizes = [12, 64], strides = [1, 1]} : vector<12x256xf32> to vector<12x64xf32>
    %23 = vector.extract_strided_slice %4 {offsets = [0, 64], sizes = [12, 64], strides = [1, 1]} : vector<12x256xf32> to vector<12x64xf32>
    %cst_6 = arith.constant dense<0.000000e+00> : vector<12x12xf32>
    %24 = tpu.matmul %21, %22, %cst_6 {dimension_numbers = #tpu.dot_dimension_numbers<[1], [1], [0], [0], [0, 0, 1, 0], [], []>} : vector<12x64xf32>, vector<12x64xf32>, vector<12x12xf32> -> vector<12x12xf32>
    %cst_7 = arith.constant 1.250000e-01 : f32
    %25 = vector.broadcast %cst_7 : f32 to vector<12x12xf32>
    %26 = arith.mulf %24, %25 : vector<12x12xf32>
    %cst_8 = arith.constant dense<0xFF800000> : vector<12xf32>
    %27 = vector.multi_reduction <maximumf>, %26, %cst_8 [1] : vector<12x12xf32> to vector<12xf32>
    %28 = vector.shape_cast %27 : vector<12xf32> to vector<12x1xf32>
    %29 = vector.broadcast %28 : vector<12x1xf32> to vector<12x12xf32>
    %30 = arith.subf %26, %29 : vector<12x12xf32>
    %31 = math.exp %30 : vector<12x12xf32>
    %cst_9 = arith.constant dense<0.000000e+00> : vector<12xf32>
    %32 = vector.multi_reduction <add>, %31, %cst_9 [1] : vector<12x12xf32> to vector<12xf32>
    %33 = vector.shape_cast %32 : vector<12xf32> to vector<12x1xf32>
    %34 = vector.broadcast %33 : vector<12x1xf32> to vector<12x12xf32>
    %35 = arith.divf %31, %34 : vector<12x12xf32>
    %cst_10 = arith.constant dense<0.000000e+00> : vector<12x64xf32>
    %36 = tpu.matmul %35, %23, %cst_10 {dimension_numbers = #tpu.dot_dimension_numbers<[1], [0], [0], [1], [0, 0, 1, 1], [], []>} : vector<12x12xf32>, vector<12x64xf32>, vector<12x64xf32> -> vector<12x64xf32>
    %37 = vector.extract_strided_slice %2 {offsets = [0, 128], sizes = [12, 64], strides = [1, 1]} : vector<12x256xf32> to vector<12x64xf32>
    %38 = vector.extract_strided_slice %3 {offsets = [0, 128], sizes = [12, 64], strides = [1, 1]} : vector<12x256xf32> to vector<12x64xf32>
    %39 = vector.extract_strided_slice %4 {offsets = [0, 128], sizes = [12, 64], strides = [1, 1]} : vector<12x256xf32> to vector<12x64xf32>
    %cst_11 = arith.constant dense<0.000000e+00> : vector<12x12xf32>
    %40 = tpu.matmul %37, %38, %cst_11 {dimension_numbers = #tpu.dot_dimension_numbers<[1], [1], [0], [0], [0, 0, 1, 0], [], []>} : vector<12x64xf32>, vector<12x64xf32>, vector<12x12xf32> -> vector<12x12xf32>
    %cst_12 = arith.constant 1.250000e-01 : f32
    %41 = vector.broadcast %cst_12 : f32 to vector<12x12xf32>
    %42 = arith.mulf %40, %41 : vector<12x12xf32>
    %cst_13 = arith.constant dense<0xFF800000> : vector<12xf32>
    %43 = vector.multi_reduction <maximumf>, %42, %cst_13 [1] : vector<12x12xf32> to vector<12xf32>
    %44 = vector.shape_cast %43 : vector<12xf32> to vector<12x1xf32>
    %45 = vector.broadcast %44 : vector<12x1xf32> to vector<12x12xf32>
    %46 = arith.subf %42, %45 : vector<12x12xf32>
    %47 = math.exp %46 : vector<12x12xf32>
    %cst_14 = arith.constant dense<0.000000e+00> : vector<12xf32>
    %48 = vector.multi_reduction <add>, %47, %cst_14 [1] : vector<12x12xf32> to vector<12xf32>
    %49 = vector.shape_cast %48 : vector<12xf32> to vector<12x1xf32>
    %50 = vector.broadcast %49 : vector<12x1xf32> to vector<12x12xf32>
    %51 = arith.divf %47, %50 : vector<12x12xf32>
    %cst_15 = arith.constant dense<0.000000e+00> : vector<12x64xf32>
    %52 = tpu.matmul %51, %39, %cst_15 {dimension_numbers = #tpu.dot_dimension_numbers<[1], [0], [0], [1], [0, 0, 1, 1], [], []>} : vector<12x12xf32>, vector<12x64xf32>, vector<12x64xf32> -> vector<12x64xf32>
    %53 = vector.extract_strided_slice %2 {offsets = [0, 192], sizes = [12, 64], strides = [1, 1]} : vector<12x256xf32> to vector<12x64xf32>
    %54 = vector.extract_strided_slice %3 {offsets = [0, 192], sizes = [12, 64], strides = [1, 1]} : vector<12x256xf32> to vector<12x64xf32>
    %55 = vector.extract_strided_slice %4 {offsets = [0, 192], sizes = [12, 64], strides = [1, 1]} : vector<12x256xf32> to vector<12x64xf32>
    %cst_16 = arith.constant dense<0.000000e+00> : vector<12x12xf32>
    %56 = tpu.matmul %53, %54, %cst_16 {dimension_numbers = #tpu.dot_dimension_numbers<[1], [1], [0], [0], [0, 0, 1, 0], [], []>} : vector<12x64xf32>, vector<12x64xf32>, vector<12x12xf32> -> vector<12x12xf32>
    %cst_17 = arith.constant 1.250000e-01 : f32
    %57 = vector.broadcast %cst_17 : f32 to vector<12x12xf32>
    %58 = arith.mulf %56, %57 : vector<12x12xf32>
    %cst_18 = arith.constant dense<0xFF800000> : vector<12xf32>
    %59 = vector.multi_reduction <maximumf>, %58, %cst_18 [1] : vector<12x12xf32> to vector<12xf32>
    %60 = vector.shape_cast %59 : vector<12xf32> to vector<12x1xf32>
    %61 = vector.broadcast %60 : vector<12x1xf32> to vector<12x12xf32>
    %62 = arith.subf %58, %61 : vector<12x12xf32>
    %63 = math.exp %62 : vector<12x12xf32>
    %cst_19 = arith.constant dense<0.000000e+00> : vector<12xf32>
    %64 = vector.multi_reduction <add>, %63, %cst_19 [1] : vector<12x12xf32> to vector<12xf32>
    %65 = vector.shape_cast %64 : vector<12xf32> to vector<12x1xf32>
    %66 = vector.broadcast %65 : vector<12x1xf32> to vector<12x12xf32>
    %67 = arith.divf %63, %66 : vector<12x12xf32>
    %cst_20 = arith.constant dense<0.000000e+00> : vector<12x64xf32>
    %68 = tpu.matmul %67, %55, %cst_20 {dimension_numbers = #tpu.dot_dimension_numbers<[1], [0], [0], [1], [0, 0, 1, 1], [], []>} : vector<12x12xf32>, vector<12x64xf32>, vector<12x64xf32> -> vector<12x64xf32>
    %69 = tpu.concatenate %20, %36, %52, %68 in 1 : vector<12x64xf32>, vector<12x64xf32>, vector<12x64xf32>, vector<12x64xf32> -> vector<12x256xf32>
    %c0_21 = arith.constant 0 : index
    %c0_22 = arith.constant 0 : index
    %c0_23 = arith.constant 0 : index
    %70 = vector.load %arg2[%c0_21, %c0_22, %c0_23] : memref<1x12x256xf32, #tpu.memory_space<vmem>>, vector<1x12x256xf32>
    %71 = vector.shape_cast %70 : vector<1x12x256xf32> to vector<12x256xf32>
    %72 = vector.shape_cast %69 : vector<12x256xf32> to vector<1x12x256xf32>
    tpu.vector_store %arg2[%c0_21, %c0_22, %c0_23], %72 {strides = array<i32>} : memref<1x12x256xf32, #tpu.memory_space<vmem>>, vector<1x12x256xf32>,
    return
  }
  func.func @transform_0(%arg0: i32) -> (i32, i32, i32) {
    %c0_i32 = arith.constant 0 : i32
    %c0_i32_0 = arith.constant 0 : i32
    %c0_i32_1 = arith.constant 0 : i32
    return %arg0, %c0_i32, %c0_i32_0 : i32, i32, i32
  }
  func.func @transform_1(%arg0: i32) -> (i32, i32, i32) {
    %c0_i32 = arith.constant 0 : i32
    %c0_i32_0 = arith.constant 0 : i32
    %c0_i32_1 = arith.constant 0 : i32
    return %arg0, %c0_i32, %c0_i32_0 : i32, i32, i32
  }
}

module attributes {stable_mosaic.version = 11 : i64} {
  func.func @_linear_kernel(%arg0: i32, %arg1: memref<24x256xf32, #tpu.memory_space<vmem>>, %arg2: memref<256x768xf32, #tpu.memory_space<vmem>>, %arg3: memref<24x768xf32, #tpu.memory_space<vmem>>) attributes {dimension_semantics = [#tpu.dimension_semantics<parallel>], iteration_bounds = array<i64: 1>, scalar_prefetch = 0 : i64, scratch_operands = 0 : i64, tpu.core_type = #tpu.core_type<tc>, window_params = [{transform_indices = @transform_0, window_bounds = array<i64: 24, 256>}, {pipeline_mode = #tpu.pipeline_mode<synchronous>, transform_indices = @transform_1, window_bounds = array<i64: 256, 768>}, {transform_indices = @transform_2, window_bounds = array<i64: 24, 768>}]} {
    %c0 = arith.constant 0 : index
    %c0_0 = arith.constant 0 : index
    %0 = vector.load %arg1[%c0, %c0_0] : memref<24x256xf32, #tpu.memory_space<vmem>>, vector<24x256xf32>
    %c0_1 = arith.constant 0 : index
    %c0_2 = arith.constant 0 : index
    %1 = vector.load %arg2[%c0_1, %c0_2] : memref<256x768xf32, #tpu.memory_space<vmem>>, vector<256x768xf32>
    %cst = arith.constant dense<0.000000e+00> : vector<24x768xf32>
    %2 = tpu.matmul %0, %1, %cst {dimension_numbers = #tpu.dot_dimension_numbers<[1], [0], [0], [1], [0, 0, 1, 1], [], []>} : vector<24x256xf32>, vector<256x768xf32>, vector<24x768xf32> -> vector<24x768xf32>
    %c0_3 = arith.constant 0 : index
    %c0_4 = arith.constant 0 : index
    %3 = vector.load %arg3[%c0_3, %c0_4] : memref<24x768xf32, #tpu.memory_space<vmem>>, vector<24x768xf32>
    tpu.vector_store %arg3[%c0_3, %c0_4], %2 {strides = array<i32>} : memref<24x768xf32, #tpu.memory_space<vmem>>, vector<24x768xf32>,
    return
  }
  func.func @transform_0(%arg0: i32) -> (i32, i32) {
    %c0_i32 = arith.constant 0 : i32
    %c0_i32_0 = arith.constant 0 : i32
    return %arg0, %c0_i32 : i32, i32
  }
  func.func @transform_1(%arg0: i32) -> (i32, i32) {
    %c0_i32 = arith.constant 0 : i32
    %c0_i32_0 = arith.constant 0 : i32
    %c0_i32_1 = arith.constant 0 : i32
    return %c0_i32, %c0_i32_0 : i32, i32
  }
  func.func @transform_2(%arg0: i32) -> (i32, i32) {
    %c0_i32 = arith.constant 0 : i32
    %c0_i32_0 = arith.constant 0 : i32
    return %arg0, %c0_i32 : i32, i32
  }
}

module attributes {stable_mosaic.version = 11 : i64} {
  func.func @_linear_kernel(%arg0: i32, %arg1: memref<24x256xf32, #tpu.memory_space<vmem>>, %arg2: memref<256x256xf32, #tpu.memory_space<vmem>>, %arg3: memref<24x256xf32, #tpu.memory_space<vmem>>) attributes {dimension_semantics = [#tpu.dimension_semantics<parallel>], iteration_bounds = array<i64: 1>, scalar_prefetch = 0 : i64, scratch_operands = 0 : i64, tpu.core_type = #tpu.core_type<tc>, window_params = [{transform_indices = @transform_0, window_bounds = array<i64: 24, 256>}, {pipeline_mode = #tpu.pipeline_mode<synchronous>, transform_indices = @transform_1, window_bounds = array<i64: 256, 256>}, {transform_indices = @transform_2, window_bounds = array<i64: 24, 256>}]} {
    %c0 = arith.constant 0 : index
    %c0_0 = arith.constant 0 : index
    %0 = vector.load %arg1[%c0, %c0_0] : memref<24x256xf32, #tpu.memory_space<vmem>>, vector<24x256xf32>
    %c0_1 = arith.constant 0 : index
    %c0_2 = arith.constant 0 : index
    %1 = vector.load %arg2[%c0_1, %c0_2] : memref<256x256xf32, #tpu.memory_space<vmem>>, vector<256x256xf32>
    %cst = arith.constant dense<0.000000e+00> : vector<24x256xf32>
    %2 = tpu.matmul %0, %1, %cst {dimension_numbers = #tpu.dot_dimension_numbers<[1], [0], [0], [1], [0, 0, 1, 1], [], []>} : vector<24x256xf32>, vector<256x256xf32>, vector<24x256xf32> -> vector<24x256xf32>
    %c0_3 = arith.constant 0 : index
    %c0_4 = arith.constant 0 : index
    %3 = vector.load %arg3[%c0_3, %c0_4] : memref<24x256xf32, #tpu.memory_space<vmem>>, vector<24x256xf32>
    tpu.vector_store %arg3[%c0_3, %c0_4], %2 {strides = array<i32>} : memref<24x256xf32, #tpu.memory_space<vmem>>, vector<24x256xf32>,
    return
  }
  func.func @transform_0(%arg0: i32) -> (i32, i32) {
    %c0_i32 = arith.constant 0 : i32
    %c0_i32_0 = arith.constant 0 : i32
    return %arg0, %c0_i32 : i32, i32
  }
  func.func @transform_1(%arg0: i32) -> (i32, i32) {
    %c0_i32 = arith.constant 0 : i32
    %c0_i32_0 = arith.constant 0 : i32
    %c0_i32_1 = arith.constant 0 : i32
    return %c0_i32, %c0_i32_0 : i32, i32
  }
  func.func @transform_2(%arg0: i32) -> (i32, i32) {
    %c0_i32 = arith.constant 0 : i32
    %c0_i32_0 = arith.constant 0 : i32
    return %arg0, %c0_i32 : i32, i32
  }
}

module attributes {stable_mosaic.version = 11 : i64} {
  func.func @_linear_kernel(%arg0: i32, %arg1: memref<24x256xf32, #tpu.memory_space<vmem>>, %arg2: memref<256x1024xf32, #tpu.memory_space<vmem>>, %arg3: memref<24x1024xf32, #tpu.memory_space<vmem>>) attributes {dimension_semantics = [#tpu.dimension_semantics<parallel>], iteration_bounds = array<i64: 1>, scalar_prefetch = 0 : i64, scratch_operands = 0 : i64, tpu.core_type = #tpu.core_type<tc>, window_params = [{transform_indices = @transform_0, window_bounds = array<i64: 24, 256>}, {pipeline_mode = #tpu.pipeline_mode<synchronous>, transform_indices = @transform_1, window_bounds = array<i64: 256, 1024>}, {transform_indices = @transform_2, window_bounds = array<i64: 24, 1024>}]} {
    %c0 = arith.constant 0 : index
    %c0_0 = arith.constant 0 : index
    %0 = vector.load %arg1[%c0, %c0_0] : memref<24x256xf32, #tpu.memory_space<vmem>>, vector<24x256xf32>
    %c0_1 = arith.constant 0 : index
    %c0_2 = arith.constant 0 : index
    %1 = vector.load %arg2[%c0_1, %c0_2] : memref<256x1024xf32, #tpu.memory_space<vmem>>, vector<256x1024xf32>
    %cst = arith.constant dense<0.000000e+00> : vector<24x1024xf32>
    %2 = tpu.matmul %0, %1, %cst {dimension_numbers = #tpu.dot_dimension_numbers<[1], [0], [0], [1], [0, 0, 1, 1], [], []>} : vector<24x256xf32>, vector<256x1024xf32>, vector<24x1024xf32> -> vector<24x1024xf32>
    %cst_3 = arith.constant 0.000000e+00 : f32
    %3 = vector.broadcast %cst_3 : f32 to vector<24x1024xf32>
    %4 = arith.maximumf %2, %3 : vector<24x1024xf32>
    %c0_4 = arith.constant 0 : index
    %c0_5 = arith.constant 0 : index
    %5 = vector.load %arg3[%c0_4, %c0_5] : memref<24x1024xf32, #tpu.memory_space<vmem>>, vector<24x1024xf32>
    tpu.vector_store %arg3[%c0_4, %c0_5], %4 {strides = array<i32>} : memref<24x1024xf32, #tpu.memory_space<vmem>>, vector<24x1024xf32>,
    return
  }
  func.func @transform_0(%arg0: i32) -> (i32, i32) {
    %c0_i32 = arith.constant 0 : i32
    %c0_i32_0 = arith.constant 0 : i32
    return %arg0, %c0_i32 : i32, i32
  }
  func.func @transform_1(%arg0: i32) -> (i32, i32) {
    %c0_i32 = arith.constant 0 : i32
    %c0_i32_0 = arith.constant 0 : i32
    %c0_i32_1 = arith.constant 0 : i32
    return %c0_i32, %c0_i32_0 : i32, i32
  }
  func.func @transform_2(%arg0: i32) -> (i32, i32) {
    %c0_i32 = arith.constant 0 : i32
    %c0_i32_0 = arith.constant 0 : i32
    return %arg0, %c0_i32 : i32, i32
  }
}

module attributes {stable_mosaic.version = 11 : i64} {
  func.func @_linear_addnorm_kernel(%arg0: i32, %arg1: memref<1xi32, #tpu.memory_space<smem>>, %arg2: memref<24x1024xf32, #tpu.memory_space<vmem>>, %arg3: memref<1024x256xf32, #tpu.memory_space<vmem>>, %arg4: memref<24x256xf32, #tpu.memory_space<vmem>>, %arg5: memref<2x256xf32, #tpu.memory_space<vmem>>, %arg6: memref<24x256xf32, #tpu.memory_space<vmem>>) attributes {dimension_semantics = [#tpu.dimension_semantics<parallel>], iteration_bounds = array<i64: 1>, scalar_prefetch = 1 : i64, scratch_operands = 0 : i64, tpu.core_type = #tpu.core_type<tc>, window_params = [{transform_indices = @transform_0, window_bounds = array<i64: 24, 1024>}, {pipeline_mode = #tpu.pipeline_mode<synchronous>, transform_indices = @transform_1, window_bounds = array<i64: 1024, 256>}, {transform_indices = @transform_2, window_bounds = array<i64: 24, 256>}, {pipeline_mode = #tpu.pipeline_mode<synchronous>, transform_indices = @transform_3, window_bounds = array<i64: 2, 256>}, {transform_indices = @transform_4, window_bounds = array<i64: 24, 256>}]} {
    %c0 = arith.constant 0 : index
    %c0_0 = arith.constant 0 : index
    %0 = vector.load %arg2[%c0, %c0_0] : memref<24x1024xf32, #tpu.memory_space<vmem>>, vector<24x1024xf32>
    %c0_1 = arith.constant 0 : index
    %c0_2 = arith.constant 0 : index
    %1 = vector.load %arg3[%c0_1, %c0_2] : memref<1024x256xf32, #tpu.memory_space<vmem>>, vector<1024x256xf32>
    %cst = arith.constant dense<0.000000e+00> : vector<24x256xf32>
    %2 = tpu.matmul %0, %1, %cst {dimension_numbers = #tpu.dot_dimension_numbers<[1], [0], [0], [1], [0, 0, 1, 1], [], []>} : vector<24x1024xf32>, vector<1024x256xf32>, vector<24x256xf32> -> vector<24x256xf32>
    %cst_3 = arith.constant 0.000000e+00 : f32
    %3 = vector.broadcast %cst_3 : f32 to vector<24x256xf32>
    %4 = arith.maximumf %2, %3 : vector<24x256xf32>
    %cst_4 = arith.constant dense<0.000000e+00> : vector<24xf32>
    %5 = vector.multi_reduction <add>, %4, %cst_4 [1] : vector<24x256xf32> to vector<24xf32>
    %6 = vector.shape_cast %5 : vector<24xf32> to vector<24x1xf32>
    %cst_5 = arith.constant 2.560000e+02 : f32
    %7 = vector.broadcast %cst_5 : f32 to vector<24x1xf32>
    %8 = arith.divf %6, %7 : vector<24x1xf32>
    %9 = vector.broadcast %8 : vector<24x1xf32> to vector<24x256xf32>
    %10 = arith.subf %4, %9 : vector<24x256xf32>
    %11 = arith.mulf %10, %10 : vector<24x256xf32>
    %cst_6 = arith.constant dense<0.000000e+00> : vector<24xf32>
    %12 = vector.multi_reduction <add>, %11, %cst_6 [1] : vector<24x256xf32> to vector<24xf32>
    %13 = vector.shape_cast %12 : vector<24xf32> to vector<24x1xf32>
    %cst_7 = arith.constant 2.560000e+02 : f32
    %14 = vector.broadcast %cst_7 : f32 to vector<24x1xf32>
    %15 = arith.divf %13, %14 : vector<24x1xf32>
    %c0_8 = arith.constant 0 : index
    %c0_9 = arith.constant 0 : index
    %16 = vector.load %arg5[%c0_8, %c0_9] : memref<2x256xf32, #tpu.memory_space<vmem>>, vector<1x256xf32>
    %c1 = arith.constant 1 : index
    %c0_10 = arith.constant 0 : index
    %17 = vector.load %arg5[%c1, %c0_10] : memref<2x256xf32, #tpu.memory_space<vmem>>, vector<1x256xf32>
    %cst_11 = arith.constant 9.99999974E-6 : f32
    %18 = vector.broadcast %cst_11 : f32 to vector<24x1xf32>
    %19 = arith.addf %15, %18 : vector<24x1xf32>
    %20 = math.rsqrt %19 : vector<24x1xf32>
    %21 = vector.broadcast %20 : vector<24x1xf32> to vector<24x256xf32>
    %22 = arith.mulf %10, %21 : vector<24x256xf32>
    %23 = vector.broadcast %16 : vector<1x256xf32> to vector<24x256xf32>
    %24 = arith.mulf %22, %23 : vector<24x256xf32>
    %25 = vector.broadcast %17 : vector<1x256xf32> to vector<24x256xf32>
    %26 = arith.addf %24, %25 : vector<24x256xf32>
    %c0_12 = arith.constant 0 : index
    %c0_13 = arith.constant 0 : index
    %27 = vector.load %arg4[%c0_12, %c0_13] : memref<24x256xf32, #tpu.memory_space<vmem>>, vector<24x256xf32>
    %28 = arith.addf %27, %26 : vector<24x256xf32>
    %c0_14 = arith.constant 0 : index
    %c0_15 = arith.constant 0 : index
    %29 = vector.load %arg6[%c0_14, %c0_15] : memref<24x256xf32, #tpu.memory_space<vmem>>, vector<24x256xf32>
    tpu.vector_store %arg6[%c0_14, %c0_15], %28 {strides = array<i32>} : memref<24x256xf32, #tpu.memory_space<vmem>>, vector<24x256xf32>,
    return
  }
  func.func @transform_0(%arg0: i32, %arg1: memref<1xi32, #tpu.memory_space<smem>>) -> (i32, i32) {
    %c0_i32 = arith.constant 0 : i32
    %c0_i32_0 = arith.constant 0 : i32
    return %arg0, %c0_i32 : i32, i32
  }
  func.func @transform_1(%arg0: i32, %arg1: memref<1xi32, #tpu.memory_space<smem>>) -> (i32, i32) {
    %c0_i32 = arith.constant 0 : i32
    %c0_i32_0 = arith.constant 0 : i32
    %c0_i32_1 = arith.constant 0 : i32
    return %c0_i32, %c0_i32_0 : i32, i32
  }
  func.func @transform_2(%arg0: i32, %arg1: memref<1xi32, #tpu.memory_space<smem>>) -> (i32, i32) {
    %c0_i32 = arith.constant 0 : i32
    %c0_i32_0 = arith.constant 0 : i32
    return %arg0, %c0_i32 : i32, i32
  }
  func.func @transform_3(%arg0: i32, %arg1: memref<1xi32, #tpu.memory_space<smem>>) -> (i32, i32) {
    %c0_i32 = arith.constant 0 : i32
    %c0_i32_0 = arith.constant 0 : i32
    %c0_i32_1 = arith.constant 0 : i32
    return %c0_i32, %c0_i32_0 : i32, i32
  }
  func.func @transform_4(%arg0: i32, %arg1: memref<1xi32, #tpu.memory_space<smem>>) -> (i32, i32) {
    %c0_i32 = arith.constant 0 : i32
    %c0_i32_0 = arith.constant 0 : i32
    return %arg0, %c0_i32 : i32, i32
  }
}

module attributes {stable_mosaic.version = 11 : i64} {
  func.func @_linear_kernel(%arg0: i32, %arg1: memref<24x256xf32, #tpu.memory_space<vmem>>, %arg2: memref<256x512xf32, #tpu.memory_space<vmem>>, %arg3: memref<24x512xf32, #tpu.memory_space<vmem>>) attributes {dimension_semantics = [#tpu.dimension_semantics<parallel>], iteration_bounds = array<i64: 1>, scalar_prefetch = 0 : i64, scratch_operands = 0 : i64, tpu.core_type = #tpu.core_type<tc>, window_params = [{transform_indices = @transform_0, window_bounds = array<i64: 24, 256>}, {pipeline_mode = #tpu.pipeline_mode<synchronous>, transform_indices = @transform_1, window_bounds = array<i64: 256, 512>}, {transform_indices = @transform_2, window_bounds = array<i64: 24, 512>}]} {
    %c0 = arith.constant 0 : index
    %c0_0 = arith.constant 0 : index
    %0 = vector.load %arg1[%c0, %c0_0] : memref<24x256xf32, #tpu.memory_space<vmem>>, vector<24x256xf32>
    %c0_1 = arith.constant 0 : index
    %c0_2 = arith.constant 0 : index
    %1 = vector.load %arg2[%c0_1, %c0_2] : memref<256x512xf32, #tpu.memory_space<vmem>>, vector<256x512xf32>
    %cst = arith.constant dense<0.000000e+00> : vector<24x512xf32>
    %2 = tpu.matmul %0, %1, %cst {dimension_numbers = #tpu.dot_dimension_numbers<[1], [0], [0], [1], [0, 0, 1, 1], [], []>} : vector<24x256xf32>, vector<256x512xf32>, vector<24x512xf32> -> vector<24x512xf32>
    %c0_3 = arith.constant 0 : index
    %c0_4 = arith.constant 0 : index
    %3 = vector.load %arg3[%c0_3, %c0_4] : memref<24x512xf32, #tpu.memory_space<vmem>>, vector<24x512xf32>
    tpu.vector_store %arg3[%c0_3, %c0_4], %2 {strides = array<i32>} : memref<24x512xf32, #tpu.memory_space<vmem>>, vector<24x512xf32>,
    return
  }
  func.func @transform_0(%arg0: i32) -> (i32, i32) {
    %c0_i32 = arith.constant 0 : i32
    %c0_i32_0 = arith.constant 0 : i32
    return %arg0, %c0_i32 : i32, i32
  }
  func.func @transform_1(%arg0: i32) -> (i32, i32) {
    %c0_i32 = arith.constant 0 : i32
    %c0_i32_0 = arith.constant 0 : i32
    %c0_i32_1 = arith.constant 0 : i32
    return %c0_i32, %c0_i32_0 : i32, i32
  }
  func.func @transform_2(%arg0: i32) -> (i32, i32) {
    %c0_i32 = arith.constant 0 : i32
    %c0_i32_0 = arith.constant 0 : i32
    return %arg0, %c0_i32 : i32, i32
  }
}

module attributes {stable_mosaic.version = 11 : i64} {
  func.func @_cross_attn_kernel(%arg0: i32, %arg1: memref<1x12x256xf32, #tpu.memory_space<vmem>>, %arg2: memref<1x12x512xf32, #tpu.memory_space<vmem>>, %arg3: memref<1x12x256xf32, #tpu.memory_space<vmem>>) attributes {dimension_semantics = [#tpu.dimension_semantics<parallel>], iteration_bounds = array<i64: 2>, scalar_prefetch = 0 : i64, scratch_operands = 0 : i64, tpu.core_type = #tpu.core_type<tc>, window_params = [{transform_indices = @transform_0, window_bounds = array<i64: 1, 12, 256>}, {transform_indices = @transform_1, window_bounds = array<i64: 1, 12, 512>}, {transform_indices = @transform_2, window_bounds = array<i64: 1, 12, 256>}]} {
    %c0 = arith.constant 0 : index
    %c0_0 = arith.constant 0 : index
    %c0_1 = arith.constant 0 : index
    %0 = vector.load %arg1[%c0, %c0_0, %c0_1] : memref<1x12x256xf32, #tpu.memory_space<vmem>>, vector<1x12x256xf32>
    %1 = vector.shape_cast %0 : vector<1x12x256xf32> to vector<12x256xf32>
    %c0_2 = arith.constant 0 : index
    %c0_3 = arith.constant 0 : index
    %c0_4 = arith.constant 0 : index
    %2 = vector.load %arg2[%c0_2, %c0_3, %c0_4] : memref<1x12x512xf32, #tpu.memory_space<vmem>>, vector<1x12x512xf32>
    %3 = vector.shape_cast %2 : vector<1x12x512xf32> to vector<12x512xf32>
    %4 = vector.extract_strided_slice %3 {offsets = [0, 0], sizes = [12, 256], strides = [1, 1]} : vector<12x512xf32> to vector<12x256xf32>
    %5 = vector.extract_strided_slice %3 {offsets = [0, 256], sizes = [12, 256], strides = [1, 1]} : vector<12x512xf32> to vector<12x256xf32>
    %6 = vector.extract_strided_slice %1 {offsets = [0, 0], sizes = [12, 64], strides = [1, 1]} : vector<12x256xf32> to vector<12x64xf32>
    %7 = vector.extract_strided_slice %4 {offsets = [0, 0], sizes = [12, 64], strides = [1, 1]} : vector<12x256xf32> to vector<12x64xf32>
    %8 = vector.extract_strided_slice %5 {offsets = [0, 0], sizes = [12, 64], strides = [1, 1]} : vector<12x256xf32> to vector<12x64xf32>
    %cst = arith.constant dense<0.000000e+00> : vector<12x12xf32>
    %9 = tpu.matmul %6, %7, %cst {dimension_numbers = #tpu.dot_dimension_numbers<[1], [1], [0], [0], [0, 0, 1, 0], [], []>} : vector<12x64xf32>, vector<12x64xf32>, vector<12x12xf32> -> vector<12x12xf32>
    %cst_5 = arith.constant 1.250000e-01 : f32
    %10 = vector.broadcast %cst_5 : f32 to vector<12x12xf32>
    %11 = arith.mulf %9, %10 : vector<12x12xf32>
    %cst_6 = arith.constant dense<0xFF800000> : vector<12xf32>
    %12 = vector.multi_reduction <maximumf>, %11, %cst_6 [1] : vector<12x12xf32> to vector<12xf32>
    %13 = vector.shape_cast %12 : vector<12xf32> to vector<12x1xf32>
    %14 = vector.broadcast %13 : vector<12x1xf32> to vector<12x12xf32>
    %15 = arith.subf %11, %14 : vector<12x12xf32>
    %16 = math.exp %15 : vector<12x12xf32>
    %cst_7 = arith.constant dense<0.000000e+00> : vector<12xf32>
    %17 = vector.multi_reduction <add>, %16, %cst_7 [1] : vector<12x12xf32> to vector<12xf32>
    %18 = vector.shape_cast %17 : vector<12xf32> to vector<12x1xf32>
    %19 = vector.broadcast %18 : vector<12x1xf32> to vector<12x12xf32>
    %20 = arith.divf %16, %19 : vector<12x12xf32>
    %cst_8 = arith.constant dense<0.000000e+00> : vector<12x64xf32>
    %21 = tpu.matmul %20, %8, %cst_8 {dimension_numbers = #tpu.dot_dimension_numbers<[1], [0], [0], [1], [0, 0, 1, 1], [], []>} : vector<12x12xf32>, vector<12x64xf32>, vector<12x64xf32> -> vector<12x64xf32>
    %22 = vector.extract_strided_slice %1 {offsets = [0, 64], sizes = [12, 64], strides = [1, 1]} : vector<12x256xf32> to vector<12x64xf32>
    %23 = vector.extract_strided_slice %4 {offsets = [0, 64], sizes = [12, 64], strides = [1, 1]} : vector<12x256xf32> to vector<12x64xf32>
    %24 = vector.extract_strided_slice %5 {offsets = [0, 64], sizes = [12, 64], strides = [1, 1]} : vector<12x256xf32> to vector<12x64xf32>
    %cst_9 = arith.constant dense<0.000000e+00> : vector<12x12xf32>
    %25 = tpu.matmul %22, %23, %cst_9 {dimension_numbers = #tpu.dot_dimension_numbers<[1], [1], [0], [0], [0, 0, 1, 0], [], []>} : vector<12x64xf32>, vector<12x64xf32>, vector<12x12xf32> -> vector<12x12xf32>
    %cst_10 = arith.constant 1.250000e-01 : f32
    %26 = vector.broadcast %cst_10 : f32 to vector<12x12xf32>
    %27 = arith.mulf %25, %26 : vector<12x12xf32>
    %cst_11 = arith.constant dense<0xFF800000> : vector<12xf32>
    %28 = vector.multi_reduction <maximumf>, %27, %cst_11 [1] : vector<12x12xf32> to vector<12xf32>
    %29 = vector.shape_cast %28 : vector<12xf32> to vector<12x1xf32>
    %30 = vector.broadcast %29 : vector<12x1xf32> to vector<12x12xf32>
    %31 = arith.subf %27, %30 : vector<12x12xf32>
    %32 = math.exp %31 : vector<12x12xf32>
    %cst_12 = arith.constant dense<0.000000e+00> : vector<12xf32>
    %33 = vector.multi_reduction <add>, %32, %cst_12 [1] : vector<12x12xf32> to vector<12xf32>
    %34 = vector.shape_cast %33 : vector<12xf32> to vector<12x1xf32>
    %35 = vector.broadcast %34 : vector<12x1xf32> to vector<12x12xf32>
    %36 = arith.divf %32, %35 : vector<12x12xf32>
    %cst_13 = arith.constant dense<0.000000e+00> : vector<12x64xf32>
    %37 = tpu.matmul %36, %24, %cst_13 {dimension_numbers = #tpu.dot_dimension_numbers<[1], [0], [0], [1], [0, 0, 1, 1], [], []>} : vector<12x12xf32>, vector<12x64xf32>, vector<12x64xf32> -> vector<12x64xf32>
    %38 = vector.extract_strided_slice %1 {offsets = [0, 128], sizes = [12, 64], strides = [1, 1]} : vector<12x256xf32> to vector<12x64xf32>
    %39 = vector.extract_strided_slice %4 {offsets = [0, 128], sizes = [12, 64], strides = [1, 1]} : vector<12x256xf32> to vector<12x64xf32>
    %40 = vector.extract_strided_slice %5 {offsets = [0, 128], sizes = [12, 64], strides = [1, 1]} : vector<12x256xf32> to vector<12x64xf32>
    %cst_14 = arith.constant dense<0.000000e+00> : vector<12x12xf32>
    %41 = tpu.matmul %38, %39, %cst_14 {dimension_numbers = #tpu.dot_dimension_numbers<[1], [1], [0], [0], [0, 0, 1, 0], [], []>} : vector<12x64xf32>, vector<12x64xf32>, vector<12x12xf32> -> vector<12x12xf32>
    %cst_15 = arith.constant 1.250000e-01 : f32
    %42 = vector.broadcast %cst_15 : f32 to vector<12x12xf32>
    %43 = arith.mulf %41, %42 : vector<12x12xf32>
    %cst_16 = arith.constant dense<0xFF800000> : vector<12xf32>
    %44 = vector.multi_reduction <maximumf>, %43, %cst_16 [1] : vector<12x12xf32> to vector<12xf32>
    %45 = vector.shape_cast %44 : vector<12xf32> to vector<12x1xf32>
    %46 = vector.broadcast %45 : vector<12x1xf32> to vector<12x12xf32>
    %47 = arith.subf %43, %46 : vector<12x12xf32>
    %48 = math.exp %47 : vector<12x12xf32>
    %cst_17 = arith.constant dense<0.000000e+00> : vector<12xf32>
    %49 = vector.multi_reduction <add>, %48, %cst_17 [1] : vector<12x12xf32> to vector<12xf32>
    %50 = vector.shape_cast %49 : vector<12xf32> to vector<12x1xf32>
    %51 = vector.broadcast %50 : vector<12x1xf32> to vector<12x12xf32>
    %52 = arith.divf %48, %51 : vector<12x12xf32>
    %cst_18 = arith.constant dense<0.000000e+00> : vector<12x64xf32>
    %53 = tpu.matmul %52, %40, %cst_18 {dimension_numbers = #tpu.dot_dimension_numbers<[1], [0], [0], [1], [0, 0, 1, 1], [], []>} : vector<12x12xf32>, vector<12x64xf32>, vector<12x64xf32> -> vector<12x64xf32>
    %54 = vector.extract_strided_slice %1 {offsets = [0, 192], sizes = [12, 64], strides = [1, 1]} : vector<12x256xf32> to vector<12x64xf32>
    %55 = vector.extract_strided_slice %4 {offsets = [0, 192], sizes = [12, 64], strides = [1, 1]} : vector<12x256xf32> to vector<12x64xf32>
    %56 = vector.extract_strided_slice %5 {offsets = [0, 192], sizes = [12, 64], strides = [1, 1]} : vector<12x256xf32> to vector<12x64xf32>
    %cst_19 = arith.constant dense<0.000000e+00> : vector<12x12xf32>
    %57 = tpu.matmul %54, %55, %cst_19 {dimension_numbers = #tpu.dot_dimension_numbers<[1], [1], [0], [0], [0, 0, 1, 0], [], []>} : vector<12x64xf32>, vector<12x64xf32>, vector<12x12xf32> -> vector<12x12xf32>
    %cst_20 = arith.constant 1.250000e-01 : f32
    %58 = vector.broadcast %cst_20 : f32 to vector<12x12xf32>
    %59 = arith.mulf %57, %58 : vector<12x12xf32>
    %cst_21 = arith.constant dense<0xFF800000> : vector<12xf32>
    %60 = vector.multi_reduction <maximumf>, %59, %cst_21 [1] : vector<12x12xf32> to vector<12xf32>
    %61 = vector.shape_cast %60 : vector<12xf32> to vector<12x1xf32>
    %62 = vector.broadcast %61 : vector<12x1xf32> to vector<12x12xf32>
    %63 = arith.subf %59, %62 : vector<12x12xf32>
    %64 = math.exp %63 : vector<12x12xf32>
    %cst_22 = arith.constant dense<0.000000e+00> : vector<12xf32>
    %65 = vector.multi_reduction <add>, %64, %cst_22 [1] : vector<12x12xf32> to vector<12xf32>
    %66 = vector.shape_cast %65 : vector<12xf32> to vector<12x1xf32>
    %67 = vector.broadcast %66 : vector<12x1xf32> to vector<12x12xf32>
    %68 = arith.divf %64, %67 : vector<12x12xf32>
    %cst_23 = arith.constant dense<0.000000e+00> : vector<12x64xf32>
    %69 = tpu.matmul %68, %56, %cst_23 {dimension_numbers = #tpu.dot_dimension_numbers<[1], [0], [0], [1], [0, 0, 1, 1], [], []>} : vector<12x12xf32>, vector<12x64xf32>, vector<12x64xf32> -> vector<12x64xf32>
    %70 = tpu.concatenate %21, %37, %53, %69 in 1 : vector<12x64xf32>, vector<12x64xf32>, vector<12x64xf32>, vector<12x64xf32> -> vector<12x256xf32>
    %c0_24 = arith.constant 0 : index
    %c0_25 = arith.constant 0 : index
    %c0_26 = arith.constant 0 : index
    %71 = vector.load %arg3[%c0_24, %c0_25, %c0_26] : memref<1x12x256xf32, #tpu.memory_space<vmem>>, vector<1x12x256xf32>
    %72 = vector.shape_cast %71 : vector<1x12x256xf32> to vector<12x256xf32>
    %73 = vector.shape_cast %70 : vector<12x256xf32> to vector<1x12x256xf32>
    tpu.vector_store %arg3[%c0_24, %c0_25, %c0_26], %73 {strides = array<i32>} : memref<1x12x256xf32, #tpu.memory_space<vmem>>, vector<1x12x256xf32>,
    return
  }
  func.func @transform_0(%arg0: i32) -> (i32, i32, i32) {
    %c0_i32 = arith.constant 0 : i32
    %c0_i32_0 = arith.constant 0 : i32
    %c0_i32_1 = arith.constant 0 : i32
    return %arg0, %c0_i32, %c0_i32_0 : i32, i32, i32
  }
  func.func @transform_1(%arg0: i32) -> (i32, i32, i32) {
    %c0_i32 = arith.constant 0 : i32
    %c0_i32_0 = arith.constant 0 : i32
    %c0_i32_1 = arith.constant 0 : i32
    return %arg0, %c0_i32, %c0_i32_0 : i32, i32, i32
  }
  func.func @transform_2(%arg0: i32) -> (i32, i32, i32) {
    %c0_i32 = arith.constant 0 : i32
    %c0_i32_0 = arith.constant 0 : i32
    %c0_i32_1 = arith.constant 0 : i32
    return %arg0, %c0_i32, %c0_i32_0 : i32, i32, i32
  }
}

module attributes {stable_mosaic.version = 11 : i64} {
  func.func @_linear_kernel(%arg0: i32, %arg1: memref<24x256xf32, #tpu.memory_space<vmem>>, %arg2: memref<256x29xf32, #tpu.memory_space<vmem>>, %arg3: memref<24x29xf32, #tpu.memory_space<vmem>>) attributes {dimension_semantics = [#tpu.dimension_semantics<parallel>], iteration_bounds = array<i64: 1>, scalar_prefetch = 0 : i64, scratch_operands = 0 : i64, tpu.core_type = #tpu.core_type<tc>, window_params = [{transform_indices = @transform_0, window_bounds = array<i64: 24, 256>}, {pipeline_mode = #tpu.pipeline_mode<synchronous>, transform_indices = @transform_1, window_bounds = array<i64: 256, 29>}, {transform_indices = @transform_2, window_bounds = array<i64: 24, 29>}]} {
    %c0 = arith.constant 0 : index
    %c0_0 = arith.constant 0 : index
    %0 = vector.load %arg1[%c0, %c0_0] : memref<24x256xf32, #tpu.memory_space<vmem>>, vector<24x256xf32>
    %c0_1 = arith.constant 0 : index
    %c0_2 = arith.constant 0 : index
    %1 = vector.load %arg2[%c0_1, %c0_2] : memref<256x29xf32, #tpu.memory_space<vmem>>, vector<256x29xf32>
    %cst = arith.constant dense<0.000000e+00> : vector<24x29xf32>
    %2 = tpu.matmul %0, %1, %cst {dimension_numbers = #tpu.dot_dimension_numbers<[1], [0], [0], [1], [0, 0, 1, 1], [], []>} : vector<24x256xf32>, vector<256x29xf32>, vector<24x29xf32> -> vector<24x29xf32>
    %c0_3 = arith.constant 0 : index
    %c0_4 = arith.constant 0 : index
    %3 = vector.load %arg3[%c0_3, %c0_4] : memref<24x29xf32, #tpu.memory_space<vmem>>, vector<24x29xf32>
    tpu.vector_store %arg3[%c0_3, %c0_4], %2 {strides = array<i32>} : memref<24x29xf32, #tpu.memory_space<vmem>>, vector<24x29xf32>,
    return
  }
  func.func @transform_0(%arg0: i32) -> (i32, i32) {
    %c0_i32 = arith.constant 0 : i32
    %c0_i32_0 = arith.constant 0 : i32
    return %arg0, %c0_i32 : i32, i32
  }
  func.func @transform_1(%arg0: i32) -> (i32, i32) {
    %c0_i32 = arith.constant 0 : i32
    %c0_i32_0 = arith.constant 0 : i32
    %c0_i32_1 = arith.constant 0 : i32
    return %c0_i32, %c0_i32_0 : i32, i32
  }
  func.func @transform_2(%arg0: i32) -> (i32, i32) {
    %c0_i32 = arith.constant 0 : i32
    %c0_i32_0 = arith.constant 0 : i32
    return %arg0, %c0_i32 : i32, i32
  }
}

</mosaic_0001>

<bundles_post_ra>
// kernel: tile.19
= control target key start
LH: loop header
LB: loop body
LE: loop exit
PB: predicated region body
PF: predicated region fallthrough
CT: control target
= control target key end

     0   :  { %vm7_vm0 = vcmask 97280   ;;  %vm13_vm1 = vcmask 195680   ;;  %s39_s0 = inlined_call_operand.vmem [shape: s32[2,12], index: 0, kind: input, shape index: {}]   ;;  %s40_s1 = inlined_call_operand.vmem [shape: s32[24,1], index: 1, kind: output, shape index: {}]  }
   0x1   :  { %v4_v0 = vld [vmem:[%s39_s0] sm:$0x3]  ;;  %s22_s0 = smov 12  }
   0x2   :  { %5 = vst [vmem:[#allocation1] sm:$0x3] %v4_v0 }
   0x9   :  { %v10_v1 = vld [vmem:[#allocation1 + $0x1] sm:$0x1]   ;;  %v6_v2 = vld [vmem:[#allocation1] sm:$0x1]  }
   0xa   :  { %11 = vrot.lane.b32.xlu0 %v10_v1, %s22_s0  ;;  %8 = vst.msk [vmem:[#allocation0] sm:$0x1] %vm7_vm0, %v6_v2  }
  0x7c   :  { %v12_v3 = vpop.permute.xlu0 %11  }
  0x7d   :  { %14 = vst.msk [vmem:[#allocation0] sm:$0x1] %vm13_vm1, %v12_v3  }
  0x84   :  { %v18_v4 = vld [vmem:[#allocation0] sm:$0x1] }
  0x85   :  { %20 = vst [vmem:[%s40_s1] sm:$0x1] %v18_v4 }

// kernel: transformer_forward.83
= control target key start
LH: loop header
LB: loop body
LE: loop exit
PB: predicated region body
PF: predicated region fallthrough
CT: control target
= control target key end

     0   :  { %s665_s0 = inlined_call_operand.<no memory space> [shape: s32[1], index: 0, kind: input, shape index: {}]   ;;  %s666_s2 = inlined_call_operand.vmem [shape: f32[256,256], index: 2, kind: input, shape index: {}]   ;;  %s667_s1 = inlined_call_operand.vmem [shape: f32[24,256], index: 1, kind: input, shape index: {}]   ;;  %s668_s4 = inlined_call_operand.vmem [shape: f32[2,256], index: 4, kind: input, shape index: {}]   ;;  %s669_s3 = inlined_call_operand.vmem [shape: f32[24,256], index: 3, kind: input, shape index: {}]   ;;  %s670_s5 = inlined_call_operand.vmem [shape: f32[24,256], index: 5, kind: output, shape index: {}]  }
   0x1   :  { %v26_v0 = vld [vmem:[%s666_s2 + $0x8] sm:$0xff]  ;;  %v28_v1 = vld [vmem:[%s666_s2 + $0x18] sm:$0xff]  ;;  %v25_v2 = vld [vmem:[%s666_s2] sm:$0xff] }
   0x2   :  { %v281_v3 = vpack.c.bf16 %v28_v1, %v26_v0  ;;  %v27_v4 = vld [vmem:[%s666_s2 + $0x10] sm:$0xff]  ;;  %v30_v5 = vld [vmem:[%s666_s2 + $0x28] sm:$0xff]  ;;  %v32_v6 = vld [vmem:[%s666_s2 + $0x38] sm:$0xff] }
   0x3   :  { %v283_v7 = vpack.c.bf16 %v27_v4, %v25_v2  ;;  %v285_v8 = vpack.c.bf16 %v32_v6, %v30_v5  ;;  %v29_v9 = vld [vmem:[%s666_s2 + $0x20] sm:$0xff]  ;;  %v31_v10 = vld [vmem:[%s666_s2 + $0x30] sm:$0xff]  ;;  %v34_v11 = vld [vmem:[%s666_s2 + $0x48] sm:$0xff] }
   0x4   :  { %282 = vmatprep.subr.bf16.mxu0 %v281_v3  ;;  %345 = vmatprep.subr.bf16.mxu1 %v281_v3  ;;  %v36_v12 = vld [vmem:[%s666_s2 + $0x58] sm:$0xff]  ;;  %v287_v13 = vpack.c.bf16 %v31_v10, %v29_v9  ;;  %v33_v15 = vld [vmem:[%s666_s2 + $0x40] sm:$0xff]  ;;  %v35_v16 = vld [vmem:[%s666_s2 + $0x50] sm:$0xff] }
   0x5   :  { %284 = vmatpush1.bf16.msra.mxu0 %v283_v7  ;;  %361 = vmatpush1.bf16.msra.mxu1 %v283_v7  ;;  %v289_v14 = vpack.c.bf16 %v36_v12, %v34_v11  ;;  %v38_v17 = vld [vmem:[%s666_s2 + $0x68] sm:$0xff]  ;;  %v40_v18 = vld [vmem:[%s666_s2 + $0x78] sm:$0xff]  ;;  %v291_v19 = vpack.c.bf16 %v35_v16, %v33_v15  ;;  %v37_v21 = vld [vmem:[%s666_s2 + $0x60] sm:$0xff] }
   0x6   :  { %286 = vmatprep.subr.bf16.mxu0 %v285_v8  ;;  %346 = vmatprep.subr.bf16.mxu1 %v285_v8  ;;  %v293_v20 = vpack.c.bf16 %v40_v18, %v38_v17  ;;  %v39_v22 = vld [vmem:[%s666_s2 + $0x70] sm:$0xff]  ;;  %v42_v23 = vld [vmem:[%s666_s2 + $0x88] sm:$0xff]  ;;  %v44_v24 = vld [vmem:[%s666_s2 + $0x98] sm:$0xff] }
   0x7   :  { %v295_v25 = vpack.c.bf16 %v39_v22, %v37_v21  ;;  %v297_v26 = vpack.c.bf16 %v44_v24, %v42_v23  ;;  %v41_v27 = vld [vmem:[%s666_s2 + $0x80] sm:$0xff]  ;;  %v43_v28 = vld [vmem:[%s666_s2 + $0x90] sm:$0xff]  ;;  %v46_v29 = vld [vmem:[%s666_s2 + $0xa8] sm:$0xff] }
   0x8   :  { %v48_v30 = vld [vmem:[%s666_s2 + $0xb8] sm:$0xff]  ;;  %v299_v31 = vpack.c.bf16 %v43_v28, %v41_v27  ;;  %v45_v33 = vld [vmem:[%s666_s2 + $0xa0] sm:$0xff]  ;;  %v47_v34 = vld [vmem:[%s666_s2 + $0xb0] sm:$0xff] }
   0x9   :  { %288 = vmatpush1.bf16.msra.mxu0 %v287_v13  ;;  %362 = vmatpush1.bf16.msra.mxu1 %v287_v13  ;;  %v301_v32 = vpack.c.bf16 %v48_v30, %v46_v29  ;;  %v50_v35 = vld [vmem:[%s666_s2 + $0xc8] sm:$0xff]  ;;  %v52_v36 = vld [vmem:[%s666_s2 + $0xd8] sm:$0xff]  ;;  %v303_v37 = vpack.c.bf16 %v47_v34, %v45_v33  ;;  %v49_v38 = vld [vmem:[%s666_s2 + $0xc0] sm:$0xff] }
   0xa   :  { %290 = vmatprep.subr.bf16.mxu0 %v289_v14  ;;  %347 = vmatprep.subr.bf16.mxu1 %v289_v14  ;;  %v305_v39 = vpack.c.bf16 %v52_v36, %v50_v35  ;;  %v51_v40 = vld [vmem:[%s666_s2 + $0xd0] sm:$0xff]  ;;  %v20_v41 = vld [vmem:[%s667_s1 + $0x8] sm:$0xff]  ;;  %v22_v42 = vld [vmem:[%s667_s1 + $0x18] sm:$0xff] }
   0xb   :  { %v54_v43 = vld [vmem:[%s666_s2 + $0xe8] sm:$0xff]  ;;  %v56_v44 = vld [vmem:[%s666_s2 + $0xf8] sm:$0xff]  ;;  %153 = vmatprep.mubr.f32.mxu0 %v20_v41  ;;  %159 = vmatprep.mubr.f32.mxu1 %v22_v42  ;;  %v307_v45 = vpack.c.bf16 %v51_v40, %v49_v38  ;;  %v53_v47 = vld [vmem:[%s666_s2 + $0xe0] sm:$0xff] }
   0xc   :  { %v309_v46 = vpack.c.bf16 %v56_v44, %v54_v43  ;;  %v55_v48 = vld [vmem:[%s666_s2 + $0xf0] sm:$0xff]  ;;  %v58_v49 = vld [vmem:[%s666_s2 + $0x108] sm:$0xff]  ;;  %v60_v50 = vld [vmem:[%s666_s2 + $0x118] sm:$0xff] }
   0xd   :  { %292 = vmatpush1.bf16.msra.mxu0 %v291_v19  ;;  %363 = vmatpush1.bf16.msra.mxu1 %v291_v19  ;;  %v311_v51 = vpack.c.bf16 %v55_v48, %v53_v47  ;;  %v313_v52 = vpack.c.bf16 %v60_v50, %v58_v49  ;;  %v57_v53 = vld [vmem:[%s666_s2 + $0x100] sm:$0xff]  ;;  %v59_v54 = vld [vmem:[%s666_s2 + $0x110] sm:$0xff]  ;;  %v62_v55 = vld [vmem:[%s666_s2 + $0x128] sm:$0xff] }
   0xe   :  { %294 = vmatprep.subr.bf16.mxu0 %v293_v20  ;;  %348 = vmatprep.subr.bf16.mxu1 %v293_v20  ;;  %v64_v56 = vld [vmem:[%s666_s2 + $0x138] sm:$0xff]  ;;  %v315_v57 = vpack.c.bf16 %v59_v54, %v57_v53  ;;  %v61_v59 = vld [vmem:[%s666_s2 + $0x120] sm:$0xff]  ;;  %v63_v60 = vld [vmem:[%s666_s2 + $0x130] sm:$0xff] }
   0xf   :  { %v317_v58 = vpack.c.bf16 %v64_v56, %v62_v55  ;;  %v66_v61 = vld [vmem:[%s666_s2 + $0x148] sm:$0xff]  ;;  %v68_v62 = vld [vmem:[%s666_s2 + $0x158] sm:$0xff]  ;;  %v319_v63 = vpack.c.bf16 %v63_v60, %v61_v59  ;;  %v65_v1 = vld [vmem:[%s666_s2 + $0x140] sm:$0xff] }
  0x10   :  { %v321_v0 = vpack.c.bf16 %v68_v62, %v66_v61  ;;  %v67_v2 = vld [vmem:[%s666_s2 + $0x150] sm:$0xff]  ;;  %v70_v3 = vld [vmem:[%s666_s2 + $0x168] sm:$0xff]  ;;  %v72_v4 = vld [vmem:[%s666_s2 + $0x178] sm:$0xff] }
  0x11   :  { %296 = vmatpush1.bf16.msra.mxu0 %v295_v25  ;;  %364 = vmatpush1.bf16.msra.mxu1 %v295_v25  ;;  %v323_v5 = vpack.c.bf16 %v67_v2, %v65_v1  ;;  %v325_v6 = vpack.c.bf16 %v72_v4, %v70_v3  ;;  %v69_v7 = vld [vmem:[%s666_s2 + $0x160] sm:$0xff]  ;;  %v71_v8 = vld [vmem:[%s666_s2 + $0x170] sm:$0xff]  ;;  %v74_v9 = vld [vmem:[%s666_s2 + $0x188] sm:$0xff] }
  0x12   :  { %298 = vmatprep.subr.bf16.mxu0 %v297_v26  ;;  %349 = vmatprep.subr.bf16.mxu1 %v297_v26  ;;  %v76_v10 = vld [vmem:[%s666_s2 + $0x198] sm:$0xff]  ;;  %v327_v11 = vpack.c.bf16 %v71_v8, %v69_v7  ;;  %v73_v13 = vld [vmem:[%s666_s2 + $0x180] sm:$0xff]  ;;  %v75_v14 = vld [vmem:[%s666_s2 + $0x190] sm:$0xff] }
  0x13   :  { %v329_v12 = vpack.c.bf16 %v76_v10, %v74_v9  ;;  %v78_v15 = vld [vmem:[%s666_s2 + $0x1a8] sm:$0xff]  ;;  %v80_v16 = vld [vmem:[%s666_s2 + $0x1b8] sm:$0xff]  ;;  %v331_v17 = vpack.c.bf16 %v75_v14, %v73_v13  ;;  %v77_v19 = vld [vmem:[%s666_s2 + $0x1a0] sm:$0xff] }
  0x14   :  { %v333_v18 = vpack.c.bf16 %v80_v16, %v78_v15  ;;  %v79_v20 = vld [vmem:[%s666_s2 + $0x1b0] sm:$0xff]  ;;  %v82_v21 = vld [vmem:[%s666_s2 + $0x1c8] sm:$0xff]  ;;  %v84_v22 = vld [vmem:[%s666_s2 + $0x1d8] sm:$0xff] }
  0x15   :  { %300 = vmatpush1.bf16.msra.mxu0 %v299_v31  ;;  %365 = vmatpush1.bf16.msra.mxu1 %v299_v31  ;;  %v335_v23 = vpack.c.bf16 %v79_v20, %v77_v19  ;;  %v337_v24 = vpack.c.bf16 %v84_v22, %v82_v21  ;;  %v81_v25 = vld [vmem:[%s666_s2 + $0x1c0] sm:$0xff]  ;;  %v83_v26 = vld [vmem:[%s666_s2 + $0x1d0] sm:$0xff]  ;;  %v86_v27 = vld [vmem:[%s666_s2 + $0x1e8] sm:$0xff] }
  0x16   :  { %302 = vmatprep.subr.bf16.mxu0 %v301_v32  ;;  %350 = vmatprep.subr.bf16.mxu1 %v301_v32  ;;  %v88_v28 = vld [vmem:[%s666_s2 + $0x1f8] sm:$0xff]  ;;  %v339_v29 = vpack.c.bf16 %v83_v26, %v81_v25  ;;  %v85_v31 = vld [vmem:[%s666_s2 + $0x1e0] sm:$0xff]  ;;  %v87_v32 = vld [vmem:[%s666_s2 + $0x1f0] sm:$0xff] }
  0x17   :  { %v341_v30 = vpack.c.bf16 %v88_v28, %v86_v27  ;;  %v343_v33 = vpack.c.bf16 %v87_v32, %v85_v31  ;;  %v19_v34 = vld [vmem:[%s667_s1] sm:$0xff]  ;;  %v21_v35 = vld [vmem:[%s667_s1 + $0x10] sm:$0xff]  ;;  %v24_v36 = vld [vmem:[%s667_s1 + $0x28] sm:$0xff] }
  0x18   :  { %v259_v31 = vld [vmem:[%s669_s3 + $0x8] sm:$0xff] }
  0x19   :  { %304 = vmatpush1.bf16.msra.mxu0 %v303_v37  ;;  %366 = vmatpush1.bf16.msra.mxu1 %v303_v37  ;;  %v23_v37 = vld [vmem:[%s667_s1 + $0x20] sm:$0xff] }
  0x1a   :  { %306 = vmatprep.subr.bf16.mxu0 %v305_v39  ;;  %351 = vmatprep.subr.bf16.mxu1 %v305_v39 }
  0x1d   :  { %308 = vmatpush1.bf16.msra.mxu0 %v307_v45  ;;  %367 = vmatpush1.bf16.msra.mxu1 %v307_v45 }
  0x1e   :  { %310 = vmatprep.subr.bf16.mxu0 %v309_v46  ;;  %352 = vmatprep.subr.bf16.mxu1 %v309_v46 }
  0x21   :  { %312 = vmatpush1.bf16.msra.mxu0 %v311_v51  ;;  %368 = vmatpush1.bf16.msra.mxu1 %v311_v51 }
  0x22   :  { %314 = vmatprep.subr.bf16.mxu0 %v313_v52  ;;  %353 = vmatprep.subr.bf16.mxu1 %v313_v52 }
  0x25   :  { %316 = vmatpush1.bf16.msra.mxu0 %v315_v57  ;;  %369 = vmatpush1.bf16.msra.mxu1 %v315_v57 }
  0x26   :  { %318 = vmatprep.subr.bf16.mxu0 %v317_v58  ;;  %354 = vmatprep.subr.bf16.mxu1 %v317_v58 }
  0x29   :  { %320 = vmatpush1.bf16.msra.mxu0 %v319_v63  ;;  %370 = vmatpush1.bf16.msra.mxu1 %v319_v63 }
  0x2a   :  { %322 = vmatprep.subr.bf16.mxu0 %v321_v0  ;;  %355 = vmatprep.subr.bf16.mxu1 %v321_v0 }
  0x2d   :  { %324 = vmatpush1.bf16.msra.mxu0 %v323_v5  ;;  %371 = vmatpush1.bf16.msra.mxu1 %v323_v5 }
  0x2e   :  { %326 = vmatprep.subr.bf16.mxu0 %v325_v6  ;;  %356 = vmatprep.subr.bf16.mxu1 %v325_v6  ;;  %v225_v6 = vlaneseq }
  0x31   :  { %328 = vmatpush1.bf16.msra.mxu0 %v327_v11  ;;  %372 = vmatpush1.bf16.msra.mxu1 %v327_v11 }
  0x32   :  { %330 = vmatprep.subr.bf16.mxu0 %v329_v12  ;;  %357 = vmatprep.subr.bf16.mxu1 %v329_v12  ;;  %v226_v12 = vshrl.u32 %v225_v6, 7 }
  0x34   :  { %v227_v15 = vsub.s32 0, %v226_v12  ;;  %v231_v16 = vsub.s32 1, %v226_v12 }
  0x35   :  { %332 = vmatpush1.bf16.msra.mxu0 %v331_v17  ;;  %373 = vmatpush1.bf16.msra.mxu1 %v331_v17  ;;  %v209_v17 = vld [vmem:[%s668_s4] ss:$2 sm:$0x3] }
  0x36   :  { %334 = vmatprep.subr.bf16.mxu0 %v333_v18  ;;  %358 = vmatprep.subr.bf16.mxu1 %v333_v18  ;;  %v280_v18 = vld [vmem:[%s668_s4 + $0x1] ss:$2 sm:$0x3]  ;;  %v228_v19 = vrot.slane %v209_v17, %v227_v15  ;;  %v232_v20 = vrot.slane %v209_v17, %v231_v16 }
  0x37   :  { %v245_v22 = vrot.slane %v280_v18, %v227_v15 }
  0x39   :  { %336 = vmatpush1.bf16.msra.mxu0 %v335_v23  ;;  %374 = vmatpush1.bf16.msra.mxu1 %v335_v23  ;;  %v249_v23 = vrot.slane %v280_v18, %v231_v16 }
  0x3a   :  { %338 = vmatprep.subr.bf16.mxu0 %v337_v24  ;;  %359 = vmatprep.subr.bf16.mxu1 %v337_v24 }
  0x3d   :  { %340 = vmatpush1.bf16.msra.mxu0 %v339_v29  ;;  %375 = vmatpush1.bf16.msra.mxu1 %v339_v29 }
  0x3e   :  { %342 = vmatprep.subr.bf16.mxu0 %v341_v30  ;;  %360 = vmatprep.subr.bf16.mxu1 %v341_v30  ;;  %v258_v30 = vld [vmem:[%s669_s3] sm:$0xff] }
  0x41   :  { %344 = vmatpush1.bf16.msra.mxu0 %v343_v33  ;;  %376 = vmatpush1.bf16.msra.mxu1 %v343_v33 }
  0x44   :  { %154 = vmatmul.mubr.f32.vlgmr.msra.gmra.mrb[0].mxu0 %v19_v34  ;;  %160 = vmatmul.mubr.f32.vlgmr.msra.gmra.mrb[0].mxu1 %v21_v35 }
  0x45   :  { %165 = vmatprep.mubr.f32.mxu1 %v24_v36 }
  0x48   :  { %166 = vmatmul.mubr.f32.gmra.mrb[2].mxu1 %v23_v37 }
 0x117   :  { %v155_v38 = vpop.f32.mrb[0].mxu0  ;;  %v161_v39 = vpop.f32.mrb[0].mxu1 }
 0x118   :  { %v157_v40 = vpop.f32.mrb[1].mxu0  ;;  %v163_v41 = vpop.f32.mrb[1].mxu1 }
 0x119   :  { %v172_v42 = vadd.f32 %v157_v40, %v155_v38  ;;  %v175_v43 = vadd.f32 %v163_v41, %v161_v39 }
 0x11b   :  { %v167_v44 = vpop.f32.mrb[2].mxu1  ;;  %173 = vadd.xlane.f32.xlu0 %v172_v42 }
 0x11c   :  { %v169_v45 = vpop.f32.mrb[3].mxu1 }
 0x11d   :  { %v178_v46 = vadd.f32 %v169_v45, %v167_v44 }
 0x11f   :  { %179 = vadd.xlane.f32.xlu1 %v178_v46  ;;  %176 = vadd.xlane.f32.xlu0 %v175_v43  ;;  %v262_v46 = vld [vmem:[%s669_s3 + $0x20] sm:$0xff] }
 0x1a8   :  { %v174_v47 = vpop.xlane.xlu0 %173 }
 0x1a9   :  { %v182_v48 = vmul.f32 0.00390625, %v174_v47  ;;  %v263_v47 = vld [vmem:[%s669_s3 + $0x28] sm:$0xff] }
 0x1ab   :  { %v185_v49 = vsub.f32 %v155_v38, %v182_v48  ;;  %v186_v50 = vsub.f32 %v157_v40, %v182_v48 }
 0x1ac   :  { %v180_v51 = vpop.xlane.xlu1 %179  ;;  %v177_v52 = vpop.xlane.xlu0 %176 }
 0x1ad   :  { %v184_v53 = vmul.f32 0.00390625, %v180_v51  ;;  %v183_v54 = vmul.f32 0.00390625, %v177_v52  ;;  %v191_v55 = vmul.f32 %v185_v49, %v185_v49  ;;  %v192_v56 = vmul.f32 %v186_v50, %v186_v50 }
 0x1af   :  { %v189_v57 = vsub.f32 %v167_v44, %v184_v53  ;;  %v190_v58 = vsub.f32 %v169_v45, %v184_v53  ;;  %v187_v59 = vsub.f32 %v161_v39, %v183_v54  ;;  %v188_v60 = vsub.f32 %v163_v41, %v183_v54  ;;  %v260_v44 = vld [vmem:[%s669_s3 + $0x10] sm:$0xff]  ;;  %v261_v45 = vld [vmem:[%s669_s3 + $0x18] sm:$0xff] }
 0x1b0   :  { %v197_v61 = vadd.f32 %v192_v56, %v191_v55 }
 0x1b1   :  { %v195_v62 = vmul.f32 %v189_v57, %v189_v57  ;;  %v196_v63 = vmul.f32 %v190_v58, %v190_v58  ;;  %v193_v0 = vmul.f32 %v187_v59, %v187_v59  ;;  %v194_v1 = vmul.f32 %v188_v60, %v188_v60 }
 0x1b2   :  { %198 = vadd.xlane.f32.xlu1 %v197_v61 }
 0x1b3   :  { %v203_v2 = vadd.f32 %v196_v63, %v195_v62  ;;  %v200_v3 = vadd.f32 %v194_v1, %v193_v0 }
 0x1b5   :  { %201 = vadd.xlane.f32.xlu0 %v200_v3 }
 0x1b6   :  { %204 = vadd.xlane.f32.xlu1 %v203_v2 }
 0x23f   :  { %v199_v4 = vpop.xlane.xlu1 %198 }
 0x240   :  { %v206_v5 = vmul.f32 0.00390625, %v199_v4 }
 0x242   :  { %v212_v7 = vadd.f32 1e-05, %v206_v5  ;;  %v202_v8 = vpop.xlane.xlu0 %201 }
 0x243   :  { %v205_v9 = vpop.xlane.xlu1 %204  ;;  %v207_v10 = vmul.f32 0.00390625, %v202_v8 }
 0x244   :  { %377 = vrsqrt.f32 %v212_v7  ;;  %v208_v11 = vmul.f32 0.00390625, %v205_v9 }
 0x245   :  { %v213_v13 = vadd.f32 1e-05, %v207_v10 }
 0x246   :  { %v214_v14 = vadd.f32 1e-05, %v208_v11 }
 0x247   :  { %379 = vrsqrt.f32 %v213_v13 }
 0x248   :  { %381 = vrsqrt.f32 %v214_v14 }
 0x24e   :  { %v378_v21 = vpop.eup %377 }
 0x24f   :  { %v218_v24 = vmul.f32 %v378_v21, %v185_v49  ;;  %v219_v25 = vmul.f32 %v378_v21, %v186_v50 }
 0x251   :  { %v380_v26 = vpop.eup %379  ;;  %v235_v27 = vmul.f32 %v228_v19, %v218_v24  ;;  %v236_v28 = vmul.f32 %v232_v20, %v219_v25 }
 0x252   :  { %v382_v29 = vpop.eup %381  ;;  %v220_v32 = vmul.f32 %v380_v26, %v187_v59  ;;  %v221_v33 = vmul.f32 %v380_v26, %v188_v60 }
 0x253   :  { %v252_v34 = vadd.f32 %v245_v22, %v235_v27  ;;  %v253_v35 = vadd.f32 %v249_v23, %v236_v28  ;;  %v222_v36 = vmul.f32 %v382_v29, %v189_v57  ;;  %v223_v37 = vmul.f32 %v382_v29, %v190_v58 }
 0x254   :  { %v237_v38 = vmul.f32 %v228_v19, %v220_v32  ;;  %v238_v39 = vmul.f32 %v232_v20, %v221_v33 }
 0x255   :  { %v264_v40 = vadd.f32 %v258_v30, %v252_v34  ;;  %v265_v41 = vadd.f32 %v259_v31, %v253_v35  ;;  %v239_v42 = vmul.f32 %v228_v19, %v222_v36  ;;  %v240_v43 = vmul.f32 %v232_v20, %v223_v37 }
 0x256   :  { %v254_v48 = vadd.f32 %v245_v22, %v237_v38  ;;  %v255_v49 = vadd.f32 %v249_v23, %v238_v39 }
 0x257   :  { %270 = vst [vmem:[%s670_s5] sm:$0xff] %v264_v40  ;;  %271 = vst [vmem:[%s670_s5 + $0x8] sm:$0xff] %v265_v41  ;;  %v256_v50 = vadd.f32 %v245_v22, %v239_v42  ;;  %v257_v51 = vadd.f32 %v249_v23, %v240_v43 }
 0x258   :  { %v266_v52 = vadd.f32 %v260_v44, %v254_v48  ;;  %v267_v53 = vadd.f32 %v261_v45, %v255_v49 }
 0x259   :  { %v268_v54 = vadd.f32 %v262_v46, %v256_v50  ;;  %v269_v55 = vadd.f32 %v263_v47, %v257_v51 }
 0x25a   :  { %272 = vst [vmem:[%s670_s5 + $0x10] sm:$0xff] %v266_v52  ;;  %273 = vst [vmem:[%s670_s5 + $0x18] sm:$0xff] %v267_v53 }
 0x25b   :  { %274 = vst [vmem:[%s670_s5 + $0x20] sm:$0xff] %v268_v54  ;;  %275 = vst [vmem:[%s670_s5 + $0x28] sm:$0xff] %v269_v55 }

// kernel: transformer_forward.80
= control target key start
LH: loop header
LB: loop body
LE: loop exit
PB: predicated region body
PF: predicated region fallthrough
CT: control target
= control target key end

     0   :  { %v301_v0 = vmov 0   ;;  %v302_v10 = vmov 0.0   ;;  %v303_v19 = vmov 1   ;;  %v17_v24 = vlaneseq  ;;  %s393_s0 = inlined_call_operand.vmem [shape: s32[24,2], index: 0, kind: input, shape index: {}]   ;;  %s394_s1 = inlined_call_operand.vmem [shape: f32[32,256], index: 1, kind: input, shape index: {}]   ;;  %s395_s2 = inlined_call_operand.vmem [shape: f32[16,256], index: 2, kind: input, shape index: {}]   ;;  %s396_s3 = inlined_call_operand.vmem [shape: f32[24,256], index: 3, kind: output, shape index: {}]  }
   0x1   :  { %296 = vset.pattern.permute.xlu0 %v301_v0  ;;  %v14_v1 = vld [vmem:[%s393_s0] sm:$0xff]  ;;  %298 = vset.pattern.permute.xlu1 %v301_v0  ;;  %v15_v2 = vld [vmem:[%s393_s0 + $0x8] sm:$0xff]  ;;  %v40_v4 = vld [vmem:[%s394_s1 + $0x18] sm:$0xff]  ;;  %vm160_vm0 = vcmask 261120   ;;  %vm67_vm3 = vcmask 130048  }
   0x2   :  { %20 = vperm.xlu0 %296, %v14_v1   ;;  %23 = vperm.xlu1 %298, %v15_v2   ;;  %v38_v3 = vld [vmem:[%s394_s1 + $0x8] sm:$0xff]  ;;  %v37_v5 = vld [vmem:[%s394_s1] sm:$0xff]  ;;  %v39_v7 = vld [vmem:[%s394_s1 + $0x10] sm:$0xff]  ;;  %v18_v25 = vand.u32 127, %v17_v24 }
   0x3   :  { %v279_v6 = vpack.c.bf16 %v40_v4, %v38_v3  ;;  %v42_v8 = vld [vmem:[%s394_s1 + $0x28] sm:$0xff]  ;;  %v44_v9 = vld [vmem:[%s394_s1 + $0x38] sm:$0xff]  ;;  %234 = vmatprep.mubr.f32.mxu0 %v302_v10  ;;  %141 = vmatprep.mubr.f32.mxu1 %v302_v10  ;;  %v281_v11 = vpack.c.bf16 %v39_v7, %v37_v5  ;;  %v41_v12 = vld [vmem:[%s394_s1 + $0x20] sm:$0xff] }
   0x4   :  { %v43_v13 = vld [vmem:[%s394_s1 + $0x30] sm:$0xff]  ;;  %v64_v14 = vld [vmem:[%s395_s2 + $0x8] sm:$0xff]  ;;  %v283_v15 = vpack.c.bf16 %v44_v9, %v42_v8  ;;  %v66_v16 = vld [vmem:[%s395_s2 + $0x18] sm:$0xff] }
   0x5   :  { %280 = vmatprep.subr.bf16.mxu0 %v279_v6  ;;  %v63_v17 = vld [vmem:[%s395_s2] sm:$0xff]  ;;  %v65_v18 = vld [vmem:[%s395_s2 + $0x10] sm:$0xff]  ;;  %v275_v20 = vpack.c.bf16 %v66_v16, %v64_v14  ;;  %v285_v23 = vpack.c.bf16 %v43_v13, %v41_v12 }
   0x6   :  { %297 = vset.pattern.permute.xlu0 %v303_v19  ;;  %299 = vset.pattern.permute.xlu1 %v303_v19  ;;  %v277_v21 = vpack.c.bf16 %v65_v18, %v63_v17  ;;  %v16_v22 = vld [vmem:[%s393_s0 + $0x10] sm:$0xff] }
   0x7   :  { %46 = vperm.xlu0 %297, %v14_v1   ;;  %49 = vperm.xlu1 %299, %v15_v2  }
   0x8   :  { %282 = vmatpush1.bf16.msra.mxu0 %v281_v11  ;;  %276 = vmatprep.subr.bf16.mxu1 %v275_v20 }
   0x9   :  { %284 = vmatprep.subr.bf16.mxu0 %v283_v15  ;;  %278 = vmatpush1.bf16.msra.mxu1 %v277_v21 }
   0xb   :  { %52 = vperm.xlu0 %297, %v16_v22   ;;  %300 = vset.pattern.permute.xlu1 %v301_v0 }
   0xc   :  { %26 = vperm.xlu1 %300, %v16_v22   ;;  %286 = vmatpush1.bf16.msra.mxu0 %v285_v23 }
  0x81   :  { %v21_v26 = vpop.permute.xlu0 %20  ;;  %v24_v27 = vpop.permute.xlu1 %23 }
  0x82   :  { %vm28_vm1 = vcmp.eq.s32.totalorder %v18_v25, %v21_v26  ;;  %vm29_vm2 = vcmp.eq.s32.totalorder %v18_v25, %v24_v27 }
  0x83   :  { %v263_v28 = vsel %vm28_vm1, 1.0, %v302_v10  ;;  %v264_v29 = vsel %vm29_vm2, 1.0, %v302_v10 }
  0x84   :  { %272 = vmatmul.mubr.msk.f32.vlgmr.msra.gmra.mrb[0].mxu0 %vm160_vm0, %v263_v28 }
  0x85   :  { %240 = vmatprep.mubr.f32.mxu0 %v302_v10 }
  0x86   :  { %v47_v30 = vpop.permute.xlu0 %46  ;;  %v50_v31 = vpop.permute.xlu1 %49 }
  0x87   :  { %vm54_vm4 = vcmp.eq.s32.totalorder %v18_v25, %v47_v30  ;;  %vm55_vm5 = vcmp.eq.s32.totalorder %v18_v25, %v50_v31 }
  0x88   :  { %v266_v32 = vsel %vm54_vm4, 1.0, %v302_v10  ;;  %273 = vmatmul.mubr.msk.f32.gmra.mrb[2].mxu0 %vm160_vm0, %v264_v29  ;;  %v267_v33 = vsel %vm55_vm5, 1.0, %v302_v10 }
  0x89   :  { %269 = vmatmul.mubr.msk.f32.vlgmr.msra.gmra.mrb[0].mxu1 %vm67_vm3, %v266_v32  ;;  %246 = vmatprep.mubr.f32.mxu0 %v302_v10 }
  0x8a   :  { %v53_v34 = vpop.permute.xlu0 %52  ;;  %147 = vmatprep.mubr.f32.mxu1 %v302_v10 }
  0x8b   :  { %v27_v35 = vpop.permute.xlu1 %26  ;;  %vm56_vm7 = vcmp.eq.s32.totalorder %v18_v25, %v53_v34 }
  0x8c   :  { %vm30_vm6 = vcmp.eq.s32.totalorder %v18_v25, %v27_v35  ;;  %v268_v37 = vsel %vm56_vm7, 1.0, %v302_v10 }
  0x8d   :  { %v265_v36 = vsel %vm30_vm6, 1.0, %v302_v10  ;;  %270 = vmatmul.mubr.msk.f32.gmra.mrb[2].mxu1 %vm67_vm3, %v267_v33 }
  0x8e   :  { %153 = vmatprep.mubr.f32.mxu1 %v302_v10  ;;  %274 = vmatmul.mubr.msk.f32.gmra.mrb[4].mxu0 %vm160_vm0, %v265_v36 }
  0x91   :  { %271 = vmatmul.mubr.msk.f32.gmra.mrb[4].mxu1 %vm67_vm3, %v268_v37 }
 0x157   :  { %v236_v38 = vpop.f32.mrb[0].mxu0 }
 0x158   :  { %v238_v39 = vpop.f32.mrb[1].mxu0 }
 0x15b   :  { %v242_v40 = vpop.f32.mrb[2].mxu0 }
 0x15c   :  { %v143_v41 = vpop.f32.mrb[0].mxu1  ;;  %v244_v42 = vpop.f32.mrb[3].mxu0 }
 0x15d   :  { %v237_v43 = vadd.f32 %v236_v38, %v143_v41  ;;  %v145_v44 = vpop.f32.mrb[1].mxu1 }
 0x15e   :  { %v239_v45 = vadd.f32 %v238_v39, %v145_v44 }
 0x15f   :  { %253 = vst [vmem:[%s396_s3] sm:$0xff] %v237_v43 }
 0x160   :  { %254 = vst [vmem:[%s396_s3 + $0x8] sm:$0xff] %v239_v45  ;;  %v149_v46 = vpop.f32.mrb[2].mxu1 }
 0x161   :  { %v243_v47 = vadd.f32 %v242_v40, %v149_v46  ;;  %v151_v48 = vpop.f32.mrb[3].mxu1  ;;  %v248_v49 = vpop.f32.mrb[4].mxu0 }
 0x162   :  { %v245_v50 = vadd.f32 %v244_v42, %v151_v48  ;;  %v250_v51 = vpop.f32.mrb[5].mxu0 }
 0x163   :  { %255 = vst [vmem:[%s396_s3 + $0x10] sm:$0xff] %v243_v47 }
 0x164   :  { %256 = vst [vmem:[%s396_s3 + $0x18] sm:$0xff] %v245_v50  ;;  %v155_v52 = vpop.f32.mrb[4].mxu1 }
 0x165   :  { %v249_v53 = vadd.f32 %v248_v49, %v155_v52  ;;  %v157_v54 = vpop.f32.mrb[5].mxu1 }
 0x166   :  { %v251_v55 = vadd.f32 %v250_v51, %v157_v54 }
 0x167   :  { %257 = vst [vmem:[%s396_s3 + $0x20] sm:$0xff] %v249_v53 }
 0x168   :  { %258 = vst [vmem:[%s396_s3 + $0x28] sm:$0xff] %v251_v55 }

// kernel: transformer_forward.81
= control target key start
LH: loop header
LB: loop body
LE: loop exit
PB: predicated region body
PF: predicated region fallthrough
CT: control target
= control target key end

     0   :  { %7 = vsyncpa [#allocation3], 0  ;;  %s746_s9 = smov [#allocation2]   ;;  %s873_s0 = inlined_call_operand.vmem [shape: f32[24,256], index: 0, kind: input, shape index: {}]   ;;  %s874_s1 = inlined_call_operand.hbm [shape: f32[256,768], index: 1, kind: input, shape index: {}]   ;;  %s875_s2 = inlined_call_operand.vmem [shape: f32[24,768], index: 2, kind: output, shape index: {}]  }
   0x1   :  { %s15_s10 = sshll.u32 %s746_s9, 4  ;;  %s722_s13 = scalar_lea.hbm %s874_s1, 24576  ;;  %s16_s10 = int_to_ptr.vmem [resolvable:$true] %s15_s10 }
   0x2   :  { %p723_p0 = scmp.ne.s32.totalorder %s874_s1, %s722_s13  ;;  %p726_p1 = scmp.lt.u32.totalorder %s722_s13, %s874_s1 }
   0x4   :  { %p728_p2 = pnand %p726_p1, %p723_p0 }
   0x6   :  { %731 = shalt.err (!%p728_p2)
}
   0x7   :  { %s732_s18 = scalar_lea.vmem %s16_s10, 24576  ;;  %p737_p4 = scmp.lt.s32.totalorder %s16_s10, %s16_s10 }
   0x8   :  { %p733_p3 = scmp.ne.s32.totalorder %s16_s10, %s732_s18  ;;  %p738_p5 = scmp.lt.s32.totalorder %s732_s18, %s732_s18 }
   0xa   :  { %p739_p6 = por %p738_p5, %p737_p4 }
   0xc   :  { %p740_p7 = pnand %p739_p6, %p733_p3 }
   0xe   :  { %743 = shalt.err (!%p740_p7)
}
   0xf   :  { %s747_s19 = smov 768   ;;  %s748_s20 = smov 48  }
  0x10   :  { %21 = dma.hbm_to_vmem [thread:$0]  %s874_s1, 24576, %s16_s10, [#allocation3], %s747_s19, %s747_s19, %s748_s20  }
  0x11   :  { %744 = dma.done.wait [#allocation3], 24576  }
  0x12   :  { %745 = vsyncadd [#allocation3], 4294942720  ;;  %v34_v0 = vld [vmem:[#allocation2 + $0x18] sm:$0xff]  ;;  %v40_v1 = vld [vmem:[#allocation2 + $0x48] sm:$0xff] }
  0x13   :  { %v33_v2 = vld [vmem:[#allocation2 + $0x10] sm:$0xff]  ;;  %v559_v3 = vpack.c.bf16 %v40_v1, %v34_v0  ;;  %v39_v4 = vld [vmem:[#allocation2 + $0x40] sm:$0xff]  ;;  %v32_v5 = vld [vmem:[#allocation2 + $0x8] sm:$0xff] }
  0x14   :  { %v38_v6 = vld [vmem:[#allocation2 + $0x38] sm:$0xff]  ;;  %v561_v7 = vpack.c.bf16 %v39_v4, %v33_v2  ;;  %v31_v9 = vld [vmem:[#allocation2] sm:$0xff]  ;;  %v37_v10 = vld [vmem:[#allocation2 + $0x30] sm:$0xff] }
  0x15   :  { %v495_v8 = vpack.c.bf16 %v38_v6, %v32_v5  ;;  %v46_v11 = vld [vmem:[#allocation2 + $0x78] sm:$0xff]  ;;  %560 = vmatprep.subr.bf16.mxu1 %v559_v3  ;;  %v497_v12 = vpack.c.bf16 %v37_v10, %v31_v9  ;;  %v52_v13 = vld [vmem:[#allocation2 + $0xa8] sm:$0xff]  ;;  %v45_v14 = vld [vmem:[#allocation2 + $0x70] sm:$0xff] }
  0x16   :  { %v51_v15 = vld [vmem:[#allocation2 + $0xa0] sm:$0xff]  ;;  %562 = vmatpush1.bf16.msra.mxu1 %v561_v7  ;;  %v563_v16 = vpack.c.bf16 %v52_v13, %v46_v11  ;;  %v44_v18 = vld [vmem:[#allocation2 + $0x68] sm:$0xff]  ;;  %v50_v19 = vld [vmem:[#allocation2 + $0x98] sm:$0xff] }
  0x17   :  { %496 = vmatprep.subr.bf16.mxu0 %v495_v8  ;;  %v565_v17 = vpack.c.bf16 %v51_v15, %v45_v14  ;;  %v43_v20 = vld [vmem:[#allocation2 + $0x60] sm:$0xff]  ;;  %v499_v21 = vpack.c.bf16 %v50_v19, %v44_v18  ;;  %v49_v22 = vld [vmem:[#allocation2 + $0x90] sm:$0xff]  ;;  %v58_v23 = vld [vmem:[#allocation2 + $0xd8] sm:$0xff] }
  0x18   :  { %498 = vmatpush1.bf16.msra.mxu0 %v497_v12  ;;  %v64_v24 = vld [vmem:[#allocation2 + $0x108] sm:$0xff]  ;;  %564 = vmatprep.subr.bf16.mxu1 %v563_v16  ;;  %v501_v25 = vpack.c.bf16 %v49_v22, %v43_v20  ;;  %v57_v27 = vld [vmem:[#allocation2 + $0xd0] sm:$0xff]  ;;  %v63_v28 = vld [vmem:[#allocation2 + $0x100] sm:$0xff] }
  0x19   :  { %v567_v26 = vpack.c.bf16 %v64_v24, %v58_v23  ;;  %v56_v29 = vld [vmem:[#allocation2 + $0xc8] sm:$0xff]  ;;  %500 = vmatprep.subr.bf16.mxu0 %v499_v21  ;;  %v62_v30 = vld [vmem:[#allocation2 + $0xf8] sm:$0xff]  ;;  %v55_v31 = vld [vmem:[#allocation2 + $0xc0] sm:$0xff]  ;;  %v569_v33 = vpack.c.bf16 %v63_v28, %v57_v27 }
  0x1a   :  { %v61_v32 = vld [vmem:[#allocation2 + $0xf0] sm:$0xff]  ;;  %566 = vmatpush1.bf16.msra.mxu1 %v565_v17  ;;  %v503_v34 = vpack.c.bf16 %v62_v30, %v56_v29  ;;  %v70_v35 = vld [vmem:[#allocation2 + $0x138] sm:$0xff]  ;;  %v76_v36 = vld [vmem:[#allocation2 + $0x168] sm:$0xff] }
  0x1b   :  { %v69_v37 = vld [vmem:[#allocation2 + $0x130] sm:$0xff]  ;;  %568 = vmatprep.subr.bf16.mxu1 %v567_v26  ;;  %v505_v38 = vpack.c.bf16 %v61_v32, %v55_v31  ;;  %v571_v39 = vpack.c.bf16 %v76_v36, %v70_v35  ;;  %v75_v40 = vld [vmem:[#allocation2 + $0x160] sm:$0xff]  ;;  %v68_v41 = vld [vmem:[#allocation2 + $0x128] sm:$0xff] }
  0x1c   :  { %502 = vmatpush1.bf16.msra.mxu0 %v501_v25  ;;  %v74_v42 = vld [vmem:[#allocation2 + $0x158] sm:$0xff]  ;;  %v67_v44 = vld [vmem:[#allocation2 + $0x120] sm:$0xff]  ;;  %v73_v45 = vld [vmem:[#allocation2 + $0x150] sm:$0xff]  ;;  %v573_v48 = vpack.c.bf16 %v75_v40, %v69_v37 }
  0x1d   :  { %504 = vmatprep.subr.bf16.mxu0 %v503_v34  ;;  %v507_v43 = vpack.c.bf16 %v74_v42, %v68_v41  ;;  %v82_v46 = vld [vmem:[#allocation2 + $0x198] sm:$0xff]  ;;  %v88_v47 = vld [vmem:[#allocation2 + $0x1c8] sm:$0xff]  ;;  %v509_v51 = vpack.c.bf16 %v73_v45, %v67_v44  ;;  %v81_v53 = vld [vmem:[#allocation2 + $0x190] sm:$0xff] }
  0x1e   :  { %570 = vmatpush1.bf16.msra.mxu1 %v569_v33  ;;  %v80_v49 = vld [vmem:[#allocation2 + $0x188] sm:$0xff]  ;;  %v86_v50 = vld [vmem:[#allocation2 + $0x1b8] sm:$0xff]  ;;  %v575_v52 = vpack.c.bf16 %v88_v47, %v82_v46  ;;  %v87_v54 = vld [vmem:[#allocation2 + $0x1c0] sm:$0xff] }
  0x1f   :  { %572 = vmatprep.subr.bf16.mxu1 %v571_v39  ;;  %v79_v55 = vld [vmem:[#allocation2 + $0x180] sm:$0xff]  ;;  %v511_v56 = vpack.c.bf16 %v86_v50, %v80_v49  ;;  %v85_v57 = vld [vmem:[#allocation2 + $0x1b0] sm:$0xff]  ;;  %v94_v58 = vld [vmem:[#allocation2 + $0x1f8] sm:$0xff]  ;;  %v577_v62 = vpack.c.bf16 %v87_v54, %v81_v53 }
  0x20   :  { %506 = vmatpush1.bf16.msra.mxu0 %v505_v38  ;;  %v100_v59 = vld [vmem:[#allocation2 + $0x228] sm:$0xff]  ;;  %v98_v61 = vld [vmem:[#allocation2 + $0x218] sm:$0xff]  ;;  %v513_v63 = vpack.c.bf16 %v85_v57, %v79_v55  ;;  %v93_v1 = vld [vmem:[#allocation2 + $0x1f0] sm:$0xff] }
  0x21   :  { %508 = vmatprep.subr.bf16.mxu0 %v507_v43  ;;  %v92_v60 = vld [vmem:[#allocation2 + $0x1e8] sm:$0xff]  ;;  %v579_v0 = vpack.c.bf16 %v100_v59, %v94_v58  ;;  %v99_v2 = vld [vmem:[#allocation2 + $0x220] sm:$0xff]  ;;  %v97_v5 = vld [vmem:[#allocation2 + $0x210] sm:$0xff] }
  0x22   :  { %574 = vmatpush1.bf16.msra.mxu1 %v573_v48  ;;  %v91_v3 = vld [vmem:[#allocation2 + $0x1e0] sm:$0xff]  ;;  %v515_v4 = vpack.c.bf16 %v98_v61, %v92_v60  ;;  %v106_v6 = vld [vmem:[#allocation2 + $0x258] sm:$0xff]  ;;  %v112_v7 = vld [vmem:[#allocation2 + $0x288] sm:$0xff]  ;;  %v581_v10 = vpack.c.bf16 %v99_v2, %v93_v1 }
  0x23   :  { %576 = vmatprep.subr.bf16.mxu1 %v575_v52  ;;  %v104_v8 = vld [vmem:[#allocation2 + $0x248] sm:$0xff]  ;;  %v110_v9 = vld [vmem:[#allocation2 + $0x278] sm:$0xff]  ;;  %v517_v11 = vpack.c.bf16 %v97_v5, %v91_v3  ;;  %v583_v12 = vpack.c.bf16 %v112_v7, %v106_v6  ;;  %v105_v13 = vld [vmem:[#allocation2 + $0x250] sm:$0xff] }
  0x24   :  { %510 = vmatpush1.bf16.msra.mxu0 %v509_v51  ;;  %v111_v14 = vld [vmem:[#allocation2 + $0x280] sm:$0xff]  ;;  %v519_v16 = vpack.c.bf16 %v110_v9, %v104_v8  ;;  %v109_v17 = vld [vmem:[#allocation2 + $0x270] sm:$0xff]  ;;  %v118_v18 = vld [vmem:[#allocation2 + $0x2b8] sm:$0xff] }
  0x25   :  { %512 = vmatprep.subr.bf16.mxu0 %v511_v56  ;;  %v103_v15 = vld [vmem:[#allocation2 + $0x240] sm:$0xff]  ;;  %v124_v19 = vld [vmem:[#allocation2 + $0x2e8] sm:$0xff]  ;;  %v122_v21 = vld [vmem:[#allocation2 + $0x2d8] sm:$0xff]  ;;  %v585_v22 = vpack.c.bf16 %v111_v14, %v105_v13 }
  0x26   :  { %578 = vmatpush1.bf16.msra.mxu1 %v577_v62  ;;  %v116_v20 = vld [vmem:[#allocation2 + $0x2a8] sm:$0xff]  ;;  %v521_v23 = vpack.c.bf16 %v109_v17, %v103_v15  ;;  %v587_v24 = vpack.c.bf16 %v124_v19, %v118_v18  ;;  %v117_v25 = vld [vmem:[#allocation2 + $0x2b0] sm:$0xff]  ;;  %v123_v26 = vld [vmem:[#allocation2 + $0x2e0] sm:$0xff] }
  0x27   :  { %580 = vmatprep.subr.bf16.mxu1 %v579_v0  ;;  %v115_v27 = vld [vmem:[#allocation2 + $0x2a0] sm:$0xff]  ;;  %v523_v28 = vpack.c.bf16 %v122_v21, %v116_v20  ;;  %v121_v29 = vld [vmem:[#allocation2 + $0x2d0] sm:$0xff]  ;;  %v130_v30 = vld [vmem:[#allocation2 + $0x318] sm:$0xff]  ;;  %v589_v34 = vpack.c.bf16 %v123_v26, %v117_v25 }
  0x28   :  { %514 = vmatpush1.bf16.msra.mxu0 %v513_v63  ;;  %v136_v31 = vld [vmem:[#allocation2 + $0x348] sm:$0xff]  ;;  %v134_v33 = vld [vmem:[#allocation2 + $0x338] sm:$0xff]  ;;  %v525_v35 = vpack.c.bf16 %v121_v29, %v115_v27  ;;  %v129_v37 = vld [vmem:[#allocation2 + $0x310] sm:$0xff] }
  0x29   :  { %516 = vmatprep.subr.bf16.mxu0 %v515_v4  ;;  %v128_v32 = vld [vmem:[#allocation2 + $0x308] sm:$0xff]  ;;  %v591_v36 = vpack.c.bf16 %v136_v31, %v130_v30  ;;  %v135_v38 = vld [vmem:[#allocation2 + $0x340] sm:$0xff]  ;;  %v133_v41 = vld [vmem:[#allocation2 + $0x330] sm:$0xff] }
  0x2a   :  { %582 = vmatpush1.bf16.msra.mxu1 %v581_v10  ;;  %v127_v39 = vld [vmem:[#allocation2 + $0x300] sm:$0xff]  ;;  %v527_v40 = vpack.c.bf16 %v134_v33, %v128_v32  ;;  %v142_v42 = vld [vmem:[#allocation2 + $0x378] sm:$0xff]  ;;  %v148_v43 = vld [vmem:[#allocation2 + $0x3a8] sm:$0xff]  ;;  %v593_v46 = vpack.c.bf16 %v135_v38, %v129_v37 }
  0x2b   :  { %584 = vmatprep.subr.bf16.mxu1 %v583_v12  ;;  %v140_v44 = vld [vmem:[#allocation2 + $0x368] sm:$0xff]  ;;  %v146_v45 = vld [vmem:[#allocation2 + $0x398] sm:$0xff]  ;;  %v529_v47 = vpack.c.bf16 %v133_v41, %v127_v39  ;;  %v595_v48 = vpack.c.bf16 %v148_v43, %v142_v42  ;;  %v141_v49 = vld [vmem:[#allocation2 + $0x370] sm:$0xff] }
  0x2c   :  { %518 = vmatpush1.bf16.msra.mxu0 %v517_v11  ;;  %v147_v50 = vld [vmem:[#allocation2 + $0x3a0] sm:$0xff]  ;;  %v531_v52 = vpack.c.bf16 %v146_v45, %v140_v44  ;;  %v145_v53 = vld [vmem:[#allocation2 + $0x390] sm:$0xff]  ;;  %v154_v54 = vld [vmem:[#allocation2 + $0x3d8] sm:$0xff] }
  0x2d   :  { %520 = vmatprep.subr.bf16.mxu0 %v519_v16  ;;  %v139_v51 = vld [vmem:[#allocation2 + $0x360] sm:$0xff]  ;;  %v160_v55 = vld [vmem:[#allocation2 + $0x408] sm:$0xff]  ;;  %v158_v57 = vld [vmem:[#allocation2 + $0x3f8] sm:$0xff]  ;;  %v597_v58 = vpack.c.bf16 %v147_v50, %v141_v49 }
  0x2e   :  { %586 = vmatpush1.bf16.msra.mxu1 %v585_v22  ;;  %v152_v56 = vld [vmem:[#allocation2 + $0x3c8] sm:$0xff]  ;;  %v533_v59 = vpack.c.bf16 %v145_v53, %v139_v51  ;;  %v599_v60 = vpack.c.bf16 %v160_v55, %v154_v54  ;;  %v153_v61 = vld [vmem:[#allocation2 + $0x3d0] sm:$0xff]  ;;  %v159_v62 = vld [vmem:[#allocation2 + $0x400] sm:$0xff] }
  0x2f   :  { %588 = vmatprep.subr.bf16.mxu1 %v587_v24  ;;  %v151_v63 = vld [vmem:[#allocation2 + $0x3c0] sm:$0xff]  ;;  %v535_v0 = vpack.c.bf16 %v158_v57, %v152_v56  ;;  %v157_v1 = vld [vmem:[#allocation2 + $0x3f0] sm:$0xff]  ;;  %v166_v2 = vld [vmem:[#allocation2 + $0x438] sm:$0xff]  ;;  %v601_v6 = vpack.c.bf16 %v159_v62, %v153_v61 }
  0x30   :  { %522 = vmatpush1.bf16.msra.mxu0 %v521_v23  ;;  %v172_v3 = vld [vmem:[#allocation2 + $0x468] sm:$0xff]  ;;  %v170_v5 = vld [vmem:[#allocation2 + $0x458] sm:$0xff]  ;;  %v165_v7 = vld [vmem:[#allocation2 + $0x430] sm:$0xff]  ;;  %v537_v8 = vpack.c.bf16 %v157_v1, %v151_v63 }
  0x31   :  { %524 = vmatprep.subr.bf16.mxu0 %v523_v28  ;;  %v164_v4 = vld [vmem:[#allocation2 + $0x428] sm:$0xff]  ;;  %v603_v9 = vpack.c.bf16 %v172_v3, %v166_v2  ;;  %v171_v10 = vld [vmem:[#allocation2 + $0x460] sm:$0xff]  ;;  %v169_v12 = vld [vmem:[#allocation2 + $0x450] sm:$0xff] }
  0x32   :  { %590 = vmatpush1.bf16.msra.mxu1 %v589_v34  ;;  %v163_v11 = vld [vmem:[#allocation2 + $0x420] sm:$0xff]  ;;  %v539_v13 = vpack.c.bf16 %v170_v5, %v164_v4  ;;  %v178_v14 = vld [vmem:[#allocation2 + $0x498] sm:$0xff]  ;;  %v184_v15 = vld [vmem:[#allocation2 + $0x4c8] sm:$0xff]  ;;  %v605_v19 = vpack.c.bf16 %v171_v10, %v165_v7 }
  0x33   :  { %592 = vmatprep.subr.bf16.mxu1 %v591_v36  ;;  %v779_v16 = vld [vmem:[%s873_s0 + $0x8] sm:$0xff]  ;;  %v182_v18 = vld [vmem:[#allocation2 + $0x4b8] sm:$0xff]  ;;  %v541_v20 = vpack.c.bf16 %v169_v12, %v163_v11  ;;  %v607_v21 = vpack.c.bf16 %v184_v15, %v178_v14  ;;  %v177_v22 = vld [vmem:[#allocation2 + $0x490] sm:$0xff] }
  0x34   :  { %526 = vmatpush1.bf16.msra.mxu0 %v525_v35  ;;  %v176_v17 = vld [vmem:[#allocation2 + $0x488] sm:$0xff]  ;;  %370 = vmatprep.mubr.f32.mxu1 %v779_v16  ;;  %v183_v23 = vld [vmem:[#allocation2 + $0x4c0] sm:$0xff]  ;;  %v181_v26 = vld [vmem:[#allocation2 + $0x4b0] sm:$0xff] }
  0x35   :  { %528 = vmatprep.subr.bf16.mxu0 %v527_v40  ;;  %287 = vmatprep.mubr.f32.mxu0 %v779_v16  ;;  %v175_v24 = vld [vmem:[#allocation2 + $0x480] sm:$0xff]  ;;  %v543_v25 = vpack.c.bf16 %v182_v18, %v176_v17  ;;  %v190_v27 = vld [vmem:[#allocation2 + $0x4f8] sm:$0xff]  ;;  %v196_v28 = vld [vmem:[#allocation2 + $0x528] sm:$0xff]  ;;  %v609_v31 = vpack.c.bf16 %v183_v23, %v177_v22 }
  0x36   :  { %594 = vmatpush1.bf16.msra.mxu1 %v593_v46  ;;  %v188_v29 = vld [vmem:[#allocation2 + $0x4e8] sm:$0xff]  ;;  %v194_v30 = vld [vmem:[#allocation2 + $0x518] sm:$0xff]  ;;  %v545_v32 = vpack.c.bf16 %v181_v26, %v175_v24  ;;  %v611_v33 = vpack.c.bf16 %v196_v28, %v190_v27  ;;  %v189_v34 = vld [vmem:[#allocation2 + $0x4f0] sm:$0xff] }
  0x37   :  { %596 = vmatprep.subr.bf16.mxu1 %v595_v48  ;;  %v195_v35 = vld [vmem:[#allocation2 + $0x520] sm:$0xff]  ;;  %v547_v37 = vpack.c.bf16 %v194_v30, %v188_v29  ;;  %v193_v38 = vld [vmem:[#allocation2 + $0x510] sm:$0xff]  ;;  %v202_v39 = vld [vmem:[#allocation2 + $0x558] sm:$0xff] }
  0x38   :  { %530 = vmatpush1.bf16.msra.mxu0 %v529_v47  ;;  %v187_v36 = vld [vmem:[#allocation2 + $0x4e0] sm:$0xff]  ;;  %v208_v40 = vld [vmem:[#allocation2 + $0x588] sm:$0xff]  ;;  %v206_v42 = vld [vmem:[#allocation2 + $0x578] sm:$0xff]  ;;  %v613_v43 = vpack.c.bf16 %v195_v35, %v189_v34 }
  0x39   :  { %532 = vmatprep.subr.bf16.mxu0 %v531_v52  ;;  %v200_v41 = vld [vmem:[#allocation2 + $0x548] sm:$0xff]  ;;  %v549_v44 = vpack.c.bf16 %v193_v38, %v187_v36  ;;  %v615_v45 = vpack.c.bf16 %v208_v40, %v202_v39  ;;  %v201_v46 = vld [vmem:[#allocation2 + $0x550] sm:$0xff]  ;;  %v207_v47 = vld [vmem:[#allocation2 + $0x580] sm:$0xff] }
  0x3a   :  { %598 = vmatpush1.bf16.msra.mxu1 %v597_v58  ;;  %v199_v48 = vld [vmem:[#allocation2 + $0x540] sm:$0xff]  ;;  %v551_v49 = vpack.c.bf16 %v206_v42, %v200_v41  ;;  %v205_v50 = vld [vmem:[#allocation2 + $0x570] sm:$0xff]  ;;  %v214_v51 = vld [vmem:[#allocation2 + $0x5b8] sm:$0xff]  ;;  %v617_v55 = vpack.c.bf16 %v207_v47, %v201_v46 }
  0x3b   :  { %600 = vmatprep.subr.bf16.mxu1 %v599_v60  ;;  %v220_v52 = vld [vmem:[#allocation2 + $0x5e8] sm:$0xff]  ;;  %v218_v54 = vld [vmem:[#allocation2 + $0x5d8] sm:$0xff]  ;;  %v553_v56 = vpack.c.bf16 %v205_v50, %v199_v48  ;;  %v213_v58 = vld [vmem:[#allocation2 + $0x5b0] sm:$0xff] }
  0x3c   :  { %534 = vmatpush1.bf16.msra.mxu0 %v533_v59  ;;  %v212_v53 = vld [vmem:[#allocation2 + $0x5a8] sm:$0xff]  ;;  %v619_v57 = vpack.c.bf16 %v220_v52, %v214_v51  ;;  %v219_v59 = vld [vmem:[#allocation2 + $0x5e0] sm:$0xff]  ;;  %v217_v62 = vld [vmem:[#allocation2 + $0x5d0] sm:$0xff] }
  0x3d   :  { %536 = vmatprep.subr.bf16.mxu0 %v535_v0  ;;  %v211_v60 = vld [vmem:[#allocation2 + $0x5a0] sm:$0xff]  ;;  %v555_v61 = vpack.c.bf16 %v218_v54, %v212_v53  ;;  %v36_v63 = vld [vmem:[#allocation2 + $0x28] sm:$0xff]  ;;  %v42_v0 = vld [vmem:[#allocation2 + $0x58] sm:$0xff]  ;;  %v621_v1 = vpack.c.bf16 %v219_v59, %v213_v58 }
  0x3e   :  { %602 = vmatpush1.bf16.msra.mxu1 %v601_v6  ;;  %v557_v2 = vpack.c.bf16 %v217_v62, %v211_v60  ;;  %v623_v3 = vpack.c.bf16 %v42_v0, %v36_v63  ;;  %v35_v4 = vld [vmem:[#allocation2 + $0x20] sm:$0xff]  ;;  %v41_v5 = vld [vmem:[#allocation2 + $0x50] sm:$0xff]  ;;  %v48_v6 = vld [vmem:[#allocation2 + $0x88] sm:$0xff] }
  0x3f   :  { %604 = vmatprep.subr.bf16.mxu1 %v603_v9  ;;  %v54_v7 = vld [vmem:[#allocation2 + $0xb8] sm:$0xff]  ;;  %v625_v9 = vpack.c.bf16 %v41_v5, %v35_v4  ;;  %v47_v11 = vld [vmem:[#allocation2 + $0x80] sm:$0xff]  ;;  %v53_v12 = vld [vmem:[#allocation2 + $0xb0] sm:$0xff] }
  0x40   :  { %538 = vmatpush1.bf16.msra.mxu0 %v537_v8  ;;  %v786_v8 = vld [vmem:[%s873_s0] sm:$0xff]  ;;  %v627_v10 = vpack.c.bf16 %v54_v7, %v48_v6  ;;  %v66_v14 = vld [vmem:[#allocation2 + $0x118] sm:$0xff]  ;;  %v629_v17 = vpack.c.bf16 %v53_v12, %v47_v11  ;;  %v796_v18 = vld [vmem:[%s873_s0 + $0x10] sm:$0xff] }
  0x41   :  { %540 = vmatprep.subr.bf16.mxu0 %v539_v13  ;;  %v60_v13 = vld [vmem:[#allocation2 + $0xe8] sm:$0xff]  ;;  %v28_v15 = vld [vmem:[%s873_s0 + $0x18] sm:$0xff]  ;;  %v808_v26 = vld [vmem:[%s873_s0 + $0x20] sm:$0xff] }
  0x42   :  { %606 = vmatpush1.bf16.msra.mxu1 %v605_v19  ;;  %v631_v19 = vpack.c.bf16 %v66_v14, %v60_v13  ;;  %v801_v22 = vld [vmem:[%s873_s0 + $0x28] sm:$0xff]  ;;  %v78_v24 = vld [vmem:[#allocation2 + $0x178] sm:$0xff]  ;;  %v71_v28 = vld [vmem:[#allocation2 + $0x140] sm:$0xff] }
  0x43   :  { %608 = vmatprep.subr.bf16.mxu1 %v607_v21  ;;  %v65_v21 = vld [vmem:[#allocation2 + $0x110] sm:$0xff]  ;;  %v72_v23 = vld [vmem:[#allocation2 + $0x148] sm:$0xff]  ;;  %v83_v34 = vld [vmem:[#allocation2 + $0x1a0] sm:$0xff] }
  0x44   :  { %542 = vmatpush1.bf16.msra.mxu0 %v541_v20  ;;  %v59_v20 = vld [vmem:[#allocation2 + $0xe0] sm:$0xff]  ;;  %v635_v27 = vpack.c.bf16 %v78_v24, %v72_v23  ;;  %v77_v29 = vld [vmem:[#allocation2 + $0x170] sm:$0xff]  ;;  %v84_v30 = vld [vmem:[#allocation2 + $0x1a8] sm:$0xff] }
  0x45   :  { %544 = vmatprep.subr.bf16.mxu0 %v543_v25  ;;  %v633_v25 = vpack.c.bf16 %v65_v21, %v59_v20  ;;  %v89_v35 = vld [vmem:[#allocation2 + $0x1d0] sm:$0xff]  ;;  %v96_v36 = vld [vmem:[#allocation2 + $0x208] sm:$0xff]  ;;  %v95_v40 = vld [vmem:[#allocation2 + $0x200] sm:$0xff] }
  0x46   :  { %610 = vmatpush1.bf16.msra.mxu1 %v609_v31  ;;  %v90_v31 = vld [vmem:[#allocation2 + $0x1d8] sm:$0xff]  ;;  %v641_v38 = vpack.c.bf16 %v89_v35, %v83_v34  ;;  %v101_v41 = vld [vmem:[#allocation2 + $0x230] sm:$0xff]  ;;  %v108_v42 = vld [vmem:[#allocation2 + $0x268] sm:$0xff] }
  0x47   :  { %612 = vmatprep.subr.bf16.mxu1 %v611_v33  ;;  %v639_v33 = vpack.c.bf16 %v90_v31, %v84_v30  ;;  %v107_v46 = vld [vmem:[#allocation2 + $0x260] sm:$0xff]  ;;  %v113_v47 = vld [vmem:[#allocation2 + $0x290] sm:$0xff]  ;;  %v120_v48 = vld [vmem:[#allocation2 + $0x2c8] sm:$0xff] }
  0x48   :  { %546 = vmatpush1.bf16.msra.mxu0 %v545_v32  ;;  %v637_v32 = vpack.c.bf16 %v77_v29, %v71_v28  ;;  %v119_v51 = vld [vmem:[#allocation2 + $0x2c0] sm:$0xff]  ;;  %v125_v52 = vld [vmem:[#allocation2 + $0x2f0] sm:$0xff]  ;;  %v132_v53 = vld [vmem:[#allocation2 + $0x328] sm:$0xff] }
  0x49   :  { %548 = vmatprep.subr.bf16.mxu0 %v547_v37  ;;  %v102_v37 = vld [vmem:[#allocation2 + $0x238] sm:$0xff]  ;;  %v137_v58 = vld [vmem:[#allocation2 + $0x350] sm:$0xff]  ;;  %v144_v59 = vld [vmem:[#allocation2 + $0x388] sm:$0xff] }
  0x4a   :  { %614 = vmatpush1.bf16.msra.mxu1 %v613_v43  ;;  %v643_v39 = vpack.c.bf16 %v102_v37, %v96_v36  ;;  %v114_v43 = vld [vmem:[#allocation2 + $0x298] sm:$0xff]  ;;  %v143_v63 = vld [vmem:[#allocation2 + $0x380] sm:$0xff]  ;;  %v149_v0 = vld [vmem:[#allocation2 + $0x3b0] sm:$0xff] }
  0x4b   :  { %616 = vmatprep.subr.bf16.mxu1 %v615_v45  ;;  %v647_v45 = vpack.c.bf16 %v114_v43, %v108_v42  ;;  %v138_v54 = vld [vmem:[#allocation2 + $0x358] sm:$0xff]  ;;  %v155_v5 = vld [vmem:[#allocation2 + $0x3e0] sm:$0xff]  ;;  %v161_v6 = vld [vmem:[#allocation2 + $0x410] sm:$0xff] }
  0x4c   :  { %550 = vmatpush1.bf16.msra.mxu0 %v549_v44  ;;  %v645_v44 = vpack.c.bf16 %v101_v41, %v95_v40  ;;  %v150_v60 = vld [vmem:[#allocation2 + $0x3b8] sm:$0xff]  ;;  %v168_v7 = vld [vmem:[#allocation2 + $0x448] sm:$0xff]  ;;  %v167_v12 = vld [vmem:[#allocation2 + $0x440] sm:$0xff] }
  0x4d   :  { %552 = vmatprep.subr.bf16.mxu0 %v551_v49  ;;  %v649_v49 = vpack.c.bf16 %v113_v47, %v107_v46  ;;  %v659_v62 = vpack.c.bf16 %v150_v60, %v144_v59  ;;  %v173_v13 = vld [vmem:[#allocation2 + $0x470] sm:$0xff]  ;;  %v180_v14 = vld [vmem:[#allocation2 + $0x4a8] sm:$0xff]  ;;  %v179_v20 = vld [vmem:[#allocation2 + $0x4a0] sm:$0xff] }
  0x4e   :  { %618 = vmatpush1.bf16.msra.mxu1 %v617_v55  ;;  %v653_v55 = vpack.c.bf16 %v125_v52, %v119_v51  ;;  %v185_v21 = vld [vmem:[#allocation2 + $0x4d0] sm:$0xff]  ;;  %v192_v23 = vld [vmem:[#allocation2 + $0x508] sm:$0xff]  ;;  %v198_v24 = vld [vmem:[#allocation2 + $0x538] sm:$0xff] }
  0x4f   :  { %620 = vmatprep.subr.bf16.mxu1 %v619_v57  ;;  %v131_v57 = vld [vmem:[#allocation2 + $0x320] sm:$0xff]  ;;  %v197_v29 = vld [vmem:[#allocation2 + $0x530] sm:$0xff]  ;;  %v204_v30 = vld [vmem:[#allocation2 + $0x568] sm:$0xff] }
  0x50   :  { %554 = vmatpush1.bf16.msra.mxu0 %v553_v56  ;;  %v655_v56 = vpack.c.bf16 %v138_v54, %v132_v53  ;;  %v191_v28 = vld [vmem:[#allocation2 + $0x500] sm:$0xff]  ;;  %v210_v31 = vld [vmem:[#allocation2 + $0x598] sm:$0xff]  ;;  %v209_v35 = vld [vmem:[#allocation2 + $0x590] sm:$0xff] }
  0x51   :  { %556 = vmatprep.subr.bf16.mxu0 %v555_v61  ;;  %v657_v61 = vpack.c.bf16 %v137_v58, %v131_v57  ;;  %v203_v34 = vld [vmem:[#allocation2 + $0x560] sm:$0xff]  ;;  %v216_v36 = vld [vmem:[#allocation2 + $0x5c8] sm:$0xff]  ;;  %v222_v37 = vld [vmem:[#allocation2 + $0x5f8] sm:$0xff] }
  0x52   :  { %622 = vmatpush1.bf16.msra.mxu1 %v621_v1  ;;  %v156_v1 = vld [vmem:[#allocation2 + $0x3e8] sm:$0xff]  ;;  %v215_v40 = vld [vmem:[#allocation2 + $0x5c0] sm:$0xff]  ;;  %v221_v41 = vld [vmem:[#allocation2 + $0x5f0] sm:$0xff] }
  0x53   :  { %687 = vmatprep.subr.bf16.mxu1 %v623_v3  ;;  %v685_v42 = vpack.c.bf16 %v221_v41, %v215_v40 }
  0x54   :  { %558 = vmatpush1.bf16.msra.mxu0 %v557_v2  ;;  %v162_v2 = vld [vmem:[#allocation2 + $0x418] sm:$0xff] }
  0x55   :  { %624 = vmatprep.subr.bf16.mxu0 %v623_v3  ;;  %371 = vmatmul.mubr.f32.vlgmr.msra.gmra.mrb[0].mxu1 %v786_v8  ;;  %v661_v3 = vpack.c.bf16 %v149_v0, %v143_v63  ;;  %v663_v4 = vpack.c.bf16 %v162_v2, %v156_v1 }
  0x56   :  { %703 = vmatpush1.bf16.msra.mxu1 %v625_v9  ;;  %376 = vmatprep.mubr.f32.mxu1 %v28_v15 }
  0x57   :  { %288 = vmatmul.mubr.f32.vlgmr.msra.gmra.mrb[0].mxu0 %v786_v8  ;;  %688 = vmatprep.subr.bf16.mxu1 %v627_v10 }
  0x58   :  { %626 = vmatpush1.bf16.msra.mxu0 %v625_v9  ;;  %293 = vmatprep.mubr.f32.mxu0 %v28_v15  ;;  %v174_v9 = vld [vmem:[#allocation2 + $0x478] sm:$0xff] }
  0x59   :  { %628 = vmatprep.subr.bf16.mxu0 %v627_v10  ;;  %377 = vmatmul.mubr.f32.gmra.mrb[2].mxu1 %v796_v18  ;;  %v665_v10 = vpack.c.bf16 %v161_v6, %v155_v5  ;;  %v667_v11 = vpack.c.bf16 %v174_v9, %v168_v7 }
  0x5a   :  { %704 = vmatpush1.bf16.msra.mxu1 %v629_v17  ;;  %382 = vmatprep.mubr.f32.mxu1 %v801_v22 }
  0x5b   :  { %689 = vmatprep.subr.bf16.mxu1 %v631_v19  ;;  %294 = vmatmul.mubr.f32.gmra.mrb[2].mxu0 %v796_v18 }
  0x5c   :  { %630 = vmatpush1.bf16.msra.mxu0 %v629_v17  ;;  %299 = vmatprep.mubr.f32.mxu0 %v801_v22  ;;  %v669_v17 = vpack.c.bf16 %v173_v13, %v167_v12 }
  0x5d   :  { %632 = vmatprep.subr.bf16.mxu0 %v631_v19  ;;  %383 = vmatmul.mubr.f32.gmra.mrb[4].mxu1 %v808_v26 }
  0x5e   :  { %705 = vmatpush1.bf16.msra.mxu1 %v633_v25  ;;  %459 = vmatprep.mubr.f32.mxu1 %v28_v15  ;;  %v186_v15 = vld [vmem:[#allocation2 + $0x4d8] sm:$0xff] }
  0x5f   :  { %690 = vmatprep.subr.bf16.mxu1 %v635_v27  ;;  %300 = vmatmul.mubr.f32.gmra.mrb[4].mxu0 %v808_v26  ;;  %v671_v19 = vpack.c.bf16 %v186_v15, %v180_v14 }
  0x60   :  { %634 = vmatpush1.bf16.msra.mxu0 %v633_v25  ;;  %453 = vmatprep.mubr.f32.mxu0 %v779_v16  ;;  %v126_v16 = vld [vmem:[#allocation2 + $0x2f8] sm:$0xff]  ;;  %v673_v25 = vpack.c.bf16 %v185_v21, %v179_v20 }
  0x61   :  { %636 = vmatprep.subr.bf16.mxu0 %v635_v27  ;;  %v651_v50 = vpack.c.bf16 %v126_v16, %v120_v48  ;;  %v675_v27 = vpack.c.bf16 %v198_v24, %v192_v23 }
  0x62   :  { %706 = vmatpush1.bf16.msra.mxu1 %v637_v32 }
  0x63   :  { %691 = vmatprep.subr.bf16.mxu1 %v639_v33 }
  0x64   :  { %638 = vmatpush1.bf16.msra.mxu0 %v637_v32  ;;  %v677_v32 = vpack.c.bf16 %v197_v29, %v191_v28 }
  0x65   :  { %640 = vmatprep.subr.bf16.mxu0 %v639_v33  ;;  %v679_v33 = vpack.c.bf16 %v210_v31, %v204_v30 }
  0x66   :  { %707 = vmatpush1.bf16.msra.mxu1 %v641_v38 }
  0x67   :  { %692 = vmatprep.subr.bf16.mxu1 %v643_v39 }
  0x68   :  { %642 = vmatpush1.bf16.msra.mxu0 %v641_v38  ;;  %v681_v38 = vpack.c.bf16 %v209_v35, %v203_v34 }
  0x69   :  { %644 = vmatprep.subr.bf16.mxu0 %v643_v39  ;;  %v683_v39 = vpack.c.bf16 %v222_v37, %v216_v36 }
  0x6a   :  { %708 = vmatpush1.bf16.msra.mxu1 %v645_v44 }
  0x6b   :  { %693 = vmatprep.subr.bf16.mxu1 %v647_v45 }
  0x6c   :  { %646 = vmatpush1.bf16.msra.mxu0 %v645_v44 }
  0x6d   :  { %648 = vmatprep.subr.bf16.mxu0 %v647_v45 }
  0x6e   :  { %709 = vmatpush1.bf16.msra.mxu1 %v649_v49 }
  0x6f   :  { %694 = vmatprep.subr.bf16.mxu1 %v651_v50 }
  0x70   :  { %650 = vmatpush1.bf16.msra.mxu0 %v649_v49 }
  0x71   :  { %652 = vmatprep.subr.bf16.mxu0 %v651_v50 }
  0x72   :  { %710 = vmatpush1.bf16.msra.mxu1 %v653_v55 }
  0x73   :  { %695 = vmatprep.subr.bf16.mxu1 %v655_v56 }
  0x74   :  { %654 = vmatpush1.bf16.msra.mxu0 %v653_v55 }
  0x75   :  { %656 = vmatprep.subr.bf16.mxu0 %v655_v56 }
  0x76   :  { %711 = vmatpush1.bf16.msra.mxu1 %v657_v61 }
  0x77   :  { %696 = vmatprep.subr.bf16.mxu1 %v659_v62 }
  0x78   :  { %658 = vmatpush1.bf16.msra.mxu0 %v657_v61 }
  0x79   :  { %660 = vmatprep.subr.bf16.mxu0 %v659_v62 }
  0x7a   :  { %712 = vmatpush1.bf16.msra.mxu1 %v661_v3 }
  0x7b   :  { %697 = vmatprep.subr.bf16.mxu1 %v663_v4 }
  0x7c   :  { %662 = vmatpush1.bf16.msra.mxu0 %v661_v3 }
  0x7d   :  { %664 = vmatprep.subr.bf16.mxu0 %v663_v4 }
  0x7e   :  { %713 = vmatpush1.bf16.msra.mxu1 %v665_v10 }
  0x7f   :  { %698 = vmatprep.subr.bf16.mxu1 %v667_v11 }
  0x80   :  { %666 = vmatpush1.bf16.msra.mxu0 %v665_v10 }
  0x81   :  { %668 = vmatprep.subr.bf16.mxu0 %v667_v11 }
  0x82   :  { %714 = vmatpush1.bf16.msra.mxu1 %v669_v17 }
  0x83   :  { %699 = vmatprep.subr.bf16.mxu1 %v671_v19 }
  0x84   :  { %670 = vmatpush1.bf16.msra.mxu0 %v669_v17 }
  0x85   :  { %672 = vmatprep.subr.bf16.mxu0 %v671_v19 }
  0x86   :  { %715 = vmatpush1.bf16.msra.mxu1 %v673_v25 }
  0x87   :  { %700 = vmatprep.subr.bf16.mxu1 %v675_v27 }
  0x88   :  { %674 = vmatpush1.bf16.msra.mxu0 %v673_v25 }
  0x89   :  { %676 = vmatprep.subr.bf16.mxu0 %v675_v27 }
  0x8a   :  { %716 = vmatpush1.bf16.msra.mxu1 %v677_v32 }
  0x8b   :  { %701 = vmatprep.subr.bf16.mxu1 %v679_v33 }
  0x8c   :  { %678 = vmatpush1.bf16.msra.mxu0 %v677_v32 }
  0x8d   :  { %680 = vmatprep.subr.bf16.mxu0 %v679_v33 }
  0x8e   :  { %717 = vmatpush1.bf16.msra.mxu1 %v681_v38 }
  0x8f   :  { %702 = vmatprep.subr.bf16.mxu1 %v683_v39 }
  0x90   :  { %682 = vmatpush1.bf16.msra.mxu0 %v681_v38 }
  0x91   :  { %684 = vmatprep.subr.bf16.mxu0 %v683_v39 }
  0x92   :  { %718 = vmatpush1.bf16.msra.mxu1 %v685_v42 }
  0x94   :  { %686 = vmatpush1.bf16.msra.mxu0 %v685_v42 }
  0x95   :  { %460 = vmatmul.mubr.f32.vlgmr.msra.gmra.mrb[6].mxu1 %v796_v18 }
  0x96   :  { %465 = vmatprep.mubr.f32.mxu1 %v801_v22 }
  0x97   :  { %454 = vmatmul.mubr.f32.vlgmr.msra.gmra.mrb[6].mxu0 %v786_v8 }
  0x99   :  { %466 = vmatmul.mubr.f32.gmra.mrb[8].mxu1 %v808_v26 }
 0x128   :  { %v372_v43 = vpop.f32.mrb[0].mxu1 }
 0x129   :  { %474 = vst [vmem:[%s875_s2 + $0x10] sm:$0xff] %v372_v43  ;;  %v374_v44 = vpop.f32.mrb[1].mxu1 }
 0x12a   :  { %v289_v45 = vpop.f32.mrb[0].mxu0  ;;  %475 = vst [vmem:[%s875_s2 + $0x18] sm:$0xff] %v374_v44 }
 0x12b   :  { %472 = vst [vmem:[%s875_s2] sm:$0xff] %v289_v45  ;;  %v291_v8 = vpop.f32.mrb[1].mxu0 }
 0x12c   :  { %473 = vst [vmem:[%s875_s2 + $0x8] sm:$0xff] %v291_v8  ;;  %v378_v18 = vpop.f32.mrb[2].mxu1 }
 0x12d   :  { %480 = vst [vmem:[%s875_s2 + $0x40] sm:$0xff] %v378_v18  ;;  %v380_v22 = vpop.f32.mrb[3].mxu1 }
 0x12e   :  { %481 = vst [vmem:[%s875_s2 + $0x48] sm:$0xff] %v380_v22  ;;  %v295_v26 = vpop.f32.mrb[2].mxu0 }
 0x12f   :  { %478 = vst [vmem:[%s875_s2 + $0x30] sm:$0xff] %v295_v26  ;;  %v297_v47 = vpop.f32.mrb[3].mxu0 }
 0x130   :  { %v384_v46 = vpop.f32.mrb[4].mxu1  ;;  %479 = vst [vmem:[%s875_s2 + $0x38] sm:$0xff] %v297_v47 }
 0x131   :  { %486 = vst [vmem:[%s875_s2 + $0x70] sm:$0xff] %v384_v46  ;;  %v386_v48 = vpop.f32.mrb[5].mxu1 }
 0x132   :  { %487 = vst [vmem:[%s875_s2 + $0x78] sm:$0xff] %v386_v48  ;;  %v301_v16 = vpop.f32.mrb[4].mxu0 }
 0x133   :  { %484 = vst [vmem:[%s875_s2 + $0x60] sm:$0xff] %v301_v16  ;;  %v303_v49 = vpop.f32.mrb[5].mxu0 }
 0x134   :  { %485 = vst [vmem:[%s875_s2 + $0x68] sm:$0xff] %v303_v49 }
 0x168   :  { %v461_v50 = vpop.f32.mrb[6].mxu1 }
 0x169   :  { %482 = vst [vmem:[%s875_s2 + $0x50] sm:$0xff] %v461_v50  ;;  %v463_v51 = vpop.f32.mrb[7].mxu1 }
 0x16a   :  { %v455_v52 = vpop.f32.mrb[6].mxu0  ;;  %483 = vst [vmem:[%s875_s2 + $0x58] sm:$0xff] %v463_v51 }
 0x16b   :  { %476 = vst [vmem:[%s875_s2 + $0x20] sm:$0xff] %v455_v52  ;;  %v457_v53 = vpop.f32.mrb[7].mxu0 }
 0x16c   :  { %477 = vst [vmem:[%s875_s2 + $0x28] sm:$0xff] %v457_v53  ;;  %v467_v54 = vpop.f32.mrb[8].mxu1 }
 0x16d   :  { %488 = vst [vmem:[%s875_s2 + $0x80] sm:$0xff] %v467_v54  ;;  %v469_v55 = vpop.f32.mrb[9].mxu1 }
 0x16e   :  { %489 = vst [vmem:[%s875_s2 + $0x88] sm:$0xff] %v469_v55 }
 0x16f   :  { %494 = vsyncpa [#allocation3], 1 }

// kernel: transformer_forward.82
= control target key start
LH: loop header
LB: loop body
LE: loop exit
PB: predicated region body
PF: predicated region fallthrough
CT: control target
= control target key end

     0   :  { %s1268_s6 = smov 0   ;;  %s1408_s0 = inlined_call_operand.vmem [shape: f32[2,12,768], index: 0, kind: input, shape index: {}]   ;;  %s1409_s1 = inlined_call_operand.vmem [shape: f32[2,12,256], index: 1, kind: output, shape index: {}]  }
   0x1 LB: > { %s1010_s7 = sadd.s32 4294967295, %s1254_s6   ;;  %p1014_p0 = scmp.ge.s32.totalorder %s1254_s6, 1  ;;  %s1254_s6 = sphi %s1268_s6, %s11_s6  }
   0x2   : > { %p87_p1 = scmp.lt.s32.totalorder %s1254_s6, 3 }
   0x4   : > { %p88_p2 = pnand %p1014_p0, %p87_p1 }
   0x5   : > { %p107_p3 = scmp.lt.s32.totalorder (!%p88_p2), %s1010_s7, 1  ;;  %vm129_vm0 = vcmask (!%p88_p2), 523264   ;;  %s1256_s12 = smov (!%p88_p2), 64   ;;  %vm219_vm2 = vcmask (!%p88_p2), 97280   ;;  %vm223_vm3 = vcmask (!%p88_p2), 93184   ;;  %vm249_vm4 = vcmask (!%p88_p2), 1043456  }
   0x6   : > { %91 = sbr.rel (%p88_p2) target bundleno = 2523 (0x9db), region = 24  ;;  %vm1286_vm1 = vmpackc.low (!%p88_p2), %vm129_vm0, %vm129_vm0  ;;  %vm1257_vm5 = vmmov (!%p88_p2), 1  }
   0x7   : > { %vm1308_vm6 = vmpackc.low (!%p88_p2), %vm249_vm4, %vm1257_vm5 }
   0xd   : > { %s1415_s7 = smov (!%p107_p3, %s1010_s7), 1 }
   0xe   : > { %s1185_s8 = smul.u32 96, %s1415_s7  ;;  %s1048_s13 = sshll.u32 %s1415_s7, 5 }
   0xf   : > { %s1380_s16 = scalar_lea.vmem %s1409_s1, %s1048_s13 }
  0x10   : > { %s1282_s11 = scalar_lea.vmem %s1408_s0, %s1185_s8 }
  0x11   : > { %v119_v1 = vld [vmem:[%s1282_s11 + $0x10] sm:$0xff]  ;;  %v125_v2 = vld [vmem:[%s1282_s11 + $0x40] sm:$0xf]  ;;  %v120_v62 = vld [vmem:[%s1282_s11 + $0x18] sm:$0xff] }
  0x12   : > { %v117_v3 = vld [vmem:[%s1282_s11] sm:$0xff]  ;;  %v1196_v4 = vpack.i.bf16 %v125_v2, %v119_v1  ;;  %v1137_v5 = vpack.c.bf16 %v125_v2, %v119_v1  ;;  %v123_v6 = vld [vmem:[%s1282_s11 + $0x30] sm:$0xf]  ;;  %v126_v63 = vld [vmem:[%s1282_s11 + $0x48] sm:$0xf] }
  0x13   : > { %1085 = vmatprep.mubr.msk.f32.mxu0 %vm129_vm0, %v117_v3  ;;  %328 = vrot.lane.b32.xlu1 %v117_v3, %s1256_s12  ;;  %v121_v23 = vld [vmem:[%s1282_s11 + $0x20] sm:$0xff]  ;;  %v127_v24 = vld [vmem:[%s1282_s11 + $0x50] sm:$0xf]  ;;  %v1161_v1 = vpack.c.bf16 %v126_v63, %v120_v62 }
  0x14   : > { %1139 = vmatprep.subr.msk.bf16.mxu0 %vm1286_vm1, %v1137_v5  ;;  %v1201_v27 = vpack.i.bf16 %v127_v24, %v121_v23  ;;  %v1143_v28 = vpack.c.bf16 %v127_v24, %v121_v23 }
  0x15   : > { %1142 = vmatpush3.bf16.xpose.msk.msra.mxu0 %vm1286_vm1, %v1137_v5 }
  0x16   : > { %1145 = vmatprep.subr.msk.bf16.mxu1 %vm1308_vm6, %v1143_v28 }
  0x17   : > { %1148 = vmatpush3.bf16.msk.msra.mxu1 %vm1308_vm6, %v1143_v28 }
  0x1c   : > { %1086 = vmatmul.mubr.msk.f32.vlgmr.msra.gmra.mrb[0].mxu0 %vm129_vm0, %v123_v6 }
  0x85   : > { %v329_v32 = vpop.permute.xlu1 %328 }
  0xef   : > { %v1087_v7 = vpop.f32.mrb[0].mxu0 }
  0xf0   : > { %v208_v8 = vpop.f32.mrb[1].mxu0  ;;  %v218_v10 = vmul.f32 0.125, %v1087_v7 }
  0xf1   : > { %v217_v9 = vmul.f32 0.125, %v208_v8  ;;  %v118_v8 = vld [vmem:[%s1282_s11 + $0x8] sm:$0xff] }
  0xf2   : > { %v224_v12 = vsel %vm223_vm3, %v218_v10, -inf }
  0xf3   : > { %v220_v11 = vsel %vm219_vm2, %v217_v9, -inf }
  0xf4   : > { %221 = vmax.xlane.f32.xlu0 %v220_v11 }
  0xf8   : > { %225 = vmax.xlane.f32.xlu0 %v224_v12 }
 0x10e   : > { %1197 = vrot.lane.b32.xlu0 %v1196_v4, %s1256_s12 }
 0x181   : > { %v222_v13 = vpop.xlane.xlu0 %221 }
 0x182   : > { %v227_v14 = vsub.f32 %v217_v9, %v222_v13  ;;  %v124_v9 = vld [vmem:[%s1282_s11 + $0x38] sm:$0xf] }
 0x184   : > { %v229_v17 = vmul.f32 1.442695, %v227_v14 }
 0x185   : > { %v226_v15 = vpop.xlane.xlu0 %225 }
 0x186   : > { %v228_v16 = vsub.f32 %v218_v10, %v226_v15 }
 0x188   : > { %v231_v18 = vmul.f32 1.442695, %v228_v16 }
 0x189   : > { %v1198_v25 = vpop.permute.xlu0 %1197 }
 0x18a   : > { %1216 = vpow2.f32 %v231_v18  ;;  %v1200_v29 = vunpack.i.h.bf16 %v1198_v25  ;;  %v1199_v30 = vunpack.i.l.bf16 %v1198_v25  ;;  %v1206_v18 = vpack.i.bf16 %v126_v63, %v120_v62 }
 0x18b   : > { %1218 = vpow2.f32 %v229_v17 }
 0x18c   : > { %v1149_v31 = vpack.c.bf16 %v1200_v29, %v1199_v30  ;;  %v122_v30 = vld [vmem:[%s1282_s11 + $0x28] sm:$0xff] }
 0x18e   : > { %1151 = vmatprep.subr.msk.bf16.mxu1 %vm1286_vm1, %v1149_v31 }
 0x194   : > { %v1217_v19 = vpop.eup %1216 }
 0x195   : > { %v236_v20 = vsel %vm223_vm3, %v1217_v19, 0.0  ;;  %v1219_v21 = vpop.eup %1218 }
 0x196   : > { %237 = vadd.xlane.f32.xlu1 %v236_v20  ;;  %v233_v22 = vsel %vm219_vm2, %v1219_v21, 0.0 }
 0x19a   : > { %234 = vadd.xlane.f32.xlu1 %v233_v22 }
 0x1ab   : > { %330 = vrot.lane.b32.xlu1 %v123_v6, %s1256_s12 }
 0x223   : > { %v238_v33 = vpop.xlane.xlu1 %237 }
 0x224   : > { %1220 = vrcp.f32 %v238_v33 }
 0x227   : > { %v235_v34 = vpop.xlane.xlu1 %234 }
 0x228   : > { %1222 = vrcp.f32 %v235_v34 }
 0x22b   : > { %v331_v39 = vpop.permute.xlu1 %330 }
 0x22e   : > { %v1221_v35 = vpop.eup %1220 }
 0x22f   : > { %v242_v38 = vmul.f32 %v1221_v35, %v1217_v19 }
 0x232   : > { %v1223_v36 = vpop.eup %1222 }
 0x233   : > { %v240_v37 = vmul.f32 %v1223_v36, %v1219_v21 }
 0x235   : > { %1092 = vmatprep.mubr.msk.f32.mxu1 %vm219_vm2, %v240_v37 }
 0x236   : > { %1093 = vmatmul.mubr.msk.f32.vlgmr.msra.gmra.mrb[0].mxu1 %vm219_vm2, %v242_v38 }
 0x237   : > { %1154 = vmatpush3.bf16.xpose.msk.msra.mxu1 %vm1286_vm1, %v1149_v31  ;;  %1099 = vmatprep.mubr.msk.f32.mxu1 %vm129_vm0, %v329_v32  ;;  %v128_v31 = vld [vmem:[%s1282_s11 + $0x58] sm:$0xf] }
 0x238   : > { %v1167_v32 = vpack.c.bf16 %v128_v31, %v122_v30 }
 0x23a   : > { %1169 = vmatprep.subr.msk.bf16.mxu1 %vm1308_vm6, %v1167_v32 }
 0x23e   : > { %1100 = vmatmul.mubr.msk.f32.vlgmr.msra.gmra.mrb[2].mxu1 %vm129_vm0, %v331_v39 }
 0x23f   : > { %1172 = vmatpush3.bf16.msk.msra.mxu1 %vm1308_vm6, %v1167_v32 }
 0x309   : > { %v1325_v40 = vpop.f32.mrb[0].mxu1 }
 0x30a   : > { %v1327_v41 = vpop.f32.mrb[1].mxu1 }
 0x311   : > { %v1101_v42 = vpop.f32.mrb[2].mxu1 }
 0x312   : > { %v420_v43 = vmul.f32 0.125, %v1101_v42  ;;  %v410_v44 = vpop.f32.mrb[3].mxu1 }
 0x313   : > { %v419_v45 = vmul.f32 0.125, %v410_v44 }
 0x314   : > { %v424_v46 = vsel %vm223_vm3, %v420_v43, -inf }
 0x315   : > { %425 = vmax.xlane.f32.xlu0 %v424_v46  ;;  %v421_v47 = vsel %vm219_vm2, %v419_v45, -inf }
 0x316   : > { %422 = vmax.xlane.f32.xlu1 %v421_v47 }
 0x327   : > { %1202 = vrot.lane.b32.xlu1 %v1201_v27, %s1256_s12 }
 0x32b   : > { %1207 = vrot.lane.b32.xlu1 %v1206_v18, %s1256_s12 }
 0x32f   : > { %729 = vrot.lane.b32.xlu1 %v124_v9, %s1256_s12 }
 0x3a2   : > { %v426_v48 = vpop.xlane.xlu0 %425 }
 0x3a3   : > { %v428_v49 = vsub.f32 %v420_v43, %v426_v48  ;;  %v423_v50 = vpop.xlane.xlu1 %422 }
 0x3a4   : > { %v427_v51 = vsub.f32 %v419_v45, %v423_v50 }
 0x3a5   : > { %v431_v52 = vmul.f32 1.442695, %v428_v49 }
 0x3a6   : > { %v429_v53 = vmul.f32 1.442695, %v427_v51 }
 0x3a7   : > { %v1203_v58 = vpop.permute.xlu1 %1202 }
 0x3a8   : > { %1224 = vpow2.f32 %v429_v53  ;;  %v1205_v59 = vunpack.i.h.bf16 %v1203_v58  ;;  %v1204_v60 = vunpack.i.l.bf16 %v1203_v58 }
 0x3a9   : > { %1226 = vpow2.f32 %v431_v52 }
 0x3aa   : > { %v1155_v61 = vpack.c.bf16 %v1205_v59, %v1204_v60 }
 0x3ab   : > { %v1208_v33 = vpop.permute.xlu1 %1207 }
 0x3ac   : > { %1157 = vmatprep.subr.msk.bf16.mxu0 %vm1308_vm6, %v1155_v61  ;;  %v1210_v34 = vunpack.i.h.bf16 %v1208_v33  ;;  %v1209_v35 = vunpack.i.l.bf16 %v1208_v33 }
 0x3ad   : > { %1160 = vmatpush3.bf16.msk.msra.mxu0 %vm1308_vm6, %v1155_v61 }
 0x3ae   : > { %1163 = vmatprep.subr.msk.bf16.mxu0 %vm1286_vm1, %v1161_v1  ;;  %v1173_v36 = vpack.c.bf16 %v1210_v34, %v1209_v35 }
 0x3af   : > { %v730_v46 = vpop.permute.xlu1 %729 }
 0x3b0   : > { %1175 = vmatprep.subr.msk.bf16.mxu1 %vm1286_vm1, %v1173_v36 }
 0x3b2   : > { %v1225_v54 = vpop.eup %1224 }
 0x3b3   : > { %v433_v55 = vsel %vm219_vm2, %v1225_v54, 0.0  ;;  %v1227_v56 = vpop.eup %1226 }
 0x3b4   : > { %434 = vadd.xlane.f32.xlu0 %v433_v55  ;;  %v436_v57 = vsel %vm223_vm3, %v1227_v56, 0.0 }
 0x3b8   : > { %437 = vadd.xlane.f32.xlu0 %v436_v57 }
 0x441   : > { %v435_v2 = vpop.xlane.xlu0 %434 }
 0x442   : > { %1228 = vrcp.f32 %v435_v2 }
 0x445   : > { %v438_v3 = vpop.xlane.xlu0 %437 }
 0x446   : > { %1230 = vrcp.f32 %v438_v3  ;;  %v1211_v3 = vpack.i.bf16 %v128_v31, %v122_v30 }
 0x44c   : > { %v1229_v4 = vpop.eup %1228 }
 0x44d   : > { %v440_v5 = vmul.f32 %v1229_v4, %v1225_v54 }
 0x44f   : > { %1106 = vmatprep.mubr.msk.f32.mxu0 %vm219_vm2, %v440_v5 }
 0x450   : > { %v1231_v6 = vpop.eup %1230 }
 0x451   : > { %v442_v7 = vmul.f32 %v1231_v6, %v1227_v56 }
 0x453   : > { %1107 = vmatmul.mubr.msk.f32.vlgmr.msra.gmra.mrb[2].mxu0 %vm219_vm2, %v442_v7 }
 0x454   : > { %1166 = vmatpush3.bf16.xpose.msk.msra.mxu0 %vm1286_vm1, %v1161_v1  ;;  %1113 = vmatprep.mubr.msk.f32.mxu0 %vm129_vm0, %v118_v8 }
 0x45b   : > { %1114 = vmatmul.mubr.msk.f32.vlgmr.msra.gmra.mrb[4].mxu0 %vm129_vm0, %v124_v9 }
 0x526   : > { %v1350_v10 = vpop.f32.mrb[2].mxu0 }
 0x527   : > { %v523_v11 = vpop.f32.mrb[3].mxu0 }
 0x52e   : > { %v1115_v12 = vpop.f32.mrb[4].mxu0 }
 0x52f   : > { %v610_v13 = vpop.f32.mrb[5].mxu0  ;;  %v620_v15 = vmul.f32 0.125, %v1115_v12 }
 0x530   : > { %v619_v14 = vmul.f32 0.125, %v610_v13 }
 0x531   : > { %v624_v17 = vsel %vm223_vm3, %v620_v15, -inf }
 0x532   : > { %v621_v16 = vsel %vm219_vm2, %v619_v14, -inf }
 0x533   : > { %622 = vmax.xlane.f32.xlu0 %v621_v16 }
 0x537   : > { %625 = vmax.xlane.f32.xlu0 %v624_v17 }
 0x5c0   : > { %v623_v19 = vpop.xlane.xlu0 %622 }
 0x5c1   : > { %v627_v20 = vsub.f32 %v619_v14, %v623_v19 }
 0x5c3   : > { %v629_v21 = vmul.f32 1.442695, %v627_v20 }
 0x5c4   : > { %v626_v22 = vpop.xlane.xlu0 %625 }
 0x5c5   : > { %1232 = vpow2.f32 %v629_v21  ;;  %v628_v23 = vsub.f32 %v620_v15, %v626_v22 }
 0x5c7   : > { %v631_v24 = vmul.f32 1.442695, %v628_v23 }
 0x5c9   : > { %1234 = vpow2.f32 %v631_v24 }
 0x5cf   : > { %v1233_v25 = vpop.eup %1232 }
 0x5d0   : > { %v633_v27 = vsel %vm219_vm2, %v1233_v25, 0.0 }
 0x5d1   : > { %634 = vadd.xlane.f32.xlu0 %v633_v27 }
 0x5d3   : > { %v1235_v28 = vpop.eup %1234 }
 0x5d4   : > { %v636_v29 = vsel %vm223_vm3, %v1235_v28, 0.0 }
 0x5d5   : > { %637 = vadd.xlane.f32.xlu0 %v636_v29 }
 0x5eb   : > { %727 = vrot.lane.b32.xlu0 %v118_v8, %s1256_s12 }
 0x65e   : > { %v635_v37 = vpop.xlane.xlu0 %634 }
 0x65f   : > { %1236 = vrcp.f32 %v635_v37 }
 0x662   : > { %v638_v38 = vpop.xlane.xlu0 %637 }
 0x663   : > { %1238 = vrcp.f32 %v638_v38 }
 0x666   : > { %v728_v45 = vpop.permute.xlu0 %727 }
 0x669   : > { %v1237_v39 = vpop.eup %1236 }
 0x66a   : > { %v640_v42 = vmul.f32 %v1237_v39, %v1233_v25 }
 0x66c   : > { %1120 = vmatprep.mubr.msk.f32.mxu1 %vm219_vm2, %v640_v42 }
 0x66d   : > { %v1239_v43 = vpop.eup %1238 }
 0x66e   : > { %v642_v44 = vmul.f32 %v1239_v43, %v1235_v28 }
 0x670   : > { %1121 = vmatmul.mubr.msk.f32.vlgmr.msra.gmra.mrb[4].mxu1 %vm219_vm2, %v642_v44 }
 0x671   : > { %1178 = vmatpush3.bf16.xpose.msk.msra.mxu1 %vm1286_vm1, %v1173_v36  ;;  %1127 = vmatprep.mubr.msk.f32.mxu1 %vm129_vm0, %v728_v45 }
 0x678   : > { %1128 = vmatmul.mubr.msk.f32.vlgmr.msra.gmra.mrb[6].mxu1 %vm129_vm0, %v730_v46 }
 0x743   : > { %v1122_v47 = vpop.f32.mrb[4].mxu1 }
 0x744   : > { %v718_v48 = vpop.f32.mrb[5].mxu1 }
 0x74b   : > { %v1129_v49 = vpop.f32.mrb[6].mxu1 }
 0x74c   : > { %v819_v50 = vmul.f32 0.125, %v1129_v49  ;;  %v809_v51 = vpop.f32.mrb[7].mxu1 }
 0x74d   : > { %v818_v52 = vmul.f32 0.125, %v809_v51 }
 0x74e   : > { %v823_v53 = vsel %vm223_vm3, %v819_v50, -inf }
 0x74f   : > { %824 = vmax.xlane.f32.xlu0 %v823_v53  ;;  %v820_v54 = vsel %vm219_vm2, %v818_v52, -inf }
 0x750   : > { %821 = vmax.xlane.f32.xlu1 %v820_v54 }
 0x765   : > { %933 = vrot.lane.b32.xlu0 %v523_v11, %s1256_s12 }
 0x7dc   : > { %v825_v0 = vpop.xlane.xlu0 %824 }
 0x7dd   : > { %v827_v55 = vsub.f32 %v819_v50, %v825_v0  ;;  %v822_v56 = vpop.xlane.xlu1 %821 }
 0x7de   : > { %v826_v57 = vsub.f32 %v818_v52, %v822_v56 }
 0x7df   : > { %v830_v58 = vmul.f32 1.442695, %v827_v55 }
 0x7e0   : > { %v828_v59 = vmul.f32 1.442695, %v826_v57  ;;  %v934_v60 = vpop.permute.xlu0 %933 }
 0x7e1   : > { %1240 = vpow2.f32 %v830_v58  ;;  %v947_v61 = vsel %vm129_vm0, %v1327_v41, %v934_v60 }
 0x7e2   : > { %951 = vst [vmem:[%s1380_s16] sm:$0xff] %v947_v61  ;;  %1242 = vpow2.f32 %v828_v59 }
 0x7eb   : > { %v1241_v62 = vpop.eup %1240 }
 0x7ec   : > { %v835_v63 = vsel %vm223_vm3, %v1241_v62, 0.0  ;;  %v1243_v1 = vpop.eup %1242 }
 0x7ed   : > { %836 = vadd.xlane.f32.xlu1 %v835_v63  ;;  %v832_v2 = vsel %vm219_vm2, %v1243_v1, 0.0 }
 0x7f1   : > { %833 = vadd.xlane.f32.xlu1 %v832_v2 }
 0x802   : > { %1212 = vrot.lane.b32.xlu1 %v1211_v3, %s1256_s12 }
 0x806   : > { %935 = vrot.lane.b32.xlu1 %v1350_v10, %s1256_s12 }
 0x87a   : > { %v837_v4 = vpop.xlane.xlu1 %836 }
 0x87b   : > { %1244 = vrcp.f32 %v837_v4 }
 0x87e   : > { %v834_v41 = vpop.xlane.xlu1 %833 }
 0x87f   : > { %1246 = vrcp.f32 %v834_v41 }
 0x882   : > { %v1213_v5 = vpop.permute.xlu1 %1212 }
 0x883   : > { %v1215_v6 = vunpack.i.h.bf16 %v1213_v5  ;;  %v1214_v7 = vunpack.i.l.bf16 %v1213_v5 }
 0x885   : > { %v1179_v8 = vpack.c.bf16 %v1215_v6, %v1214_v7  ;;  %v1245_v12 = vpop.eup %1244 }
 0x886   : > { %v936_v9 = vpop.permute.xlu1 %935  ;;  %v841_v14 = vmul.f32 %v1245_v12, %v1241_v62 }
 0x887   : > { %v948_v11 = vsel %vm129_vm0, %v1325_v40, %v936_v9  ;;  %1181 = vmatprep.subr.msk.bf16.mxu0 %vm1308_vm6, %v1179_v8 }
 0x888   : > { %953 = vst [vmem:[%s1380_s16 + $0x10] sm:$0xf] %v948_v11  ;;  %1184 = vmatpush3.bf16.msk.msra.mxu0 %vm1308_vm6, %v1179_v8 }
 0x889   : > { %v1247_v10 = vpop.eup %1246 }
 0x88a   : > { %v839_v13 = vmul.f32 %v1247_v10, %v1243_v1 }
 0x88c   : > { %1134 = vmatprep.mubr.msk.f32.mxu0 %vm219_vm2, %v839_v13 }
 0x88d   : > { %1135 = vmatmul.mubr.msk.f32.vlgmr.msra.gmra.mrb[6].mxu0 %vm219_vm2, %v841_v14 }
 0x960   : > { %v1136_v15 = vpop.f32.mrb[6].mxu0 }
 0x961   : > { %v922_v16 = vpop.f32.mrb[7].mxu0 }
 0x962   : > { %941 = vrot.lane.b32.xlu1 %v922_v16, %s1256_s12 }
 0x966   : > { %943 = vrot.lane.b32.xlu1 %v1136_v15, %s1256_s12 }
 0x9d4   : > { %v942_v40 = vpop.permute.xlu1 %941 }
 0x9d5   : > { %v949_v17 = vsel %vm129_vm0, %v718_v48, %v942_v40 }
 0x9d6   : > { %952 = vst [vmem:[%s1380_s16 + $0x8] sm:$0xff] %v949_v17 }
 0x9d8   : > { %v944_v26 = vpop.permute.xlu1 %943 }
 0x9d9   : > { %v950_v18 = vsel %vm129_vm0, %v1122_v47, %v944_v26 }
 0x9da   : > { %954 = vst [vmem:[%s1380_s16 + $0x18] sm:$0xf] %v950_v18 }
 0x9db PF: > { %s11_s6 = sadd.s32 1, %s1254_s6  }
 0x9dc   : > { %p8_p4 = scmp.ge.s32.totalorder %s11_s6, 4  }
 0x9de   :  { %10 = sbr.rel (!%p8_p4) target bundleno = 1 (0x1), region = 54 }

// kernel: transformer_forward.84
= control target key start
LH: loop header
LB: loop body
LE: loop exit
PB: predicated region body
PF: predicated region fallthrough
CT: control target
= control target key end

     0   :  { %s513_s1 = inlined_call_operand.vmem [shape: f32[256,256], index: 1, kind: input, shape index: {}]   ;;  %s514_s0 = inlined_call_operand.vmem [shape: f32[24,256], index: 0, kind: input, shape index: {}]   ;;  %s515_s2 = inlined_call_operand.vmem [shape: f32[24,256], index: 2, kind: output, shape index: {}]  }
   0x1   :  { %v18_v0 = vld [vmem:[%s513_s1 + $0x8] sm:$0xff]  ;;  %v20_v1 = vld [vmem:[%s513_s1 + $0x18] sm:$0xff]  ;;  %v17_v2 = vld [vmem:[%s513_s1] sm:$0xff] }
   0x2   :  { %v174_v3 = vpack.c.bf16 %v20_v1, %v18_v0  ;;  %v19_v4 = vld [vmem:[%s513_s1 + $0x10] sm:$0xff]  ;;  %v22_v5 = vld [vmem:[%s513_s1 + $0x28] sm:$0xff]  ;;  %v24_v6 = vld [vmem:[%s513_s1 + $0x38] sm:$0xff] }
   0x3   :  { %v176_v7 = vpack.c.bf16 %v19_v4, %v17_v2  ;;  %v178_v8 = vpack.c.bf16 %v24_v6, %v22_v5  ;;  %v21_v9 = vld [vmem:[%s513_s1 + $0x20] sm:$0xff]  ;;  %v23_v10 = vld [vmem:[%s513_s1 + $0x30] sm:$0xff]  ;;  %v26_v11 = vld [vmem:[%s513_s1 + $0x48] sm:$0xff] }
   0x4   :  { %238 = vmatprep.subr.bf16.mxu1 %v174_v3  ;;  %175 = vmatprep.subr.bf16.mxu0 %v174_v3  ;;  %v28_v12 = vld [vmem:[%s513_s1 + $0x58] sm:$0xff]  ;;  %v180_v13 = vpack.c.bf16 %v23_v10, %v21_v9  ;;  %v25_v15 = vld [vmem:[%s513_s1 + $0x40] sm:$0xff]  ;;  %v27_v16 = vld [vmem:[%s513_s1 + $0x50] sm:$0xff] }
   0x5   :  { %254 = vmatpush1.bf16.msra.mxu1 %v176_v7  ;;  %177 = vmatpush1.bf16.msra.mxu0 %v176_v7  ;;  %v182_v14 = vpack.c.bf16 %v28_v12, %v26_v11  ;;  %v30_v17 = vld [vmem:[%s513_s1 + $0x68] sm:$0xff]  ;;  %v32_v18 = vld [vmem:[%s513_s1 + $0x78] sm:$0xff]  ;;  %v184_v19 = vpack.c.bf16 %v27_v16, %v25_v15  ;;  %v29_v21 = vld [vmem:[%s513_s1 + $0x60] sm:$0xff] }
   0x6   :  { %239 = vmatprep.subr.bf16.mxu1 %v178_v8  ;;  %179 = vmatprep.subr.bf16.mxu0 %v178_v8  ;;  %v186_v20 = vpack.c.bf16 %v32_v18, %v30_v17  ;;  %v31_v22 = vld [vmem:[%s513_s1 + $0x70] sm:$0xff]  ;;  %v34_v23 = vld [vmem:[%s513_s1 + $0x88] sm:$0xff]  ;;  %v36_v24 = vld [vmem:[%s513_s1 + $0x98] sm:$0xff] }
   0x7   :  { %v188_v25 = vpack.c.bf16 %v31_v22, %v29_v21  ;;  %v190_v26 = vpack.c.bf16 %v36_v24, %v34_v23  ;;  %v33_v27 = vld [vmem:[%s513_s1 + $0x80] sm:$0xff]  ;;  %v35_v28 = vld [vmem:[%s513_s1 + $0x90] sm:$0xff]  ;;  %v38_v29 = vld [vmem:[%s513_s1 + $0xa8] sm:$0xff] }
   0x8   :  { %v40_v30 = vld [vmem:[%s513_s1 + $0xb8] sm:$0xff]  ;;  %v192_v31 = vpack.c.bf16 %v35_v28, %v33_v27  ;;  %v37_v33 = vld [vmem:[%s513_s1 + $0xa0] sm:$0xff]  ;;  %v39_v34 = vld [vmem:[%s513_s1 + $0xb0] sm:$0xff] }
   0x9   :  { %255 = vmatpush1.bf16.msra.mxu1 %v180_v13  ;;  %181 = vmatpush1.bf16.msra.mxu0 %v180_v13  ;;  %v194_v32 = vpack.c.bf16 %v40_v30, %v38_v29  ;;  %v42_v35 = vld [vmem:[%s513_s1 + $0xc8] sm:$0xff]  ;;  %v44_v36 = vld [vmem:[%s513_s1 + $0xd8] sm:$0xff]  ;;  %v196_v37 = vpack.c.bf16 %v39_v34, %v37_v33  ;;  %v41_v39 = vld [vmem:[%s513_s1 + $0xc0] sm:$0xff] }
   0xa   :  { %240 = vmatprep.subr.bf16.mxu1 %v182_v14  ;;  %183 = vmatprep.subr.bf16.mxu0 %v182_v14  ;;  %v198_v38 = vpack.c.bf16 %v44_v36, %v42_v35  ;;  %v43_v40 = vld [vmem:[%s513_s1 + $0xd0] sm:$0xff]  ;;  %v14_v41 = vld [vmem:[%s514_s0 + $0x18] sm:$0xff]  ;;  %v46_v42 = vld [vmem:[%s513_s1 + $0xe8] sm:$0xff] }
   0xb   :  { %v48_v43 = vld [vmem:[%s513_s1 + $0xf8] sm:$0xff]  ;;  %151 = vmatprep.mubr.f32.mxu1 %v14_v41  ;;  %v12_v44 = vld [vmem:[%s514_s0 + $0x8] sm:$0xff]  ;;  %v200_v45 = vpack.c.bf16 %v43_v40, %v41_v39  ;;  %v45_v47 = vld [vmem:[%s513_s1 + $0xe0] sm:$0xff] }
   0xc   :  { %145 = vmatprep.mubr.f32.mxu0 %v12_v44  ;;  %v202_v46 = vpack.c.bf16 %v48_v43, %v46_v42  ;;  %v47_v48 = vld [vmem:[%s513_s1 + $0xf0] sm:$0xff]  ;;  %v50_v49 = vld [vmem:[%s513_s1 + $0x108] sm:$0xff]  ;;  %v52_v50 = vld [vmem:[%s513_s1 + $0x118] sm:$0xff] }
   0xd   :  { %256 = vmatpush1.bf16.msra.mxu1 %v184_v19  ;;  %185 = vmatpush1.bf16.msra.mxu0 %v184_v19  ;;  %v204_v51 = vpack.c.bf16 %v47_v48, %v45_v47  ;;  %v206_v52 = vpack.c.bf16 %v52_v50, %v50_v49  ;;  %v49_v53 = vld [vmem:[%s513_s1 + $0x100] sm:$0xff]  ;;  %v51_v54 = vld [vmem:[%s513_s1 + $0x110] sm:$0xff]  ;;  %v54_v55 = vld [vmem:[%s513_s1 + $0x128] sm:$0xff] }
   0xe   :  { %241 = vmatprep.subr.bf16.mxu1 %v186_v20  ;;  %187 = vmatprep.subr.bf16.mxu0 %v186_v20  ;;  %v56_v56 = vld [vmem:[%s513_s1 + $0x138] sm:$0xff]  ;;  %v208_v57 = vpack.c.bf16 %v51_v54, %v49_v53  ;;  %v53_v59 = vld [vmem:[%s513_s1 + $0x120] sm:$0xff]  ;;  %v55_v60 = vld [vmem:[%s513_s1 + $0x130] sm:$0xff] }
   0xf   :  { %v210_v58 = vpack.c.bf16 %v56_v56, %v54_v55  ;;  %v58_v61 = vld [vmem:[%s513_s1 + $0x148] sm:$0xff]  ;;  %v60_v62 = vld [vmem:[%s513_s1 + $0x158] sm:$0xff]  ;;  %v212_v63 = vpack.c.bf16 %v55_v60, %v53_v59  ;;  %v57_v1 = vld [vmem:[%s513_s1 + $0x140] sm:$0xff] }
  0x10   :  { %v214_v0 = vpack.c.bf16 %v60_v62, %v58_v61  ;;  %v59_v2 = vld [vmem:[%s513_s1 + $0x150] sm:$0xff]  ;;  %v62_v3 = vld [vmem:[%s513_s1 + $0x168] sm:$0xff]  ;;  %v64_v4 = vld [vmem:[%s513_s1 + $0x178] sm:$0xff] }
  0x11   :  { %257 = vmatpush1.bf16.msra.mxu1 %v188_v25  ;;  %189 = vmatpush1.bf16.msra.mxu0 %v188_v25  ;;  %v216_v5 = vpack.c.bf16 %v59_v2, %v57_v1  ;;  %v218_v6 = vpack.c.bf16 %v64_v4, %v62_v3  ;;  %v61_v7 = vld [vmem:[%s513_s1 + $0x160] sm:$0xff]  ;;  %v63_v8 = vld [vmem:[%s513_s1 + $0x170] sm:$0xff]  ;;  %v66_v9 = vld [vmem:[%s513_s1 + $0x188] sm:$0xff] }
  0x12   :  { %242 = vmatprep.subr.bf16.mxu1 %v190_v26  ;;  %191 = vmatprep.subr.bf16.mxu0 %v190_v26  ;;  %v68_v10 = vld [vmem:[%s513_s1 + $0x198] sm:$0xff]  ;;  %v220_v11 = vpack.c.bf16 %v63_v8, %v61_v7  ;;  %v65_v13 = vld [vmem:[%s513_s1 + $0x180] sm:$0xff]  ;;  %v67_v14 = vld [vmem:[%s513_s1 + $0x190] sm:$0xff] }
  0x13   :  { %v222_v12 = vpack.c.bf16 %v68_v10, %v66_v9  ;;  %v70_v15 = vld [vmem:[%s513_s1 + $0x1a8] sm:$0xff]  ;;  %v72_v16 = vld [vmem:[%s513_s1 + $0x1b8] sm:$0xff]  ;;  %v224_v17 = vpack.c.bf16 %v67_v14, %v65_v13  ;;  %v69_v19 = vld [vmem:[%s513_s1 + $0x1a0] sm:$0xff] }
  0x14   :  { %v226_v18 = vpack.c.bf16 %v72_v16, %v70_v15  ;;  %v71_v20 = vld [vmem:[%s513_s1 + $0x1b0] sm:$0xff]  ;;  %v74_v21 = vld [vmem:[%s513_s1 + $0x1c8] sm:$0xff]  ;;  %v76_v22 = vld [vmem:[%s513_s1 + $0x1d8] sm:$0xff] }
  0x15   :  { %258 = vmatpush1.bf16.msra.mxu1 %v192_v31  ;;  %193 = vmatpush1.bf16.msra.mxu0 %v192_v31  ;;  %v228_v23 = vpack.c.bf16 %v71_v20, %v69_v19  ;;  %v230_v24 = vpack.c.bf16 %v76_v22, %v74_v21  ;;  %v73_v25 = vld [vmem:[%s513_s1 + $0x1c0] sm:$0xff]  ;;  %v75_v26 = vld [vmem:[%s513_s1 + $0x1d0] sm:$0xff]  ;;  %v78_v27 = vld [vmem:[%s513_s1 + $0x1e8] sm:$0xff] }
  0x16   :  { %243 = vmatprep.subr.bf16.mxu1 %v194_v32  ;;  %195 = vmatprep.subr.bf16.mxu0 %v194_v32  ;;  %v80_v28 = vld [vmem:[%s513_s1 + $0x1f8] sm:$0xff]  ;;  %v232_v29 = vpack.c.bf16 %v75_v26, %v73_v25  ;;  %v77_v31 = vld [vmem:[%s513_s1 + $0x1e0] sm:$0xff]  ;;  %v79_v32 = vld [vmem:[%s513_s1 + $0x1f0] sm:$0xff] }
  0x17   :  { %v234_v30 = vpack.c.bf16 %v80_v28, %v78_v27  ;;  %v236_v33 = vpack.c.bf16 %v79_v32, %v77_v31  ;;  %v13_v34 = vld [vmem:[%s514_s0 + $0x10] sm:$0xff]  ;;  %v11_v35 = vld [vmem:[%s514_s0] sm:$0xff]  ;;  %v16_v36 = vld [vmem:[%s514_s0 + $0x28] sm:$0xff] }
  0x19   :  { %259 = vmatpush1.bf16.msra.mxu1 %v196_v37  ;;  %197 = vmatpush1.bf16.msra.mxu0 %v196_v37  ;;  %v15_v37 = vld [vmem:[%s514_s0 + $0x20] sm:$0xff] }
  0x1a   :  { %244 = vmatprep.subr.bf16.mxu1 %v198_v38  ;;  %199 = vmatprep.subr.bf16.mxu0 %v198_v38 }
  0x1d   :  { %260 = vmatpush1.bf16.msra.mxu1 %v200_v45  ;;  %201 = vmatpush1.bf16.msra.mxu0 %v200_v45 }
  0x1e   :  { %245 = vmatprep.subr.bf16.mxu1 %v202_v46  ;;  %203 = vmatprep.subr.bf16.mxu0 %v202_v46 }
  0x21   :  { %261 = vmatpush1.bf16.msra.mxu1 %v204_v51  ;;  %205 = vmatpush1.bf16.msra.mxu0 %v204_v51 }
  0x22   :  { %246 = vmatprep.subr.bf16.mxu1 %v206_v52  ;;  %207 = vmatprep.subr.bf16.mxu0 %v206_v52 }
  0x25   :  { %262 = vmatpush1.bf16.msra.mxu1 %v208_v57  ;;  %209 = vmatpush1.bf16.msra.mxu0 %v208_v57 }
  0x26   :  { %247 = vmatprep.subr.bf16.mxu1 %v210_v58  ;;  %211 = vmatprep.subr.bf16.mxu0 %v210_v58 }
  0x29   :  { %263 = vmatpush1.bf16.msra.mxu1 %v212_v63  ;;  %213 = vmatpush1.bf16.msra.mxu0 %v212_v63 }
  0x2a   :  { %248 = vmatprep.subr.bf16.mxu1 %v214_v0  ;;  %215 = vmatprep.subr.bf16.mxu0 %v214_v0 }
  0x2d   :  { %264 = vmatpush1.bf16.msra.mxu1 %v216_v5  ;;  %217 = vmatpush1.bf16.msra.mxu0 %v216_v5 }
  0x2e   :  { %249 = vmatprep.subr.bf16.mxu1 %v218_v6  ;;  %219 = vmatprep.subr.bf16.mxu0 %v218_v6 }
  0x31   :  { %265 = vmatpush1.bf16.msra.mxu1 %v220_v11  ;;  %221 = vmatpush1.bf16.msra.mxu0 %v220_v11 }
  0x32   :  { %250 = vmatprep.subr.bf16.mxu1 %v222_v12  ;;  %223 = vmatprep.subr.bf16.mxu0 %v222_v12 }
  0x35   :  { %266 = vmatpush1.bf16.msra.mxu1 %v224_v17  ;;  %225 = vmatpush1.bf16.msra.mxu0 %v224_v17 }
  0x36   :  { %251 = vmatprep.subr.bf16.mxu1 %v226_v18  ;;  %227 = vmatprep.subr.bf16.mxu0 %v226_v18 }
  0x39   :  { %267 = vmatpush1.bf16.msra.mxu1 %v228_v23  ;;  %229 = vmatpush1.bf16.msra.mxu0 %v228_v23 }
  0x3a   :  { %252 = vmatprep.subr.bf16.mxu1 %v230_v24  ;;  %231 = vmatprep.subr.bf16.mxu0 %v230_v24 }
  0x3d   :  { %268 = vmatpush1.bf16.msra.mxu1 %v232_v29  ;;  %233 = vmatpush1.bf16.msra.mxu0 %v232_v29 }
  0x3e   :  { %253 = vmatprep.subr.bf16.mxu1 %v234_v30  ;;  %235 = vmatprep.subr.bf16.mxu0 %v234_v30 }
  0x41   :  { %269 = vmatpush1.bf16.msra.mxu1 %v236_v33  ;;  %237 = vmatpush1.bf16.msra.mxu0 %v236_v33 }
  0x44   :  { %152 = vmatmul.mubr.f32.vlgmr.msra.gmra.mrb[0].mxu1 %v13_v34  ;;  %146 = vmatmul.mubr.f32.vlgmr.msra.gmra.mrb[0].mxu0 %v11_v35 }
  0x45   :  { %157 = vmatprep.mubr.f32.mxu1 %v16_v36 }
  0x48   :  { %158 = vmatmul.mubr.f32.gmra.mrb[2].mxu1 %v15_v37 }
 0x117   :  { %v153_v38 = vpop.f32.mrb[0].mxu1  ;;  %v147_v39 = vpop.f32.mrb[0].mxu0 }
 0x118   :  { %166 = vst [vmem:[%s515_s2 + $0x10] sm:$0xff] %v153_v38  ;;  %v155_v40 = vpop.f32.mrb[1].mxu1  ;;  %164 = vst [vmem:[%s515_s2] sm:$0xff] %v147_v39  ;;  %v149_v41 = vpop.f32.mrb[1].mxu0 }
 0x119   :  { %167 = vst [vmem:[%s515_s2 + $0x18] sm:$0xff] %v155_v40  ;;  %165 = vst [vmem:[%s515_s2 + $0x8] sm:$0xff] %v149_v41 }
 0x11b   :  { %v159_v42 = vpop.f32.mrb[2].mxu1 }
 0x11c   :  { %168 = vst [vmem:[%s515_s2 + $0x20] sm:$0xff] %v159_v42  ;;  %v161_v43 = vpop.f32.mrb[3].mxu1 }
 0x11d   :  { %169 = vst [vmem:[%s515_s2 + $0x28] sm:$0xff] %v161_v43 }

// kernel: transformer_forward.60
= control target key start
LH: loop header
LB: loop body
LE: loop exit
PB: predicated region body
PF: predicated region fallthrough
CT: control target
= control target key end

     0   :  { %s1392_s1 = inlined_call_operand.vmem [shape: f32[256,768], index: 1, kind: input, shape index: {}]   ;;  %s1393_s0 = inlined_call_operand.vmem [shape: f32[24,256], index: 0, kind: input, shape index: {}]   ;;  %s1394_s2 = inlined_call_operand.vmem [shape: f32[24,768], index: 2, kind: output, shape index: {}]  }
   0x1   :  { %v20_v0 = vld [vmem:[%s1392_s1 + $0x18] sm:$0xff]  ;;  %v26_v1 = vld [vmem:[%s1392_s1 + $0x48] sm:$0xff]  ;;  %v19_v2 = vld [vmem:[%s1392_s1 + $0x10] sm:$0xff] }
   0x2   :  { %v544_v3 = vpack.c.bf16 %v26_v1, %v20_v0  ;;  %v25_v4 = vld [vmem:[%s1392_s1 + $0x40] sm:$0xff]  ;;  %v18_v5 = vld [vmem:[%s1392_s1 + $0x8] sm:$0xff]  ;;  %v24_v6 = vld [vmem:[%s1392_s1 + $0x38] sm:$0xff] }
   0x3   :  { %v546_v7 = vpack.c.bf16 %v25_v4, %v19_v2  ;;  %v480_v8 = vpack.c.bf16 %v24_v6, %v18_v5  ;;  %v17_v9 = vld [vmem:[%s1392_s1] sm:$0xff]  ;;  %v23_v10 = vld [vmem:[%s1392_s1 + $0x30] sm:$0xff]  ;;  %v32_v11 = vld [vmem:[%s1392_s1 + $0x78] sm:$0xff] }
   0x4   :  { %545 = vmatprep.subr.bf16.mxu1 %v544_v3  ;;  %v482_v12 = vpack.c.bf16 %v23_v10, %v17_v9  ;;  %v38_v13 = vld [vmem:[%s1392_s1 + $0xa8] sm:$0xff]  ;;  %v31_v14 = vld [vmem:[%s1392_s1 + $0x70] sm:$0xff]  ;;  %v37_v15 = vld [vmem:[%s1392_s1 + $0xa0] sm:$0xff] }
   0x5   :  { %547 = vmatpush1.bf16.msra.mxu1 %v546_v7  ;;  %481 = vmatprep.subr.bf16.mxu0 %v480_v8  ;;  %v548_v16 = vpack.c.bf16 %v38_v13, %v32_v11  ;;  %v550_v17 = vpack.c.bf16 %v37_v15, %v31_v14  ;;  %v30_v18 = vld [vmem:[%s1392_s1 + $0x68] sm:$0xff]  ;;  %v36_v19 = vld [vmem:[%s1392_s1 + $0x98] sm:$0xff]  ;;  %v29_v20 = vld [vmem:[%s1392_s1 + $0x60] sm:$0xff] }
   0x6   :  { %483 = vmatpush1.bf16.msra.mxu0 %v482_v12  ;;  %v484_v21 = vpack.c.bf16 %v36_v19, %v30_v18  ;;  %v35_v22 = vld [vmem:[%s1392_s1 + $0x90] sm:$0xff]  ;;  %v44_v23 = vld [vmem:[%s1392_s1 + $0xd8] sm:$0xff]  ;;  %v50_v24 = vld [vmem:[%s1392_s1 + $0x108] sm:$0xff] }
   0x7   :  { %549 = vmatprep.subr.bf16.mxu1 %v548_v16  ;;  %v486_v25 = vpack.c.bf16 %v35_v22, %v29_v20  ;;  %v552_v26 = vpack.c.bf16 %v50_v24, %v44_v23  ;;  %v43_v27 = vld [vmem:[%s1392_s1 + $0xd0] sm:$0xff]  ;;  %v49_v28 = vld [vmem:[%s1392_s1 + $0x100] sm:$0xff]  ;;  %v42_v29 = vld [vmem:[%s1392_s1 + $0xc8] sm:$0xff] }
   0x8   :  { %485 = vmatprep.subr.bf16.mxu0 %v484_v21  ;;  %v48_v30 = vld [vmem:[%s1392_s1 + $0xf8] sm:$0xff]  ;;  %v41_v31 = vld [vmem:[%s1392_s1 + $0xc0] sm:$0xff]  ;;  %v47_v32 = vld [vmem:[%s1392_s1 + $0xf0] sm:$0xff]  ;;  %v554_v33 = vpack.c.bf16 %v49_v28, %v43_v27 }
   0x9   :  { %551 = vmatpush1.bf16.msra.mxu1 %v550_v17  ;;  %v488_v34 = vpack.c.bf16 %v48_v30, %v42_v29  ;;  %v56_v35 = vld [vmem:[%s1392_s1 + $0x138] sm:$0xff]  ;;  %v62_v36 = vld [vmem:[%s1392_s1 + $0x168] sm:$0xff]  ;;  %v55_v37 = vld [vmem:[%s1392_s1 + $0x130] sm:$0xff]  ;;  %v490_v38 = vpack.c.bf16 %v47_v32, %v41_v31 }
   0xa   :  { %487 = vmatpush1.bf16.msra.mxu0 %v486_v25  ;;  %553 = vmatprep.subr.bf16.mxu1 %v552_v26  ;;  %v556_v39 = vpack.c.bf16 %v62_v36, %v56_v35  ;;  %v61_v40 = vld [vmem:[%s1392_s1 + $0x160] sm:$0xff]  ;;  %v54_v41 = vld [vmem:[%s1392_s1 + $0x128] sm:$0xff]  ;;  %v60_v42 = vld [vmem:[%s1392_s1 + $0x158] sm:$0xff] }
   0xb   :  { %489 = vmatprep.subr.bf16.mxu0 %v488_v34  ;;  %v492_v43 = vpack.c.bf16 %v60_v42, %v54_v41  ;;  %v53_v44 = vld [vmem:[%s1392_s1 + $0x120] sm:$0xff]  ;;  %v59_v45 = vld [vmem:[%s1392_s1 + $0x150] sm:$0xff]  ;;  %v68_v46 = vld [vmem:[%s1392_s1 + $0x198] sm:$0xff]  ;;  %v558_v48 = vpack.c.bf16 %v61_v40, %v55_v37 }
   0xc   :  { %v74_v47 = vld [vmem:[%s1392_s1 + $0x1c8] sm:$0xff]  ;;  %v72_v50 = vld [vmem:[%s1392_s1 + $0x1b8] sm:$0xff]  ;;  %v494_v51 = vpack.c.bf16 %v59_v45, %v53_v44  ;;  %v67_v53 = vld [vmem:[%s1392_s1 + $0x190] sm:$0xff] }
   0xd   :  { %555 = vmatpush1.bf16.msra.mxu1 %v554_v33  ;;  %v66_v49 = vld [vmem:[%s1392_s1 + $0x188] sm:$0xff]  ;;  %v560_v52 = vpack.c.bf16 %v74_v47, %v68_v46  ;;  %v73_v54 = vld [vmem:[%s1392_s1 + $0x1c0] sm:$0xff]  ;;  %v71_v57 = vld [vmem:[%s1392_s1 + $0x1b0] sm:$0xff] }
   0xe   :  { %491 = vmatpush1.bf16.msra.mxu0 %v490_v38  ;;  %557 = vmatprep.subr.bf16.mxu1 %v556_v39  ;;  %v65_v55 = vld [vmem:[%s1392_s1 + $0x180] sm:$0xff]  ;;  %v496_v56 = vpack.c.bf16 %v72_v50, %v66_v49  ;;  %v80_v58 = vld [vmem:[%s1392_s1 + $0x1f8] sm:$0xff]  ;;  %v86_v59 = vld [vmem:[%s1392_s1 + $0x228] sm:$0xff]  ;;  %v562_v62 = vpack.c.bf16 %v73_v54, %v67_v53 }
   0xf   :  { %493 = vmatprep.subr.bf16.mxu0 %v492_v43  ;;  %v78_v60 = vld [vmem:[%s1392_s1 + $0x1e8] sm:$0xff]  ;;  %v84_v61 = vld [vmem:[%s1392_s1 + $0x218] sm:$0xff]  ;;  %v498_v63 = vpack.c.bf16 %v71_v57, %v65_v55  ;;  %v564_v0 = vpack.c.bf16 %v86_v59, %v80_v58  ;;  %v79_v1 = vld [vmem:[%s1392_s1 + $0x1f0] sm:$0xff] }
  0x10   :  { %v85_v2 = vld [vmem:[%s1392_s1 + $0x220] sm:$0xff]  ;;  %v500_v4 = vpack.c.bf16 %v84_v61, %v78_v60  ;;  %v83_v5 = vld [vmem:[%s1392_s1 + $0x210] sm:$0xff]  ;;  %v92_v6 = vld [vmem:[%s1392_s1 + $0x258] sm:$0xff] }
  0x11   :  { %559 = vmatpush1.bf16.msra.mxu1 %v558_v48  ;;  %v77_v3 = vld [vmem:[%s1392_s1 + $0x1e0] sm:$0xff]  ;;  %v98_v7 = vld [vmem:[%s1392_s1 + $0x288] sm:$0xff]  ;;  %v96_v9 = vld [vmem:[%s1392_s1 + $0x278] sm:$0xff]  ;;  %v566_v10 = vpack.c.bf16 %v85_v2, %v79_v1 }
  0x12   :  { %495 = vmatpush1.bf16.msra.mxu0 %v494_v51  ;;  %561 = vmatprep.subr.bf16.mxu1 %v560_v52  ;;  %v90_v8 = vld [vmem:[%s1392_s1 + $0x248] sm:$0xff]  ;;  %v502_v11 = vpack.c.bf16 %v83_v5, %v77_v3  ;;  %v568_v12 = vpack.c.bf16 %v98_v7, %v92_v6  ;;  %v91_v13 = vld [vmem:[%s1392_s1 + $0x250] sm:$0xff]  ;;  %v97_v14 = vld [vmem:[%s1392_s1 + $0x280] sm:$0xff] }
  0x13   :  { %497 = vmatprep.subr.bf16.mxu0 %v496_v56  ;;  %v89_v15 = vld [vmem:[%s1392_s1 + $0x240] sm:$0xff]  ;;  %v504_v16 = vpack.c.bf16 %v96_v9, %v90_v8  ;;  %v95_v17 = vld [vmem:[%s1392_s1 + $0x270] sm:$0xff]  ;;  %v104_v18 = vld [vmem:[%s1392_s1 + $0x2b8] sm:$0xff]  ;;  %v570_v22 = vpack.c.bf16 %v97_v14, %v91_v13 }
  0x14   :  { %v110_v19 = vld [vmem:[%s1392_s1 + $0x2e8] sm:$0xff]  ;;  %v108_v21 = vld [vmem:[%s1392_s1 + $0x2d8] sm:$0xff]  ;;  %v506_v23 = vpack.c.bf16 %v95_v17, %v89_v15  ;;  %v103_v25 = vld [vmem:[%s1392_s1 + $0x2b0] sm:$0xff] }
  0x15   :  { %563 = vmatpush1.bf16.msra.mxu1 %v562_v62  ;;  %v102_v20 = vld [vmem:[%s1392_s1 + $0x2a8] sm:$0xff]  ;;  %v572_v24 = vpack.c.bf16 %v110_v19, %v104_v18  ;;  %v109_v26 = vld [vmem:[%s1392_s1 + $0x2e0] sm:$0xff]  ;;  %v107_v29 = vld [vmem:[%s1392_s1 + $0x2d0] sm:$0xff] }
  0x16   :  { %499 = vmatpush1.bf16.msra.mxu0 %v498_v63  ;;  %565 = vmatprep.subr.bf16.mxu1 %v564_v0  ;;  %v101_v27 = vld [vmem:[%s1392_s1 + $0x2a0] sm:$0xff]  ;;  %v508_v28 = vpack.c.bf16 %v108_v21, %v102_v20  ;;  %v116_v30 = vld [vmem:[%s1392_s1 + $0x318] sm:$0xff]  ;;  %v122_v31 = vld [vmem:[%s1392_s1 + $0x348] sm:$0xff]  ;;  %v574_v34 = vpack.c.bf16 %v109_v26, %v103_v25 }
  0x17   :  { %501 = vmatprep.subr.bf16.mxu0 %v500_v4  ;;  %v114_v32 = vld [vmem:[%s1392_s1 + $0x308] sm:$0xff]  ;;  %v120_v33 = vld [vmem:[%s1392_s1 + $0x338] sm:$0xff]  ;;  %v510_v35 = vpack.c.bf16 %v107_v29, %v101_v27  ;;  %v576_v36 = vpack.c.bf16 %v122_v31, %v116_v30  ;;  %v115_v37 = vld [vmem:[%s1392_s1 + $0x310] sm:$0xff] }
  0x18   :  { %v121_v38 = vld [vmem:[%s1392_s1 + $0x340] sm:$0xff]  ;;  %v512_v40 = vpack.c.bf16 %v120_v33, %v114_v32  ;;  %v119_v41 = vld [vmem:[%s1392_s1 + $0x330] sm:$0xff]  ;;  %v128_v42 = vld [vmem:[%s1392_s1 + $0x378] sm:$0xff] }
  0x19   :  { %567 = vmatpush1.bf16.msra.mxu1 %v566_v10  ;;  %v113_v39 = vld [vmem:[%s1392_s1 + $0x300] sm:$0xff]  ;;  %v134_v43 = vld [vmem:[%s1392_s1 + $0x3a8] sm:$0xff]  ;;  %v132_v45 = vld [vmem:[%s1392_s1 + $0x398] sm:$0xff]  ;;  %v578_v46 = vpack.c.bf16 %v121_v38, %v115_v37 }
  0x1a   :  { %503 = vmatpush1.bf16.msra.mxu0 %v502_v11  ;;  %569 = vmatprep.subr.bf16.mxu1 %v568_v12  ;;  %v126_v44 = vld [vmem:[%s1392_s1 + $0x368] sm:$0xff]  ;;  %v514_v47 = vpack.c.bf16 %v119_v41, %v113_v39  ;;  %v580_v48 = vpack.c.bf16 %v134_v43, %v128_v42  ;;  %v127_v49 = vld [vmem:[%s1392_s1 + $0x370] sm:$0xff]  ;;  %v133_v50 = vld [vmem:[%s1392_s1 + $0x3a0] sm:$0xff] }
  0x1b   :  { %505 = vmatprep.subr.bf16.mxu0 %v504_v16  ;;  %v125_v51 = vld [vmem:[%s1392_s1 + $0x360] sm:$0xff]  ;;  %v516_v52 = vpack.c.bf16 %v132_v45, %v126_v44  ;;  %v131_v53 = vld [vmem:[%s1392_s1 + $0x390] sm:$0xff]  ;;  %v140_v54 = vld [vmem:[%s1392_s1 + $0x3d8] sm:$0xff]  ;;  %v582_v58 = vpack.c.bf16 %v133_v50, %v127_v49 }
  0x1c   :  { %v146_v55 = vld [vmem:[%s1392_s1 + $0x408] sm:$0xff]  ;;  %v144_v57 = vld [vmem:[%s1392_s1 + $0x3f8] sm:$0xff]  ;;  %v518_v59 = vpack.c.bf16 %v131_v53, %v125_v51  ;;  %v139_v61 = vld [vmem:[%s1392_s1 + $0x3d0] sm:$0xff] }
  0x1d   :  { %571 = vmatpush1.bf16.msra.mxu1 %v570_v22  ;;  %v138_v56 = vld [vmem:[%s1392_s1 + $0x3c8] sm:$0xff]  ;;  %v584_v60 = vpack.c.bf16 %v146_v55, %v140_v54  ;;  %v145_v62 = vld [vmem:[%s1392_s1 + $0x400] sm:$0xff]  ;;  %v143_v1 = vld [vmem:[%s1392_s1 + $0x3f0] sm:$0xff] }
  0x1e   :  { %507 = vmatpush1.bf16.msra.mxu0 %v506_v23  ;;  %573 = vmatprep.subr.bf16.mxu1 %v572_v24  ;;  %v137_v63 = vld [vmem:[%s1392_s1 + $0x3c0] sm:$0xff]  ;;  %v520_v0 = vpack.c.bf16 %v144_v57, %v138_v56  ;;  %v152_v2 = vld [vmem:[%s1392_s1 + $0x438] sm:$0xff]  ;;  %v158_v3 = vld [vmem:[%s1392_s1 + $0x468] sm:$0xff]  ;;  %v586_v6 = vpack.c.bf16 %v145_v62, %v139_v61 }
  0x1f   :  { %509 = vmatprep.subr.bf16.mxu0 %v508_v28  ;;  %v150_v4 = vld [vmem:[%s1392_s1 + $0x428] sm:$0xff]  ;;  %v156_v5 = vld [vmem:[%s1392_s1 + $0x458] sm:$0xff]  ;;  %v151_v7 = vld [vmem:[%s1392_s1 + $0x430] sm:$0xff]  ;;  %v522_v8 = vpack.c.bf16 %v143_v1, %v137_v63  ;;  %v588_v9 = vpack.c.bf16 %v158_v3, %v152_v2 }
  0x20   :  { %v157_v10 = vld [vmem:[%s1392_s1 + $0x460] sm:$0xff]  ;;  %v155_v12 = vld [vmem:[%s1392_s1 + $0x450] sm:$0xff]  ;;  %v524_v13 = vpack.c.bf16 %v156_v5, %v150_v4  ;;  %v164_v14 = vld [vmem:[%s1392_s1 + $0x498] sm:$0xff] }
  0x21   :  { %575 = vmatpush1.bf16.msra.mxu1 %v574_v34  ;;  %v149_v11 = vld [vmem:[%s1392_s1 + $0x420] sm:$0xff]  ;;  %v170_v15 = vld [vmem:[%s1392_s1 + $0x4c8] sm:$0xff]  ;;  %v168_v18 = vld [vmem:[%s1392_s1 + $0x4b8] sm:$0xff]  ;;  %v590_v19 = vpack.c.bf16 %v157_v10, %v151_v7 }
  0x22   :  { %511 = vmatpush1.bf16.msra.mxu0 %v510_v35  ;;  %577 = vmatprep.subr.bf16.mxu1 %v576_v36  ;;  %v1016_v16 = vld [vmem:[%s1393_s0 + $0x8] sm:$0xff]  ;;  %v526_v20 = vpack.c.bf16 %v155_v12, %v149_v11  ;;  %v592_v21 = vpack.c.bf16 %v170_v15, %v164_v14  ;;  %v163_v22 = vld [vmem:[%s1392_s1 + $0x490] sm:$0xff]  ;;  %v169_v23 = vld [vmem:[%s1392_s1 + $0x4c0] sm:$0xff] }
  0x23   :  { %513 = vmatprep.subr.bf16.mxu0 %v512_v40  ;;  %v162_v17 = vld [vmem:[%s1392_s1 + $0x488] sm:$0xff]  ;;  %356 = vmatprep.mubr.f32.mxu1 %v1016_v16  ;;  %v161_v24 = vld [vmem:[%s1392_s1 + $0x480] sm:$0xff]  ;;  %v167_v26 = vld [vmem:[%s1392_s1 + $0x4b0] sm:$0xff]  ;;  %v594_v31 = vpack.c.bf16 %v169_v23, %v163_v22 }
  0x24   :  { %273 = vmatprep.mubr.f32.mxu0 %v1016_v16  ;;  %v528_v25 = vpack.c.bf16 %v168_v18, %v162_v17  ;;  %v176_v27 = vld [vmem:[%s1392_s1 + $0x4f8] sm:$0xff]  ;;  %v182_v28 = vld [vmem:[%s1392_s1 + $0x528] sm:$0xff]  ;;  %v530_v32 = vpack.c.bf16 %v167_v26, %v161_v24  ;;  %v175_v34 = vld [vmem:[%s1392_s1 + $0x4f0] sm:$0xff] }
  0x25   :  { %579 = vmatpush1.bf16.msra.mxu1 %v578_v46  ;;  %v174_v29 = vld [vmem:[%s1392_s1 + $0x4e8] sm:$0xff]  ;;  %v180_v30 = vld [vmem:[%s1392_s1 + $0x518] sm:$0xff]  ;;  %v596_v33 = vpack.c.bf16 %v182_v28, %v176_v27  ;;  %v181_v35 = vld [vmem:[%s1392_s1 + $0x520] sm:$0xff] }
  0x26   :  { %515 = vmatpush1.bf16.msra.mxu0 %v514_v47  ;;  %581 = vmatprep.subr.bf16.mxu1 %v580_v48  ;;  %v173_v36 = vld [vmem:[%s1392_s1 + $0x4e0] sm:$0xff]  ;;  %v532_v37 = vpack.c.bf16 %v180_v30, %v174_v29  ;;  %v179_v38 = vld [vmem:[%s1392_s1 + $0x510] sm:$0xff]  ;;  %v188_v39 = vld [vmem:[%s1392_s1 + $0x558] sm:$0xff]  ;;  %v598_v43 = vpack.c.bf16 %v181_v35, %v175_v34 }
  0x27   :  { %517 = vmatprep.subr.bf16.mxu0 %v516_v52  ;;  %v194_v40 = vld [vmem:[%s1392_s1 + $0x588] sm:$0xff]  ;;  %v192_v42 = vld [vmem:[%s1392_s1 + $0x578] sm:$0xff]  ;;  %v534_v44 = vpack.c.bf16 %v179_v38, %v173_v36  ;;  %v187_v46 = vld [vmem:[%s1392_s1 + $0x550] sm:$0xff] }
  0x28   :  { %v186_v41 = vld [vmem:[%s1392_s1 + $0x548] sm:$0xff]  ;;  %v600_v45 = vpack.c.bf16 %v194_v40, %v188_v39  ;;  %v193_v47 = vld [vmem:[%s1392_s1 + $0x580] sm:$0xff]  ;;  %v191_v50 = vld [vmem:[%s1392_s1 + $0x570] sm:$0xff] }
  0x29   :  { %583 = vmatpush1.bf16.msra.mxu1 %v582_v58  ;;  %v185_v48 = vld [vmem:[%s1392_s1 + $0x540] sm:$0xff]  ;;  %v536_v49 = vpack.c.bf16 %v192_v42, %v186_v41  ;;  %v200_v51 = vld [vmem:[%s1392_s1 + $0x5b8] sm:$0xff]  ;;  %v206_v52 = vld [vmem:[%s1392_s1 + $0x5e8] sm:$0xff]  ;;  %v602_v55 = vpack.c.bf16 %v193_v47, %v187_v46 }
  0x2a   :  { %519 = vmatpush1.bf16.msra.mxu0 %v518_v59  ;;  %585 = vmatprep.subr.bf16.mxu1 %v584_v60  ;;  %v198_v53 = vld [vmem:[%s1392_s1 + $0x5a8] sm:$0xff]  ;;  %v204_v54 = vld [vmem:[%s1392_s1 + $0x5d8] sm:$0xff]  ;;  %v538_v56 = vpack.c.bf16 %v191_v50, %v185_v48  ;;  %v604_v57 = vpack.c.bf16 %v206_v52, %v200_v51  ;;  %v199_v58 = vld [vmem:[%s1392_s1 + $0x5b0] sm:$0xff] }
  0x2b   :  { %521 = vmatprep.subr.bf16.mxu0 %v520_v0  ;;  %v205_v59 = vld [vmem:[%s1392_s1 + $0x5e0] sm:$0xff]  ;;  %v540_v61 = vpack.c.bf16 %v204_v54, %v198_v53  ;;  %v203_v62 = vld [vmem:[%s1392_s1 + $0x5d0] sm:$0xff]  ;;  %v22_v63 = vld [vmem:[%s1392_s1 + $0x28] sm:$0xff] }
  0x2c   :  { %v197_v60 = vld [vmem:[%s1392_s1 + $0x5a0] sm:$0xff]  ;;  %v28_v0 = vld [vmem:[%s1392_s1 + $0x58] sm:$0xff]  ;;  %v606_v1 = vpack.c.bf16 %v205_v59, %v199_v58  ;;  %v27_v5 = vld [vmem:[%s1392_s1 + $0x50] sm:$0xff] }
  0x2d   :  { %587 = vmatpush1.bf16.msra.mxu1 %v586_v6  ;;  %v542_v2 = vpack.c.bf16 %v203_v62, %v197_v60  ;;  %v608_v3 = vpack.c.bf16 %v28_v0, %v22_v63  ;;  %v21_v4 = vld [vmem:[%s1392_s1 + $0x20] sm:$0xff]  ;;  %v34_v6 = vld [vmem:[%s1392_s1 + $0x88] sm:$0xff]  ;;  %v40_v7 = vld [vmem:[%s1392_s1 + $0xb8] sm:$0xff] }
  0x2e   :  { %523 = vmatpush1.bf16.msra.mxu0 %v522_v8  ;;  %589 = vmatprep.subr.bf16.mxu1 %v588_v9  ;;  %v1131_v8 = vld [vmem:[%s1393_s0] sm:$0xff]  ;;  %v610_v9 = vpack.c.bf16 %v27_v5, %v21_v4  ;;  %v612_v10 = vpack.c.bf16 %v40_v7, %v34_v6  ;;  %v39_v12 = vld [vmem:[%s1392_s1 + $0xb0] sm:$0xff]  ;;  %v52_v14 = vld [vmem:[%s1392_s1 + $0x118] sm:$0xff] }
  0x2f   :  { %525 = vmatprep.subr.bf16.mxu0 %v524_v13  ;;  %v33_v11 = vld [vmem:[%s1392_s1 + $0x80] sm:$0xff]  ;;  %v46_v13 = vld [vmem:[%s1392_s1 + $0xe8] sm:$0xff]  ;;  %v14_v15 = vld [vmem:[%s1393_s0 + $0x18] sm:$0xff] }
  0x30   :  { %v614_v17 = vpack.c.bf16 %v39_v12, %v33_v11  ;;  %v1153_v18 = vld [vmem:[%s1393_s0 + $0x10] sm:$0xff]  ;;  %v1164_v22 = vld [vmem:[%s1393_s0 + $0x28] sm:$0xff]  ;;  %v64_v24 = vld [vmem:[%s1392_s1 + $0x178] sm:$0xff] }
  0x31   :  { %591 = vmatpush1.bf16.msra.mxu1 %v590_v19  ;;  %v616_v19 = vpack.c.bf16 %v52_v14, %v46_v13  ;;  %v58_v23 = vld [vmem:[%s1392_s1 + $0x148] sm:$0xff]  ;;  %v1177_v26 = vld [vmem:[%s1393_s0 + $0x20] sm:$0xff]  ;;  %v63_v29 = vld [vmem:[%s1392_s1 + $0x170] sm:$0xff] }
  0x32   :  { %527 = vmatpush1.bf16.msra.mxu0 %v526_v20  ;;  %593 = vmatprep.subr.bf16.mxu1 %v592_v21  ;;  %v45_v20 = vld [vmem:[%s1392_s1 + $0xe0] sm:$0xff]  ;;  %v51_v21 = vld [vmem:[%s1392_s1 + $0x110] sm:$0xff]  ;;  %v620_v27 = vpack.c.bf16 %v64_v24, %v58_v23  ;;  %v70_v30 = vld [vmem:[%s1392_s1 + $0x1a8] sm:$0xff] }
  0x33   :  { %529 = vmatprep.subr.bf16.mxu0 %v528_v25  ;;  %v618_v25 = vpack.c.bf16 %v51_v21, %v45_v20  ;;  %v57_v28 = vld [vmem:[%s1392_s1 + $0x140] sm:$0xff]  ;;  %v75_v35 = vld [vmem:[%s1392_s1 + $0x1d0] sm:$0xff]  ;;  %v82_v36 = vld [vmem:[%s1392_s1 + $0x208] sm:$0xff] }
  0x34   :  { %v69_v34 = vld [vmem:[%s1392_s1 + $0x1a0] sm:$0xff]  ;;  %v87_v41 = vld [vmem:[%s1392_s1 + $0x230] sm:$0xff]  ;;  %v94_v42 = vld [vmem:[%s1392_s1 + $0x268] sm:$0xff] }
  0x35   :  { %595 = vmatpush1.bf16.msra.mxu1 %v594_v31  ;;  %v76_v31 = vld [vmem:[%s1392_s1 + $0x1d8] sm:$0xff]  ;;  %v626_v38 = vpack.c.bf16 %v75_v35, %v69_v34  ;;  %v81_v40 = vld [vmem:[%s1392_s1 + $0x200] sm:$0xff]  ;;  %v99_v46 = vld [vmem:[%s1392_s1 + $0x290] sm:$0xff] }
  0x36   :  { %531 = vmatpush1.bf16.msra.mxu0 %v530_v32  ;;  %597 = vmatprep.subr.bf16.mxu1 %v596_v33  ;;  %v622_v32 = vpack.c.bf16 %v63_v29, %v57_v28  ;;  %v624_v33 = vpack.c.bf16 %v76_v31, %v70_v30  ;;  %v106_v47 = vld [vmem:[%s1392_s1 + $0x2c8] sm:$0xff]  ;;  %v112_v48 = vld [vmem:[%s1392_s1 + $0x2f8] sm:$0xff]  ;;  %v105_v51 = vld [vmem:[%s1392_s1 + $0x2c0] sm:$0xff] }
  0x37   :  { %533 = vmatprep.subr.bf16.mxu0 %v532_v37  ;;  %v88_v37 = vld [vmem:[%s1392_s1 + $0x238] sm:$0xff]  ;;  %v636_v50 = vpack.c.bf16 %v112_v48, %v106_v47  ;;  %v111_v52 = vld [vmem:[%s1392_s1 + $0x2f0] sm:$0xff]  ;;  %v118_v53 = vld [vmem:[%s1392_s1 + $0x328] sm:$0xff] }
  0x38   :  { %v628_v39 = vpack.c.bf16 %v88_v37, %v82_v36  ;;  %v124_v54 = vld [vmem:[%s1392_s1 + $0x358] sm:$0xff]  ;;  %v123_v58 = vld [vmem:[%s1392_s1 + $0x350] sm:$0xff]  ;;  %v130_v59 = vld [vmem:[%s1392_s1 + $0x388] sm:$0xff] }
  0x39   :  { %599 = vmatpush1.bf16.msra.mxu1 %v598_v43  ;;  %v630_v43 = vpack.c.bf16 %v87_v41, %v81_v40  ;;  %v136_v60 = vld [vmem:[%s1392_s1 + $0x3b8] sm:$0xff]  ;;  %v129_v63 = vld [vmem:[%s1392_s1 + $0x380] sm:$0xff]  ;;  %v135_v0 = vld [vmem:[%s1392_s1 + $0x3b0] sm:$0xff] }
  0x3a   :  { %535 = vmatpush1.bf16.msra.mxu0 %v534_v44  ;;  %601 = vmatprep.subr.bf16.mxu1 %v600_v45  ;;  %v93_v45 = vld [vmem:[%s1392_s1 + $0x260] sm:$0xff]  ;;  %v644_v62 = vpack.c.bf16 %v136_v60, %v130_v59  ;;  %v147_v6 = vld [vmem:[%s1392_s1 + $0x410] sm:$0xff]  ;;  %v154_v7 = vld [vmem:[%s1392_s1 + $0x448] sm:$0xff] }
  0x3b   :  { %537 = vmatprep.subr.bf16.mxu0 %v536_v49  ;;  %v634_v49 = vpack.c.bf16 %v99_v46, %v93_v45  ;;  %v141_v5 = vld [vmem:[%s1392_s1 + $0x3e0] sm:$0xff]  ;;  %v159_v13 = vld [vmem:[%s1392_s1 + $0x470] sm:$0xff]  ;;  %v166_v14 = vld [vmem:[%s1392_s1 + $0x4a8] sm:$0xff] }
  0x3c   :  { %v153_v12 = vld [vmem:[%s1392_s1 + $0x440] sm:$0xff]  ;;  %v171_v21 = vld [vmem:[%s1392_s1 + $0x4d0] sm:$0xff]  ;;  %v178_v23 = vld [vmem:[%s1392_s1 + $0x508] sm:$0xff] }
  0x3d   :  { %603 = vmatpush1.bf16.msra.mxu1 %v602_v55  ;;  %v638_v55 = vpack.c.bf16 %v111_v52, %v105_v51  ;;  %v165_v20 = vld [vmem:[%s1392_s1 + $0x4a0] sm:$0xff]  ;;  %v184_v24 = vld [vmem:[%s1392_s1 + $0x538] sm:$0xff]  ;;  %v183_v29 = vld [vmem:[%s1392_s1 + $0x530] sm:$0xff] }
  0x3e   :  { %539 = vmatpush1.bf16.msra.mxu0 %v538_v56  ;;  %605 = vmatprep.subr.bf16.mxu1 %v604_v57  ;;  %v640_v56 = vpack.c.bf16 %v124_v54, %v118_v53  ;;  %v117_v57 = vld [vmem:[%s1392_s1 + $0x320] sm:$0xff]  ;;  %v190_v30 = vld [vmem:[%s1392_s1 + $0x568] sm:$0xff]  ;;  %v196_v31 = vld [vmem:[%s1392_s1 + $0x598] sm:$0xff] }
  0x3f   :  { %541 = vmatprep.subr.bf16.mxu0 %v540_v61  ;;  %v642_v61 = vpack.c.bf16 %v123_v58, %v117_v57  ;;  %v177_v28 = vld [vmem:[%s1392_s1 + $0x500] sm:$0xff]  ;;  %v195_v35 = vld [vmem:[%s1392_s1 + $0x590] sm:$0xff]  ;;  %v202_v36 = vld [vmem:[%s1392_s1 + $0x5c8] sm:$0xff] }
  0x40   :  { %v189_v34 = vld [vmem:[%s1392_s1 + $0x560] sm:$0xff]  ;;  %v208_v37 = vld [vmem:[%s1392_s1 + $0x5f8] sm:$0xff]  ;;  %v207_v41 = vld [vmem:[%s1392_s1 + $0x5f0] sm:$0xff] }
  0x41   :  { %607 = vmatpush1.bf16.msra.mxu1 %v606_v1  ;;  %v142_v1 = vld [vmem:[%s1392_s1 + $0x3e8] sm:$0xff]  ;;  %v201_v40 = vld [vmem:[%s1392_s1 + $0x5c0] sm:$0xff] }
  0x42   :  { %543 = vmatpush1.bf16.msra.mxu0 %v542_v2  ;;  %672 = vmatprep.subr.bf16.mxu1 %v608_v3  ;;  %v148_v2 = vld [vmem:[%s1392_s1 + $0x418] sm:$0xff] }
  0x43   :  { %609 = vmatprep.subr.bf16.mxu0 %v608_v3  ;;  %v646_v3 = vpack.c.bf16 %v135_v0, %v129_v63  ;;  %v648_v4 = vpack.c.bf16 %v148_v2, %v142_v1 }
  0x44   :  { %357 = vmatmul.mubr.f32.vlgmr.msra.gmra.mrb[0].mxu1 %v1131_v8 }
  0x45   :  { %688 = vmatpush1.bf16.msra.mxu1 %v610_v9  ;;  %274 = vmatmul.mubr.f32.vlgmr.msra.gmra.mrb[0].mxu0 %v1131_v8 }
  0x46   :  { %611 = vmatpush1.bf16.msra.mxu0 %v610_v9  ;;  %673 = vmatprep.subr.bf16.mxu1 %v612_v10  ;;  %v160_v9 = vld [vmem:[%s1392_s1 + $0x478] sm:$0xff] }
  0x47   :  { %613 = vmatprep.subr.bf16.mxu0 %v612_v10  ;;  %362 = vmatprep.mubr.f32.mxu1 %v14_v15  ;;  %v650_v10 = vpack.c.bf16 %v147_v6, %v141_v5  ;;  %v652_v11 = vpack.c.bf16 %v160_v9, %v154_v7 }
  0x48   :  { %363 = vmatmul.mubr.f32.gmra.mrb[2].mxu1 %v1153_v18  ;;  %279 = vmatprep.mubr.f32.mxu0 %v14_v15 }
  0x49   :  { %689 = vmatpush1.bf16.msra.mxu1 %v614_v17  ;;  %368 = vmatprep.mubr.f32.mxu1 %v1164_v22 }
  0x4a   :  { %615 = vmatpush1.bf16.msra.mxu0 %v614_v17  ;;  %674 = vmatprep.subr.bf16.mxu1 %v616_v19  ;;  %v654_v17 = vpack.c.bf16 %v159_v13, %v153_v12 }
  0x4b   :  { %617 = vmatprep.subr.bf16.mxu0 %v616_v19  ;;  %280 = vmatmul.mubr.f32.gmra.mrb[2].mxu0 %v1153_v18 }
  0x4c   :  { %369 = vmatmul.mubr.f32.gmra.mrb[4].mxu1 %v1177_v26  ;;  %285 = vmatprep.mubr.f32.mxu0 %v1164_v22 }
  0x4d   :  { %690 = vmatpush1.bf16.msra.mxu1 %v618_v25  ;;  %445 = vmatprep.mubr.f32.mxu1 %v14_v15  ;;  %v172_v15 = vld [vmem:[%s1392_s1 + $0x4d8] sm:$0xff] }
  0x4e   :  { %619 = vmatpush1.bf16.msra.mxu0 %v618_v25  ;;  %675 = vmatprep.subr.bf16.mxu1 %v620_v27  ;;  %v656_v19 = vpack.c.bf16 %v172_v15, %v166_v14  ;;  %v658_v25 = vpack.c.bf16 %v171_v21, %v165_v20 }
  0x4f   :  { %621 = vmatprep.subr.bf16.mxu0 %v620_v27  ;;  %286 = vmatmul.mubr.f32.gmra.mrb[4].mxu0 %v1177_v26  ;;  %v660_v27 = vpack.c.bf16 %v184_v24, %v178_v23 }
  0x50   :  { %439 = vmatprep.mubr.f32.mxu0 %v1016_v16  ;;  %v100_v16 = vld [vmem:[%s1392_s1 + $0x298] sm:$0xff] }
  0x51   :  { %691 = vmatpush1.bf16.msra.mxu1 %v622_v32  ;;  %v632_v44 = vpack.c.bf16 %v100_v16, %v94_v42  ;;  %v670_v42 = vpack.c.bf16 %v207_v41, %v201_v40 }
  0x52   :  { %623 = vmatpush1.bf16.msra.mxu0 %v622_v32  ;;  %676 = vmatprep.subr.bf16.mxu1 %v624_v33  ;;  %v662_v32 = vpack.c.bf16 %v183_v29, %v177_v28 }
  0x53   :  { %625 = vmatprep.subr.bf16.mxu0 %v624_v33  ;;  %v664_v33 = vpack.c.bf16 %v196_v31, %v190_v30 }
  0x55   :  { %692 = vmatpush1.bf16.msra.mxu1 %v626_v38 }
  0x56   :  { %627 = vmatpush1.bf16.msra.mxu0 %v626_v38  ;;  %677 = vmatprep.subr.bf16.mxu1 %v628_v39  ;;  %v666_v38 = vpack.c.bf16 %v195_v35, %v189_v34 }
  0x57   :  { %629 = vmatprep.subr.bf16.mxu0 %v628_v39  ;;  %v668_v39 = vpack.c.bf16 %v208_v37, %v202_v36 }
  0x59   :  { %693 = vmatpush1.bf16.msra.mxu1 %v630_v43 }
  0x5a   :  { %631 = vmatpush1.bf16.msra.mxu0 %v630_v43  ;;  %678 = vmatprep.subr.bf16.mxu1 %v632_v44 }
  0x5b   :  { %633 = vmatprep.subr.bf16.mxu0 %v632_v44 }
  0x5d   :  { %694 = vmatpush1.bf16.msra.mxu1 %v634_v49 }
  0x5e   :  { %635 = vmatpush1.bf16.msra.mxu0 %v634_v49  ;;  %679 = vmatprep.subr.bf16.mxu1 %v636_v50 }
  0x5f   :  { %637 = vmatprep.subr.bf16.mxu0 %v636_v50 }
  0x61   :  { %695 = vmatpush1.bf16.msra.mxu1 %v638_v55 }
  0x62   :  { %639 = vmatpush1.bf16.msra.mxu0 %v638_v55  ;;  %680 = vmatprep.subr.bf16.mxu1 %v640_v56 }
  0x63   :  { %641 = vmatprep.subr.bf16.mxu0 %v640_v56 }
  0x65   :  { %696 = vmatpush1.bf16.msra.mxu1 %v642_v61 }
  0x66   :  { %643 = vmatpush1.bf16.msra.mxu0 %v642_v61  ;;  %681 = vmatprep.subr.bf16.mxu1 %v644_v62 }
  0x67   :  { %645 = vmatprep.subr.bf16.mxu0 %v644_v62 }
  0x69   :  { %697 = vmatpush1.bf16.msra.mxu1 %v646_v3 }
  0x6a   :  { %647 = vmatpush1.bf16.msra.mxu0 %v646_v3  ;;  %682 = vmatprep.subr.bf16.mxu1 %v648_v4 }
  0x6b   :  { %649 = vmatprep.subr.bf16.mxu0 %v648_v4 }
  0x6d   :  { %698 = vmatpush1.bf16.msra.mxu1 %v650_v10 }
  0x6e   :  { %651 = vmatpush1.bf16.msra.mxu0 %v650_v10  ;;  %683 = vmatprep.subr.bf16.mxu1 %v652_v11 }
  0x6f   :  { %653 = vmatprep.subr.bf16.mxu0 %v652_v11 }
  0x71   :  { %699 = vmatpush1.bf16.msra.mxu1 %v654_v17 }
  0x72   :  { %655 = vmatpush1.bf16.msra.mxu0 %v654_v17  ;;  %684 = vmatprep.subr.bf16.mxu1 %v656_v19 }
  0x73   :  { %657 = vmatprep.subr.bf16.mxu0 %v656_v19 }
  0x75   :  { %700 = vmatpush1.bf16.msra.mxu1 %v658_v25 }
  0x76   :  { %659 = vmatpush1.bf16.msra.mxu0 %v658_v25  ;;  %685 = vmatprep.subr.bf16.mxu1 %v660_v27 }
  0x77   :  { %661 = vmatprep.subr.bf16.mxu0 %v660_v27 }
  0x79   :  { %701 = vmatpush1.bf16.msra.mxu1 %v662_v32 }
  0x7a   :  { %663 = vmatpush1.bf16.msra.mxu0 %v662_v32  ;;  %686 = vmatprep.subr.bf16.mxu1 %v664_v33 }
  0x7b   :  { %665 = vmatprep.subr.bf16.mxu0 %v664_v33 }
  0x7d   :  { %702 = vmatpush1.bf16.msra.mxu1 %v666_v38 }
  0x7e   :  { %667 = vmatpush1.bf16.msra.mxu0 %v666_v38  ;;  %687 = vmatprep.subr.bf16.mxu1 %v668_v39 }
  0x7f   :  { %669 = vmatprep.subr.bf16.mxu0 %v668_v39 }
  0x81   :  { %703 = vmatpush1.bf16.msra.mxu1 %v670_v42 }
  0x82   :  { %671 = vmatpush1.bf16.msra.mxu0 %v670_v42 }
  0x84   :  { %446 = vmatmul.mubr.f32.vlgmr.msra.gmra.mrb[6].mxu1 %v1153_v18 }
  0x85   :  { %440 = vmatmul.mubr.f32.vlgmr.msra.gmra.mrb[6].mxu0 %v1131_v8  ;;  %451 = vmatprep.mubr.f32.mxu1 %v1164_v22 }
  0x88   :  { %452 = vmatmul.mubr.f32.gmra.mrb[8].mxu1 %v1177_v26 }
 0x117   :  { %v358_v16 = vpop.f32.mrb[0].mxu1 }
 0x118   :  { %460 = vst [vmem:[%s1394_s2 + $0x10] sm:$0xff] %v358_v16  ;;  %v360_v43 = vpop.f32.mrb[1].mxu1  ;;  %v275_v44 = vpop.f32.mrb[0].mxu0 }
 0x119   :  { %461 = vst [vmem:[%s1394_s2 + $0x18] sm:$0xff] %v360_v43  ;;  %458 = vst [vmem:[%s1394_s2] sm:$0xff] %v275_v44  ;;  %v277_v8 = vpop.f32.mrb[1].mxu0 }
 0x11a   :  { %459 = vst [vmem:[%s1394_s2 + $0x8] sm:$0xff] %v277_v8 }
 0x11b   :  { %v364_v18 = vpop.f32.mrb[2].mxu1 }
 0x11c   :  { %466 = vst [vmem:[%s1394_s2 + $0x40] sm:$0xff] %v364_v18  ;;  %v366_v22 = vpop.f32.mrb[3].mxu1 }
 0x11d   :  { %467 = vst [vmem:[%s1394_s2 + $0x48] sm:$0xff] %v366_v22 }
 0x11e   :  { %v281_v26 = vpop.f32.mrb[2].mxu0 }
 0x11f   :  { %464 = vst [vmem:[%s1394_s2 + $0x30] sm:$0xff] %v281_v26  ;;  %v370_v45 = vpop.f32.mrb[4].mxu1  ;;  %v283_v46 = vpop.f32.mrb[3].mxu0 }
 0x120   :  { %472 = vst [vmem:[%s1394_s2 + $0x70] sm:$0xff] %v370_v45  ;;  %465 = vst [vmem:[%s1394_s2 + $0x38] sm:$0xff] %v283_v46  ;;  %v372_v47 = vpop.f32.mrb[5].mxu1 }
 0x121   :  { %473 = vst [vmem:[%s1394_s2 + $0x78] sm:$0xff] %v372_v47 }
 0x122   :  { %v287_v48 = vpop.f32.mrb[4].mxu0 }
 0x123   :  { %470 = vst [vmem:[%s1394_s2 + $0x60] sm:$0xff] %v287_v48  ;;  %v289_v49 = vpop.f32.mrb[5].mxu0 }
 0x124   :  { %471 = vst [vmem:[%s1394_s2 + $0x68] sm:$0xff] %v289_v49 }
 0x157   :  { %v447_v50 = vpop.f32.mrb[6].mxu1 }
 0x158   :  { %468 = vst [vmem:[%s1394_s2 + $0x50] sm:$0xff] %v447_v50  ;;  %v449_v51 = vpop.f32.mrb[7].mxu1  ;;  %v441_v52 = vpop.f32.mrb[6].mxu0 }
 0x159   :  { %469 = vst [vmem:[%s1394_s2 + $0x58] sm:$0xff] %v449_v51  ;;  %462 = vst [vmem:[%s1394_s2 + $0x20] sm:$0xff] %v441_v52  ;;  %v443_v53 = vpop.f32.mrb[7].mxu0 }
 0x15a   :  { %463 = vst [vmem:[%s1394_s2 + $0x28] sm:$0xff] %v443_v53 }
 0x15b   :  { %v453_v54 = vpop.f32.mrb[8].mxu1 }
 0x15c   :  { %474 = vst [vmem:[%s1394_s2 + $0x80] sm:$0xff] %v453_v54  ;;  %v455_v55 = vpop.f32.mrb[9].mxu1 }
 0x15d   :  { %475 = vst [vmem:[%s1394_s2 + $0x88] sm:$0xff] %v455_v55 }

// kernel: transformer_forward.63
= control target key start
LH: loop header
LB: loop body
LE: loop exit
PB: predicated region body
PF: predicated region fallthrough
CT: control target
= control target key end

     0   :  { %s1822_s1 = inlined_call_operand.vmem [shape: f32[256,1024], index: 1, kind: input, shape index: {}]   ;;  %s1823_s0 = inlined_call_operand.vmem [shape: f32[24,256], index: 0, kind: input, shape index: {}]   ;;  %s1824_s2 = inlined_call_operand.vmem [shape: f32[24,1024], index: 2, kind: output, shape index: {}]  }
   0x1   :  { %v18_v0 = vld [vmem:[%s1822_s1 + $0x8] sm:$0xff]  ;;  %v20_v2 = vld [vmem:[%s1822_s1 + $0x18] sm:$0xff]  ;;  %v17_v5 = vld [vmem:[%s1822_s1] sm:$0xff] }
   0x2   :  { %v26_v1 = vld [vmem:[%s1822_s1 + $0x48] sm:$0xff]  ;;  %v28_v4 = vld [vmem:[%s1822_s1 + $0x58] sm:$0xff]  ;;  %v25_v6 = vld [vmem:[%s1822_s1 + $0x40] sm:$0xff] }
   0x3   :  { %v657_v3 = vpack.c.bf16 %v26_v1, %v18_v0  ;;  %v721_v7 = vpack.c.bf16 %v28_v4, %v20_v2  ;;  %v659_v8 = vpack.c.bf16 %v25_v6, %v17_v5  ;;  %v19_v9 = vld [vmem:[%s1822_s1 + $0x10] sm:$0xff]  ;;  %v34_v11 = vld [vmem:[%s1822_s1 + $0x88] sm:$0xff]  ;;  %v36_v14 = vld [vmem:[%s1822_s1 + $0x98] sm:$0xff] }
   0x4   :  { %v27_v10 = vld [vmem:[%s1822_s1 + $0x50] sm:$0xff]  ;;  %v42_v13 = vld [vmem:[%s1822_s1 + $0xc8] sm:$0xff]  ;;  %v44_v15 = vld [vmem:[%s1822_s1 + $0xd8] sm:$0xff] }
   0x5   :  { %658 = vmatprep.subr.bf16.mxu0 %v657_v3  ;;  %v723_v12 = vpack.c.bf16 %v27_v10, %v19_v9  ;;  %722 = vmatprep.subr.bf16.mxu1 %v721_v7  ;;  %v661_v16 = vpack.c.bf16 %v42_v13, %v34_v11  ;;  %v725_v17 = vpack.c.bf16 %v44_v15, %v36_v14  ;;  %v33_v18 = vld [vmem:[%s1822_s1 + $0x80] sm:$0xff]  ;;  %v35_v20 = vld [vmem:[%s1822_s1 + $0x90] sm:$0xff]  ;;  %v50_v23 = vld [vmem:[%s1822_s1 + $0x108] sm:$0xff] }
   0x6   :  { %660 = vmatpush1.bf16.msra.mxu0 %v659_v8  ;;  %v41_v19 = vld [vmem:[%s1822_s1 + $0xc0] sm:$0xff]  ;;  %v43_v22 = vld [vmem:[%s1822_s1 + $0xd0] sm:$0xff]  ;;  %v58_v24 = vld [vmem:[%s1822_s1 + $0x148] sm:$0xff] }
   0x7   :  { %724 = vmatpush1.bf16.msra.mxu1 %v723_v12  ;;  %v663_v21 = vpack.c.bf16 %v41_v19, %v33_v18  ;;  %662 = vmatprep.subr.bf16.mxu0 %v661_v16  ;;  %v727_v25 = vpack.c.bf16 %v43_v22, %v35_v20  ;;  %v665_v26 = vpack.c.bf16 %v58_v24, %v50_v23  ;;  %v52_v27 = vld [vmem:[%s1822_s1 + $0x118] sm:$0xff]  ;;  %v49_v29 = vld [vmem:[%s1822_s1 + $0x100] sm:$0xff]  ;;  %v51_v32 = vld [vmem:[%s1822_s1 + $0x110] sm:$0xff] }
   0x8   :  { %726 = vmatprep.subr.bf16.mxu1 %v725_v17  ;;  %v60_v28 = vld [vmem:[%s1822_s1 + $0x158] sm:$0xff]  ;;  %v57_v31 = vld [vmem:[%s1822_s1 + $0x140] sm:$0xff]  ;;  %v59_v33 = vld [vmem:[%s1822_s1 + $0x150] sm:$0xff] }
   0x9   :  { %v729_v30 = vpack.c.bf16 %v60_v28, %v52_v27  ;;  %v667_v34 = vpack.c.bf16 %v57_v31, %v49_v29  ;;  %v66_v35 = vld [vmem:[%s1822_s1 + $0x188] sm:$0xff]  ;;  %v68_v37 = vld [vmem:[%s1822_s1 + $0x198] sm:$0xff]  ;;  %v731_v38 = vpack.c.bf16 %v59_v33, %v51_v32  ;;  %v65_v41 = vld [vmem:[%s1822_s1 + $0x180] sm:$0xff] }
   0xa   :  { %664 = vmatpush1.bf16.msra.mxu0 %v663_v21  ;;  %v74_v36 = vld [vmem:[%s1822_s1 + $0x1c8] sm:$0xff]  ;;  %v76_v40 = vld [vmem:[%s1822_s1 + $0x1d8] sm:$0xff]  ;;  %v73_v42 = vld [vmem:[%s1822_s1 + $0x1c0] sm:$0xff] }
   0xb   :  { %728 = vmatpush1.bf16.msra.mxu1 %v727_v25  ;;  %666 = vmatprep.subr.bf16.mxu0 %v665_v26  ;;  %v669_v39 = vpack.c.bf16 %v74_v36, %v66_v35  ;;  %v733_v43 = vpack.c.bf16 %v76_v40, %v68_v37  ;;  %v67_v44 = vld [vmem:[%s1822_s1 + $0x190] sm:$0xff]  ;;  %v82_v46 = vld [vmem:[%s1822_s1 + $0x208] sm:$0xff]  ;;  %v84_v48 = vld [vmem:[%s1822_s1 + $0x218] sm:$0xff]  ;;  %v671_v50 = vpack.c.bf16 %v73_v42, %v65_v41 }
   0xc   :  { %730 = vmatprep.subr.bf16.mxu1 %v729_v30  ;;  %v75_v45 = vld [vmem:[%s1822_s1 + $0x1d0] sm:$0xff]  ;;  %v90_v47 = vld [vmem:[%s1822_s1 + $0x248] sm:$0xff]  ;;  %v92_v49 = vld [vmem:[%s1822_s1 + $0x258] sm:$0xff] }
   0xd   :  { %v735_v51 = vpack.c.bf16 %v75_v45, %v67_v44  ;;  %v673_v52 = vpack.c.bf16 %v90_v47, %v82_v46  ;;  %v81_v53 = vld [vmem:[%s1822_s1 + $0x200] sm:$0xff]  ;;  %v83_v55 = vld [vmem:[%s1822_s1 + $0x210] sm:$0xff]  ;;  %v737_v56 = vpack.c.bf16 %v92_v49, %v84_v48  ;;  %v98_v58 = vld [vmem:[%s1822_s1 + $0x288] sm:$0xff] }
   0xe   :  { %668 = vmatpush1.bf16.msra.mxu0 %v667_v34  ;;  %v89_v54 = vld [vmem:[%s1822_s1 + $0x240] sm:$0xff]  ;;  %v91_v57 = vld [vmem:[%s1822_s1 + $0x250] sm:$0xff]  ;;  %v106_v59 = vld [vmem:[%s1822_s1 + $0x2c8] sm:$0xff] }
   0xf   :  { %732 = vmatpush1.bf16.msra.mxu1 %v731_v38  ;;  %670 = vmatprep.subr.bf16.mxu0 %v669_v39  ;;  %v100_v60 = vld [vmem:[%s1822_s1 + $0x298] sm:$0xff]  ;;  %v675_v62 = vpack.c.bf16 %v89_v54, %v81_v53  ;;  %v739_v63 = vpack.c.bf16 %v91_v57, %v83_v55  ;;  %v677_v0 = vpack.c.bf16 %v106_v59, %v98_v58  ;;  %v97_v1 = vld [vmem:[%s1822_s1 + $0x280] sm:$0xff]  ;;  %v99_v3 = vld [vmem:[%s1822_s1 + $0x290] sm:$0xff] }
  0x10   :  { %734 = vmatprep.subr.bf16.mxu1 %v733_v43  ;;  %v108_v61 = vld [vmem:[%s1822_s1 + $0x2d8] sm:$0xff]  ;;  %v105_v2 = vld [vmem:[%s1822_s1 + $0x2c0] sm:$0xff]  ;;  %v107_v5 = vld [vmem:[%s1822_s1 + $0x2d0] sm:$0xff] }
  0x11   :  { %v741_v4 = vpack.c.bf16 %v108_v61, %v100_v60  ;;  %v114_v6 = vld [vmem:[%s1822_s1 + $0x308] sm:$0xff]  ;;  %v116_v8 = vld [vmem:[%s1822_s1 + $0x318] sm:$0xff]  ;;  %v679_v10 = vpack.c.bf16 %v105_v2, %v97_v1  ;;  %v743_v11 = vpack.c.bf16 %v107_v5, %v99_v3  ;;  %v113_v13 = vld [vmem:[%s1822_s1 + $0x300] sm:$0xff] }
  0x12   :  { %672 = vmatpush1.bf16.msra.mxu0 %v671_v50  ;;  %v122_v7 = vld [vmem:[%s1822_s1 + $0x348] sm:$0xff]  ;;  %v124_v9 = vld [vmem:[%s1822_s1 + $0x358] sm:$0xff]  ;;  %v121_v14 = vld [vmem:[%s1822_s1 + $0x340] sm:$0xff] }
  0x13   :  { %736 = vmatpush1.bf16.msra.mxu1 %v735_v51  ;;  %674 = vmatprep.subr.bf16.mxu0 %v673_v52  ;;  %v681_v12 = vpack.c.bf16 %v122_v7, %v114_v6  ;;  %v115_v15 = vld [vmem:[%s1822_s1 + $0x310] sm:$0xff]  ;;  %v745_v16 = vpack.c.bf16 %v124_v9, %v116_v8  ;;  %v130_v18 = vld [vmem:[%s1822_s1 + $0x388] sm:$0xff]  ;;  %v132_v20 = vld [vmem:[%s1822_s1 + $0x398] sm:$0xff]  ;;  %v683_v22 = vpack.c.bf16 %v121_v14, %v113_v13 }
  0x14   :  { %738 = vmatprep.subr.bf16.mxu1 %v737_v56  ;;  %v123_v17 = vld [vmem:[%s1822_s1 + $0x350] sm:$0xff]  ;;  %v138_v19 = vld [vmem:[%s1822_s1 + $0x3c8] sm:$0xff]  ;;  %v140_v21 = vld [vmem:[%s1822_s1 + $0x3d8] sm:$0xff] }
  0x15   :  { %v747_v23 = vpack.c.bf16 %v123_v17, %v115_v15  ;;  %v685_v24 = vpack.c.bf16 %v138_v19, %v130_v18  ;;  %v129_v25 = vld [vmem:[%s1822_s1 + $0x380] sm:$0xff]  ;;  %v131_v27 = vld [vmem:[%s1822_s1 + $0x390] sm:$0xff]  ;;  %v749_v28 = vpack.c.bf16 %v140_v21, %v132_v20  ;;  %v146_v30 = vld [vmem:[%s1822_s1 + $0x408] sm:$0xff] }
  0x16   :  { %676 = vmatpush1.bf16.msra.mxu0 %v675_v62  ;;  %v137_v26 = vld [vmem:[%s1822_s1 + $0x3c0] sm:$0xff]  ;;  %v139_v29 = vld [vmem:[%s1822_s1 + $0x3d0] sm:$0xff]  ;;  %v154_v31 = vld [vmem:[%s1822_s1 + $0x448] sm:$0xff] }
  0x17   :  { %740 = vmatpush1.bf16.msra.mxu1 %v739_v63  ;;  %678 = vmatprep.subr.bf16.mxu0 %v677_v0  ;;  %v148_v32 = vld [vmem:[%s1822_s1 + $0x418] sm:$0xff]  ;;  %v687_v34 = vpack.c.bf16 %v137_v26, %v129_v25  ;;  %v751_v35 = vpack.c.bf16 %v139_v29, %v131_v27  ;;  %v689_v36 = vpack.c.bf16 %v154_v31, %v146_v30  ;;  %v145_v37 = vld [vmem:[%s1822_s1 + $0x400] sm:$0xff]  ;;  %v147_v39 = vld [vmem:[%s1822_s1 + $0x410] sm:$0xff] }
  0x18   :  { %742 = vmatprep.subr.bf16.mxu1 %v741_v4  ;;  %v156_v33 = vld [vmem:[%s1822_s1 + $0x458] sm:$0xff]  ;;  %v153_v38 = vld [vmem:[%s1822_s1 + $0x440] sm:$0xff]  ;;  %v155_v41 = vld [vmem:[%s1822_s1 + $0x450] sm:$0xff] }
  0x19   :  { %v753_v40 = vpack.c.bf16 %v156_v33, %v148_v32  ;;  %v162_v42 = vld [vmem:[%s1822_s1 + $0x488] sm:$0xff]  ;;  %v164_v44 = vld [vmem:[%s1822_s1 + $0x498] sm:$0xff]  ;;  %v691_v46 = vpack.c.bf16 %v153_v38, %v145_v37  ;;  %v755_v47 = vpack.c.bf16 %v155_v41, %v147_v39  ;;  %v161_v49 = vld [vmem:[%s1822_s1 + $0x480] sm:$0xff] }
  0x1a   :  { %680 = vmatpush1.bf16.msra.mxu0 %v679_v10  ;;  %v170_v43 = vld [vmem:[%s1822_s1 + $0x4c8] sm:$0xff]  ;;  %v172_v45 = vld [vmem:[%s1822_s1 + $0x4d8] sm:$0xff]  ;;  %v169_v50 = vld [vmem:[%s1822_s1 + $0x4c0] sm:$0xff] }
  0x1b   :  { %744 = vmatpush1.bf16.msra.mxu1 %v743_v11  ;;  %682 = vmatprep.subr.bf16.mxu0 %v681_v12  ;;  %v693_v48 = vpack.c.bf16 %v170_v43, %v162_v42  ;;  %v163_v51 = vld [vmem:[%s1822_s1 + $0x490] sm:$0xff]  ;;  %v757_v52 = vpack.c.bf16 %v172_v45, %v164_v44  ;;  %v178_v54 = vld [vmem:[%s1822_s1 + $0x508] sm:$0xff]  ;;  %v180_v56 = vld [vmem:[%s1822_s1 + $0x518] sm:$0xff]  ;;  %v695_v58 = vpack.c.bf16 %v169_v50, %v161_v49 }
  0x1c   :  { %746 = vmatprep.subr.bf16.mxu1 %v745_v16  ;;  %v171_v53 = vld [vmem:[%s1822_s1 + $0x4d0] sm:$0xff]  ;;  %v186_v55 = vld [vmem:[%s1822_s1 + $0x548] sm:$0xff]  ;;  %v188_v57 = vld [vmem:[%s1822_s1 + $0x558] sm:$0xff] }
  0x1d   :  { %v759_v59 = vpack.c.bf16 %v171_v53, %v163_v51  ;;  %v697_v60 = vpack.c.bf16 %v186_v55, %v178_v54  ;;  %v177_v61 = vld [vmem:[%s1822_s1 + $0x500] sm:$0xff]  ;;  %v179_v63 = vld [vmem:[%s1822_s1 + $0x510] sm:$0xff]  ;;  %v761_v0 = vpack.c.bf16 %v188_v57, %v180_v56  ;;  %v194_v2 = vld [vmem:[%s1822_s1 + $0x588] sm:$0xff] }
  0x1e   :  { %684 = vmatpush1.bf16.msra.mxu0 %v683_v22  ;;  %v185_v62 = vld [vmem:[%s1822_s1 + $0x540] sm:$0xff]  ;;  %v187_v1 = vld [vmem:[%s1822_s1 + $0x550] sm:$0xff]  ;;  %v202_v3 = vld [vmem:[%s1822_s1 + $0x5c8] sm:$0xff] }
  0x1f   :  { %748 = vmatpush1.bf16.msra.mxu1 %v747_v23  ;;  %686 = vmatprep.subr.bf16.mxu0 %v685_v24  ;;  %v196_v4 = vld [vmem:[%s1822_s1 + $0x598] sm:$0xff]  ;;  %v699_v6 = vpack.c.bf16 %v185_v62, %v177_v61  ;;  %v193_v7 = vld [vmem:[%s1822_s1 + $0x580] sm:$0xff]  ;;  %v763_v8 = vpack.c.bf16 %v187_v1, %v179_v63  ;;  %v701_v9 = vpack.c.bf16 %v202_v3, %v194_v2  ;;  %v195_v11 = vld [vmem:[%s1822_s1 + $0x590] sm:$0xff] }
  0x20   :  { %750 = vmatprep.subr.bf16.mxu1 %v749_v28  ;;  %v204_v5 = vld [vmem:[%s1822_s1 + $0x5d8] sm:$0xff]  ;;  %v201_v10 = vld [vmem:[%s1822_s1 + $0x5c0] sm:$0xff]  ;;  %v203_v12 = vld [vmem:[%s1822_s1 + $0x5d0] sm:$0xff] }
  0x21   :  { %v765_v13 = vpack.c.bf16 %v204_v5, %v196_v4  ;;  %v210_v14 = vld [vmem:[%s1822_s1 + $0x608] sm:$0xff]  ;;  %v212_v17 = vld [vmem:[%s1822_s1 + $0x618] sm:$0xff]  ;;  %v703_v19 = vpack.c.bf16 %v201_v10, %v193_v7  ;;  %v767_v20 = vpack.c.bf16 %v203_v12, %v195_v11  ;;  %v209_v22 = vld [vmem:[%s1822_s1 + $0x600] sm:$0xff] }
  0x22   :  { %688 = vmatpush1.bf16.msra.mxu0 %v687_v34  ;;  %v218_v15 = vld [vmem:[%s1822_s1 + $0x648] sm:$0xff]  ;;  %v220_v18 = vld [vmem:[%s1822_s1 + $0x658] sm:$0xff]  ;;  %v217_v23 = vld [vmem:[%s1822_s1 + $0x640] sm:$0xff] }
  0x23   :  { %752 = vmatpush1.bf16.msra.mxu1 %v751_v35  ;;  %690 = vmatprep.subr.bf16.mxu0 %v689_v36  ;;  %v1225_v16 = vld [vmem:[%s1823_s0 + $0x8] sm:$0xff]  ;;  %v705_v21 = vpack.c.bf16 %v218_v15, %v210_v14  ;;  %v211_v24 = vld [vmem:[%s1822_s1 + $0x610] sm:$0xff]  ;;  %v769_v25 = vpack.c.bf16 %v220_v18, %v212_v17  ;;  %v228_v29 = vld [vmem:[%s1822_s1 + $0x698] sm:$0xff]  ;;  %v707_v31 = vpack.c.bf16 %v217_v23, %v209_v22 }
  0x24   :  { %754 = vmatprep.subr.bf16.mxu1 %v753_v40  ;;  %337 = vmatprep.mubr.f32.mxu0 %v1225_v16  ;;  %v219_v26 = vld [vmem:[%s1822_s1 + $0x650] sm:$0xff]  ;;  %v226_v27 = vld [vmem:[%s1822_s1 + $0x688] sm:$0xff]  ;;  %v236_v30 = vld [vmem:[%s1822_s1 + $0x6d8] sm:$0xff] }
  0x25   :  { %420 = vmatprep.mubr.f32.mxu1 %v1225_v16  ;;  %v234_v28 = vld [vmem:[%s1822_s1 + $0x6c8] sm:$0xff]  ;;  %v771_v32 = vpack.c.bf16 %v219_v26, %v211_v24  ;;  %v225_v34 = vld [vmem:[%s1822_s1 + $0x680] sm:$0xff]  ;;  %v227_v36 = vld [vmem:[%s1822_s1 + $0x690] sm:$0xff]  ;;  %v773_v37 = vpack.c.bf16 %v236_v30, %v228_v29 }
  0x26   :  { %692 = vmatpush1.bf16.msra.mxu0 %v691_v46  ;;  %v709_v33 = vpack.c.bf16 %v234_v28, %v226_v27  ;;  %v233_v35 = vld [vmem:[%s1822_s1 + $0x6c0] sm:$0xff]  ;;  %v235_v38 = vld [vmem:[%s1822_s1 + $0x6d0] sm:$0xff]  ;;  %v242_v39 = vld [vmem:[%s1822_s1 + $0x708] sm:$0xff] }
  0x27   :  { %756 = vmatpush1.bf16.msra.mxu1 %v755_v47  ;;  %694 = vmatprep.subr.bf16.mxu0 %v693_v48  ;;  %v250_v40 = vld [vmem:[%s1822_s1 + $0x748] sm:$0xff]  ;;  %v244_v41 = vld [vmem:[%s1822_s1 + $0x718] sm:$0xff]  ;;  %v711_v43 = vpack.c.bf16 %v233_v35, %v225_v34  ;;  %v775_v44 = vpack.c.bf16 %v235_v38, %v227_v36  ;;  %v241_v46 = vld [vmem:[%s1822_s1 + $0x700] sm:$0xff] }
  0x28   :  { %758 = vmatprep.subr.bf16.mxu1 %v757_v52  ;;  %v252_v42 = vld [vmem:[%s1822_s1 + $0x758] sm:$0xff]  ;;  %v713_v45 = vpack.c.bf16 %v250_v40, %v242_v39  ;;  %v249_v47 = vld [vmem:[%s1822_s1 + $0x740] sm:$0xff]  ;;  %v243_v48 = vld [vmem:[%s1822_s1 + $0x710] sm:$0xff] }
  0x29   :  { %v777_v49 = vpack.c.bf16 %v252_v42, %v244_v41  ;;  %v251_v50 = vld [vmem:[%s1822_s1 + $0x750] sm:$0xff]  ;;  %v258_v51 = vld [vmem:[%s1822_s1 + $0x788] sm:$0xff]  ;;  %v260_v53 = vld [vmem:[%s1822_s1 + $0x798] sm:$0xff]  ;;  %v715_v55 = vpack.c.bf16 %v249_v47, %v241_v46 }
  0x2a   :  { %696 = vmatpush1.bf16.msra.mxu0 %v695_v58  ;;  %v266_v52 = vld [vmem:[%s1822_s1 + $0x7c8] sm:$0xff]  ;;  %v268_v54 = vld [vmem:[%s1822_s1 + $0x7d8] sm:$0xff]  ;;  %v779_v56 = vpack.c.bf16 %v251_v50, %v243_v48  ;;  %v257_v58 = vld [vmem:[%s1822_s1 + $0x780] sm:$0xff] }
  0x2b   :  { %760 = vmatpush1.bf16.msra.mxu1 %v759_v59  ;;  %698 = vmatprep.subr.bf16.mxu0 %v697_v60  ;;  %v717_v57 = vpack.c.bf16 %v266_v52, %v258_v51  ;;  %v265_v59 = vld [vmem:[%s1822_s1 + $0x7c0] sm:$0xff]  ;;  %v259_v60 = vld [vmem:[%s1822_s1 + $0x790] sm:$0xff]  ;;  %v781_v61 = vpack.c.bf16 %v268_v54, %v260_v53  ;;  %v22_v63 = vld [vmem:[%s1822_s1 + $0x28] sm:$0xff] }
  0x2c   :  { %762 = vmatprep.subr.bf16.mxu1 %v761_v0  ;;  %v267_v62 = vld [vmem:[%s1822_s1 + $0x7d0] sm:$0xff]  ;;  %v30_v0 = vld [vmem:[%s1822_s1 + $0x68] sm:$0xff]  ;;  %v24_v1 = vld [vmem:[%s1822_s1 + $0x38] sm:$0xff]  ;;  %v719_v3 = vpack.c.bf16 %v265_v59, %v257_v58 }
  0x2d   :  { %v32_v2 = vld [vmem:[%s1822_s1 + $0x78] sm:$0xff]  ;;  %v783_v4 = vpack.c.bf16 %v267_v62, %v259_v60  ;;  %v785_v5 = vpack.c.bf16 %v30_v0, %v22_v63  ;;  %v29_v7 = vld [vmem:[%s1822_s1 + $0x60] sm:$0xff]  ;;  %v31_v10 = vld [vmem:[%s1822_s1 + $0x70] sm:$0xff] }
  0x2e   :  { %700 = vmatpush1.bf16.msra.mxu0 %v699_v6  ;;  %v21_v6 = vld [vmem:[%s1822_s1 + $0x20] sm:$0xff]  ;;  %v38_v11 = vld [vmem:[%s1822_s1 + $0xa8] sm:$0xff]  ;;  %v48_v14 = vld [vmem:[%s1822_s1 + $0xf8] sm:$0xff] }
  0x2f   :  { %764 = vmatpush1.bf16.msra.mxu1 %v763_v8  ;;  %702 = vmatprep.subr.bf16.mxu0 %v701_v9  ;;  %v23_v8 = vld [vmem:[%s1822_s1 + $0x30] sm:$0xff]  ;;  %v849_v9 = vpack.c.bf16 %v32_v2, %v24_v1  ;;  %v46_v12 = vld [vmem:[%s1822_s1 + $0xe8] sm:$0xff]  ;;  %v1358_v15 = vld [vmem:[%s1823_s0] sm:$0xff]  ;;  %v787_v17 = vpack.c.bf16 %v29_v7, %v21_v6 }
  0x30   :  { %766 = vmatprep.subr.bf16.mxu1 %v765_v13  ;;  %v40_v13 = vld [vmem:[%s1822_s1 + $0xb8] sm:$0xff]  ;;  %v851_v18 = vpack.c.bf16 %v31_v10, %v23_v8  ;;  %v39_v22 = vld [vmem:[%s1822_s1 + $0xb0] sm:$0xff]  ;;  %v62_v26 = vld [vmem:[%s1822_s1 + $0x168] sm:$0xff] }
  0x31   :  { %v853_v23 = vpack.c.bf16 %v48_v14, %v40_v13  ;;  %v47_v24 = vld [vmem:[%s1822_s1 + $0xf0] sm:$0xff]  ;;  %v56_v27 = vld [vmem:[%s1822_s1 + $0x138] sm:$0xff]  ;;  %v78_v38 = vld [vmem:[%s1822_s1 + $0x1e8] sm:$0xff] }
  0x32   :  { %704 = vmatpush1.bf16.msra.mxu0 %v703_v19  ;;  %v789_v19 = vpack.c.bf16 %v46_v12, %v38_v11  ;;  %v64_v28 = vld [vmem:[%s1822_s1 + $0x178] sm:$0xff]  ;;  %v855_v30 = vpack.c.bf16 %v47_v24, %v39_v22  ;;  %v55_v34 = vld [vmem:[%s1822_s1 + $0x130] sm:$0xff]  ;;  %v94_v50 = vld [vmem:[%s1822_s1 + $0x268] sm:$0xff] }
  0x33   :  { %768 = vmatpush1.bf16.msra.mxu1 %v767_v20  ;;  %706 = vmatprep.subr.bf16.mxu0 %v705_v21  ;;  %v37_v20 = vld [vmem:[%s1822_s1 + $0xa0] sm:$0xff]  ;;  %v857_v35 = vpack.c.bf16 %v64_v28, %v56_v27  ;;  %v63_v36 = vld [vmem:[%s1822_s1 + $0x170] sm:$0xff]  ;;  %v72_v39 = vld [vmem:[%s1822_s1 + $0x1b8] sm:$0xff] }
  0x34   :  { %770 = vmatprep.subr.bf16.mxu1 %v769_v25  ;;  %v45_v21 = vld [vmem:[%s1822_s1 + $0xe0] sm:$0xff]  ;;  %v54_v25 = vld [vmem:[%s1822_s1 + $0x128] sm:$0xff]  ;;  %v80_v40 = vld [vmem:[%s1822_s1 + $0x1f8] sm:$0xff]  ;;  %v859_v42 = vpack.c.bf16 %v63_v36, %v55_v34 }
  0x35   :  { %v791_v29 = vpack.c.bf16 %v45_v21, %v37_v20  ;;  %v71_v46 = vld [vmem:[%s1822_s1 + $0x1b0] sm:$0xff]  ;;  %v861_v47 = vpack.c.bf16 %v80_v40, %v72_v39  ;;  %v88_v51 = vld [vmem:[%s1822_s1 + $0x238] sm:$0xff]  ;;  %v110_v62 = vld [vmem:[%s1822_s1 + $0x2e8] sm:$0xff] }
  0x36   :  { %708 = vmatpush1.bf16.msra.mxu0 %v707_v31  ;;  %v793_v31 = vpack.c.bf16 %v62_v26, %v54_v25  ;;  %v79_v48 = vld [vmem:[%s1822_s1 + $0x1f0] sm:$0xff]  ;;  %v96_v52 = vld [vmem:[%s1822_s1 + $0x278] sm:$0xff]  ;;  %v101_v2 = vld [vmem:[%s1822_s1 + $0x2a0] sm:$0xff] }
  0x37   :  { %772 = vmatpush1.bf16.msra.mxu1 %v771_v32  ;;  %710 = vmatprep.subr.bf16.mxu0 %v709_v33  ;;  %v53_v32 = vld [vmem:[%s1822_s1 + $0x120] sm:$0xff]  ;;  %v863_v54 = vpack.c.bf16 %v79_v48, %v71_v46  ;;  %v87_v58 = vld [vmem:[%s1822_s1 + $0x230] sm:$0xff]  ;;  %v865_v59 = vpack.c.bf16 %v96_v52, %v88_v51  ;;  %v104_v63 = vld [vmem:[%s1822_s1 + $0x2b8] sm:$0xff] }
  0x38   :  { %774 = vmatprep.subr.bf16.mxu1 %v773_v37  ;;  %v61_v33 = vld [vmem:[%s1822_s1 + $0x160] sm:$0xff]  ;;  %v70_v37 = vld [vmem:[%s1822_s1 + $0x1a8] sm:$0xff]  ;;  %v95_v60 = vld [vmem:[%s1822_s1 + $0x270] sm:$0xff] }
  0x39   :  { %v795_v41 = vpack.c.bf16 %v61_v33, %v53_v32  ;;  %v112_v0 = vld [vmem:[%s1822_s1 + $0x2f8] sm:$0xff]  ;;  %v109_v6 = vld [vmem:[%s1822_s1 + $0x2e0] sm:$0xff]  ;;  %v103_v7 = vld [vmem:[%s1822_s1 + $0x2b0] sm:$0xff] }
  0x3a   :  { %712 = vmatpush1.bf16.msra.mxu0 %v711_v43  ;;  %v797_v43 = vpack.c.bf16 %v78_v38, %v70_v37  ;;  %v1475_v8 = vld [vmem:[%s1823_s0 + $0x10] sm:$0xff]  ;;  %v118_v11 = vld [vmem:[%s1822_s1 + $0x328] sm:$0xff]  ;;  %v120_v13 = vld [vmem:[%s1822_s1 + $0x338] sm:$0xff] }
  0x3b   :  { %776 = vmatpush1.bf16.msra.mxu1 %v775_v44  ;;  %714 = vmatprep.subr.bf16.mxu0 %v713_v45  ;;  %v69_v44 = vld [vmem:[%s1822_s1 + $0x1a0] sm:$0xff]  ;;  %v111_v10 = vld [vmem:[%s1822_s1 + $0x2f0] sm:$0xff]  ;;  %v126_v12 = vld [vmem:[%s1822_s1 + $0x368] sm:$0xff] }
  0x3c   :  { %778 = vmatprep.subr.bf16.mxu1 %v777_v49  ;;  %v77_v45 = vld [vmem:[%s1822_s1 + $0x1e0] sm:$0xff]  ;;  %v86_v49 = vld [vmem:[%s1822_s1 + $0x228] sm:$0xff]  ;;  %v128_v14 = vld [vmem:[%s1822_s1 + $0x378] sm:$0xff]  ;;  %v871_v20 = vpack.c.bf16 %v111_v10, %v103_v7  ;;  %v809_v21 = vpack.c.bf16 %v126_v12, %v118_v11 }
  0x3d   :  { %v799_v53 = vpack.c.bf16 %v77_v45, %v69_v44  ;;  %v117_v22 = vld [vmem:[%s1822_s1 + $0x320] sm:$0xff]  ;;  %v119_v24 = vld [vmem:[%s1822_s1 + $0x330] sm:$0xff]  ;;  %v873_v25 = vpack.c.bf16 %v128_v14, %v120_v13  ;;  %v134_v27 = vld [vmem:[%s1822_s1 + $0x3a8] sm:$0xff] }
  0x3e   :  { %716 = vmatpush1.bf16.msra.mxu0 %v715_v55  ;;  %v801_v55 = vpack.c.bf16 %v94_v50, %v86_v49  ;;  %v127_v26 = vld [vmem:[%s1822_s1 + $0x370] sm:$0xff]  ;;  %v142_v28 = vld [vmem:[%s1822_s1 + $0x3e8] sm:$0xff]  ;;  %v133_v34 = vld [vmem:[%s1822_s1 + $0x3a0] sm:$0xff] }
  0x3f   :  { %780 = vmatpush1.bf16.msra.mxu1 %v779_v56  ;;  %718 = vmatprep.subr.bf16.mxu0 %v717_v57  ;;  %v85_v56 = vld [vmem:[%s1822_s1 + $0x220] sm:$0xff]  ;;  %v875_v32 = vpack.c.bf16 %v127_v26, %v119_v24  ;;  %v813_v33 = vpack.c.bf16 %v142_v28, %v134_v27  ;;  %v135_v36 = vld [vmem:[%s1822_s1 + $0x3b0] sm:$0xff]  ;;  %v150_v39 = vld [vmem:[%s1822_s1 + $0x428] sm:$0xff] }
  0x40   :  { %782 = vmatprep.subr.bf16.mxu1 %v781_v61  ;;  %v93_v57 = vld [vmem:[%s1822_s1 + $0x260] sm:$0xff]  ;;  %v102_v61 = vld [vmem:[%s1822_s1 + $0x2a8] sm:$0xff]  ;;  %v143_v38 = vld [vmem:[%s1822_s1 + $0x3f0] sm:$0xff] }
  0x41   :  { %v803_v1 = vpack.c.bf16 %v93_v57, %v85_v56  ;;  %v158_v40 = vld [vmem:[%s1822_s1 + $0x468] sm:$0xff]  ;;  %v879_v44 = vpack.c.bf16 %v143_v38, %v135_v36  ;;  %v149_v46 = vld [vmem:[%s1822_s1 + $0x420] sm:$0xff]  ;;  %v151_v48 = vld [vmem:[%s1822_s1 + $0x430] sm:$0xff] }
  0x42   :  { %720 = vmatpush1.bf16.msra.mxu0 %v719_v3  ;;  %v1464_v3 = vld [vmem:[%s1823_s0 + $0x18] sm:$0xff]  ;;  %v817_v45 = vpack.c.bf16 %v158_v40, %v150_v39  ;;  %v159_v49 = vld [vmem:[%s1822_s1 + $0x470] sm:$0xff]  ;;  %v166_v50 = vld [vmem:[%s1822_s1 + $0x4a8] sm:$0xff] }
  0x43   :  { %784 = vmatpush1.bf16.msra.mxu1 %v783_v4  ;;  %786 = vmatprep.subr.bf16.mxu0 %v785_v5  ;;  %v867_v4 = vpack.c.bf16 %v95_v60, %v87_v58  ;;  %v805_v5 = vpack.c.bf16 %v110_v62, %v102_v61  ;;  %v174_v51 = vld [vmem:[%s1822_s1 + $0x4e8] sm:$0xff]  ;;  %v168_v52 = vld [vmem:[%s1822_s1 + $0x4b8] sm:$0xff]  ;;  %v165_v57 = vld [vmem:[%s1822_s1 + $0x4a0] sm:$0xff] }
  0x44   :  { %850 = vmatprep.subr.bf16.mxu1 %v849_v9  ;;  %v869_v9 = vpack.c.bf16 %v112_v0, %v104_v63  ;;  %v821_v56 = vpack.c.bf16 %v174_v51, %v166_v50  ;;  %v173_v58 = vld [vmem:[%s1822_s1 + $0x4e0] sm:$0xff]  ;;  %v175_v61 = vld [vmem:[%s1822_s1 + $0x4f0] sm:$0xff]  ;;  %v182_v62 = vld [vmem:[%s1822_s1 + $0x528] sm:$0xff] }
  0x45   :  { %338 = vmatmul.mubr.f32.vlgmr.msra.gmra.mrb[0].mxu0 %v1358_v15  ;;  %v190_v63 = vld [vmem:[%s1822_s1 + $0x568] sm:$0xff]  ;;  %v184_v0 = vld [vmem:[%s1822_s1 + $0x538] sm:$0xff]  ;;  %v189_v7 = vld [vmem:[%s1822_s1 + $0x560] sm:$0xff] }
  0x46   :  { %421 = vmatmul.mubr.f32.vlgmr.msra.gmra.mrb[0].mxu1 %v1358_v15  ;;  %788 = vmatpush1.bf16.msra.mxu0 %v787_v17  ;;  %v807_v17 = vpack.c.bf16 %v109_v6, %v101_v2  ;;  %v823_v2 = vpack.c.bf16 %v173_v58, %v165_v57  ;;  %v181_v6 = vld [vmem:[%s1822_s1 + $0x520] sm:$0xff]  ;;  %v191_v11 = vld [vmem:[%s1822_s1 + $0x570] sm:$0xff]  ;;  %v198_v12 = vld [vmem:[%s1822_s1 + $0x5a8] sm:$0xff] }
  0x47   :  { %852 = vmatpush1.bf16.msra.mxu1 %v851_v18  ;;  %790 = vmatprep.subr.bf16.mxu0 %v789_v19  ;;  %v1499_v18 = vld [vmem:[%s1823_s0 + $0x28] sm:$0xff]  ;;  %v1504_v19 = vld [vmem:[%s1823_s0 + $0x20] sm:$0xff]  ;;  %v200_v14 = vld [vmem:[%s1822_s1 + $0x5b8] sm:$0xff] }
  0x48   :  { %854 = vmatprep.subr.bf16.mxu1 %v853_v23  ;;  %343 = vmatprep.mubr.f32.mxu0 %v1464_v3  ;;  %v125_v23 = vld [vmem:[%s1822_s1 + $0x360] sm:$0xff]  ;;  %v206_v13 = vld [vmem:[%s1822_s1 + $0x5e8] sm:$0xff]  ;;  %v207_v27 = vld [vmem:[%s1822_s1 + $0x5f0] sm:$0xff] }
  0x49   :  { %426 = vmatprep.mubr.f32.mxu1 %v1464_v3  ;;  %344 = vmatmul.mubr.f32.gmra.mrb[2].mxu0 %v1475_v8  ;;  %v205_v24 = vld [vmem:[%s1822_s1 + $0x5e0] sm:$0xff]  ;;  %v214_v28 = vld [vmem:[%s1822_s1 + $0x628] sm:$0xff]  ;;  %v223_v39 = vld [vmem:[%s1822_s1 + $0x670] sm:$0xff] }
  0x4a   :  { %792 = vmatpush1.bf16.msra.mxu0 %v791_v29  ;;  %427 = vmatmul.mubr.f32.gmra.mrb[2].mxu1 %v1475_v8  ;;  %v136_v29 = vld [vmem:[%s1822_s1 + $0x3b8] sm:$0xff]  ;;  %v221_v36 = vld [vmem:[%s1822_s1 + $0x660] sm:$0xff]  ;;  %v230_v40 = vld [vmem:[%s1822_s1 + $0x6a8] sm:$0xff] }
  0x4b   :  { %856 = vmatpush1.bf16.msra.mxu1 %v855_v30  ;;  %794 = vmatprep.subr.bf16.mxu0 %v793_v31  ;;  %v144_v30 = vld [vmem:[%s1822_s1 + $0x3f8] sm:$0xff]  ;;  %v811_v31 = vpack.c.bf16 %v125_v23, %v117_v22  ;;  %v829_v22 = vpack.c.bf16 %v206_v13, %v198_v12  ;;  %v197_v23 = vld [vmem:[%s1822_s1 + $0x5a0] sm:$0xff]  ;;  %v239_v50 = vld [vmem:[%s1822_s1 + $0x6f0] sm:$0xff] }
  0x4c   :  { %858 = vmatprep.subr.bf16.mxu1 %v857_v35  ;;  %349 = vmatprep.mubr.f32.mxu0 %v1499_v18  ;;  %v141_v35 = vld [vmem:[%s1822_s1 + $0x3e0] sm:$0xff]  ;;  %v877_v37 = vpack.c.bf16 %v144_v30, %v136_v29  ;;  %v222_v29 = vld [vmem:[%s1822_s1 + $0x668] sm:$0xff]  ;;  %v216_v30 = vld [vmem:[%s1822_s1 + $0x638] sm:$0xff] }
  0x4d   :  { %432 = vmatprep.mubr.f32.mxu1 %v1499_v18  ;;  %350 = vmatmul.mubr.f32.gmra.mrb[4].mxu0 %v1504_v19  ;;  %v246_v51 = vld [vmem:[%s1822_s1 + $0x728] sm:$0xff]  ;;  %v245_v58 = vld [vmem:[%s1822_s1 + $0x720] sm:$0xff]  ;;  %v271_v12 = vld [vmem:[%s1822_s1 + $0x7f0] sm:$0xff] }
  0x4e   :  { %796 = vmatpush1.bf16.msra.mxu0 %v795_v41  ;;  %433 = vmatmul.mubr.f32.gmra.mrb[4].mxu1 %v1504_v19  ;;  %v152_v41 = vld [vmem:[%s1822_s1 + $0x438] sm:$0xff] }
  0x4f   :  { %860 = vmatpush1.bf16.msra.mxu1 %v859_v42  ;;  %798 = vmatprep.subr.bf16.mxu0 %v797_v43  ;;  %v160_v42 = vld [vmem:[%s1822_s1 + $0x478] sm:$0xff]  ;;  %v815_v43 = vpack.c.bf16 %v141_v35, %v133_v34  ;;  %v833_v34 = vpack.c.bf16 %v222_v29, %v214_v28  ;;  %v213_v35 = vld [vmem:[%s1822_s1 + $0x620] sm:$0xff] }
  0x50   :  { %862 = vmatprep.subr.bf16.mxu1 %v861_v47  ;;  %503 = vmatprep.mubr.f32.mxu0 %v1225_v16  ;;  %v157_v47 = vld [vmem:[%s1822_s1 + $0x460] sm:$0xff] }
  0x51   :  { %586 = vmatprep.mubr.f32.mxu1 %v1225_v16  ;;  %v881_v16 = vpack.c.bf16 %v160_v42, %v152_v41  ;;  %v238_v41 = vld [vmem:[%s1822_s1 + $0x6e8] sm:$0xff]  ;;  %v232_v42 = vld [vmem:[%s1822_s1 + $0x6b8] sm:$0xff] }
  0x52   :  { %800 = vmatpush1.bf16.msra.mxu0 %v799_v53  ;;  %v176_v53 = vld [vmem:[%s1822_s1 + $0x4f8] sm:$0xff] }
  0x53   :  { %864 = vmatpush1.bf16.msra.mxu1 %v863_v54  ;;  %802 = vmatprep.subr.bf16.mxu0 %v801_v55  ;;  %v819_v54 = vpack.c.bf16 %v157_v47, %v149_v46  ;;  %v883_v55 = vpack.c.bf16 %v159_v49, %v151_v48  ;;  %v885_v60 = vpack.c.bf16 %v176_v53, %v168_v52  ;;  %v229_v47 = vld [vmem:[%s1822_s1 + $0x6a0] sm:$0xff]  ;;  %v254_v52 = vld [vmem:[%s1822_s1 + $0x768] sm:$0xff]  ;;  %v248_v53 = vld [vmem:[%s1822_s1 + $0x738] sm:$0xff] }
  0x54   :  { %866 = vmatprep.subr.bf16.mxu1 %v865_v59  ;;  %v167_v59 = vld [vmem:[%s1822_s1 + $0x4b0] sm:$0xff]  ;;  %v837_v46 = vpack.c.bf16 %v238_v41, %v230_v40  ;;  %v237_v48 = vld [vmem:[%s1822_s1 + $0x6e0] sm:$0xff]  ;;  %v841_v57 = vpack.c.bf16 %v254_v52, %v246_v51 }
  0x56   :  { %804 = vmatpush1.bf16.msra.mxu0 %v803_v1  ;;  %v192_v1 = vld [vmem:[%s1822_s1 + $0x578] sm:$0xff] }
  0x57   :  { %868 = vmatpush1.bf16.msra.mxu1 %v867_v4  ;;  %806 = vmatprep.subr.bf16.mxu0 %v805_v5  ;;  %v887_v4 = vpack.c.bf16 %v175_v61, %v167_v59  ;;  %v825_v5 = vpack.c.bf16 %v190_v63, %v182_v62  ;;  %v889_v10 = vpack.c.bf16 %v192_v1, %v184_v0  ;;  %v253_v59 = vld [vmem:[%s1822_s1 + $0x760] sm:$0xff]  ;;  %v255_v62 = vld [vmem:[%s1822_s1 + $0x770] sm:$0xff]  ;;  %v262_v63 = vld [vmem:[%s1822_s1 + $0x7a8] sm:$0xff] }
  0x58   :  { %870 = vmatprep.subr.bf16.mxu1 %v869_v9  ;;  %v183_v9 = vld [vmem:[%s1822_s1 + $0x530] sm:$0xff]  ;;  %v270_v0 = vld [vmem:[%s1822_s1 + $0x7e8] sm:$0xff]  ;;  %v264_v1 = vld [vmem:[%s1822_s1 + $0x7b8] sm:$0xff] }
  0x5a   :  { %808 = vmatpush1.bf16.msra.mxu0 %v807_v17  ;;  %v208_v17 = vld [vmem:[%s1822_s1 + $0x5f8] sm:$0xff] }
  0x5b   :  { %872 = vmatpush1.bf16.msra.mxu1 %v871_v20  ;;  %810 = vmatprep.subr.bf16.mxu0 %v809_v21  ;;  %v827_v20 = vpack.c.bf16 %v189_v7, %v181_v6  ;;  %v891_v21 = vpack.c.bf16 %v191_v11, %v183_v9  ;;  %v893_v26 = vpack.c.bf16 %v208_v17, %v200_v14  ;;  %v261_v7 = vld [vmem:[%s1822_s1 + $0x7a0] sm:$0xff]  ;;  %v263_v11 = vld [vmem:[%s1822_s1 + $0x7b0] sm:$0xff] }
  0x5c   :  { %874 = vmatprep.subr.bf16.mxu1 %v873_v25  ;;  %v199_v25 = vld [vmem:[%s1822_s1 + $0x5b0] sm:$0xff]  ;;  %v845_v6 = vpack.c.bf16 %v270_v0, %v262_v63  ;;  %v269_v9 = vld [vmem:[%s1822_s1 + $0x7e0] sm:$0xff]  ;;  %v911_v14 = vpack.c.bf16 %v271_v12, %v263_v11 }
  0x5d   :  { %v847_v13 = vpack.c.bf16 %v269_v9, %v261_v7 }
  0x5e   :  { %812 = vmatpush1.bf16.msra.mxu0 %v811_v31  ;;  %v224_v31 = vld [vmem:[%s1822_s1 + $0x678] sm:$0xff] }
  0x5f   :  { %876 = vmatpush1.bf16.msra.mxu1 %v875_v32  ;;  %814 = vmatprep.subr.bf16.mxu0 %v813_v33  ;;  %v831_v32 = vpack.c.bf16 %v205_v24, %v197_v23  ;;  %v895_v33 = vpack.c.bf16 %v207_v27, %v199_v25  ;;  %v897_v38 = vpack.c.bf16 %v224_v31, %v216_v30 }
  0x60   :  { %878 = vmatprep.subr.bf16.mxu1 %v877_v37  ;;  %v215_v37 = vld [vmem:[%s1822_s1 + $0x630] sm:$0xff] }
  0x62   :  { %816 = vmatpush1.bf16.msra.mxu0 %v815_v43  ;;  %v240_v43 = vld [vmem:[%s1822_s1 + $0x6f8] sm:$0xff] }
  0x63   :  { %880 = vmatpush1.bf16.msra.mxu1 %v879_v44  ;;  %818 = vmatprep.subr.bf16.mxu0 %v817_v45  ;;  %v835_v44 = vpack.c.bf16 %v221_v36, %v213_v35  ;;  %v899_v45 = vpack.c.bf16 %v223_v39, %v215_v37  ;;  %v901_v49 = vpack.c.bf16 %v240_v43, %v232_v42 }
  0x64   :  { %882 = vmatprep.subr.bf16.mxu1 %v881_v16  ;;  %v231_v16 = vld [vmem:[%s1822_s1 + $0x6b0] sm:$0xff] }
  0x66   :  { %820 = vmatpush1.bf16.msra.mxu0 %v819_v54  ;;  %v256_v54 = vld [vmem:[%s1822_s1 + $0x778] sm:$0xff] }
  0x67   :  { %884 = vmatpush1.bf16.msra.mxu1 %v883_v55  ;;  %822 = vmatprep.subr.bf16.mxu0 %v821_v56  ;;  %v839_v55 = vpack.c.bf16 %v237_v48, %v229_v47  ;;  %v903_v56 = vpack.c.bf16 %v239_v50, %v231_v16  ;;  %v905_v61 = vpack.c.bf16 %v256_v54, %v248_v53 }
  0x68   :  { %886 = vmatprep.subr.bf16.mxu1 %v885_v60  ;;  %v247_v60 = vld [vmem:[%s1822_s1 + $0x730] sm:$0xff] }
  0x6a   :  { %824 = vmatpush1.bf16.msra.mxu0 %v823_v2  ;;  %v272_v2 = vld [vmem:[%s1822_s1 + $0x7f8] sm:$0xff] }
  0x6b   :  { %888 = vmatpush1.bf16.msra.mxu1 %v887_v4  ;;  %826 = vmatprep.subr.bf16.mxu0 %v825_v5  ;;  %v843_v4 = vpack.c.bf16 %v253_v59, %v245_v58  ;;  %v907_v5 = vpack.c.bf16 %v255_v62, %v247_v60 }
  0x6c   :  { %890 = vmatprep.subr.bf16.mxu1 %v889_v10  ;;  %v909_v10 = vpack.c.bf16 %v272_v2, %v264_v1 }
  0x6e   :  { %828 = vmatpush1.bf16.msra.mxu0 %v827_v20 }
  0x6f   :  { %892 = vmatpush1.bf16.msra.mxu1 %v891_v21  ;;  %830 = vmatprep.subr.bf16.mxu0 %v829_v22 }
  0x70   :  { %894 = vmatprep.subr.bf16.mxu1 %v893_v26 }
  0x72   :  { %832 = vmatpush1.bf16.msra.mxu0 %v831_v32 }
  0x73   :  { %896 = vmatpush1.bf16.msra.mxu1 %v895_v33  ;;  %834 = vmatprep.subr.bf16.mxu0 %v833_v34 }
  0x74   :  { %898 = vmatprep.subr.bf16.mxu1 %v897_v38 }
  0x76   :  { %836 = vmatpush1.bf16.msra.mxu0 %v835_v44 }
  0x77   :  { %900 = vmatpush1.bf16.msra.mxu1 %v899_v45  ;;  %838 = vmatprep.subr.bf16.mxu0 %v837_v46 }
  0x78   :  { %902 = vmatprep.subr.bf16.mxu1 %v901_v49 }
  0x7a   :  { %840 = vmatpush1.bf16.msra.mxu0 %v839_v55 }
  0x7b   :  { %904 = vmatpush1.bf16.msra.mxu1 %v903_v56  ;;  %842 = vmatprep.subr.bf16.mxu0 %v841_v57 }
  0x7c   :  { %906 = vmatprep.subr.bf16.mxu1 %v905_v61 }
  0x7e   :  { %844 = vmatpush1.bf16.msra.mxu0 %v843_v4 }
  0x7f   :  { %908 = vmatpush1.bf16.msra.mxu1 %v907_v5  ;;  %846 = vmatprep.subr.bf16.mxu0 %v845_v6 }
  0x80   :  { %910 = vmatprep.subr.bf16.mxu1 %v909_v10 }
  0x82   :  { %848 = vmatpush1.bf16.msra.mxu0 %v847_v13 }
  0x83   :  { %912 = vmatpush1.bf16.msra.mxu1 %v911_v14 }
  0x85   :  { %504 = vmatmul.mubr.f32.vlgmr.msra.gmra.mrb[6].mxu0 %v1358_v15 }
  0x86   :  { %587 = vmatmul.mubr.f32.vlgmr.msra.gmra.mrb[6].mxu1 %v1358_v15  ;;  %509 = vmatprep.mubr.f32.mxu0 %v1464_v3 }
  0x87   :  { %592 = vmatprep.mubr.f32.mxu1 %v1464_v3 }
  0x89   :  { %510 = vmatmul.mubr.f32.gmra.mrb[8].mxu0 %v1475_v8 }
  0x8a   :  { %593 = vmatmul.mubr.f32.gmra.mrb[8].mxu1 %v1475_v8  ;;  %515 = vmatprep.mubr.f32.mxu0 %v1499_v18 }
  0x8b   :  { %598 = vmatprep.mubr.f32.mxu1 %v1499_v18 }
  0x8d   :  { %516 = vmatmul.mubr.f32.gmra.mrb[10].mxu0 %v1504_v19 }
  0x8e   :  { %599 = vmatmul.mubr.f32.gmra.mrb[10].mxu1 %v1504_v19 }
 0x118   :  { %v339_v17 = vpop.f32.mrb[0].mxu0 }
 0x119   :  { %v605_v20 = vmax.f32 %v339_v17, 0.0  ;;  %v422_v21 = vpop.f32.mrb[0].mxu1  ;;  %v341_v15 = vpop.f32.mrb[1].mxu0 }
 0x11a   :  { %v607_v22 = vmax.f32 %v422_v21, 0.0  ;;  %v606_v23 = vmax.f32 %v341_v15, 0.0  ;;  %v424_v24 = vpop.f32.mrb[1].mxu1 }
 0x11b   :  { %629 = vst [vmem:[%s1824_s2] sm:$0xff] %v605_v20  ;;  %v608_v3 = vmax.f32 %v424_v24, 0.0 }
 0x11c   :  { %631 = vst [vmem:[%s1824_s2 + $0x10] sm:$0xff] %v607_v22  ;;  %630 = vst [vmem:[%s1824_s2 + $0x8] sm:$0xff] %v606_v23  ;;  %v345_v8 = vpop.f32.mrb[2].mxu0 }
 0x11d   :  { %632 = vst [vmem:[%s1824_s2 + $0x18] sm:$0xff] %v608_v3  ;;  %v613_v18 = vmax.f32 %v345_v8, 0.0  ;;  %v428_v19 = vpop.f32.mrb[2].mxu1  ;;  %v347_v25 = vpop.f32.mrb[3].mxu0 }
 0x11e   :  { %v615_v26 = vmax.f32 %v428_v19, 0.0  ;;  %v614_v27 = vmax.f32 %v347_v25, 0.0  ;;  %v430_v28 = vpop.f32.mrb[3].mxu1 }
 0x11f   :  { %637 = vst [vmem:[%s1824_s2 + $0x40] sm:$0xff] %v613_v18  ;;  %v616_v29 = vmax.f32 %v430_v28, 0.0 }
 0x120   :  { %639 = vst [vmem:[%s1824_s2 + $0x50] sm:$0xff] %v615_v26  ;;  %638 = vst [vmem:[%s1824_s2 + $0x48] sm:$0xff] %v614_v27  ;;  %v351_v30 = vpop.f32.mrb[4].mxu0 }
 0x121   :  { %640 = vst [vmem:[%s1824_s2 + $0x58] sm:$0xff] %v616_v29  ;;  %v621_v31 = vmax.f32 %v351_v30, 0.0  ;;  %v434_v32 = vpop.f32.mrb[4].mxu1  ;;  %v353_v33 = vpop.f32.mrb[5].mxu0 }
 0x122   :  { %v623_v34 = vmax.f32 %v434_v32, 0.0  ;;  %v622_v35 = vmax.f32 %v353_v33, 0.0  ;;  %v436_v36 = vpop.f32.mrb[5].mxu1 }
 0x123   :  { %645 = vst [vmem:[%s1824_s2 + $0x80] sm:$0xff] %v621_v31  ;;  %v624_v37 = vmax.f32 %v436_v36, 0.0 }
 0x124   :  { %647 = vst [vmem:[%s1824_s2 + $0x90] sm:$0xff] %v623_v34  ;;  %646 = vst [vmem:[%s1824_s2 + $0x88] sm:$0xff] %v622_v35 }
 0x125   :  { %648 = vst [vmem:[%s1824_s2 + $0x98] sm:$0xff] %v624_v37 }
 0x158   :  { %v505_v38 = vpop.f32.mrb[6].mxu0 }
 0x159   :  { %v609_v39 = vmax.f32 %v505_v38, 0.0  ;;  %v588_v40 = vpop.f32.mrb[6].mxu1  ;;  %v507_v41 = vpop.f32.mrb[7].mxu0 }
 0x15a   :  { %v611_v42 = vmax.f32 %v588_v40, 0.0  ;;  %v610_v43 = vmax.f32 %v507_v41, 0.0  ;;  %v590_v44 = vpop.f32.mrb[7].mxu1 }
 0x15b   :  { %633 = vst [vmem:[%s1824_s2 + $0x20] sm:$0xff] %v609_v39  ;;  %v612_v45 = vmax.f32 %v590_v44, 0.0 }
 0x15c   :  { %635 = vst [vmem:[%s1824_s2 + $0x30] sm:$0xff] %v611_v42  ;;  %634 = vst [vmem:[%s1824_s2 + $0x28] sm:$0xff] %v610_v43  ;;  %v511_v46 = vpop.f32.mrb[8].mxu0 }
 0x15d   :  { %636 = vst [vmem:[%s1824_s2 + $0x38] sm:$0xff] %v612_v45  ;;  %v617_v47 = vmax.f32 %v511_v46, 0.0  ;;  %v594_v48 = vpop.f32.mrb[8].mxu1  ;;  %v513_v16 = vpop.f32.mrb[9].mxu0 }
 0x15e   :  { %v619_v49 = vmax.f32 %v594_v48, 0.0  ;;  %v618_v50 = vmax.f32 %v513_v16, 0.0  ;;  %v596_v51 = vpop.f32.mrb[9].mxu1 }
 0x15f   :  { %641 = vst [vmem:[%s1824_s2 + $0x60] sm:$0xff] %v617_v47  ;;  %v620_v52 = vmax.f32 %v596_v51, 0.0 }
 0x160   :  { %643 = vst [vmem:[%s1824_s2 + $0x70] sm:$0xff] %v619_v49  ;;  %642 = vst [vmem:[%s1824_s2 + $0x68] sm:$0xff] %v618_v50  ;;  %v517_v53 = vpop.f32.mrb[10].mxu0 }
 0x161   :  { %644 = vst [vmem:[%s1824_s2 + $0x78] sm:$0xff] %v620_v52  ;;  %v625_v54 = vmax.f32 %v517_v53, 0.0  ;;  %v600_v55 = vpop.f32.mrb[10].mxu1  ;;  %v519_v56 = vpop.f32.mrb[11].mxu0 }
 0x162   :  { %v627_v57 = vmax.f32 %v600_v55, 0.0  ;;  %v626_v58 = vmax.f32 %v519_v56, 0.0  ;;  %v602_v59 = vpop.f32.mrb[11].mxu1 }
 0x163   :  { %649 = vst [vmem:[%s1824_s2 + $0xa0] sm:$0xff] %v625_v54  ;;  %v628_v60 = vmax.f32 %v602_v59, 0.0 }
 0x164   :  { %651 = vst [vmem:[%s1824_s2 + $0xb0] sm:$0xff] %v627_v57  ;;  %650 = vst [vmem:[%s1824_s2 + $0xa8] sm:$0xff] %v626_v58 }
 0x165   :  { %652 = vst [vmem:[%s1824_s2 + $0xb8] sm:$0xff] %v628_v60 }

// kernel: transformer_forward.85
= control target key start
LH: loop header
LB: loop body
LE: loop exit
PB: predicated region body
PF: predicated region fallthrough
CT: control target
= control target key end

     0   :  { %s908_s1 = inlined_call_operand.vmem [shape: f32[256,512], index: 1, kind: input, shape index: {}]   ;;  %s909_s0 = inlined_call_operand.vmem [shape: f32[24,256], index: 0, kind: input, shape index: {}]   ;;  %s910_s2 = inlined_call_operand.vmem [shape: f32[24,512], index: 2, kind: output, shape index: {}]  }
   0x1   :  { %v18_v0 = vld [vmem:[%s908_s1 + $0x8] sm:$0xff]  ;;  %v20_v2 = vld [vmem:[%s908_s1 + $0x18] sm:$0xff]  ;;  %v17_v5 = vld [vmem:[%s908_s1] sm:$0xff] }
   0x2   :  { %v22_v1 = vld [vmem:[%s908_s1 + $0x28] sm:$0xff]  ;;  %v24_v4 = vld [vmem:[%s908_s1 + $0x38] sm:$0xff]  ;;  %v21_v6 = vld [vmem:[%s908_s1 + $0x20] sm:$0xff] }
   0x3   :  { %v327_v3 = vpack.c.bf16 %v22_v1, %v18_v0  ;;  %v391_v7 = vpack.c.bf16 %v24_v4, %v20_v2  ;;  %v329_v8 = vpack.c.bf16 %v21_v6, %v17_v5  ;;  %v19_v9 = vld [vmem:[%s908_s1 + $0x10] sm:$0xff]  ;;  %v26_v11 = vld [vmem:[%s908_s1 + $0x48] sm:$0xff]  ;;  %v28_v14 = vld [vmem:[%s908_s1 + $0x58] sm:$0xff] }
   0x4   :  { %v23_v10 = vld [vmem:[%s908_s1 + $0x30] sm:$0xff]  ;;  %v30_v13 = vld [vmem:[%s908_s1 + $0x68] sm:$0xff]  ;;  %v32_v15 = vld [vmem:[%s908_s1 + $0x78] sm:$0xff] }
   0x5   :  { %328 = vmatprep.subr.bf16.mxu0 %v327_v3  ;;  %v393_v12 = vpack.c.bf16 %v23_v10, %v19_v9  ;;  %392 = vmatprep.subr.bf16.mxu1 %v391_v7  ;;  %v331_v16 = vpack.c.bf16 %v30_v13, %v26_v11  ;;  %v395_v17 = vpack.c.bf16 %v32_v15, %v28_v14  ;;  %v25_v18 = vld [vmem:[%s908_s1 + $0x40] sm:$0xff]  ;;  %v27_v20 = vld [vmem:[%s908_s1 + $0x50] sm:$0xff]  ;;  %v34_v23 = vld [vmem:[%s908_s1 + $0x88] sm:$0xff] }
   0x6   :  { %330 = vmatpush1.bf16.msra.mxu0 %v329_v8  ;;  %v29_v19 = vld [vmem:[%s908_s1 + $0x60] sm:$0xff]  ;;  %v31_v22 = vld [vmem:[%s908_s1 + $0x70] sm:$0xff]  ;;  %v38_v24 = vld [vmem:[%s908_s1 + $0xa8] sm:$0xff] }
   0x7   :  { %394 = vmatpush1.bf16.msra.mxu1 %v393_v12  ;;  %v333_v21 = vpack.c.bf16 %v29_v19, %v25_v18  ;;  %332 = vmatprep.subr.bf16.mxu0 %v331_v16  ;;  %v397_v25 = vpack.c.bf16 %v31_v22, %v27_v20  ;;  %v335_v26 = vpack.c.bf16 %v38_v24, %v34_v23  ;;  %v36_v27 = vld [vmem:[%s908_s1 + $0x98] sm:$0xff]  ;;  %v33_v29 = vld [vmem:[%s908_s1 + $0x80] sm:$0xff]  ;;  %v35_v32 = vld [vmem:[%s908_s1 + $0x90] sm:$0xff] }
   0x8   :  { %396 = vmatprep.subr.bf16.mxu1 %v395_v17  ;;  %v40_v28 = vld [vmem:[%s908_s1 + $0xb8] sm:$0xff]  ;;  %v37_v31 = vld [vmem:[%s908_s1 + $0xa0] sm:$0xff]  ;;  %v39_v33 = vld [vmem:[%s908_s1 + $0xb0] sm:$0xff] }
   0x9   :  { %v399_v30 = vpack.c.bf16 %v40_v28, %v36_v27  ;;  %v337_v34 = vpack.c.bf16 %v37_v31, %v33_v29  ;;  %v42_v35 = vld [vmem:[%s908_s1 + $0xc8] sm:$0xff]  ;;  %v44_v37 = vld [vmem:[%s908_s1 + $0xd8] sm:$0xff]  ;;  %v401_v38 = vpack.c.bf16 %v39_v33, %v35_v32  ;;  %v41_v41 = vld [vmem:[%s908_s1 + $0xc0] sm:$0xff] }
   0xa   :  { %334 = vmatpush1.bf16.msra.mxu0 %v333_v21  ;;  %v46_v36 = vld [vmem:[%s908_s1 + $0xe8] sm:$0xff]  ;;  %v48_v40 = vld [vmem:[%s908_s1 + $0xf8] sm:$0xff]  ;;  %v45_v42 = vld [vmem:[%s908_s1 + $0xe0] sm:$0xff] }
   0xb   :  { %398 = vmatpush1.bf16.msra.mxu1 %v397_v25  ;;  %336 = vmatprep.subr.bf16.mxu0 %v335_v26  ;;  %v339_v39 = vpack.c.bf16 %v46_v36, %v42_v35  ;;  %v403_v43 = vpack.c.bf16 %v48_v40, %v44_v37  ;;  %v43_v44 = vld [vmem:[%s908_s1 + $0xd0] sm:$0xff]  ;;  %v50_v46 = vld [vmem:[%s908_s1 + $0x108] sm:$0xff]  ;;  %v52_v48 = vld [vmem:[%s908_s1 + $0x118] sm:$0xff]  ;;  %v341_v50 = vpack.c.bf16 %v45_v42, %v41_v41 }
   0xc   :  { %400 = vmatprep.subr.bf16.mxu1 %v399_v30  ;;  %v47_v45 = vld [vmem:[%s908_s1 + $0xf0] sm:$0xff]  ;;  %v54_v47 = vld [vmem:[%s908_s1 + $0x128] sm:$0xff]  ;;  %v56_v49 = vld [vmem:[%s908_s1 + $0x138] sm:$0xff] }
   0xd   :  { %v405_v51 = vpack.c.bf16 %v47_v45, %v43_v44  ;;  %v343_v52 = vpack.c.bf16 %v54_v47, %v50_v46  ;;  %v49_v53 = vld [vmem:[%s908_s1 + $0x100] sm:$0xff]  ;;  %v51_v55 = vld [vmem:[%s908_s1 + $0x110] sm:$0xff]  ;;  %v407_v56 = vpack.c.bf16 %v56_v49, %v52_v48  ;;  %v58_v58 = vld [vmem:[%s908_s1 + $0x148] sm:$0xff] }
   0xe   :  { %338 = vmatpush1.bf16.msra.mxu0 %v337_v34  ;;  %v53_v54 = vld [vmem:[%s908_s1 + $0x120] sm:$0xff]  ;;  %v55_v57 = vld [vmem:[%s908_s1 + $0x130] sm:$0xff]  ;;  %v62_v59 = vld [vmem:[%s908_s1 + $0x168] sm:$0xff] }
   0xf   :  { %402 = vmatpush1.bf16.msra.mxu1 %v401_v38  ;;  %340 = vmatprep.subr.bf16.mxu0 %v339_v39  ;;  %v60_v60 = vld [vmem:[%s908_s1 + $0x158] sm:$0xff]  ;;  %v345_v62 = vpack.c.bf16 %v53_v54, %v49_v53  ;;  %v409_v63 = vpack.c.bf16 %v55_v57, %v51_v55  ;;  %v347_v0 = vpack.c.bf16 %v62_v59, %v58_v58  ;;  %v57_v1 = vld [vmem:[%s908_s1 + $0x140] sm:$0xff]  ;;  %v59_v3 = vld [vmem:[%s908_s1 + $0x150] sm:$0xff] }
  0x10   :  { %404 = vmatprep.subr.bf16.mxu1 %v403_v43  ;;  %v64_v61 = vld [vmem:[%s908_s1 + $0x178] sm:$0xff]  ;;  %v61_v2 = vld [vmem:[%s908_s1 + $0x160] sm:$0xff]  ;;  %v63_v5 = vld [vmem:[%s908_s1 + $0x170] sm:$0xff] }
  0x11   :  { %v411_v4 = vpack.c.bf16 %v64_v61, %v60_v60  ;;  %v66_v6 = vld [vmem:[%s908_s1 + $0x188] sm:$0xff]  ;;  %v68_v8 = vld [vmem:[%s908_s1 + $0x198] sm:$0xff]  ;;  %v349_v10 = vpack.c.bf16 %v61_v2, %v57_v1  ;;  %v413_v11 = vpack.c.bf16 %v63_v5, %v59_v3  ;;  %v65_v13 = vld [vmem:[%s908_s1 + $0x180] sm:$0xff] }
  0x12   :  { %342 = vmatpush1.bf16.msra.mxu0 %v341_v50  ;;  %v70_v7 = vld [vmem:[%s908_s1 + $0x1a8] sm:$0xff]  ;;  %v72_v9 = vld [vmem:[%s908_s1 + $0x1b8] sm:$0xff]  ;;  %v69_v14 = vld [vmem:[%s908_s1 + $0x1a0] sm:$0xff] }
  0x13   :  { %406 = vmatpush1.bf16.msra.mxu1 %v405_v51  ;;  %344 = vmatprep.subr.bf16.mxu0 %v343_v52  ;;  %v351_v12 = vpack.c.bf16 %v70_v7, %v66_v6  ;;  %v67_v15 = vld [vmem:[%s908_s1 + $0x190] sm:$0xff]  ;;  %v415_v16 = vpack.c.bf16 %v72_v9, %v68_v8  ;;  %v74_v18 = vld [vmem:[%s908_s1 + $0x1c8] sm:$0xff]  ;;  %v76_v20 = vld [vmem:[%s908_s1 + $0x1d8] sm:$0xff]  ;;  %v353_v22 = vpack.c.bf16 %v69_v14, %v65_v13 }
  0x14   :  { %408 = vmatprep.subr.bf16.mxu1 %v407_v56  ;;  %v71_v17 = vld [vmem:[%s908_s1 + $0x1b0] sm:$0xff]  ;;  %v78_v19 = vld [vmem:[%s908_s1 + $0x1e8] sm:$0xff]  ;;  %v80_v21 = vld [vmem:[%s908_s1 + $0x1f8] sm:$0xff] }
  0x15   :  { %v417_v23 = vpack.c.bf16 %v71_v17, %v67_v15  ;;  %v355_v24 = vpack.c.bf16 %v78_v19, %v74_v18  ;;  %v73_v25 = vld [vmem:[%s908_s1 + $0x1c0] sm:$0xff]  ;;  %v75_v27 = vld [vmem:[%s908_s1 + $0x1d0] sm:$0xff]  ;;  %v419_v28 = vpack.c.bf16 %v80_v21, %v76_v20  ;;  %v82_v30 = vld [vmem:[%s908_s1 + $0x208] sm:$0xff] }
  0x16   :  { %346 = vmatpush1.bf16.msra.mxu0 %v345_v62  ;;  %v77_v26 = vld [vmem:[%s908_s1 + $0x1e0] sm:$0xff]  ;;  %v79_v29 = vld [vmem:[%s908_s1 + $0x1f0] sm:$0xff]  ;;  %v86_v31 = vld [vmem:[%s908_s1 + $0x228] sm:$0xff] }
  0x17   :  { %410 = vmatpush1.bf16.msra.mxu1 %v409_v63  ;;  %348 = vmatprep.subr.bf16.mxu0 %v347_v0  ;;  %v84_v32 = vld [vmem:[%s908_s1 + $0x218] sm:$0xff]  ;;  %v357_v34 = vpack.c.bf16 %v77_v26, %v73_v25  ;;  %v421_v35 = vpack.c.bf16 %v79_v29, %v75_v27  ;;  %v359_v36 = vpack.c.bf16 %v86_v31, %v82_v30  ;;  %v81_v37 = vld [vmem:[%s908_s1 + $0x200] sm:$0xff]  ;;  %v83_v39 = vld [vmem:[%s908_s1 + $0x210] sm:$0xff] }
  0x18   :  { %412 = vmatprep.subr.bf16.mxu1 %v411_v4  ;;  %v88_v33 = vld [vmem:[%s908_s1 + $0x238] sm:$0xff]  ;;  %v85_v38 = vld [vmem:[%s908_s1 + $0x220] sm:$0xff]  ;;  %v87_v41 = vld [vmem:[%s908_s1 + $0x230] sm:$0xff] }
  0x19   :  { %v423_v40 = vpack.c.bf16 %v88_v33, %v84_v32  ;;  %v90_v42 = vld [vmem:[%s908_s1 + $0x248] sm:$0xff]  ;;  %v92_v44 = vld [vmem:[%s908_s1 + $0x258] sm:$0xff]  ;;  %v361_v46 = vpack.c.bf16 %v85_v38, %v81_v37  ;;  %v425_v47 = vpack.c.bf16 %v87_v41, %v83_v39  ;;  %v89_v49 = vld [vmem:[%s908_s1 + $0x240] sm:$0xff] }
  0x1a   :  { %350 = vmatpush1.bf16.msra.mxu0 %v349_v10  ;;  %v94_v43 = vld [vmem:[%s908_s1 + $0x268] sm:$0xff]  ;;  %v96_v45 = vld [vmem:[%s908_s1 + $0x278] sm:$0xff]  ;;  %v93_v50 = vld [vmem:[%s908_s1 + $0x260] sm:$0xff] }
  0x1b   :  { %414 = vmatpush1.bf16.msra.mxu1 %v413_v11  ;;  %352 = vmatprep.subr.bf16.mxu0 %v351_v12  ;;  %v363_v48 = vpack.c.bf16 %v94_v43, %v90_v42  ;;  %v91_v51 = vld [vmem:[%s908_s1 + $0x250] sm:$0xff]  ;;  %v427_v52 = vpack.c.bf16 %v96_v45, %v92_v44  ;;  %v98_v54 = vld [vmem:[%s908_s1 + $0x288] sm:$0xff]  ;;  %v100_v56 = vld [vmem:[%s908_s1 + $0x298] sm:$0xff]  ;;  %v365_v58 = vpack.c.bf16 %v93_v50, %v89_v49 }
  0x1c   :  { %416 = vmatprep.subr.bf16.mxu1 %v415_v16  ;;  %v95_v53 = vld [vmem:[%s908_s1 + $0x270] sm:$0xff]  ;;  %v102_v55 = vld [vmem:[%s908_s1 + $0x2a8] sm:$0xff]  ;;  %v104_v57 = vld [vmem:[%s908_s1 + $0x2b8] sm:$0xff] }
  0x1d   :  { %v429_v59 = vpack.c.bf16 %v95_v53, %v91_v51  ;;  %v367_v60 = vpack.c.bf16 %v102_v55, %v98_v54  ;;  %v97_v61 = vld [vmem:[%s908_s1 + $0x280] sm:$0xff]  ;;  %v99_v63 = vld [vmem:[%s908_s1 + $0x290] sm:$0xff]  ;;  %v431_v0 = vpack.c.bf16 %v104_v57, %v100_v56  ;;  %v106_v2 = vld [vmem:[%s908_s1 + $0x2c8] sm:$0xff] }
  0x1e   :  { %354 = vmatpush1.bf16.msra.mxu0 %v353_v22  ;;  %v101_v62 = vld [vmem:[%s908_s1 + $0x2a0] sm:$0xff]  ;;  %v103_v1 = vld [vmem:[%s908_s1 + $0x2b0] sm:$0xff]  ;;  %v110_v3 = vld [vmem:[%s908_s1 + $0x2e8] sm:$0xff] }
  0x1f   :  { %418 = vmatpush1.bf16.msra.mxu1 %v417_v23  ;;  %356 = vmatprep.subr.bf16.mxu0 %v355_v24  ;;  %v108_v4 = vld [vmem:[%s908_s1 + $0x2d8] sm:$0xff]  ;;  %v369_v6 = vpack.c.bf16 %v101_v62, %v97_v61  ;;  %v105_v7 = vld [vmem:[%s908_s1 + $0x2c0] sm:$0xff]  ;;  %v433_v8 = vpack.c.bf16 %v103_v1, %v99_v63  ;;  %v371_v9 = vpack.c.bf16 %v110_v3, %v106_v2  ;;  %v107_v11 = vld [vmem:[%s908_s1 + $0x2d0] sm:$0xff] }
  0x20   :  { %420 = vmatprep.subr.bf16.mxu1 %v419_v28  ;;  %v112_v5 = vld [vmem:[%s908_s1 + $0x2f8] sm:$0xff]  ;;  %v109_v10 = vld [vmem:[%s908_s1 + $0x2e0] sm:$0xff]  ;;  %v111_v12 = vld [vmem:[%s908_s1 + $0x2f0] sm:$0xff] }
  0x21   :  { %v435_v13 = vpack.c.bf16 %v112_v5, %v108_v4  ;;  %v114_v14 = vld [vmem:[%s908_s1 + $0x308] sm:$0xff]  ;;  %v116_v17 = vld [vmem:[%s908_s1 + $0x318] sm:$0xff]  ;;  %v373_v19 = vpack.c.bf16 %v109_v10, %v105_v7  ;;  %v437_v20 = vpack.c.bf16 %v111_v12, %v107_v11  ;;  %v113_v22 = vld [vmem:[%s908_s1 + $0x300] sm:$0xff] }
  0x22   :  { %358 = vmatpush1.bf16.msra.mxu0 %v357_v34  ;;  %v118_v15 = vld [vmem:[%s908_s1 + $0x328] sm:$0xff]  ;;  %v120_v18 = vld [vmem:[%s908_s1 + $0x338] sm:$0xff]  ;;  %v117_v23 = vld [vmem:[%s908_s1 + $0x320] sm:$0xff] }
  0x23   :  { %422 = vmatpush1.bf16.msra.mxu1 %v421_v35  ;;  %360 = vmatprep.subr.bf16.mxu0 %v359_v36  ;;  %v12_v16 = vld [vmem:[%s909_s0 + $0x8] sm:$0xff]  ;;  %v375_v21 = vpack.c.bf16 %v118_v15, %v114_v14  ;;  %v115_v24 = vld [vmem:[%s908_s1 + $0x310] sm:$0xff]  ;;  %v439_v25 = vpack.c.bf16 %v120_v18, %v116_v17  ;;  %v124_v29 = vld [vmem:[%s908_s1 + $0x358] sm:$0xff]  ;;  %v377_v31 = vpack.c.bf16 %v117_v23, %v113_v22 }
  0x24   :  { %424 = vmatprep.subr.bf16.mxu1 %v423_v40  ;;  %209 = vmatprep.mubr.f32.mxu0 %v12_v16  ;;  %v119_v26 = vld [vmem:[%s908_s1 + $0x330] sm:$0xff]  ;;  %v122_v27 = vld [vmem:[%s908_s1 + $0x348] sm:$0xff]  ;;  %v128_v30 = vld [vmem:[%s908_s1 + $0x378] sm:$0xff] }
  0x25   :  { %292 = vmatprep.mubr.f32.mxu1 %v12_v16  ;;  %v126_v28 = vld [vmem:[%s908_s1 + $0x368] sm:$0xff]  ;;  %v441_v32 = vpack.c.bf16 %v119_v26, %v115_v24  ;;  %v121_v34 = vld [vmem:[%s908_s1 + $0x340] sm:$0xff]  ;;  %v123_v36 = vld [vmem:[%s908_s1 + $0x350] sm:$0xff]  ;;  %v443_v37 = vpack.c.bf16 %v128_v30, %v124_v29 }
  0x26   :  { %362 = vmatpush1.bf16.msra.mxu0 %v361_v46  ;;  %v379_v33 = vpack.c.bf16 %v126_v28, %v122_v27  ;;  %v125_v35 = vld [vmem:[%s908_s1 + $0x360] sm:$0xff]  ;;  %v127_v38 = vld [vmem:[%s908_s1 + $0x370] sm:$0xff]  ;;  %v130_v39 = vld [vmem:[%s908_s1 + $0x388] sm:$0xff] }
  0x27   :  { %426 = vmatpush1.bf16.msra.mxu1 %v425_v47  ;;  %364 = vmatprep.subr.bf16.mxu0 %v363_v48  ;;  %v134_v40 = vld [vmem:[%s908_s1 + $0x3a8] sm:$0xff]  ;;  %v132_v41 = vld [vmem:[%s908_s1 + $0x398] sm:$0xff]  ;;  %v381_v43 = vpack.c.bf16 %v125_v35, %v121_v34  ;;  %v445_v44 = vpack.c.bf16 %v127_v38, %v123_v36  ;;  %v129_v46 = vld [vmem:[%s908_s1 + $0x380] sm:$0xff] }
  0x28   :  { %428 = vmatprep.subr.bf16.mxu1 %v427_v52  ;;  %v136_v42 = vld [vmem:[%s908_s1 + $0x3b8] sm:$0xff]  ;;  %v383_v45 = vpack.c.bf16 %v134_v40, %v130_v39  ;;  %v133_v47 = vld [vmem:[%s908_s1 + $0x3a0] sm:$0xff]  ;;  %v131_v48 = vld [vmem:[%s908_s1 + $0x390] sm:$0xff] }
  0x29   :  { %v447_v49 = vpack.c.bf16 %v136_v42, %v132_v41  ;;  %v135_v50 = vld [vmem:[%s908_s1 + $0x3b0] sm:$0xff]  ;;  %v138_v51 = vld [vmem:[%s908_s1 + $0x3c8] sm:$0xff]  ;;  %v140_v53 = vld [vmem:[%s908_s1 + $0x3d8] sm:$0xff]  ;;  %v385_v55 = vpack.c.bf16 %v133_v47, %v129_v46 }
  0x2a   :  { %366 = vmatpush1.bf16.msra.mxu0 %v365_v58  ;;  %v142_v52 = vld [vmem:[%s908_s1 + $0x3e8] sm:$0xff]  ;;  %v144_v54 = vld [vmem:[%s908_s1 + $0x3f8] sm:$0xff]  ;;  %v449_v56 = vpack.c.bf16 %v135_v50, %v131_v48  ;;  %v137_v58 = vld [vmem:[%s908_s1 + $0x3c0] sm:$0xff] }
  0x2b   :  { %430 = vmatpush1.bf16.msra.mxu1 %v429_v59  ;;  %368 = vmatprep.subr.bf16.mxu0 %v367_v60  ;;  %v387_v57 = vpack.c.bf16 %v142_v52, %v138_v51  ;;  %v141_v59 = vld [vmem:[%s908_s1 + $0x3e0] sm:$0xff]  ;;  %v451_v60 = vpack.c.bf16 %v144_v54, %v140_v53  ;;  %v139_v61 = vld [vmem:[%s908_s1 + $0x3d0] sm:$0xff]  ;;  %v14_v2 = vld [vmem:[%s909_s0 + $0x18] sm:$0xff] }
  0x2c   :  { %432 = vmatprep.subr.bf16.mxu1 %v431_v0  ;;  %v143_v62 = vld [vmem:[%s908_s1 + $0x3f0] sm:$0xff]  ;;  %v389_v63 = vpack.c.bf16 %v141_v59, %v137_v58  ;;  %v11_v1 = vld [vmem:[%s909_s0] sm:$0xff]  ;;  %v16_v4 = vld [vmem:[%s909_s0 + $0x28] sm:$0xff] }
  0x2d   :  { %v453_v0 = vpack.c.bf16 %v143_v62, %v139_v61  ;;  %v13_v3 = vld [vmem:[%s909_s0 + $0x10] sm:$0xff]  ;;  %v15_v5 = vld [vmem:[%s909_s0 + $0x20] sm:$0xff] }
  0x2e   :  { %370 = vmatpush1.bf16.msra.mxu0 %v369_v6 }
  0x2f   :  { %434 = vmatpush1.bf16.msra.mxu1 %v433_v8  ;;  %372 = vmatprep.subr.bf16.mxu0 %v371_v9 }
  0x30   :  { %436 = vmatprep.subr.bf16.mxu1 %v435_v13 }
  0x32   :  { %374 = vmatpush1.bf16.msra.mxu0 %v373_v19 }
  0x33   :  { %438 = vmatpush1.bf16.msra.mxu1 %v437_v20  ;;  %376 = vmatprep.subr.bf16.mxu0 %v375_v21 }
  0x34   :  { %440 = vmatprep.subr.bf16.mxu1 %v439_v25 }
  0x36   :  { %378 = vmatpush1.bf16.msra.mxu0 %v377_v31 }
  0x37   :  { %442 = vmatpush1.bf16.msra.mxu1 %v441_v32  ;;  %380 = vmatprep.subr.bf16.mxu0 %v379_v33 }
  0x38   :  { %444 = vmatprep.subr.bf16.mxu1 %v443_v37 }
  0x3a   :  { %382 = vmatpush1.bf16.msra.mxu0 %v381_v43 }
  0x3b   :  { %446 = vmatpush1.bf16.msra.mxu1 %v445_v44  ;;  %384 = vmatprep.subr.bf16.mxu0 %v383_v45 }
  0x3c   :  { %448 = vmatprep.subr.bf16.mxu1 %v447_v49 }
  0x3e   :  { %386 = vmatpush1.bf16.msra.mxu0 %v385_v55 }
  0x3f   :  { %450 = vmatpush1.bf16.msra.mxu1 %v449_v56  ;;  %388 = vmatprep.subr.bf16.mxu0 %v387_v57 }
  0x40   :  { %452 = vmatprep.subr.bf16.mxu1 %v451_v60 }
  0x42   :  { %390 = vmatpush1.bf16.msra.mxu0 %v389_v63 }
  0x43   :  { %454 = vmatpush1.bf16.msra.mxu1 %v453_v0 }
  0x45   :  { %210 = vmatmul.mubr.f32.vlgmr.msra.gmra.mrb[0].mxu0 %v11_v1 }
  0x46   :  { %293 = vmatmul.mubr.f32.vlgmr.msra.gmra.mrb[0].mxu1 %v11_v1  ;;  %215 = vmatprep.mubr.f32.mxu0 %v14_v2 }
  0x47   :  { %298 = vmatprep.mubr.f32.mxu1 %v14_v2 }
  0x49   :  { %216 = vmatmul.mubr.f32.gmra.mrb[2].mxu0 %v13_v3 }
  0x4a   :  { %299 = vmatmul.mubr.f32.gmra.mrb[2].mxu1 %v13_v3  ;;  %221 = vmatprep.mubr.f32.mxu0 %v16_v4 }
  0x4b   :  { %304 = vmatprep.mubr.f32.mxu1 %v16_v4 }
  0x4d   :  { %222 = vmatmul.mubr.f32.gmra.mrb[4].mxu0 %v15_v5 }
  0x4e   :  { %305 = vmatmul.mubr.f32.gmra.mrb[4].mxu1 %v15_v5 }
 0x118   :  { %v211_v6 = vpop.f32.mrb[0].mxu0 }
 0x119   :  { %311 = vst [vmem:[%s910_s2] sm:$0xff] %v211_v6  ;;  %v294_v7 = vpop.f32.mrb[0].mxu1  ;;  %v213_v8 = vpop.f32.mrb[1].mxu0 }
 0x11a   :  { %313 = vst [vmem:[%s910_s2 + $0x10] sm:$0xff] %v294_v7  ;;  %312 = vst [vmem:[%s910_s2 + $0x8] sm:$0xff] %v213_v8  ;;  %v296_v9 = vpop.f32.mrb[1].mxu1 }
 0x11b   :  { %314 = vst [vmem:[%s910_s2 + $0x18] sm:$0xff] %v296_v9 }
 0x11c   :  { %v217_v10 = vpop.f32.mrb[2].mxu0 }
 0x11d   :  { %315 = vst [vmem:[%s910_s2 + $0x20] sm:$0xff] %v217_v10  ;;  %v300_v11 = vpop.f32.mrb[2].mxu1  ;;  %v219_v12 = vpop.f32.mrb[3].mxu0 }
 0x11e   :  { %317 = vst [vmem:[%s910_s2 + $0x30] sm:$0xff] %v300_v11  ;;  %316 = vst [vmem:[%s910_s2 + $0x28] sm:$0xff] %v219_v12  ;;  %v302_v13 = vpop.f32.mrb[3].mxu1 }
 0x11f   :  { %318 = vst [vmem:[%s910_s2 + $0x38] sm:$0xff] %v302_v13 }
 0x120   :  { %v223_v14 = vpop.f32.mrb[4].mxu0 }
 0x121   :  { %319 = vst [vmem:[%s910_s2 + $0x40] sm:$0xff] %v223_v14  ;;  %v306_v15 = vpop.f32.mrb[4].mxu1  ;;  %v225_v16 = vpop.f32.mrb[5].mxu0 }
 0x122   :  { %321 = vst [vmem:[%s910_s2 + $0x50] sm:$0xff] %v306_v15  ;;  %320 = vst [vmem:[%s910_s2 + $0x48] sm:$0xff] %v225_v16  ;;  %v308_v17 = vpop.f32.mrb[5].mxu1 }
 0x123   :  { %322 = vst [vmem:[%s910_s2 + $0x58] sm:$0xff] %v308_v17 }

// kernel: transformer_forward.64
= control target key start
LH: loop header
LB: loop body
LE: loop exit
PB: predicated region body
PF: predicated region fallthrough
CT: control target
= control target key end

     0   :  { %s1938_s0 = inlined_call_operand.<no memory space> [shape: s32[1], index: 0, kind: input, shape index: {}]   ;;  %s1939_s2 = inlined_call_operand.vmem [shape: f32[1024,256], index: 2, kind: input, shape index: {}]   ;;  %s1940_s1 = inlined_call_operand.vmem [shape: f32[24,1024], index: 1, kind: input, shape index: {}]   ;;  %s1941_s4 = inlined_call_operand.vmem [shape: f32[2,256], index: 4, kind: input, shape index: {}]   ;;  %s1942_s3 = inlined_call_operand.vmem [shape: f32[24,256], index: 3, kind: input, shape index: {}]   ;;  %s1943_s5 = inlined_call_operand.vmem [shape: f32[24,256], index: 5, kind: output, shape index: {}]  }
   0x1   :  { %v44_v0 = vld [vmem:[%s1939_s2 + $0x8] sm:$0xff]  ;;  %v46_v1 = vld [vmem:[%s1939_s2 + $0x18] sm:$0xff]  ;;  %v43_v5 = vld [vmem:[%s1939_s2] sm:$0xff] }
   0x2   :  { %v172_v2 = vld [vmem:[%s1939_s2 + $0x408] sm:$0xff]  ;;  %v746_v3 = vpack.c.bf16 %v46_v1, %v44_v0  ;;  %v174_v4 = vld [vmem:[%s1939_s2 + $0x418] sm:$0xff]  ;;  %v45_v6 = vld [vmem:[%s1939_s2 + $0x10] sm:$0xff] }
   0x3   :  { %v874_v7 = vpack.c.bf16 %v174_v4, %v172_v2  ;;  %v748_v8 = vpack.c.bf16 %v45_v6, %v43_v5  ;;  %v171_v9 = vld [vmem:[%s1939_s2 + $0x400] sm:$0xff]  ;;  %v173_v10 = vld [vmem:[%s1939_s2 + $0x410] sm:$0xff]  ;;  %v48_v11 = vld [vmem:[%s1939_s2 + $0x28] sm:$0xff] }
   0x4   :  { %747 = vmatprep.subr.bf16.mxu1 %v746_v3  ;;  %v876_v12 = vpack.c.bf16 %v173_v10, %v171_v9  ;;  %v50_v13 = vld [vmem:[%s1939_s2 + $0x38] sm:$0xff]  ;;  %v176_v14 = vld [vmem:[%s1939_s2 + $0x428] sm:$0xff]  ;;  %v47_v18 = vld [vmem:[%s1939_s2 + $0x20] sm:$0xff] }
   0x5   :  { %v178_v15 = vld [vmem:[%s1939_s2 + $0x438] sm:$0xff]  ;;  %875 = vmatprep.subr.bf16.mxu0 %v874_v7  ;;  %749 = vmatpush1.bf16.msra.mxu1 %v748_v8  ;;  %v750_v16 = vpack.c.bf16 %v50_v13, %v48_v11  ;;  %v49_v19 = vld [vmem:[%s1939_s2 + $0x30] sm:$0xff]  ;;  %v175_v20 = vld [vmem:[%s1939_s2 + $0x420] sm:$0xff] }
   0x6   :  { %v878_v17 = vpack.c.bf16 %v178_v15, %v176_v14  ;;  %877 = vmatpush1.bf16.msra.mxu0 %v876_v12  ;;  %v752_v21 = vpack.c.bf16 %v49_v19, %v47_v18  ;;  %v177_v22 = vld [vmem:[%s1939_s2 + $0x430] sm:$0xff]  ;;  %v52_v23 = vld [vmem:[%s1939_s2 + $0x48] sm:$0xff]  ;;  %v54_v24 = vld [vmem:[%s1939_s2 + $0x58] sm:$0xff] }
   0x7   :  { %751 = vmatprep.subr.bf16.mxu1 %v750_v16  ;;  %v880_v25 = vpack.c.bf16 %v177_v22, %v175_v20  ;;  %v754_v26 = vpack.c.bf16 %v54_v24, %v52_v23  ;;  %v180_v27 = vld [vmem:[%s1939_s2 + $0x448] sm:$0xff]  ;;  %v182_v28 = vld [vmem:[%s1939_s2 + $0x458] sm:$0xff]  ;;  %v51_v29 = vld [vmem:[%s1939_s2 + $0x40] sm:$0xff] }
   0x8   :  { %879 = vmatprep.subr.bf16.mxu0 %v878_v17  ;;  %v882_v30 = vpack.c.bf16 %v182_v28, %v180_v27  ;;  %v53_v31 = vld [vmem:[%s1939_s2 + $0x50] sm:$0xff]  ;;  %v179_v32 = vld [vmem:[%s1939_s2 + $0x440] sm:$0xff]  ;;  %v56_v35 = vld [vmem:[%s1939_s2 + $0x68] sm:$0xff] }
   0x9   :  { %v181_v33 = vld [vmem:[%s1939_s2 + $0x450] sm:$0xff]  ;;  %753 = vmatpush1.bf16.msra.mxu1 %v752_v21  ;;  %v756_v34 = vpack.c.bf16 %v53_v31, %v51_v29  ;;  %v58_v36 = vld [vmem:[%s1939_s2 + $0x78] sm:$0xff]  ;;  %v184_v37 = vld [vmem:[%s1939_s2 + $0x468] sm:$0xff] }
   0xa   :  { %881 = vmatpush1.bf16.msra.mxu0 %v880_v25  ;;  %755 = vmatprep.subr.bf16.mxu1 %v754_v26  ;;  %v884_v38 = vpack.c.bf16 %v181_v33, %v179_v32  ;;  %v758_v39 = vpack.c.bf16 %v58_v36, %v56_v35  ;;  %v186_v40 = vld [vmem:[%s1939_s2 + $0x478] sm:$0xff]  ;;  %v55_v41 = vld [vmem:[%s1939_s2 + $0x60] sm:$0xff]  ;;  %v57_v42 = vld [vmem:[%s1939_s2 + $0x70] sm:$0xff] }
   0xb   :  { %883 = vmatprep.subr.bf16.mxu0 %v882_v30  ;;  %v886_v43 = vpack.c.bf16 %v186_v40, %v184_v37  ;;  %v183_v44 = vld [vmem:[%s1939_s2 + $0x460] sm:$0xff]  ;;  %v185_v45 = vld [vmem:[%s1939_s2 + $0x470] sm:$0xff]  ;;  %v60_v46 = vld [vmem:[%s1939_s2 + $0x88] sm:$0xff]  ;;  %v760_v50 = vpack.c.bf16 %v57_v42, %v55_v41 }
   0xc   :  { %v62_v47 = vld [vmem:[%s1939_s2 + $0x98] sm:$0xff]  ;;  %v188_v48 = vld [vmem:[%s1939_s2 + $0x488] sm:$0xff]  ;;  %v888_v51 = vpack.c.bf16 %v185_v45, %v183_v44  ;;  %v59_v53 = vld [vmem:[%s1939_s2 + $0x80] sm:$0xff] }
   0xd   :  { %v190_v49 = vld [vmem:[%s1939_s2 + $0x498] sm:$0xff]  ;;  %757 = vmatpush1.bf16.msra.mxu1 %v756_v34  ;;  %v762_v52 = vpack.c.bf16 %v62_v47, %v60_v46  ;;  %v61_v54 = vld [vmem:[%s1939_s2 + $0x90] sm:$0xff]  ;;  %v187_v55 = vld [vmem:[%s1939_s2 + $0x480] sm:$0xff] }
   0xe   :  { %885 = vmatpush1.bf16.msra.mxu0 %v884_v38  ;;  %759 = vmatprep.subr.bf16.mxu1 %v758_v39  ;;  %v890_v56 = vpack.c.bf16 %v190_v49, %v188_v48  ;;  %v189_v57 = vld [vmem:[%s1939_s2 + $0x490] sm:$0xff]  ;;  %v64_v58 = vld [vmem:[%s1939_s2 + $0xa8] sm:$0xff]  ;;  %v66_v59 = vld [vmem:[%s1939_s2 + $0xb8] sm:$0xff]  ;;  %v764_v62 = vpack.c.bf16 %v61_v54, %v59_v53 }
   0xf   :  { %887 = vmatprep.subr.bf16.mxu0 %v886_v43  ;;  %v192_v60 = vld [vmem:[%s1939_s2 + $0x4a8] sm:$0xff]  ;;  %v194_v61 = vld [vmem:[%s1939_s2 + $0x4b8] sm:$0xff]  ;;  %v892_v63 = vpack.c.bf16 %v189_v57, %v187_v55  ;;  %v766_v0 = vpack.c.bf16 %v66_v59, %v64_v58  ;;  %v63_v1 = vld [vmem:[%s1939_s2 + $0xa0] sm:$0xff] }
  0x10   :  { %v65_v2 = vld [vmem:[%s1939_s2 + $0xb0] sm:$0xff]  ;;  %v191_v3 = vld [vmem:[%s1939_s2 + $0x4a0] sm:$0xff]  ;;  %v894_v4 = vpack.c.bf16 %v194_v61, %v192_v60  ;;  %v68_v6 = vld [vmem:[%s1939_s2 + $0xc8] sm:$0xff] }
  0x11   :  { %761 = vmatpush1.bf16.msra.mxu1 %v760_v50  ;;  %v193_v5 = vld [vmem:[%s1939_s2 + $0x4b0] sm:$0xff]  ;;  %v70_v7 = vld [vmem:[%s1939_s2 + $0xd8] sm:$0xff]  ;;  %v196_v8 = vld [vmem:[%s1939_s2 + $0x4c8] sm:$0xff]  ;;  %v768_v10 = vpack.c.bf16 %v65_v2, %v63_v1 }
  0x12   :  { %889 = vmatpush1.bf16.msra.mxu0 %v888_v51  ;;  %763 = vmatprep.subr.bf16.mxu1 %v762_v52  ;;  %v198_v9 = vld [vmem:[%s1939_s2 + $0x4d8] sm:$0xff]  ;;  %v896_v11 = vpack.c.bf16 %v193_v5, %v191_v3  ;;  %v770_v12 = vpack.c.bf16 %v70_v7, %v68_v6  ;;  %v67_v13 = vld [vmem:[%s1939_s2 + $0xc0] sm:$0xff]  ;;  %v69_v14 = vld [vmem:[%s1939_s2 + $0xd0] sm:$0xff] }
  0x13   :  { %891 = vmatprep.subr.bf16.mxu0 %v890_v56  ;;  %v195_v15 = vld [vmem:[%s1939_s2 + $0x4c0] sm:$0xff]  ;;  %v898_v16 = vpack.c.bf16 %v198_v9, %v196_v8  ;;  %v197_v17 = vld [vmem:[%s1939_s2 + $0x4d0] sm:$0xff]  ;;  %v72_v18 = vld [vmem:[%s1939_s2 + $0xe8] sm:$0xff]  ;;  %v772_v22 = vpack.c.bf16 %v69_v14, %v67_v13 }
  0x14   :  { %v74_v19 = vld [vmem:[%s1939_s2 + $0xf8] sm:$0xff]  ;;  %v200_v20 = vld [vmem:[%s1939_s2 + $0x4e8] sm:$0xff]  ;;  %v900_v23 = vpack.c.bf16 %v197_v17, %v195_v15  ;;  %v71_v25 = vld [vmem:[%s1939_s2 + $0xe0] sm:$0xff] }
  0x15   :  { %765 = vmatpush1.bf16.msra.mxu1 %v764_v62  ;;  %v202_v21 = vld [vmem:[%s1939_s2 + $0x4f8] sm:$0xff]  ;;  %v774_v24 = vpack.c.bf16 %v74_v19, %v72_v18  ;;  %v73_v26 = vld [vmem:[%s1939_s2 + $0xf0] sm:$0xff]  ;;  %v199_v27 = vld [vmem:[%s1939_s2 + $0x4e0] sm:$0xff] }
  0x16   :  { %893 = vmatpush1.bf16.msra.mxu0 %v892_v63  ;;  %767 = vmatprep.subr.bf16.mxu1 %v766_v0  ;;  %v902_v28 = vpack.c.bf16 %v202_v21, %v200_v20  ;;  %v201_v29 = vld [vmem:[%s1939_s2 + $0x4f0] sm:$0xff]  ;;  %v76_v30 = vld [vmem:[%s1939_s2 + $0x108] sm:$0xff]  ;;  %v78_v31 = vld [vmem:[%s1939_s2 + $0x118] sm:$0xff]  ;;  %v776_v34 = vpack.c.bf16 %v73_v26, %v71_v25 }
  0x17   :  { %895 = vmatprep.subr.bf16.mxu0 %v894_v4  ;;  %v204_v32 = vld [vmem:[%s1939_s2 + $0x508] sm:$0xff]  ;;  %v206_v33 = vld [vmem:[%s1939_s2 + $0x518] sm:$0xff]  ;;  %v904_v35 = vpack.c.bf16 %v201_v29, %v199_v27  ;;  %v778_v36 = vpack.c.bf16 %v78_v31, %v76_v30  ;;  %v75_v37 = vld [vmem:[%s1939_s2 + $0x100] sm:$0xff] }
  0x18   :  { %v77_v38 = vld [vmem:[%s1939_s2 + $0x110] sm:$0xff]  ;;  %v203_v39 = vld [vmem:[%s1939_s2 + $0x500] sm:$0xff]  ;;  %v906_v40 = vpack.c.bf16 %v206_v33, %v204_v32  ;;  %v80_v42 = vld [vmem:[%s1939_s2 + $0x128] sm:$0xff] }
  0x19   :  { %769 = vmatpush1.bf16.msra.mxu1 %v768_v10  ;;  %v205_v41 = vld [vmem:[%s1939_s2 + $0x510] sm:$0xff]  ;;  %v82_v43 = vld [vmem:[%s1939_s2 + $0x138] sm:$0xff]  ;;  %v208_v44 = vld [vmem:[%s1939_s2 + $0x528] sm:$0xff]  ;;  %v780_v46 = vpack.c.bf16 %v77_v38, %v75_v37 }
  0x1a   :  { %897 = vmatpush1.bf16.msra.mxu0 %v896_v11  ;;  %771 = vmatprep.subr.bf16.mxu1 %v770_v12  ;;  %v210_v45 = vld [vmem:[%s1939_s2 + $0x538] sm:$0xff]  ;;  %v908_v47 = vpack.c.bf16 %v205_v41, %v203_v39  ;;  %v782_v48 = vpack.c.bf16 %v82_v43, %v80_v42  ;;  %v79_v49 = vld [vmem:[%s1939_s2 + $0x120] sm:$0xff]  ;;  %v81_v50 = vld [vmem:[%s1939_s2 + $0x130] sm:$0xff] }
  0x1b   :  { %899 = vmatprep.subr.bf16.mxu0 %v898_v16  ;;  %v207_v51 = vld [vmem:[%s1939_s2 + $0x520] sm:$0xff]  ;;  %v910_v52 = vpack.c.bf16 %v210_v45, %v208_v44  ;;  %v209_v53 = vld [vmem:[%s1939_s2 + $0x530] sm:$0xff]  ;;  %v84_v54 = vld [vmem:[%s1939_s2 + $0x148] sm:$0xff]  ;;  %v784_v58 = vpack.c.bf16 %v81_v50, %v79_v49 }
  0x1c   :  { %v86_v55 = vld [vmem:[%s1939_s2 + $0x158] sm:$0xff]  ;;  %v212_v56 = vld [vmem:[%s1939_s2 + $0x548] sm:$0xff]  ;;  %v912_v59 = vpack.c.bf16 %v209_v53, %v207_v51  ;;  %v83_v61 = vld [vmem:[%s1939_s2 + $0x140] sm:$0xff] }
  0x1d   :  { %773 = vmatpush1.bf16.msra.mxu1 %v772_v22  ;;  %v214_v57 = vld [vmem:[%s1939_s2 + $0x558] sm:$0xff]  ;;  %v786_v60 = vpack.c.bf16 %v86_v55, %v84_v54  ;;  %v85_v62 = vld [vmem:[%s1939_s2 + $0x150] sm:$0xff]  ;;  %v211_v63 = vld [vmem:[%s1939_s2 + $0x540] sm:$0xff] }
  0x1e   :  { %901 = vmatpush1.bf16.msra.mxu0 %v900_v23  ;;  %775 = vmatprep.subr.bf16.mxu1 %v774_v24  ;;  %v914_v0 = vpack.c.bf16 %v214_v57, %v212_v56  ;;  %v213_v1 = vld [vmem:[%s1939_s2 + $0x550] sm:$0xff]  ;;  %v88_v2 = vld [vmem:[%s1939_s2 + $0x168] sm:$0xff]  ;;  %v90_v3 = vld [vmem:[%s1939_s2 + $0x178] sm:$0xff]  ;;  %v788_v6 = vpack.c.bf16 %v85_v62, %v83_v61 }
  0x1f   :  { %903 = vmatprep.subr.bf16.mxu0 %v902_v28  ;;  %v216_v4 = vld [vmem:[%s1939_s2 + $0x568] sm:$0xff]  ;;  %v218_v5 = vld [vmem:[%s1939_s2 + $0x578] sm:$0xff]  ;;  %v87_v7 = vld [vmem:[%s1939_s2 + $0x160] sm:$0xff]  ;;  %v916_v8 = vpack.c.bf16 %v213_v1, %v211_v63  ;;  %v790_v9 = vpack.c.bf16 %v90_v3, %v88_v2 }
  0x20   :  { %v89_v10 = vld [vmem:[%s1939_s2 + $0x170] sm:$0xff]  ;;  %v215_v11 = vld [vmem:[%s1939_s2 + $0x560] sm:$0xff]  ;;  %v918_v13 = vpack.c.bf16 %v218_v5, %v216_v4  ;;  %v92_v14 = vld [vmem:[%s1939_s2 + $0x188] sm:$0xff] }
  0x21   :  { %777 = vmatpush1.bf16.msra.mxu1 %v776_v34  ;;  %v217_v12 = vld [vmem:[%s1939_s2 + $0x570] sm:$0xff]  ;;  %v94_v15 = vld [vmem:[%s1939_s2 + $0x198] sm:$0xff]  ;;  %v20_v16 = vld [vmem:[%s1940_s1 + $0x8] sm:$0xff]  ;;  %v792_v20 = vpack.c.bf16 %v89_v10, %v87_v7 }
  0x22   :  { %905 = vmatpush1.bf16.msra.mxu0 %v904_v35  ;;  %779 = vmatprep.subr.bf16.mxu1 %v778_v36  ;;  %v220_v17 = vld [vmem:[%s1939_s2 + $0x588] sm:$0xff]  ;;  %v222_v18 = vld [vmem:[%s1939_s2 + $0x598] sm:$0xff]  ;;  %v920_v21 = vpack.c.bf16 %v217_v12, %v215_v11  ;;  %v794_v22 = vpack.c.bf16 %v94_v15, %v92_v14  ;;  %v91_v23 = vld [vmem:[%s1939_s2 + $0x180] sm:$0xff] }
  0x23   :  { %907 = vmatprep.subr.bf16.mxu0 %v906_v40  ;;  %363 = vmatprep.mubr.f32.mxu1 %v20_v16  ;;  %v24_v19 = vld [vmem:[%s1940_s1 + $0x28] sm:$0xff]  ;;  %v93_v24 = vld [vmem:[%s1939_s2 + $0x190] sm:$0xff]  ;;  %v219_v25 = vld [vmem:[%s1939_s2 + $0x580] sm:$0xff]  ;;  %v922_v26 = vpack.c.bf16 %v222_v18, %v220_v17 }
  0x24   :  { %529 = vmatprep.mubr.f32.mxu0 %v24_v19  ;;  %v221_v27 = vld [vmem:[%s1939_s2 + $0x590] sm:$0xff]  ;;  %v96_v28 = vld [vmem:[%s1939_s2 + $0x1a8] sm:$0xff]  ;;  %v98_v29 = vld [vmem:[%s1939_s2 + $0x1b8] sm:$0xff]  ;;  %v796_v32 = vpack.c.bf16 %v93_v24, %v91_v23 }
  0x25   :  { %781 = vmatpush1.bf16.msra.mxu1 %v780_v46  ;;  %v224_v30 = vld [vmem:[%s1939_s2 + $0x5a8] sm:$0xff]  ;;  %v226_v31 = vld [vmem:[%s1939_s2 + $0x5b8] sm:$0xff]  ;;  %v924_v33 = vpack.c.bf16 %v221_v27, %v219_v25  ;;  %v798_v34 = vpack.c.bf16 %v98_v29, %v96_v28  ;;  %v95_v35 = vld [vmem:[%s1939_s2 + $0x1a0] sm:$0xff] }
  0x26   :  { %909 = vmatpush1.bf16.msra.mxu0 %v908_v47  ;;  %783 = vmatprep.subr.bf16.mxu1 %v782_v48  ;;  %v97_v36 = vld [vmem:[%s1939_s2 + $0x1b0] sm:$0xff]  ;;  %v223_v37 = vld [vmem:[%s1939_s2 + $0x5a0] sm:$0xff]  ;;  %v926_v38 = vpack.c.bf16 %v226_v31, %v224_v30  ;;  %v100_v40 = vld [vmem:[%s1939_s2 + $0x1c8] sm:$0xff] }
  0x27   :  { %911 = vmatprep.subr.bf16.mxu0 %v910_v52  ;;  %v225_v39 = vld [vmem:[%s1939_s2 + $0x5b0] sm:$0xff]  ;;  %v102_v41 = vld [vmem:[%s1939_s2 + $0x1d8] sm:$0xff]  ;;  %v228_v42 = vld [vmem:[%s1939_s2 + $0x5c8] sm:$0xff]  ;;  %v800_v44 = vpack.c.bf16 %v97_v36, %v95_v35 }
  0x28   :  { %v230_v43 = vld [vmem:[%s1939_s2 + $0x5d8] sm:$0xff]  ;;  %v928_v45 = vpack.c.bf16 %v225_v39, %v223_v37  ;;  %v802_v46 = vpack.c.bf16 %v102_v41, %v100_v40  ;;  %v99_v47 = vld [vmem:[%s1939_s2 + $0x1c0] sm:$0xff]  ;;  %v101_v48 = vld [vmem:[%s1939_s2 + $0x1d0] sm:$0xff] }
  0x29   :  { %785 = vmatpush1.bf16.msra.mxu1 %v784_v58  ;;  %v227_v49 = vld [vmem:[%s1939_s2 + $0x5c0] sm:$0xff]  ;;  %v930_v50 = vpack.c.bf16 %v230_v43, %v228_v42  ;;  %v229_v51 = vld [vmem:[%s1939_s2 + $0x5d0] sm:$0xff]  ;;  %v104_v52 = vld [vmem:[%s1939_s2 + $0x1e8] sm:$0xff]  ;;  %v804_v56 = vpack.c.bf16 %v101_v48, %v99_v47 }
  0x2a   :  { %913 = vmatpush1.bf16.msra.mxu0 %v912_v59  ;;  %787 = vmatprep.subr.bf16.mxu1 %v786_v60  ;;  %v106_v53 = vld [vmem:[%s1939_s2 + $0x1f8] sm:$0xff]  ;;  %v232_v54 = vld [vmem:[%s1939_s2 + $0x5e8] sm:$0xff]  ;;  %v932_v57 = vpack.c.bf16 %v229_v51, %v227_v49  ;;  %v103_v59 = vld [vmem:[%s1939_s2 + $0x1e0] sm:$0xff] }
  0x2b   :  { %915 = vmatprep.subr.bf16.mxu0 %v914_v0  ;;  %v234_v55 = vld [vmem:[%s1939_s2 + $0x5f8] sm:$0xff]  ;;  %v806_v58 = vpack.c.bf16 %v106_v53, %v104_v52  ;;  %v105_v60 = vld [vmem:[%s1939_s2 + $0x1f0] sm:$0xff]  ;;  %v231_v61 = vld [vmem:[%s1939_s2 + $0x5e0] sm:$0xff] }
  0x2c   :  { %v934_v62 = vpack.c.bf16 %v234_v55, %v232_v54  ;;  %v233_v63 = vld [vmem:[%s1939_s2 + $0x5f0] sm:$0xff]  ;;  %v108_v0 = vld [vmem:[%s1939_s2 + $0x208] sm:$0xff]  ;;  %v110_v1 = vld [vmem:[%s1939_s2 + $0x218] sm:$0xff]  ;;  %v808_v4 = vpack.c.bf16 %v105_v60, %v103_v59 }
  0x2d   :  { %789 = vmatpush1.bf16.msra.mxu1 %v788_v6  ;;  %v236_v2 = vld [vmem:[%s1939_s2 + $0x608] sm:$0xff]  ;;  %v238_v3 = vld [vmem:[%s1939_s2 + $0x618] sm:$0xff]  ;;  %v936_v5 = vpack.c.bf16 %v233_v63, %v231_v61  ;;  %v810_v6 = vpack.c.bf16 %v110_v1, %v108_v0  ;;  %v107_v7 = vld [vmem:[%s1939_s2 + $0x200] sm:$0xff] }
  0x2e   :  { %917 = vmatpush1.bf16.msra.mxu0 %v916_v8  ;;  %791 = vmatprep.subr.bf16.mxu1 %v790_v9  ;;  %v109_v8 = vld [vmem:[%s1939_s2 + $0x210] sm:$0xff]  ;;  %v235_v9 = vld [vmem:[%s1939_s2 + $0x600] sm:$0xff]  ;;  %v938_v10 = vpack.c.bf16 %v238_v3, %v236_v2  ;;  %v112_v12 = vld [vmem:[%s1939_s2 + $0x228] sm:$0xff] }
  0x2f   :  { %919 = vmatprep.subr.bf16.mxu0 %v918_v13  ;;  %v237_v11 = vld [vmem:[%s1939_s2 + $0x610] sm:$0xff]  ;;  %v114_v13 = vld [vmem:[%s1939_s2 + $0x238] sm:$0xff]  ;;  %v240_v14 = vld [vmem:[%s1939_s2 + $0x628] sm:$0xff]  ;;  %v812_v17 = vpack.c.bf16 %v109_v8, %v107_v7 }
  0x30   :  { %v242_v15 = vld [vmem:[%s1939_s2 + $0x638] sm:$0xff]  ;;  %v19_v16 = vld [vmem:[%s1940_s1] sm:$0xff]  ;;  %v940_v19 = vpack.c.bf16 %v237_v11, %v235_v9  ;;  %v241_v25 = vld [vmem:[%s1939_s2 + $0x630] sm:$0xff] }
  0x31   :  { %793 = vmatpush1.bf16.msra.mxu1 %v792_v20  ;;  %v23_v18 = vld [vmem:[%s1940_s1 + $0x20] sm:$0xff]  ;;  %v814_v20 = vpack.c.bf16 %v114_v13, %v112_v12  ;;  %v942_v24 = vpack.c.bf16 %v242_v15, %v240_v14  ;;  %v118_v27 = vld [vmem:[%s1939_s2 + $0x258] sm:$0xff]  ;;  %v244_v28 = vld [vmem:[%s1939_s2 + $0x648] sm:$0xff] }
  0x32   :  { %921 = vmatpush1.bf16.msra.mxu0 %v920_v21  ;;  %795 = vmatprep.subr.bf16.mxu1 %v794_v22  ;;  %v111_v21 = vld [vmem:[%s1939_s2 + $0x220] sm:$0xff]  ;;  %v113_v22 = vld [vmem:[%s1939_s2 + $0x230] sm:$0xff]  ;;  %v246_v29 = vld [vmem:[%s1939_s2 + $0x658] sm:$0xff] }
  0x33   :  { %923 = vmatprep.subr.bf16.mxu0 %v922_v26  ;;  %v239_v23 = vld [vmem:[%s1939_s2 + $0x620] sm:$0xff]  ;;  %v116_v26 = vld [vmem:[%s1939_s2 + $0x248] sm:$0xff]  ;;  %v816_v30 = vpack.c.bf16 %v113_v22, %v111_v21  ;;  %v946_v36 = vpack.c.bf16 %v246_v29, %v244_v28  ;;  %v245_v37 = vld [vmem:[%s1939_s2 + $0x650] sm:$0xff] }
  0x34   :  { %v944_v31 = vpack.c.bf16 %v241_v25, %v239_v23  ;;  %v243_v35 = vld [vmem:[%s1939_s2 + $0x640] sm:$0xff]  ;;  %v122_v39 = vld [vmem:[%s1939_s2 + $0x278] sm:$0xff]  ;;  %v248_v40 = vld [vmem:[%s1939_s2 + $0x668] sm:$0xff] }
  0x35   :  { %797 = vmatpush1.bf16.msra.mxu1 %v796_v32  ;;  %v818_v32 = vpack.c.bf16 %v118_v27, %v116_v26  ;;  %v250_v41 = vld [vmem:[%s1939_s2 + $0x678] sm:$0xff]  ;;  %v948_v43 = vpack.c.bf16 %v245_v37, %v243_v35  ;;  %v247_v47 = vld [vmem:[%s1939_s2 + $0x660] sm:$0xff]  ;;  %v249_v49 = vld [vmem:[%s1939_s2 + $0x670] sm:$0xff] }
  0x36   :  { %925 = vmatpush1.bf16.msra.mxu0 %v924_v33  ;;  %799 = vmatprep.subr.bf16.mxu1 %v798_v34  ;;  %v115_v33 = vld [vmem:[%s1939_s2 + $0x240] sm:$0xff]  ;;  %v117_v34 = vld [vmem:[%s1939_s2 + $0x250] sm:$0xff]  ;;  %v950_v48 = vpack.c.bf16 %v250_v41, %v248_v40  ;;  %v126_v51 = vld [vmem:[%s1939_s2 + $0x298] sm:$0xff]  ;;  %v952_v55 = vpack.c.bf16 %v249_v49, %v247_v47 }
  0x37   :  { %927 = vmatprep.subr.bf16.mxu0 %v926_v38  ;;  %v120_v38 = vld [vmem:[%s1939_s2 + $0x268] sm:$0xff]  ;;  %v820_v42 = vpack.c.bf16 %v117_v34, %v115_v33  ;;  %v254_v53 = vld [vmem:[%s1939_s2 + $0x698] sm:$0xff]  ;;  %v251_v59 = vld [vmem:[%s1939_s2 + $0x680] sm:$0xff] }
  0x38   :  { %v252_v52 = vld [vmem:[%s1939_s2 + $0x688] sm:$0xff]  ;;  %v253_v61 = vld [vmem:[%s1939_s2 + $0x690] sm:$0xff]  ;;  %v130_v63 = vld [vmem:[%s1939_s2 + $0x2b8] sm:$0xff] }
  0x39   :  { %801 = vmatpush1.bf16.msra.mxu1 %v800_v44  ;;  %v822_v44 = vpack.c.bf16 %v122_v39, %v120_v38  ;;  %v954_v60 = vpack.c.bf16 %v254_v53, %v252_v52  ;;  %v256_v0 = vld [vmem:[%s1939_s2 + $0x6a8] sm:$0xff]  ;;  %v258_v1 = vld [vmem:[%s1939_s2 + $0x6b8] sm:$0xff]  ;;  %v127_v3 = vld [vmem:[%s1939_s2 + $0x2a0] sm:$0xff] }
  0x3a   :  { %929 = vmatpush1.bf16.msra.mxu0 %v928_v45  ;;  %803 = vmatprep.subr.bf16.mxu1 %v802_v46  ;;  %v119_v45 = vld [vmem:[%s1939_s2 + $0x260] sm:$0xff]  ;;  %v121_v46 = vld [vmem:[%s1939_s2 + $0x270] sm:$0xff]  ;;  %v28_v9 = vld [vmem:[%s1940_s1 + $0x48] sm:$0xff]  ;;  %v958_v11 = vpack.c.bf16 %v258_v1, %v256_v0 }
  0x3b   :  { %931 = vmatprep.subr.bf16.mxu0 %v930_v50  ;;  %v124_v50 = vld [vmem:[%s1939_s2 + $0x288] sm:$0xff]  ;;  %v824_v54 = vpack.c.bf16 %v121_v46, %v119_v45  ;;  %v257_v8 = vld [vmem:[%s1939_s2 + $0x6b0] sm:$0xff]  ;;  %v134_v13 = vld [vmem:[%s1939_s2 + $0x2d8] sm:$0xff] }
  0x3c   :  { %v132_v12 = vld [vmem:[%s1939_s2 + $0x2c8] sm:$0xff]  ;;  %v27_v14 = vld [vmem:[%s1940_s1 + $0x40] sm:$0xff]  ;;  %v138_v29 = vld [vmem:[%s1939_s2 + $0x2f8] sm:$0xff] }
  0x3d   :  { %805 = vmatpush1.bf16.msra.mxu1 %v804_v56  ;;  %v826_v56 = vpack.c.bf16 %v126_v51, %v124_v50  ;;  %v260_v15 = vld [vmem:[%s1939_s2 + $0x6c8] sm:$0xff]  ;;  %v259_v21 = vld [vmem:[%s1939_s2 + $0x6c0] sm:$0xff]  ;;  %v834_v23 = vpack.c.bf16 %v134_v13, %v132_v12  ;;  %v22_v40 = vld [vmem:[%s1940_s1 + $0x18] sm:$0xff] }
  0x3e   :  { %933 = vmatpush1.bf16.msra.mxu0 %v932_v57  ;;  %807 = vmatprep.subr.bf16.mxu1 %v806_v58  ;;  %v123_v57 = vld [vmem:[%s1939_s2 + $0x280] sm:$0xff]  ;;  %v125_v58 = vld [vmem:[%s1939_s2 + $0x290] sm:$0xff]  ;;  %v36_v25 = vld [vmem:[%s1940_s1 + $0x88] sm:$0xff] }
  0x3f   :  { %935 = vmatprep.subr.bf16.mxu0 %v934_v62  ;;  %v128_v62 = vld [vmem:[%s1939_s2 + $0x2a8] sm:$0xff]  ;;  %v828_v2 = vpack.c.bf16 %v125_v58, %v123_v57  ;;  %v39_v33 = vld [vmem:[%s1940_s1 + $0xa0] sm:$0xff]  ;;  %v26_v41 = vld [vmem:[%s1940_s1 + $0x38] sm:$0xff] }
  0x40   :  { %v830_v7 = vpack.c.bf16 %v130_v63, %v128_v62  ;;  %v40_v26 = vld [vmem:[%s1940_s1 + $0xa8] sm:$0xff]  ;;  %v135_v35 = vld [vmem:[%s1939_s2 + $0x2e0] sm:$0xff]  ;;  %v142_v45 = vld [vmem:[%s1939_s2 + $0x318] sm:$0xff] }
  0x41   :  { %809 = vmatpush1.bf16.msra.mxu1 %v808_v4  ;;  %v129_v4 = vld [vmem:[%s1939_s2 + $0x2b0] sm:$0xff]  ;;  %v136_v28 = vld [vmem:[%s1939_s2 + $0x2e8] sm:$0xff]  ;;  %v263_v39 = vld [vmem:[%s1939_s2 + $0x6e0] sm:$0xff] }
  0x42   :  { %937 = vmatpush1.bf16.msra.mxu0 %v936_v5  ;;  %811 = vmatprep.subr.bf16.mxu1 %v810_v6  ;;  %v255_v5 = vld [vmem:[%s1939_s2 + $0x6a0] sm:$0xff]  ;;  %v956_v6 = vpack.c.bf16 %v253_v61, %v251_v59  ;;  %v838_v38 = vpack.c.bf16 %v138_v29, %v136_v28  ;;  %v268_v46 = vld [vmem:[%s1939_s2 + $0x708] sm:$0xff]  ;;  %v270_v47 = vld [vmem:[%s1939_s2 + $0x718] sm:$0xff] }
  0x43   :  { %939 = vmatprep.subr.bf16.mxu0 %v938_v10  ;;  %v32_v10 = vld [vmem:[%s1940_s1 + $0x68] sm:$0xff]  ;;  %v960_v22 = vpack.c.bf16 %v257_v8, %v255_v5  ;;  %v139_v51 = vld [vmem:[%s1939_s2 + $0x300] sm:$0xff]  ;;  %v141_v52 = vld [vmem:[%s1939_s2 + $0x310] sm:$0xff] }
  0x44   :  { %364 = vmatmul.mubr.f32.vlgmr.msra.gmra.mrb[0].mxu1 %v19_v16  ;;  %v262_v16 = vld [vmem:[%s1939_s2 + $0x6d8] sm:$0xff]  ;;  %v267_v53 = vld [vmem:[%s1939_s2 + $0x700] sm:$0xff]  ;;  %v272_v58 = vld [vmem:[%s1939_s2 + $0x728] sm:$0xff] }
  0x45   :  { %813 = vmatpush1.bf16.msra.mxu1 %v812_v17  ;;  %530 = vmatmul.mubr.f32.vlgmr.msra.gmra.mrb[0].mxu0 %v23_v18  ;;  %v31_v17 = vld [vmem:[%s1940_s1 + $0x60] sm:$0xff]  ;;  %v832_v18 = vpack.c.bf16 %v129_v4, %v127_v3  ;;  %v962_v27 = vpack.c.bf16 %v262_v16, %v260_v15  ;;  %v146_v57 = vld [vmem:[%s1939_s2 + $0x338] sm:$0xff]  ;;  %v145_v0 = vld [vmem:[%s1939_s2 + $0x330] sm:$0xff] }
  0x46   :  { %941 = vmatpush1.bf16.msra.mxu0 %v940_v19  ;;  %815 = vmatprep.subr.bf16.mxu1 %v814_v20  ;;  %v131_v19 = vld [vmem:[%s1939_s2 + $0x2c0] sm:$0xff]  ;;  %v133_v20 = vld [vmem:[%s1939_s2 + $0x2d0] sm:$0xff]  ;;  %v274_v59 = vld [vmem:[%s1939_s2 + $0x738] sm:$0xff] }
  0x47   :  { %943 = vmatprep.subr.bf16.mxu0 %v942_v24  ;;  %369 = vmatprep.mubr.f32.mxu1 %v28_v9  ;;  %v261_v24 = vld [vmem:[%s1939_s2 + $0x6d0] sm:$0xff]  ;;  %v836_v34 = vpack.c.bf16 %v133_v20, %v131_v19  ;;  %v143_v63 = vld [vmem:[%s1939_s2 + $0x320] sm:$0xff]  ;;  %v148_v4 = vld [vmem:[%s1939_s2 + $0x348] sm:$0xff] }
  0x48   :  { %535 = vmatprep.mubr.f32.mxu0 %v32_v10  ;;  %370 = vmatmul.mubr.f32.gmra.mrb[2].mxu1 %v27_v14  ;;  %v964_v37 = vpack.c.bf16 %v261_v24, %v259_v21  ;;  %v271_v1 = vld [vmem:[%s1939_s2 + $0x720] sm:$0xff]  ;;  %v273_v3 = vld [vmem:[%s1939_s2 + $0x730] sm:$0xff]  ;;  %v150_v5 = vld [vmem:[%s1939_s2 + $0x358] sm:$0xff]  ;;  %v848_v8 = vpack.c.bf16 %v145_v0, %v143_v63 }
  0x49   :  { %817 = vmatpush1.bf16.msra.mxu1 %v816_v30  ;;  %536 = vmatmul.mubr.f32.gmra.mrb[2].mxu0 %v31_v17  ;;  %v35_v30 = vld [vmem:[%s1940_s1 + $0x80] sm:$0xff]  ;;  %v976_v9 = vpack.c.bf16 %v273_v3, %v271_v1  ;;  %v850_v10 = vpack.c.bf16 %v150_v5, %v148_v4  ;;  %v149_v12 = vld [vmem:[%s1939_s2 + $0x350] sm:$0xff]  ;;  %v152_v16 = vld [vmem:[%s1939_s2 + $0x368] sm:$0xff] }
  0x4a   :  { %945 = vmatpush1.bf16.msra.mxu0 %v944_v31  ;;  %819 = vmatprep.subr.bf16.mxu1 %v818_v32  ;;  %v264_v31 = vld [vmem:[%s1939_s2 + $0x6e8] sm:$0xff]  ;;  %v266_v32 = vld [vmem:[%s1939_s2 + $0x6f8] sm:$0xff]  ;;  %v275_v13 = vld [vmem:[%s1939_s2 + $0x740] sm:$0xff] }
  0x4b   :  { %947 = vmatprep.subr.bf16.mxu0 %v946_v36  ;;  %375 = vmatprep.mubr.f32.mxu1 %v36_v25  ;;  %v137_v36 = vld [vmem:[%s1939_s2 + $0x2f0] sm:$0xff]  ;;  %v154_v17 = vld [vmem:[%s1939_s2 + $0x378] sm:$0xff]  ;;  %v279_v25 = vld [vmem:[%s1939_s2 + $0x760] sm:$0xff] }
  0x4c   :  { %541 = vmatprep.mubr.f32.mxu0 %v40_v26  ;;  %376 = vmatmul.mubr.f32.gmra.mrb[4].mxu1 %v35_v30  ;;  %v277_v15 = vld [vmem:[%s1939_s2 + $0x750] sm:$0xff]  ;;  %v282_v19 = vld [vmem:[%s1939_s2 + $0x778] sm:$0xff]  ;;  %v156_v28 = vld [vmem:[%s1939_s2 + $0x388] sm:$0xff] }
  0x4d   :  { %821 = vmatpush1.bf16.msra.mxu1 %v820_v42  ;;  %542 = vmatmul.mubr.f32.gmra.mrb[4].mxu0 %v39_v33  ;;  %v966_v42 = vpack.c.bf16 %v266_v32, %v264_v31  ;;  %v980_v21 = vpack.c.bf16 %v277_v15, %v275_v13  ;;  %v153_v24 = vld [vmem:[%s1939_s2 + $0x370] sm:$0xff]  ;;  %v158_v29 = vld [vmem:[%s1939_s2 + $0x398] sm:$0xff]  ;;  %v284_v30 = vld [vmem:[%s1939_s2 + $0x788] sm:$0xff] }
  0x4e   :  { %949 = vmatpush1.bf16.msra.mxu0 %v948_v43  ;;  %823 = vmatprep.subr.bf16.mxu1 %v822_v44  ;;  %v265_v43 = vld [vmem:[%s1939_s2 + $0x6f0] sm:$0xff]  ;;  %v140_v44 = vld [vmem:[%s1939_s2 + $0x308] sm:$0xff]  ;;  %v286_v31 = vld [vmem:[%s1939_s2 + $0x798] sm:$0xff] }
  0x4f   :  { %951 = vmatprep.subr.bf16.mxu0 %v950_v48  ;;  %446 = vmatprep.mubr.f32.mxu1 %v22_v40  ;;  %v840_v48 = vpack.c.bf16 %v137_v36, %v135_v35  ;;  %v968_v49 = vpack.c.bf16 %v265_v43, %v263_v39  ;;  %v842_v50 = vpack.c.bf16 %v142_v45, %v140_v44  ;;  %v155_v35 = vld [vmem:[%s1939_s2 + $0x380] sm:$0xff]  ;;  %v157_v36 = vld [vmem:[%s1939_s2 + $0x390] sm:$0xff]  ;;  %v160_v40 = vld [vmem:[%s1939_s2 + $0x3a8] sm:$0xff] }
  0x50   :  { %612 = vmatprep.mubr.f32.mxu0 %v26_v41  ;;  %v285_v39 = vld [vmem:[%s1939_s2 + $0x790] sm:$0xff]  ;;  %v162_v41 = vld [vmem:[%s1939_s2 + $0x3b8] sm:$0xff]  ;;  %v860_v44 = vpack.c.bf16 %v157_v36, %v155_v35  ;;  %v168_v0 = vld [vmem:[%s1939_s2 + $0x3e8] sm:$0xff] }
  0x51   :  { %825 = vmatpush1.bf16.msra.mxu1 %v824_v54  ;;  %v970_v54 = vpack.c.bf16 %v270_v47, %v268_v46  ;;  %v290_v43 = vld [vmem:[%s1939_s2 + $0x7b8] sm:$0xff]  ;;  %v862_v46 = vpack.c.bf16 %v162_v41, %v160_v40  ;;  %v159_v47 = vld [vmem:[%s1939_s2 + $0x3a0] sm:$0xff]  ;;  %v293_v63 = vld [vmem:[%s1939_s2 + $0x7d0] sm:$0xff] }
  0x52   :  { %953 = vmatpush1.bf16.msra.mxu0 %v952_v55  ;;  %827 = vmatprep.subr.bf16.mxu1 %v826_v56  ;;  %v269_v55 = vld [vmem:[%s1939_s2 + $0x710] sm:$0xff]  ;;  %v144_v56 = vld [vmem:[%s1939_s2 + $0x328] sm:$0xff]  ;;  %v170_v1 = vld [vmem:[%s1939_s2 + $0x3f8] sm:$0xff] }
  0x53   :  { %955 = vmatprep.subr.bf16.mxu0 %v954_v60  ;;  %v844_v60 = vpack.c.bf16 %v141_v52, %v139_v51  ;;  %v972_v61 = vpack.c.bf16 %v269_v55, %v267_v53  ;;  %v846_v62 = vpack.c.bf16 %v146_v57, %v144_v56  ;;  %v289_v51 = vld [vmem:[%s1939_s2 + $0x7b0] sm:$0xff]  ;;  %v164_v52 = vld [vmem:[%s1939_s2 + $0x3c8] sm:$0xff]  ;;  %v166_v53 = vld [vmem:[%s1939_s2 + $0x3d8] sm:$0xff] }
  0x54   :  { %v294_v55 = vld [vmem:[%s1939_s2 + $0x7d8] sm:$0xff]  ;;  %v25_v15 = vld [vmem:[%s1940_s1 + $0x30] sm:$0xff] }
  0x55   :  { %829 = vmatpush1.bf16.msra.mxu1 %v828_v2  ;;  %v974_v2 = vpack.c.bf16 %v274_v59, %v272_v58  ;;  %v866_v58 = vpack.c.bf16 %v166_v53, %v164_v52  ;;  %v163_v59 = vld [vmem:[%s1939_s2 + $0x3c0] sm:$0xff]  ;;  %v298_v3 = vld [vmem:[%s1939_s2 + $0x7f8] sm:$0xff] }
  0x56   :  { %957 = vmatpush1.bf16.msra.mxu0 %v956_v6  ;;  %831 = vmatprep.subr.bf16.mxu1 %v830_v7  ;;  %v276_v6 = vld [vmem:[%s1939_s2 + $0x748] sm:$0xff]  ;;  %v278_v7 = vld [vmem:[%s1939_s2 + $0x758] sm:$0xff] }
  0x57   :  { %959 = vmatprep.subr.bf16.mxu0 %v958_v11  ;;  %v147_v11 = vld [vmem:[%s1939_s2 + $0x340] sm:$0xff]  ;;  %v978_v14 = vpack.c.bf16 %v278_v7, %v276_v6  ;;  %v870_v6 = vpack.c.bf16 %v170_v1, %v168_v0 }
  0x58   :  { %v852_v20 = vpack.c.bf16 %v149_v12, %v147_v11  ;;  %v167_v7 = vld [vmem:[%s1939_s2 + $0x3e0] sm:$0xff]  ;;  %v297_v11 = vld [vmem:[%s1939_s2 + $0x7f0] sm:$0xff] }
  0x59   :  { %833 = vmatpush1.bf16.msra.mxu1 %v832_v18  ;;  %v280_v18 = vld [vmem:[%s1939_s2 + $0x768] sm:$0xff] }
  0x5a   :  { %961 = vmatpush1.bf16.msra.mxu0 %v960_v22  ;;  %835 = vmatprep.subr.bf16.mxu1 %v834_v23  ;;  %v854_v22 = vpack.c.bf16 %v154_v17, %v152_v16  ;;  %v151_v23 = vld [vmem:[%s1939_s2 + $0x360] sm:$0xff]  ;;  %v982_v26 = vpack.c.bf16 %v282_v19, %v280_v18  ;;  %v30_v16 = vld [vmem:[%s1940_s1 + $0x58] sm:$0xff]  ;;  %v29_v18 = vld [vmem:[%s1940_s1 + $0x50] sm:$0xff] }
  0x5b   :  { %963 = vmatprep.subr.bf16.mxu0 %v962_v27  ;;  %v281_v27 = vld [vmem:[%s1939_s2 + $0x770] sm:$0xff]  ;;  %v856_v32 = vpack.c.bf16 %v153_v24, %v151_v23  ;;  %v34_v17 = vld [vmem:[%s1940_s1 + $0x78] sm:$0xff] }
  0x5c   :  { %v984_v33 = vpack.c.bf16 %v281_v27, %v279_v25  ;;  %v33_v19 = vld [vmem:[%s1940_s1 + $0x70] sm:$0xff] }
  0x5d   :  { %837 = vmatpush1.bf16.msra.mxu1 %v836_v34  ;;  %v858_v34 = vpack.c.bf16 %v158_v29, %v156_v28  ;;  %v41_v23 = vld [vmem:[%s1940_s1 + $0xb0] sm:$0xff] }
  0x5e   :  { %965 = vmatpush1.bf16.msra.mxu0 %v964_v37  ;;  %839 = vmatprep.subr.bf16.mxu1 %v838_v38  ;;  %v283_v37 = vld [vmem:[%s1939_s2 + $0x780] sm:$0xff]  ;;  %v986_v38 = vpack.c.bf16 %v286_v31, %v284_v30 }
  0x5f   :  { %967 = vmatprep.subr.bf16.mxu0 %v966_v42  ;;  %v288_v42 = vld [vmem:[%s1939_s2 + $0x7a8] sm:$0xff]  ;;  %v988_v45 = vpack.c.bf16 %v285_v39, %v283_v37 }
  0x61   :  { %841 = vmatpush1.bf16.msra.mxu1 %v840_v48  ;;  %v161_v48 = vld [vmem:[%s1939_s2 + $0x3b0] sm:$0xff] }
  0x62   :  { %969 = vmatpush1.bf16.msra.mxu0 %v968_v49  ;;  %843 = vmatprep.subr.bf16.mxu1 %v842_v50  ;;  %v287_v49 = vld [vmem:[%s1939_s2 + $0x7a0] sm:$0xff]  ;;  %v990_v50 = vpack.c.bf16 %v290_v43, %v288_v42  ;;  %v864_v56 = vpack.c.bf16 %v161_v48, %v159_v47 }
  0x63   :  { %971 = vmatprep.subr.bf16.mxu0 %v970_v54  ;;  %v292_v54 = vld [vmem:[%s1939_s2 + $0x7c8] sm:$0xff]  ;;  %v992_v57 = vpack.c.bf16 %v289_v51, %v287_v49 }
  0x65   :  { %845 = vmatpush1.bf16.msra.mxu1 %v844_v60  ;;  %v165_v60 = vld [vmem:[%s1939_s2 + $0x3d0] sm:$0xff] }
  0x66   :  { %973 = vmatpush1.bf16.msra.mxu0 %v972_v61  ;;  %847 = vmatprep.subr.bf16.mxu1 %v846_v62  ;;  %v291_v61 = vld [vmem:[%s1939_s2 + $0x7c0] sm:$0xff]  ;;  %v994_v62 = vpack.c.bf16 %v294_v55, %v292_v54  ;;  %v868_v4 = vpack.c.bf16 %v165_v60, %v163_v59 }
  0x67   :  { %975 = vmatprep.subr.bf16.mxu0 %v974_v2  ;;  %v296_v2 = vld [vmem:[%s1939_s2 + $0x7e8] sm:$0xff]  ;;  %v996_v5 = vpack.c.bf16 %v293_v63, %v291_v61 }
  0x69   :  { %849 = vmatpush1.bf16.msra.mxu1 %v848_v8  ;;  %v169_v8 = vld [vmem:[%s1939_s2 + $0x3f0] sm:$0xff] }
  0x6a   :  { %977 = vmatpush1.bf16.msra.mxu0 %v976_v9  ;;  %851 = vmatprep.subr.bf16.mxu1 %v850_v10  ;;  %v998_v9 = vpack.c.bf16 %v298_v3, %v296_v2  ;;  %v295_v10 = vld [vmem:[%s1939_s2 + $0x7e0] sm:$0xff]  ;;  %v872_v12 = vpack.c.bf16 %v169_v8, %v167_v7 }
  0x6b   :  { %979 = vmatprep.subr.bf16.mxu0 %v978_v14  ;;  %v1000_v13 = vpack.c.bf16 %v297_v11, %v295_v10  ;;  %v21_v14 = vld [vmem:[%s1940_s1 + $0x10] sm:$0xff]  ;;  %v690_v10 = vlaneseq }
  0x6d   :  { %853 = vmatpush1.bf16.msra.mxu1 %v852_v20  ;;  %v38_v20 = vld [vmem:[%s1940_s1 + $0x98] sm:$0xff] }
  0x6e   :  { %981 = vmatpush1.bf16.msra.mxu0 %v980_v21  ;;  %855 = vmatprep.subr.bf16.mxu1 %v854_v22  ;;  %v42_v21 = vld [vmem:[%s1940_s1 + $0xb8] sm:$0xff]  ;;  %v37_v22 = vld [vmem:[%s1940_s1 + $0x90] sm:$0xff] }
  0x6f   :  { %983 = vmatprep.subr.bf16.mxu0 %v982_v26 }
  0x71   :  { %857 = vmatpush1.bf16.msra.mxu1 %v856_v32 }
  0x72   :  { %985 = vmatpush1.bf16.msra.mxu0 %v984_v33  ;;  %859 = vmatprep.subr.bf16.mxu1 %v858_v34 }
  0x73   :  { %987 = vmatprep.subr.bf16.mxu0 %v986_v38 }
  0x75   :  { %861 = vmatpush1.bf16.msra.mxu1 %v860_v44 }
  0x76   :  { %989 = vmatpush1.bf16.msra.mxu0 %v988_v45  ;;  %863 = vmatprep.subr.bf16.mxu1 %v862_v46 }
  0x77   :  { %991 = vmatprep.subr.bf16.mxu0 %v990_v50 }
  0x79   :  { %865 = vmatpush1.bf16.msra.mxu1 %v864_v56 }
  0x7a   :  { %993 = vmatpush1.bf16.msra.mxu0 %v992_v57  ;;  %867 = vmatprep.subr.bf16.mxu1 %v866_v58 }
  0x7b   :  { %995 = vmatprep.subr.bf16.mxu0 %v994_v62 }
  0x7d   :  { %869 = vmatpush1.bf16.msra.mxu1 %v868_v4 }
  0x7e   :  { %997 = vmatpush1.bf16.msra.mxu0 %v996_v5  ;;  %871 = vmatprep.subr.bf16.mxu1 %v870_v6 }
  0x7f   :  { %999 = vmatprep.subr.bf16.mxu0 %v998_v9 }
  0x81   :  { %873 = vmatpush1.bf16.msra.mxu1 %v872_v12 }
  0x82   :  { %1001 = vmatpush1.bf16.msra.mxu0 %v1000_v13 }
  0x84   :  { %447 = vmatmul.mubr.f32.vlgmr.msra.gmra.mrb[0].mxu1 %v21_v14  ;;  %v691_v14 = vshrl.u32 %v690_v10, 7 }
  0x85   :  { %613 = vmatmul.mubr.f32.vlgmr.msra.gmra.mrb[0].mxu0 %v25_v15  ;;  %452 = vmatprep.mubr.f32.mxu1 %v30_v16 }
  0x86   :  { %618 = vmatprep.mubr.f32.mxu0 %v34_v17 }
  0x88   :  { %453 = vmatmul.mubr.f32.gmra.mrb[2].mxu1 %v29_v18  ;;  %v692_v18 = vsub.s32 0, %v691_v14 }
  0x89   :  { %619 = vmatmul.mubr.f32.gmra.mrb[2].mxu0 %v33_v19  ;;  %458 = vmatprep.mubr.f32.mxu1 %v38_v20  ;;  %v696_v19 = vsub.s32 1, %v691_v14  ;;  %v674_v20 = vld [vmem:[%s1941_s4] ss:$2 sm:$0x3] }
  0x8a   :  { %624 = vmatprep.mubr.f32.mxu0 %v42_v21 }
  0x8c   :  { %459 = vmatmul.mubr.f32.gmra.mrb[4].mxu1 %v37_v22  ;;  %v745_v22 = vld [vmem:[%s1941_s4 + $0x1] ss:$2 sm:$0x3] }
  0x8d   :  { %625 = vmatmul.mubr.f32.gmra.mrb[4].mxu0 %v41_v23  ;;  %v693_v23 = vrot.slane %v674_v20, %v692_v18 }
 0x157   :  { %v448_v24 = vpop.f32.mrb[0].mxu1 }
 0x158   :  { %v614_v25 = vpop.f32.mrb[0].mxu0  ;;  %v450_v26 = vpop.f32.mrb[1].mxu1 }
 0x159   :  { %v1002_v27 = vadd.f32 %v614_v25, %v448_v24  ;;  %v616_v28 = vpop.f32.mrb[1].mxu0  ;;  %v697_v24 = vrot.slane %v674_v20, %v696_v19 }
 0x15a   :  { %v1003_v29 = vadd.f32 %v616_v28, %v450_v26  ;;  %v710_v26 = vrot.slane %v745_v22, %v692_v18 }
 0x15b   :  { %v631_v30 = vmax.f32 %v1002_v27, 0.0  ;;  %v454_v31 = vpop.f32.mrb[2].mxu1  ;;  %v714_v27 = vrot.slane %v745_v22, %v696_v19 }
 0x15c   :  { %v632_v32 = vmax.f32 %v1003_v29, 0.0  ;;  %v620_v33 = vpop.f32.mrb[2].mxu0  ;;  %v456_v34 = vpop.f32.mrb[3].mxu1 }
 0x15d   :  { %v1004_v35 = vadd.f32 %v620_v33, %v454_v31  ;;  %v622_v36 = vpop.f32.mrb[3].mxu0  ;;  %v723_v33 = vld [vmem:[%s1942_s3] sm:$0xff] }
 0x15e   :  { %v1005_v37 = vadd.f32 %v622_v36, %v456_v34  ;;  %v637_v38 = vadd.f32 %v632_v32, %v631_v30  ;;  %v724_v34 = vld [vmem:[%s1942_s3 + $0x8] sm:$0xff] }
 0x15f   :  { %v633_v39 = vmax.f32 %v1004_v35, 0.0  ;;  %v460_v40 = vpop.f32.mrb[4].mxu1 }
 0x160   :  { %v634_v41 = vmax.f32 %v1005_v37, 0.0  ;;  %v626_v42 = vpop.f32.mrb[4].mxu0  ;;  %638 = vadd.xlane.f32.xlu0 %v637_v38  ;;  %v462_v43 = vpop.f32.mrb[5].mxu1 }
 0x161   :  { %v1006_v44 = vadd.f32 %v626_v42, %v460_v40  ;;  %v628_v45 = vpop.f32.mrb[5].mxu0 }
 0x162   :  { %v1007_v46 = vadd.f32 %v628_v45, %v462_v43  ;;  %v640_v47 = vadd.f32 %v634_v41, %v633_v39  ;;  %v726_v45 = vld [vmem:[%s1942_s3 + $0x18] sm:$0xff] }
 0x163   :  { %v635_v48 = vmax.f32 %v1006_v44, 0.0  ;;  %v725_v44 = vld [vmem:[%s1942_s3 + $0x10] sm:$0xff] }
 0x164   :  { %v636_v49 = vmax.f32 %v1007_v46, 0.0  ;;  %641 = vadd.xlane.f32.xlu0 %v640_v47 }
 0x166   :  { %v643_v50 = vadd.f32 %v636_v49, %v635_v48 }
 0x168   :  { %644 = vadd.xlane.f32.xlu1 %v643_v50 }
 0x1ed   :  { %v639_v51 = vpop.xlane.xlu0 %638 }
 0x1ee   :  { %v647_v52 = vmul.f32 0.00390625, %v639_v51 }
 0x1f0   :  { %v650_v53 = vsub.f32 %v631_v30, %v647_v52  ;;  %v651_v54 = vsub.f32 %v632_v32, %v647_v52 }
 0x1f1   :  { %v642_v55 = vpop.xlane.xlu0 %641 }
 0x1f2   :  { %v648_v56 = vmul.f32 0.00390625, %v642_v55  ;;  %v656_v57 = vmul.f32 %v650_v53, %v650_v53  ;;  %v657_v58 = vmul.f32 %v651_v54, %v651_v54  ;;  %v728_v55 = vld [vmem:[%s1942_s3 + $0x28] sm:$0xff] }
 0x1f4   :  { %v652_v59 = vsub.f32 %v633_v39, %v648_v56  ;;  %v653_v60 = vsub.f32 %v634_v41, %v648_v56  ;;  %v662_v61 = vadd.f32 %v657_v58, %v656_v57 }
 0x1f5   :  { %v645_v62 = vpop.xlane.xlu1 %644 }
 0x1f6   :  { %v649_v63 = vmul.f32 0.00390625, %v645_v62  ;;  %663 = vadd.xlane.f32.xlu1 %v662_v61  ;;  %v658_v0 = vmul.f32 %v652_v59, %v652_v59  ;;  %v659_v1 = vmul.f32 %v653_v60, %v653_v60 }
 0x1f8   :  { %v654_v2 = vsub.f32 %v635_v48, %v649_v63  ;;  %v655_v3 = vsub.f32 %v636_v49, %v649_v63  ;;  %v665_v4 = vadd.f32 %v659_v1, %v658_v0 }
 0x1fa   :  { %666 = vadd.xlane.f32.xlu0 %v665_v4  ;;  %v660_v5 = vmul.f32 %v654_v2, %v654_v2  ;;  %v661_v6 = vmul.f32 %v655_v3, %v655_v3 }
 0x1fc   :  { %v668_v7 = vadd.f32 %v661_v6, %v660_v5 }
 0x1fe   :  { %669 = vadd.xlane.f32.xlu1 %v668_v7 }
 0x283   :  { %v664_v8 = vpop.xlane.xlu1 %663 }
 0x284   :  { %v671_v9 = vmul.f32 0.00390625, %v664_v8 }
 0x286   :  { %v677_v11 = vadd.f32 1e-05, %v671_v9 }
 0x287   :  { %v667_v12 = vpop.xlane.xlu0 %666 }
 0x288   :  { %1020 = vrsqrt.f32 %v677_v11  ;;  %v672_v13 = vmul.f32 0.00390625, %v667_v12 }
 0x28a   :  { %v678_v15 = vadd.f32 1e-05, %v672_v13 }
 0x28b   :  { %v670_v16 = vpop.xlane.xlu1 %669 }
 0x28c   :  { %1022 = vrsqrt.f32 %v678_v15  ;;  %v673_v17 = vmul.f32 0.00390625, %v670_v16 }
 0x28e   :  { %v679_v21 = vadd.f32 1e-05, %v673_v17 }
 0x290   :  { %1024 = vrsqrt.f32 %v679_v21 }
 0x292   :  { %v1021_v25 = vpop.eup %1020 }
 0x293   :  { %v683_v28 = vmul.f32 %v1021_v25, %v650_v53  ;;  %v684_v29 = vmul.f32 %v1021_v25, %v651_v54  ;;  %v727_v54 = vld [vmem:[%s1942_s3 + $0x20] sm:$0xff] }
 0x295   :  { %v700_v30 = vmul.f32 %v693_v23, %v683_v28  ;;  %v701_v31 = vmul.f32 %v697_v24, %v684_v29 }
 0x296   :  { %v1023_v32 = vpop.eup %1022 }
 0x297   :  { %v717_v35 = vadd.f32 %v710_v26, %v700_v30  ;;  %v718_v36 = vadd.f32 %v714_v27, %v701_v31  ;;  %v685_v37 = vmul.f32 %v1023_v32, %v652_v59  ;;  %v686_v38 = vmul.f32 %v1023_v32, %v653_v60 }
 0x299   :  { %v729_v39 = vadd.f32 %v723_v33, %v717_v35  ;;  %v730_v40 = vadd.f32 %v724_v34, %v718_v36  ;;  %v702_v41 = vmul.f32 %v693_v23, %v685_v37  ;;  %v703_v42 = vmul.f32 %v697_v24, %v686_v38 }
 0x29a   :  { %v1025_v43 = vpop.eup %1024 }
 0x29b   :  { %735 = vst [vmem:[%s1943_s5] sm:$0xff] %v729_v39  ;;  %736 = vst [vmem:[%s1943_s5 + $0x8] sm:$0xff] %v730_v40  ;;  %v719_v46 = vadd.f32 %v710_v26, %v702_v41  ;;  %v720_v47 = vadd.f32 %v714_v27, %v703_v42  ;;  %v687_v48 = vmul.f32 %v1025_v43, %v654_v2 }
 0x29c   :  { %v688_v49 = vmul.f32 %v1025_v43, %v655_v3 }
 0x29d   :  { %v731_v50 = vadd.f32 %v725_v44, %v719_v46  ;;  %v732_v51 = vadd.f32 %v726_v45, %v720_v47  ;;  %v704_v52 = vmul.f32 %v693_v23, %v687_v48 }
 0x29e   :  { %v705_v53 = vmul.f32 %v697_v24, %v688_v49 }
 0x29f   :  { %737 = vst [vmem:[%s1943_s5 + $0x10] sm:$0xff] %v731_v50  ;;  %738 = vst [vmem:[%s1943_s5 + $0x18] sm:$0xff] %v732_v51  ;;  %v721_v56 = vadd.f32 %v710_v26, %v704_v52 }
 0x2a0   :  { %v722_v57 = vadd.f32 %v714_v27, %v705_v53 }
 0x2a1   :  { %v733_v58 = vadd.f32 %v727_v54, %v721_v56 }
 0x2a2   :  { %v734_v59 = vadd.f32 %v728_v55, %v722_v57 }
 0x2a3   :  { %739 = vst [vmem:[%s1943_s5 + $0x20] sm:$0xff] %v733_v58 }
 0x2a4   :  { %740 = vst [vmem:[%s1943_s5 + $0x28] sm:$0xff] %v734_v59 }

// kernel: transformer_forward.86
= control target key start
LH: loop header
LB: loop body
LE: loop exit
PB: predicated region body
PF: predicated region fallthrough
CT: control target
= control target key end

     0   :  { %s1336_s9 = smov 0   ;;  %s1485_s0 = inlined_call_operand.vmem [shape: f32[2,12,256], index: 0, kind: input, shape index: {}]   ;;  %s1486_s1 = inlined_call_operand.vmem [shape: f32[2,12,512], index: 1, kind: input, shape index: {}]   ;;  %s1487_s2 = inlined_call_operand.vmem [shape: f32[2,12,256], index: 2, kind: output, shape index: {}]  }
   0x1 LB: > { %s1069_s10 = sadd.s32 4294967295, %s1317_s9   ;;  %p1073_p0 = scmp.ge.s32.totalorder %s1317_s9, 1  ;;  %s1317_s9 = sphi %s1336_s9, %s12_s9  }
   0x2   : > { %p122_p1 = scmp.lt.s32.totalorder %s1317_s9, 3 }
   0x4   : > { %p123_p2 = pnand %p1073_p0, %p122_p1 }
   0x5   : > { %p149_p3 = scmp.lt.s32.totalorder (!%p123_p2), %s1069_s10, 1  ;;  %vm176_vm0 = vcmask (!%p123_p2), 523264   ;;  %s1319_s19 = smov (!%p123_p2), 64   ;;  %vm266_vm2 = vcmask (!%p123_p2), 97280   ;;  %vm270_vm3 = vcmask (!%p123_p2), 93184   ;;  %vm296_vm4 = vcmask (!%p123_p2), 1043456  }
   0x6   : > { %126 = sbr.rel (%p123_p2) target bundleno = 2523 (0x9db), region = 28  ;;  %vm1355_vm1 = vmpackc.low (!%p123_p2), %vm176_vm0, %vm176_vm0  ;;  %vm1320_vm5 = vmmov (!%p123_p2), 1  }
   0x7   : > { %vm1384_vm6 = vmpackc.low (!%p123_p2), %vm296_vm4, %vm1320_vm5 }
   0xd   : > { %s1493_s10 = smov (!%p149_p3, %s1069_s10), 1 }
   0xe   : > { %s1111_s11 = sshll.u32 %s1493_s10, 6  ;;  %s1110_s12 = sshll.u32 %s1493_s10, 5 }
   0xf   : > { %s1351_s15 = scalar_lea.vmem %s1486_s1, %s1111_s11  ;;  %s1364_s18 = scalar_lea.vmem %s1485_s0, %s1110_s12 }
  0x10   : > { %v168_v1 = vld [vmem:[%s1351_s15] sm:$0xff]  ;;  %v166_v6 = vld [vmem:[%s1364_s18 + $0x10] sm:$0xf]  ;;  %v169_v62 = vld [vmem:[%s1351_s15 + $0x8] sm:$0xff]  ;;  %s1457_s22 = scalar_lea.vmem %s1487_s2, %s1110_s12 }
  0x11   : > { %v172_v2 = vld [vmem:[%s1351_s15 + $0x20] sm:$0xf]  ;;  %v170_v23 = vld [vmem:[%s1351_s15 + $0x10] sm:$0xff]  ;;  %v173_v63 = vld [vmem:[%s1351_s15 + $0x28] sm:$0xf] }
  0x12   : > { %v164_v3 = vld [vmem:[%s1364_s18] sm:$0xff]  ;;  %v1259_v4 = vpack.i.bf16 %v172_v2, %v168_v1  ;;  %v1201_v5 = vpack.c.bf16 %v172_v2, %v168_v1  ;;  %v174_v24 = vld [vmem:[%s1351_s15 + $0x30] sm:$0xf]  ;;  %v1225_v1 = vpack.c.bf16 %v173_v63, %v169_v62 }
  0x13   : > { %1149 = vmatprep.mubr.msk.f32.mxu0 %vm176_vm0, %v164_v3  ;;  %375 = vrot.lane.b32.xlu1 %v164_v3, %s1319_s19  ;;  %v1264_v27 = vpack.i.bf16 %v174_v24, %v170_v23  ;;  %v1207_v28 = vpack.c.bf16 %v174_v24, %v170_v23 }
  0x14   : > { %1203 = vmatprep.subr.msk.bf16.mxu0 %vm1355_vm1, %v1201_v5 }
  0x15   : > { %1206 = vmatpush3.bf16.xpose.msk.msra.mxu0 %vm1355_vm1, %v1201_v5  ;;  %1209 = vmatprep.subr.msk.bf16.mxu1 %vm1384_vm6, %v1207_v28 }
  0x16   : > { %1212 = vmatpush3.bf16.msk.msra.mxu1 %vm1384_vm6, %v1207_v28 }
  0x1c   : > { %1150 = vmatmul.mubr.msk.f32.vlgmr.msra.gmra.mrb[0].mxu0 %vm176_vm0, %v166_v6 }
  0x85   : > { %v376_v32 = vpop.permute.xlu1 %375 }
  0xef   : > { %v1151_v7 = vpop.f32.mrb[0].mxu0 }
  0xf0   : > { %v255_v8 = vpop.f32.mrb[1].mxu0  ;;  %v265_v10 = vmul.f32 0.125, %v1151_v7 }
  0xf1   : > { %v264_v9 = vmul.f32 0.125, %v255_v8  ;;  %v165_v8 = vld [vmem:[%s1364_s18 + $0x8] sm:$0xff] }
  0xf2   : > { %v271_v12 = vsel %vm270_vm3, %v265_v10, -inf }
  0xf3   : > { %v267_v11 = vsel %vm266_vm2, %v264_v9, -inf }
  0xf4   : > { %268 = vmax.xlane.f32.xlu0 %v267_v11 }
  0xf8   : > { %272 = vmax.xlane.f32.xlu0 %v271_v12 }
 0x10e   : > { %1260 = vrot.lane.b32.xlu0 %v1259_v4, %s1319_s19 }
 0x181   : > { %v269_v13 = vpop.xlane.xlu0 %268 }
 0x182   : > { %v274_v14 = vsub.f32 %v264_v9, %v269_v13  ;;  %v167_v9 = vld [vmem:[%s1364_s18 + $0x18] sm:$0xf] }
 0x184   : > { %v276_v17 = vmul.f32 1.442695, %v274_v14 }
 0x185   : > { %v273_v15 = vpop.xlane.xlu0 %272 }
 0x186   : > { %v275_v16 = vsub.f32 %v265_v10, %v273_v15 }
 0x188   : > { %v278_v18 = vmul.f32 1.442695, %v275_v16 }
 0x189   : > { %v1261_v25 = vpop.permute.xlu0 %1260 }
 0x18a   : > { %1279 = vpow2.f32 %v278_v18  ;;  %v1263_v29 = vunpack.i.h.bf16 %v1261_v25  ;;  %v1262_v30 = vunpack.i.l.bf16 %v1261_v25  ;;  %v1269_v18 = vpack.i.bf16 %v173_v63, %v169_v62 }
 0x18b   : > { %1281 = vpow2.f32 %v276_v17 }
 0x18c   : > { %v1213_v31 = vpack.c.bf16 %v1263_v29, %v1262_v30  ;;  %v171_v30 = vld [vmem:[%s1351_s15 + $0x18] sm:$0xff] }
 0x18e   : > { %1215 = vmatprep.subr.msk.bf16.mxu1 %vm1355_vm1, %v1213_v31 }
 0x194   : > { %v1280_v19 = vpop.eup %1279 }
 0x195   : > { %v283_v20 = vsel %vm270_vm3, %v1280_v19, 0.0  ;;  %v1282_v21 = vpop.eup %1281 }
 0x196   : > { %284 = vadd.xlane.f32.xlu1 %v283_v20  ;;  %v280_v22 = vsel %vm266_vm2, %v1282_v21, 0.0 }
 0x19a   : > { %281 = vadd.xlane.f32.xlu1 %v280_v22 }
 0x1ab   : > { %377 = vrot.lane.b32.xlu1 %v166_v6, %s1319_s19 }
 0x223   : > { %v285_v33 = vpop.xlane.xlu1 %284 }
 0x224   : > { %1283 = vrcp.f32 %v285_v33 }
 0x227   : > { %v282_v34 = vpop.xlane.xlu1 %281 }
 0x228   : > { %1285 = vrcp.f32 %v282_v34 }
 0x22b   : > { %v378_v39 = vpop.permute.xlu1 %377 }
 0x22e   : > { %v1284_v35 = vpop.eup %1283 }
 0x22f   : > { %v289_v38 = vmul.f32 %v1284_v35, %v1280_v19 }
 0x232   : > { %v1286_v36 = vpop.eup %1285 }
 0x233   : > { %v287_v37 = vmul.f32 %v1286_v36, %v1282_v21 }
 0x235   : > { %1156 = vmatprep.mubr.msk.f32.mxu1 %vm266_vm2, %v287_v37 }
 0x236   : > { %1157 = vmatmul.mubr.msk.f32.vlgmr.msra.gmra.mrb[0].mxu1 %vm266_vm2, %v289_v38 }
 0x237   : > { %1218 = vmatpush3.bf16.xpose.msk.msra.mxu1 %vm1355_vm1, %v1213_v31  ;;  %1163 = vmatprep.mubr.msk.f32.mxu1 %vm176_vm0, %v376_v32  ;;  %v175_v31 = vld [vmem:[%s1351_s15 + $0x38] sm:$0xf] }
 0x238   : > { %v1231_v32 = vpack.c.bf16 %v175_v31, %v171_v30 }
 0x23a   : > { %1233 = vmatprep.subr.msk.bf16.mxu1 %vm1384_vm6, %v1231_v32 }
 0x23e   : > { %1164 = vmatmul.mubr.msk.f32.vlgmr.msra.gmra.mrb[2].mxu1 %vm176_vm0, %v378_v39 }
 0x23f   : > { %1236 = vmatpush3.bf16.msk.msra.mxu1 %vm1384_vm6, %v1231_v32 }
 0x309   : > { %v1401_v40 = vpop.f32.mrb[0].mxu1 }
 0x30a   : > { %v1403_v41 = vpop.f32.mrb[1].mxu1 }
 0x311   : > { %v1165_v42 = vpop.f32.mrb[2].mxu1 }
 0x312   : > { %v467_v43 = vmul.f32 0.125, %v1165_v42  ;;  %v457_v44 = vpop.f32.mrb[3].mxu1 }
 0x313   : > { %v466_v45 = vmul.f32 0.125, %v457_v44 }
 0x314   : > { %v471_v46 = vsel %vm270_vm3, %v467_v43, -inf }
 0x315   : > { %472 = vmax.xlane.f32.xlu0 %v471_v46  ;;  %v468_v47 = vsel %vm266_vm2, %v466_v45, -inf }
 0x316   : > { %469 = vmax.xlane.f32.xlu1 %v468_v47 }
 0x327   : > { %1265 = vrot.lane.b32.xlu1 %v1264_v27, %s1319_s19 }
 0x32b   : > { %1270 = vrot.lane.b32.xlu1 %v1269_v18, %s1319_s19 }
 0x32f   : > { %776 = vrot.lane.b32.xlu1 %v167_v9, %s1319_s19 }
 0x3a2   : > { %v473_v48 = vpop.xlane.xlu0 %472 }
 0x3a3   : > { %v475_v49 = vsub.f32 %v467_v43, %v473_v48  ;;  %v470_v50 = vpop.xlane.xlu1 %469 }
 0x3a4   : > { %v474_v51 = vsub.f32 %v466_v45, %v470_v50 }
 0x3a5   : > { %v478_v52 = vmul.f32 1.442695, %v475_v49 }
 0x3a6   : > { %v476_v53 = vmul.f32 1.442695, %v474_v51 }
 0x3a7   : > { %v1266_v58 = vpop.permute.xlu1 %1265 }
 0x3a8   : > { %1287 = vpow2.f32 %v476_v53  ;;  %v1268_v59 = vunpack.i.h.bf16 %v1266_v58  ;;  %v1267_v60 = vunpack.i.l.bf16 %v1266_v58 }
 0x3a9   : > { %1289 = vpow2.f32 %v478_v52 }
 0x3aa   : > { %v1219_v61 = vpack.c.bf16 %v1268_v59, %v1267_v60 }
 0x3ab   : > { %v1271_v33 = vpop.permute.xlu1 %1270 }
 0x3ac   : > { %1221 = vmatprep.subr.msk.bf16.mxu0 %vm1384_vm6, %v1219_v61  ;;  %v1273_v34 = vunpack.i.h.bf16 %v1271_v33  ;;  %v1272_v35 = vunpack.i.l.bf16 %v1271_v33 }
 0x3ad   : > { %1224 = vmatpush3.bf16.msk.msra.mxu0 %vm1384_vm6, %v1219_v61 }
 0x3ae   : > { %1227 = vmatprep.subr.msk.bf16.mxu0 %vm1355_vm1, %v1225_v1  ;;  %v1237_v36 = vpack.c.bf16 %v1273_v34, %v1272_v35 }
 0x3af   : > { %v777_v46 = vpop.permute.xlu1 %776 }
 0x3b0   : > { %1239 = vmatprep.subr.msk.bf16.mxu1 %vm1355_vm1, %v1237_v36 }
 0x3b2   : > { %v1288_v54 = vpop.eup %1287 }
 0x3b3   : > { %v480_v55 = vsel %vm266_vm2, %v1288_v54, 0.0  ;;  %v1290_v56 = vpop.eup %1289 }
 0x3b4   : > { %481 = vadd.xlane.f32.xlu0 %v480_v55  ;;  %v483_v57 = vsel %vm270_vm3, %v1290_v56, 0.0 }
 0x3b8   : > { %484 = vadd.xlane.f32.xlu0 %v483_v57 }
 0x441   : > { %v482_v2 = vpop.xlane.xlu0 %481 }
 0x442   : > { %1291 = vrcp.f32 %v482_v2 }
 0x445   : > { %v485_v3 = vpop.xlane.xlu0 %484 }
 0x446   : > { %1293 = vrcp.f32 %v485_v3  ;;  %v1274_v3 = vpack.i.bf16 %v175_v31, %v171_v30 }
 0x44c   : > { %v1292_v4 = vpop.eup %1291 }
 0x44d   : > { %v487_v5 = vmul.f32 %v1292_v4, %v1288_v54 }
 0x44f   : > { %1170 = vmatprep.mubr.msk.f32.mxu0 %vm266_vm2, %v487_v5 }
 0x450   : > { %v1294_v6 = vpop.eup %1293 }
 0x451   : > { %v489_v7 = vmul.f32 %v1294_v6, %v1290_v56 }
 0x453   : > { %1171 = vmatmul.mubr.msk.f32.vlgmr.msra.gmra.mrb[2].mxu0 %vm266_vm2, %v489_v7 }
 0x454   : > { %1230 = vmatpush3.bf16.xpose.msk.msra.mxu0 %vm1355_vm1, %v1225_v1  ;;  %1177 = vmatprep.mubr.msk.f32.mxu0 %vm176_vm0, %v165_v8 }
 0x45b   : > { %1178 = vmatmul.mubr.msk.f32.vlgmr.msra.gmra.mrb[4].mxu0 %vm176_vm0, %v167_v9 }
 0x526   : > { %v1426_v10 = vpop.f32.mrb[2].mxu0 }
 0x527   : > { %v570_v11 = vpop.f32.mrb[3].mxu0 }
 0x52e   : > { %v1179_v12 = vpop.f32.mrb[4].mxu0 }
 0x52f   : > { %v657_v13 = vpop.f32.mrb[5].mxu0  ;;  %v667_v15 = vmul.f32 0.125, %v1179_v12 }
 0x530   : > { %v666_v14 = vmul.f32 0.125, %v657_v13 }
 0x531   : > { %v671_v17 = vsel %vm270_vm3, %v667_v15, -inf }
 0x532   : > { %v668_v16 = vsel %vm266_vm2, %v666_v14, -inf }
 0x533   : > { %669 = vmax.xlane.f32.xlu0 %v668_v16 }
 0x537   : > { %672 = vmax.xlane.f32.xlu0 %v671_v17 }
 0x5c0   : > { %v670_v19 = vpop.xlane.xlu0 %669 }
 0x5c1   : > { %v674_v20 = vsub.f32 %v666_v14, %v670_v19 }
 0x5c3   : > { %v676_v21 = vmul.f32 1.442695, %v674_v20 }
 0x5c4   : > { %v673_v22 = vpop.xlane.xlu0 %672 }
 0x5c5   : > { %1295 = vpow2.f32 %v676_v21  ;;  %v675_v23 = vsub.f32 %v667_v15, %v673_v22 }
 0x5c7   : > { %v678_v24 = vmul.f32 1.442695, %v675_v23 }
 0x5c9   : > { %1297 = vpow2.f32 %v678_v24 }
 0x5cf   : > { %v1296_v25 = vpop.eup %1295 }
 0x5d0   : > { %v680_v27 = vsel %vm266_vm2, %v1296_v25, 0.0 }
 0x5d1   : > { %681 = vadd.xlane.f32.xlu0 %v680_v27 }
 0x5d3   : > { %v1298_v28 = vpop.eup %1297 }
 0x5d4   : > { %v683_v29 = vsel %vm270_vm3, %v1298_v28, 0.0 }
 0x5d5   : > { %684 = vadd.xlane.f32.xlu0 %v683_v29 }
 0x5eb   : > { %774 = vrot.lane.b32.xlu0 %v165_v8, %s1319_s19 }
 0x65e   : > { %v682_v37 = vpop.xlane.xlu0 %681 }
 0x65f   : > { %1299 = vrcp.f32 %v682_v37 }
 0x662   : > { %v685_v38 = vpop.xlane.xlu0 %684 }
 0x663   : > { %1301 = vrcp.f32 %v685_v38 }
 0x666   : > { %v775_v45 = vpop.permute.xlu0 %774 }
 0x669   : > { %v1300_v39 = vpop.eup %1299 }
 0x66a   : > { %v687_v42 = vmul.f32 %v1300_v39, %v1296_v25 }
 0x66c   : > { %1184 = vmatprep.mubr.msk.f32.mxu1 %vm266_vm2, %v687_v42 }
 0x66d   : > { %v1302_v43 = vpop.eup %1301 }
 0x66e   : > { %v689_v44 = vmul.f32 %v1302_v43, %v1298_v28 }
 0x670   : > { %1185 = vmatmul.mubr.msk.f32.vlgmr.msra.gmra.mrb[4].mxu1 %vm266_vm2, %v689_v44 }
 0x671   : > { %1242 = vmatpush3.bf16.xpose.msk.msra.mxu1 %vm1355_vm1, %v1237_v36  ;;  %1191 = vmatprep.mubr.msk.f32.mxu1 %vm176_vm0, %v775_v45 }
 0x678   : > { %1192 = vmatmul.mubr.msk.f32.vlgmr.msra.gmra.mrb[6].mxu1 %vm176_vm0, %v777_v46 }
 0x743   : > { %v1186_v47 = vpop.f32.mrb[4].mxu1 }
 0x744   : > { %v765_v48 = vpop.f32.mrb[5].mxu1 }
 0x74b   : > { %v1193_v49 = vpop.f32.mrb[6].mxu1 }
 0x74c   : > { %v866_v50 = vmul.f32 0.125, %v1193_v49  ;;  %v856_v51 = vpop.f32.mrb[7].mxu1 }
 0x74d   : > { %v865_v52 = vmul.f32 0.125, %v856_v51 }
 0x74e   : > { %v870_v53 = vsel %vm270_vm3, %v866_v50, -inf }
 0x74f   : > { %871 = vmax.xlane.f32.xlu0 %v870_v53  ;;  %v867_v54 = vsel %vm266_vm2, %v865_v52, -inf }
 0x750   : > { %868 = vmax.xlane.f32.xlu1 %v867_v54 }
 0x765   : > { %980 = vrot.lane.b32.xlu0 %v570_v11, %s1319_s19 }
 0x7dc   : > { %v872_v0 = vpop.xlane.xlu0 %871 }
 0x7dd   : > { %v874_v55 = vsub.f32 %v866_v50, %v872_v0  ;;  %v869_v56 = vpop.xlane.xlu1 %868 }
 0x7de   : > { %v873_v57 = vsub.f32 %v865_v52, %v869_v56 }
 0x7df   : > { %v877_v58 = vmul.f32 1.442695, %v874_v55 }
 0x7e0   : > { %v875_v59 = vmul.f32 1.442695, %v873_v57  ;;  %v981_v60 = vpop.permute.xlu0 %980 }
 0x7e1   : > { %1303 = vpow2.f32 %v877_v58  ;;  %v994_v61 = vsel %vm176_vm0, %v1403_v41, %v981_v60 }
 0x7e2   : > { %998 = vst [vmem:[%s1457_s22] sm:$0xff] %v994_v61  ;;  %1305 = vpow2.f32 %v875_v59 }
 0x7eb   : > { %v1304_v62 = vpop.eup %1303 }
 0x7ec   : > { %v882_v63 = vsel %vm270_vm3, %v1304_v62, 0.0  ;;  %v1306_v1 = vpop.eup %1305 }
 0x7ed   : > { %883 = vadd.xlane.f32.xlu1 %v882_v63  ;;  %v879_v2 = vsel %vm266_vm2, %v1306_v1, 0.0 }
 0x7f1   : > { %880 = vadd.xlane.f32.xlu1 %v879_v2 }
 0x802   : > { %1275 = vrot.lane.b32.xlu1 %v1274_v3, %s1319_s19 }
 0x806   : > { %982 = vrot.lane.b32.xlu1 %v1426_v10, %s1319_s19 }
 0x87a   : > { %v884_v4 = vpop.xlane.xlu1 %883 }
 0x87b   : > { %1307 = vrcp.f32 %v884_v4 }
 0x87e   : > { %v881_v41 = vpop.xlane.xlu1 %880 }
 0x87f   : > { %1309 = vrcp.f32 %v881_v41 }
 0x882   : > { %v1276_v5 = vpop.permute.xlu1 %1275 }
 0x883   : > { %v1278_v6 = vunpack.i.h.bf16 %v1276_v5  ;;  %v1277_v7 = vunpack.i.l.bf16 %v1276_v5 }
 0x885   : > { %v1243_v8 = vpack.c.bf16 %v1278_v6, %v1277_v7  ;;  %v1308_v12 = vpop.eup %1307 }
 0x886   : > { %v983_v9 = vpop.permute.xlu1 %982  ;;  %v888_v14 = vmul.f32 %v1308_v12, %v1304_v62 }
 0x887   : > { %v995_v11 = vsel %vm176_vm0, %v1401_v40, %v983_v9  ;;  %1245 = vmatprep.subr.msk.bf16.mxu0 %vm1384_vm6, %v1243_v8 }
 0x888   : > { %1000 = vst [vmem:[%s1457_s22 + $0x10] sm:$0xf] %v995_v11  ;;  %1248 = vmatpush3.bf16.msk.msra.mxu0 %vm1384_vm6, %v1243_v8 }
 0x889   : > { %v1310_v10 = vpop.eup %1309 }
 0x88a   : > { %v886_v13 = vmul.f32 %v1310_v10, %v1306_v1 }
 0x88c   : > { %1198 = vmatprep.mubr.msk.f32.mxu0 %vm266_vm2, %v886_v13 }
 0x88d   : > { %1199 = vmatmul.mubr.msk.f32.vlgmr.msra.gmra.mrb[6].mxu0 %vm266_vm2, %v888_v14 }
 0x960   : > { %v1200_v15 = vpop.f32.mrb[6].mxu0 }
 0x961   : > { %v969_v16 = vpop.f32.mrb[7].mxu0 }
 0x962   : > { %988 = vrot.lane.b32.xlu1 %v969_v16, %s1319_s19 }
 0x966   : > { %990 = vrot.lane.b32.xlu1 %v1200_v15, %s1319_s19 }
 0x9d4   : > { %v989_v40 = vpop.permute.xlu1 %988 }
 0x9d5   : > { %v996_v17 = vsel %vm176_vm0, %v765_v48, %v989_v40 }
 0x9d6   : > { %999 = vst [vmem:[%s1457_s22 + $0x8] sm:$0xff] %v996_v17 }
 0x9d8   : > { %v991_v26 = vpop.permute.xlu1 %990 }
 0x9d9   : > { %v997_v18 = vsel %vm176_vm0, %v1186_v47, %v991_v26 }
 0x9da   : > { %1001 = vst [vmem:[%s1457_s22 + $0x18] sm:$0xf] %v997_v18 }
 0x9db PF: > { %s12_s9 = sadd.s32 1, %s1317_s9  }
 0x9dc   : > { %p9_p4 = scmp.ge.s32.totalorder %s12_s9, 4  }
 0x9de   :  { %11 = sbr.rel (!%p9_p4) target bundleno = 1 (0x1), region = 61 }

// kernel: transformer_forward.117
= control target key start
LH: loop header
LB: loop body
LE: loop exit
PB: predicated region body
PF: predicated region fallthrough
CT: control target
= control target key end

     0   :  { %vm129_vm0 = vcmask 236544   ;;  %s364_s1 = inlined_call_operand.vmem [shape: f32[256,29], index: 1, kind: input, shape index: {}]   ;;  %s365_s0 = inlined_call_operand.vmem [shape: f32[24,256], index: 0, kind: input, shape index: {}]   ;;  %s366_s2 = inlined_call_operand.vmem [shape: f32[24,29], index: 2, kind: output, shape index: {}]  }
   0x1   :  { %v33_v0 = vld [vmem:[%s364_s1 + $0x80] sm:$0xff]  ;;  %v34_v1 = vld [vmem:[%s364_s1 + $0x88] sm:$0xff]  ;;  %v35_v5 = vld [vmem:[%s364_s1 + $0x90] sm:$0xff] }
   0x2   :  { %v17_v2 = vld [vmem:[%s364_s1] sm:$0xff]  ;;  %v178_v3 = vpack.c.bf16 %v34_v1, %v33_v0  ;;  %v18_v4 = vld [vmem:[%s364_s1 + $0x8] sm:$0xff]  ;;  %v36_v6 = vld [vmem:[%s364_s1 + $0x98] sm:$0xff] }
   0x3   :  { %v180_v7 = vpack.c.bf16 %v18_v4, %v17_v2  ;;  %v182_v8 = vpack.c.bf16 %v36_v6, %v35_v5  ;;  %v19_v9 = vld [vmem:[%s364_s1 + $0x10] sm:$0xff]  ;;  %v20_v10 = vld [vmem:[%s364_s1 + $0x18] sm:$0xff]  ;;  %v37_v11 = vld [vmem:[%s364_s1 + $0xa0] sm:$0xff] }
   0x4   :  { %210 = vmatprep.subr.bf16.mxu1 %v178_v3  ;;  %179 = vmatprep.subr.bf16.mxu0 %v178_v3  ;;  %v38_v12 = vld [vmem:[%s364_s1 + $0xa8] sm:$0xff]  ;;  %v184_v13 = vpack.c.bf16 %v20_v10, %v19_v9  ;;  %v21_v15 = vld [vmem:[%s364_s1 + $0x20] sm:$0xff]  ;;  %v39_v17 = vld [vmem:[%s364_s1 + $0xb0] sm:$0xff] }
   0x5   :  { %218 = vmatpush3.bf16.msra.mxu1 %v180_v7  ;;  %181 = vmatpush3.bf16.msra.mxu0 %v180_v7  ;;  %v186_v14 = vpack.c.bf16 %v38_v12, %v37_v11  ;;  %v22_v16 = vld [vmem:[%s364_s1 + $0x28] sm:$0xff]  ;;  %v40_v18 = vld [vmem:[%s364_s1 + $0xb8] sm:$0xff]  ;;  %v23_v21 = vld [vmem:[%s364_s1 + $0x30] sm:$0xff] }
   0x6   :  { %211 = vmatprep.subr.bf16.mxu1 %v182_v8  ;;  %183 = vmatprep.subr.bf16.mxu0 %v182_v8  ;;  %v188_v19 = vpack.c.bf16 %v22_v16, %v21_v15  ;;  %v190_v20 = vpack.c.bf16 %v40_v18, %v39_v17  ;;  %v24_v22 = vld [vmem:[%s364_s1 + $0x38] sm:$0xff]  ;;  %v41_v23 = vld [vmem:[%s364_s1 + $0xc0] sm:$0xff]  ;;  %v42_v24 = vld [vmem:[%s364_s1 + $0xc8] sm:$0xff] }
   0x7   :  { %v14_v25 = vld [vmem:[%s365_s0 + $0x18] sm:$0xff]  ;;  %v12_v26 = vld [vmem:[%s365_s0 + $0x8] sm:$0xff]  ;;  %v192_v27 = vpack.c.bf16 %v24_v22, %v23_v21  ;;  %v194_v28 = vpack.c.bf16 %v42_v24, %v41_v23  ;;  %v25_v29 = vld [vmem:[%s364_s1 + $0x40] sm:$0xff] }
   0x8   :  { %118 = vmatprep.mubr.f32.mxu1 %v14_v25  ;;  %v26_v30 = vld [vmem:[%s364_s1 + $0x48] sm:$0xff]  ;;  %v43_v31 = vld [vmem:[%s364_s1 + $0xd0] sm:$0xff]  ;;  %v44_v32 = vld [vmem:[%s364_s1 + $0xd8] sm:$0xff]  ;;  %113 = vmatprep.mubr.f32.mxu0 %v12_v26 }
   0x9   :  { %219 = vmatpush3.bf16.msra.mxu1 %v184_v13  ;;  %185 = vmatpush3.bf16.msra.mxu0 %v184_v13  ;;  %v196_v33 = vpack.c.bf16 %v26_v30, %v25_v29  ;;  %v198_v34 = vpack.c.bf16 %v44_v32, %v43_v31  ;;  %v27_v35 = vld [vmem:[%s364_s1 + $0x50] sm:$0xff]  ;;  %v28_v36 = vld [vmem:[%s364_s1 + $0x58] sm:$0xff]  ;;  %v45_v37 = vld [vmem:[%s364_s1 + $0xe0] sm:$0xff] }
   0xa   :  { %212 = vmatprep.subr.bf16.mxu1 %v186_v14  ;;  %187 = vmatprep.subr.bf16.mxu0 %v186_v14  ;;  %v46_v38 = vld [vmem:[%s364_s1 + $0xe8] sm:$0xff]  ;;  %v200_v39 = vpack.c.bf16 %v28_v36, %v27_v35  ;;  %v29_v41 = vld [vmem:[%s364_s1 + $0x60] sm:$0xff]  ;;  %v47_v43 = vld [vmem:[%s364_s1 + $0xf0] sm:$0xff] }
   0xb   :  { %v202_v40 = vpack.c.bf16 %v46_v38, %v45_v37  ;;  %v30_v42 = vld [vmem:[%s364_s1 + $0x68] sm:$0xff]  ;;  %v48_v44 = vld [vmem:[%s364_s1 + $0xf8] sm:$0xff]  ;;  %v31_v47 = vld [vmem:[%s364_s1 + $0x70] sm:$0xff] }
   0xc   :  { %v204_v45 = vpack.c.bf16 %v30_v42, %v29_v41  ;;  %v206_v46 = vpack.c.bf16 %v48_v44, %v47_v43  ;;  %v32_v48 = vld [vmem:[%s364_s1 + $0x78] sm:$0xff]  ;;  %v13_v50 = vld [vmem:[%s365_s0 + $0x10] sm:$0xff]  ;;  %v11_v51 = vld [vmem:[%s365_s0] sm:$0xff] }
   0xd   :  { %220 = vmatpush3.bf16.msra.mxu1 %v188_v19  ;;  %189 = vmatpush3.bf16.msra.mxu0 %v188_v19  ;;  %v208_v49 = vpack.c.bf16 %v32_v48, %v31_v47  ;;  %v16_v52 = vld [vmem:[%s365_s0 + $0x28] sm:$0xff]  ;;  %v15_v53 = vld [vmem:[%s365_s0 + $0x20] sm:$0xff] }
   0xe   :  { %213 = vmatprep.subr.bf16.mxu1 %v190_v20  ;;  %191 = vmatprep.subr.bf16.mxu0 %v190_v20 }
  0x11   :  { %221 = vmatpush3.bf16.msra.mxu1 %v192_v27  ;;  %193 = vmatpush3.bf16.msra.mxu0 %v192_v27 }
  0x12   :  { %214 = vmatprep.subr.bf16.mxu1 %v194_v28  ;;  %195 = vmatprep.subr.bf16.mxu0 %v194_v28 }
  0x15   :  { %222 = vmatpush3.bf16.msra.mxu1 %v196_v33  ;;  %197 = vmatpush3.bf16.msra.mxu0 %v196_v33 }
  0x16   :  { %215 = vmatprep.subr.bf16.mxu1 %v198_v34  ;;  %199 = vmatprep.subr.bf16.mxu0 %v198_v34 }
  0x19   :  { %223 = vmatpush3.bf16.msra.mxu1 %v200_v39  ;;  %201 = vmatpush3.bf16.msra.mxu0 %v200_v39 }
  0x1a   :  { %216 = vmatprep.subr.bf16.mxu1 %v202_v40  ;;  %203 = vmatprep.subr.bf16.mxu0 %v202_v40 }
  0x1d   :  { %224 = vmatpush3.bf16.msra.mxu1 %v204_v45  ;;  %205 = vmatpush3.bf16.msra.mxu0 %v204_v45 }
  0x1e   :  { %217 = vmatprep.subr.bf16.mxu1 %v206_v46  ;;  %207 = vmatprep.subr.bf16.mxu0 %v206_v46 }
  0x21   :  { %225 = vmatpush3.bf16.msra.mxu1 %v208_v49  ;;  %209 = vmatpush3.bf16.msra.mxu0 %v208_v49 }
  0x24   :  { %119 = vmatmul.mubr.f32.vlgmr.msra.gmra.mrb[0].mxu1 %v13_v50  ;;  %114 = vmatmul.mubr.f32.vlgmr.msra.gmra.mrb[0].mxu0 %v11_v51 }
  0x25   :  { %123 = vmatprep.mubr.f32.mxu1 %v16_v52 }
  0x28   :  { %124 = vmatmul.mubr.f32.gmra.mrb[2].mxu1 %v15_v53 }
  0xf7   :  { %v172_v54 = vpop.f32.mrb[0].mxu1  ;;  %v169_v55 = vpop.f32.mrb[0].mxu0 }
  0xf8   :  { %v173_v56 = vpop.f32.mrb[1].mxu1  ;;  %v170_v57 = vpop.f32.mrb[1].mxu0 }
  0xf9   :  { %v174_v58 = vadd.f32 %v173_v56, %v172_v54  ;;  %v171_v59 = vadd.f32 %v170_v57, %v169_v55 }
  0xfb   :  { %131 = vst.msk [vmem:[%s366_s2 + $0x8] sm:$0xff] %vm129_vm0, %v174_v58  ;;  %130 = vst.msk [vmem:[%s366_s2] sm:$0xff] %vm129_vm0, %v171_v59  ;;  %v175_v60 = vpop.f32.mrb[2].mxu1 }
  0xfc   :  { %v176_v61 = vpop.f32.mrb[3].mxu1 }
  0xfd   :  { %v177_v62 = vadd.f32 %v176_v61, %v175_v60 }
  0xff   :  { %132 = vst.msk [vmem:[%s366_s2 + $0x10] sm:$0xff] %vm129_vm0, %v177_v62 }

</bundles_post_ra>
